<compile_context>
chip_gen: v7x
topology: tpu7x:2x2x1
jax: 0.10.0
libtpu: 0.0.40
codegen_flags: <defaults>
</compile_context>

<pallas_src>
import math
from functools import partial

import jax
import jax.numpy as jnp
from jax.experimental import pallas as pl
from jax.experimental.pallas import tpu as pltpu


_BASE = 512       # lane tile for the scatter/gather kernels (multiple of 128/256)
_BIG_CAP = 4096   # lane-tile cap for the memory-bound elementwise kernels


# ------------------------------------------------------------------------
# Helpers
# ------------------------------------------------------------------------
def _pad_to(n, t):
    return ((n + t - 1) // t) * t


def _big_tile(n_pad, cap=_BIG_CAP):
    """Largest multiple of _BASE that divides n_pad, capped at `cap`."""
    t = min(n_pad, (cap // _BASE) * _BASE)
    while n_pad % t:
        t -= _BASE
    return t


def _mosaic(dim_semantics, est_bytes):
    try:
        cap = pltpu.get_tpu_info().vmem_capacity_bytes
    except Exception:                               # interpret / CPU fallback
        cap = 64 << 20
    vmem = int(min(max(est_bytes + (4 << 20), 16 << 20), int(cap * 0.9)))
    return pltpu.CompilerParams(dimension_semantics=dim_semantics,
                                vmem_limit_bytes=vmem)


def _pad1(v, target, fill=0):
    pad = target - v.shape[0]
    return v if pad == 0 else jnp.pad(v, (0, pad), constant_values=fill)


def _pad_cols(m, target):
    pad = target - m.shape[1]
    return m if pad == 0 else jnp.pad(m, ((0, 0), (0, pad)))


def _onehot_f32(cmp):
    return cmp.astype(jnp.float32)


# ------------------------------------------------------------------------
# Kernel 1: node_sums[Ce, N] = scatter_add of edge_attr over dst index.
# Grid (node tiles [parallel], edge tiles [arbitrary, accumulates]).
# ------------------------------------------------------------------------
def _scatter_add_kernel(ea_ref, dst_ref, ns_ref):
    j = pl.program_id(0)
    k = pl.program_id(1)
    te = ea_ref.shape[1]
    tn = ns_ref.shape[1]

    @pl.when(k == 0)
    def _():
        ns_ref[...] = jnp.zeros_like(ns_ref)

    iota_n = jax.lax.broadcasted_iota(jnp.int32, (te, tn), 1) + j * tn
    oh = _onehot_f32(iota_n == dst_ref[...])                    # [te, tn]
    ns_ref[...] += jnp.dot(ea_ref[...], oh,
                           preferred_element_type=jnp.float32)


def edge_scatter_add(ea_t, dst_col, n_pad, tn=_BASE, te=_BASE):
    ce, e_pad = ea_t.shape
    nn, ne = n_pad // tn, e_pad // te
    est = 4 * (2 * (ce * te + te) + 2 * ce * tn + 2 * te * tn)
    return pl.pallas_call(
        _scatter_add_kernel,
        grid=(nn, ne),
        in_specs=[pl.BlockSpec((ce, te), lambda j, k: (0, k)),
                  pl.BlockSpec((te, 1), lambda j, k: (k, 0))],
        out_specs=pl.BlockSpec((ce, tn), lambda j, k: (0, j)),
        out_shape=jax.ShapeDtypeStruct((ce, n_pad), jnp.float32),
        compiler_params=_mosaic(("parallel", "arbitrary"), est),
    )(ea_t, dst_col)


# ------------------------------------------------------------------------
# Kernel 2: gather node_sums by src (accumulated over node tiles) + residual
# + Linear(Ce,Ce); per-edge-tile BN statistics (sum / sum-sq) emitted so the
# edge-tile axis stays fully parallel.
# ------------------------------------------------------------------------
def _gather_linear_kernel(ns_ref, ea_ref, src_ref, vmask_ref, w_ref, b_ref,
                          h_ref, ssum_ref, ssq_ref):
    j = pl.program_id(1)
    tn = ns_ref.shape[1]
    te = ea_ref.shape[1]

    @pl.when(j == 0)
    def _():
        h_ref[...] = jnp.zeros_like(h_ref)

    iota_n = jax.lax.broadcasted_iota(jnp.int32, (tn, te), 0) + j * tn
    oh = _onehot_f32(iota_n == src_ref[...])                    # [tn, te]
    h_ref[...] += jnp.dot(ns_ref[...], oh,
                          preferred_element_type=jnp.float32)   # partial gather

    @pl.when(j == pl.num_programs(1) - 1)
    def _():
        prop = h_ref[...] + ea_ref[...]                         # + residual
        h = jnp.dot(w_ref[...], prop,
                    preferred_element_type=jnp.float32) + b_ref[...]
        h = h * vmask_ref[...]                                  # zero padded edges
        h_ref[...] = h
        ssum_ref[...] = jnp.sum(h, axis=1, keepdims=True)[None]
        ssq_ref[...] = jnp.sum(h * h, axis=1, keepdims=True)[None]


def edge_gather_linear(node_sums, ea_t, src_row, valid_row, w, b_col,
                       tn=_BASE, te=_BASE):
    ce, e_pad = ea_t.shape
    n_pad = node_sums.shape[1]
    ne, nn = e_pad // te, n_pad // tn
    est = 4 * (2 * (ce * tn + ce * te + 2 * te + ce * ce + ce)
               + 2 * (ce * te + 2 * ce) + 2 * tn * te)
    return pl.pallas_call(
        _gather_linear_kernel,
        grid=(ne, nn),
        in_specs=[pl.BlockSpec((ce, tn), lambda i, j: (0, j)),
                  pl.BlockSpec((ce, te), lambda i, j: (0, i)),
                  pl.BlockSpec((1, te), lambda i, j: (0, i)),
                  pl.BlockSpec((1, te), lambda i, j: (0, i)),
                  pl.BlockSpec((ce, ce), lambda i, j: (0, 0)),
                  pl.BlockSpec((ce, 1), lambda i, j: (0, 0))],
        out_specs=(pl.BlockSpec((ce, te), lambda i, j: (0, i)),
                   pl.BlockSpec((1, ce, 1), lambda i, j: (i, 0, 0)),
                   pl.BlockSpec((1, ce, 1), lambda i, j: (i, 0, 0))),
        out_shape=(jax.ShapeDtypeStruct((ce, e_pad), jnp.float32),
                   jax.ShapeDtypeStruct((ne, ce, 1), jnp.float32),
                   jax.ShapeDtypeStruct((ne, ce, 1), jnp.float32)),
        compiler_params=_mosaic(("parallel", "arbitrary"), est),
    )(node_sums, ea_t, src_row, valid_row, w, b_col)


# ------------------------------------------------------------------------
# Kernel 3: BatchNorm(affine) + ReLU + score projection u = S_hat . h_relu.
# Memory-bound -> large lane tile, fully parallel grid.
# ------------------------------------------------------------------------
def _bn_relu_score_kernel(h_ref, mean_ref, istd_ref, g_ref, b_ref, shat_ref,
                          hr_ref, u_ref):
    hn = (h_ref[...] - mean_ref[...]) * istd_ref[...]
    hr = jnp.maximum(hn * g_ref[...] + b_ref[...], 0.0)
    hr_ref[...] = hr
    u_ref[...] = jnp.dot(shat_ref[...], hr, preferred_element_type=jnp.float32)


def edge_bn_relu_score(h_t, mean, inv_std, gamma, beta, s_hat):
    ce, e_pad = h_t.shape
    te = _big_tile(e_pad)
    est = 4 * (2 * (ce * te + 5 * ce) + 2 * (ce * te + te))
    return pl.pallas_call(
        _bn_relu_score_kernel,
        grid=(e_pad // te,),
        in_specs=[pl.BlockSpec((ce, te), lambda k: (0, k)),
                  pl.BlockSpec((ce, 1), lambda k: (0, 0)),
                  pl.BlockSpec((ce, 1), lambda k: (0, 0)),
                  pl.BlockSpec((ce, 1), lambda k: (0, 0)),
                  pl.BlockSpec((ce, 1), lambda k: (0, 0)),
                  pl.BlockSpec((1, ce), lambda k: (0, 0))],
        out_specs=(pl.BlockSpec((ce, te), lambda k: (0, k)),
                   pl.BlockSpec((1, te), lambda k: (0, k))),
        out_shape=(jax.ShapeDtypeStruct((ce, e_pad), jnp.float32),
                   jax.ShapeDtypeStruct((1, e_pad), jnp.float32)),
        compiler_params=_mosaic(("parallel",), est),
    )(h_t, mean, inv_std, gamma, beta, s_hat)


# ------------------------------------------------------------------------
# Kernel 4a: EGIN messages msg = relu(gather(x, col) + W_ex @ e) * sel_mask.
# TODO(synk): EGIN is not defined in the reference source; a GINE-style conv
# (x' = (x + sum_{sel edges} relu(x_col + e @ W_e)) @ W_x) is used here.
# ------------------------------------------------------------------------
def _egin_msg_kernel(x_ref, col_ref, e_ref, wex_ref, mask_ref, msg_ref):
    j = pl.program_id(1)
    tn = x_ref.shape[1]
    te = e_ref.shape[1]

    @pl.when(j == 0)
    def _():
        msg_ref[...] = jnp.zeros_like(msg_ref)

    iota_n = jax.lax.broadcasted_iota(jnp.int32, (tn, te), 0) + j * tn
    oh = _onehot_f32(iota_n == col_ref[...])                    # [tn, te]
    msg_ref[...] += jnp.dot(x_ref[...], oh,
                            preferred_element_type=jnp.float32)

    @pl.when(j == pl.num_programs(1) - 1)
    def _():
        msg = msg_ref[...] + jnp.dot(wex_ref[...], e_ref[...],
                                     preferred_element_type=jnp.float32)
        msg_ref[...] = jnp.maximum(msg, 0.0) * mask_ref[...]    # mask on [Cx, te]


def egin_messages(x_t, col_row, e_t, wex, sel_row, tn=_BASE, te=_BASE):
    cx, n_pad = x_t.shape
    ce, e_pad = e_t.shape
    ne, nn = e_pad // te, n_pad // tn
    est = 4 * (2 * (cx * tn + 2 * te + ce * te + cx * ce)
               + 2 * cx * te + 2 * tn * te)
    return pl.pallas_call(
        _egin_msg_kernel,
        grid=(ne, nn),
        in_specs=[pl.BlockSpec((cx, tn), lambda i, j: (0, j)),
                  pl.BlockSpec((1, te), lambda i, j: (0, i)),
                  pl.BlockSpec((ce, te), lambda i, j: (0, i)),
                  pl.BlockSpec((cx, ce), lambda i, j: (0, 0)),
                  pl.BlockSpec((1, te), lambda i, j: (0, i))],
        out_specs=pl.BlockSpec((cx, te), lambda i, j: (0, i)),
        out_shape=jax.ShapeDtypeStruct((cx, e_pad), jnp.float32),
        compiler_params=_mosaic(("parallel", "arbitrary"), est),
    )(x_t, col_row, e_t, wex, sel_row)


# ------------------------------------------------------------------------
# Kernel 4b: aggregate messages at the row endpoint and apply W_x.
# ------------------------------------------------------------------------
def _egin_agg_kernel(msg_ref, row_ref, x_ref, wx_ref, out_ref):
    j = pl.program_id(0)
    k = pl.program_id(1)
    te = msg_ref.shape[1]
    tn = out_ref.shape[1]

    @pl.when(k == 0)
    def _():
        out_ref[...] = jnp.zeros_like(out_ref)

    iota_n = jax.lax.broadcasted_iota(jnp.int32, (te, tn), 1) + j * tn
    oh = _onehot_f32(iota_n == row_ref[...])                    # [te, tn]
    out_ref[...] += jnp.dot(msg_ref[...], oh,
                            preferred_element_type=jnp.float32)

    @pl.when(k == pl.num_programs(1) - 1)
    def _():
        out_ref[...] = jnp.dot(wx_ref[...], x_ref[...] + out_ref[...],
                               preferred_element_type=jnp.float32)


def egin_aggregate(msg_t, row_col, x_t, wx, tn=_BASE, te=_BASE):
    cx, e_pad = msg_t.shape
    n_pad = x_t.shape[1]
    nn, ne = n_pad // tn, e_pad // te
    est = 4 * (2 * (cx * te + te + cx * tn + cx * cx)
               + 2 * cx * tn + 2 * te * tn)
    return pl.pallas_call(
        _egin_agg_kernel,
        grid=(nn, ne),
        in_specs=[pl.BlockSpec((cx, te), lambda j, k: (0, k)),
                  pl.BlockSpec((te, 1), lambda j, k: (k, 0)),
                  pl.BlockSpec((cx, tn), lambda j, k: (0, j)),
                  pl.BlockSpec((cx, cx), lambda j, k: (0, 0))],
        out_specs=pl.BlockSpec((cx, tn), lambda j, k: (0, j)),
        out_shape=jax.ShapeDtypeStruct((cx, n_pad), jnp.float32),
        compiler_params=_mosaic(("parallel", "arbitrary"), est),
    )(msg_t, row_col, x_t, wx)


# ------------------------------------------------------------------------
# Kernel 5: global_add_pool (index-driven scatter over node tiles) + BN over
# the graphs of the batch.  Large node tile; single accumulating axis.
# ------------------------------------------------------------------------
def _pool_bn_kernel(x_ref, bidx_ref, g_ref, b_ref, out_ref):
    k = pl.program_id(0)
    tn = x_ref.shape[1]
    nb = out_ref.shape[1]

    @pl.when(k == 0)
    def _():
        out_ref[...] = jnp.zeros_like(out_ref)

    iota_b = jax.lax.broadcasted_iota(jnp.int32, (tn, nb), 1)
    oh = _onehot_f32(iota_b == bidx_ref[...])                   # [tn, B]
    out_ref[...] += jnp.dot(x_ref[...], oh,
                            preferred_element_type=jnp.float32)

    @pl.when(k == pl.num_programs(0) - 1)
    def _():
        xg = out_ref[...]
        mean = jnp.mean(xg, axis=1, keepdims=True)
        var = jnp.mean((xg - mean) ** 2, axis=1, keepdims=True)
        out_ref[...] = ((xg - mean) * jax.lax.rsqrt(var + 1e-5)
                        * g_ref[...] + b_ref[...])


def global_pool_bn(x_out_t, bidx_col, batch_size, gamma_col, beta_col):
    cx, n_pad = x_out_t.shape
    tn = _big_tile(n_pad)
    est = 4 * (2 * (cx * tn + tn + 2 * cx)
               + 2 * cx * batch_size + 2 * tn * batch_size)
    return pl.pallas_call(
        _pool_bn_kernel,
        grid=(n_pad // tn,),
        in_specs=[pl.BlockSpec((cx, tn), lambda k: (0, k)),
                  pl.BlockSpec((tn, 1), lambda k: (k, 0)),
                  pl.BlockSpec((cx, 1), lambda k: (0, 0)),
                  pl.BlockSpec((cx, 1), lambda k: (0, 0))],
        out_specs=pl.BlockSpec((cx, batch_size), lambda k: (0, 0)),
        out_shape=jax.ShapeDtypeStruct((cx, batch_size), jnp.float32),
        compiler_params=_mosaic(("arbitrary",), est),
    )(x_out_t, bidx_col, gamma_col, beta_col)


# ------------------------------------------------------------------------
# Forward pass (glue in plain JAX, hot paths in the Pallas kernels above)
# ------------------------------------------------------------------------
@partial(jax.jit, static_argnums=(5,))
def muse_pool_forward(params, x, edge_index, edge_attr, batch, batch_size, threshold):
    n_nodes, cx = x.shape
    e_edges, ce = edge_attr.shape
    row, col = edge_index[0], edge_index[1]
    edge_batch = batch[row]                                   # generate_edge_batch

    # --- pad graph axes to the lane tile; padded indices = -1 (never match) ---
    n_pad = _pad_to(n_nodes, _BASE)
    e_pad = _pad_to(e_edges, _BASE)
    x_t = _pad_cols(x.T, n_pad)                               # [Cx, Np]
    ea_t = _pad_cols(edge_attr.T, e_pad)                      # [Ce, Ep]
    row_p = _pad1(row.astype(jnp.int32), e_pad, -1)
    col_p = _pad1(col.astype(jnp.int32), e_pad, -1)
    valid_row = (jnp.arange(e_pad) < e_edges).astype(jnp.float32).reshape(1, e_pad)

    # ---- edge_prop + mlp_e  (Pallas kernels 1-3) ----
    node_sums = edge_scatter_add(ea_t, col_p.reshape(e_pad, 1), n_pad)
    h_pre_t, ssum, ssq = edge_gather_linear(
        node_sums, ea_t, row_p.reshape(1, e_pad), valid_row,
        params["W_e"].T, params["b_e"].reshape(ce, 1))
    # train-mode BN statistics (biased variance) over all E real edges.
    mean = ssum.sum(axis=0) / e_edges                         # [Ce, 1]
    var = jnp.maximum(ssq.sum(axis=0) / e_edges - mean * mean, 0.0)
    inv_std = jax.lax.rsqrt(var + 1e-5)

    s_vec = params["S"]                                       # [1, Ce]
    s_hat = s_vec / jnp.sqrt(jnp.sum(s_vec * s_vec) + 1e-12)
    h_relu_t_p, u_row = edge_bn_relu_score(h_pre_t, mean, inv_std,
                                           params["gamma_e"].reshape(ce, 1),
                                           params["beta_e"].reshape(ce, 1),
                                           s_hat)
    h_relu_t = h_relu_t_p[:, :e_edges]
    u = u_row[0, :e_edges]                                    # S_hat . mlp_e(e)

    # to_undirected: reverse-edge pairing via sorted-key search (O(E log E)).
    # TODO(synk): PyG to_undirected/coalesce with dynamic edge counts is
    # approximated by reverse-edge pairing (graph must contain both directions).
    key = row * n_nodes + col
    rkey = col * n_nodes + row
    order = jnp.argsort(key)
    skey = key[order]
    pos = jnp.clip(jnp.searchsorted(skey, rkey), 0, e_edges - 1)
    has_rev = skey[pos] == rkey
    rev_idx = order[pos]
    logits = u + jnp.where(has_rev, u[rev_idx], 0.0)          # S.(h+h_rev)/||S||
    score = jax.nn.sigmoid(logits)

    edge_attr_scaled_t = h_relu_t * score[None, :]            # [Ce, E]
    edge_attr_scaled = edge_attr_scaled_t.T                   # [E, Ce]

    # scatter_mean of scores per graph
    bsum = jax.ops.segment_sum(score, edge_batch, num_segments=batch_size)
    bcnt = jax.ops.segment_sum(jnp.ones_like(score), edge_batch,
                               num_segments=batch_size)
    scores_mean = (bsum / jnp.maximum(bcnt, 1.0))[edge_batch]
    perm_mask = (score <= threshold) & (score < scores_mean)
    edge_mask = perm_mask

    # clustering: connected components over selected edges, O(log N) rounds.
    # TODO(synk): `connection` is undefined in the source; min-label connected
    # components with consecutive relabeling is used (fixed-shape masked form).
    big = jnp.int32(n_nodes)

    def cc_round(_, labels):
        lr, lc = labels[row], labels[col]
        m_r = jax.ops.segment_min(jnp.where(perm_mask, lc, big), row,
                                  num_segments=n_nodes)
        m_c = jax.ops.segment_min(jnp.where(perm_mask, lr, big), col,
                                  num_segments=n_nodes)
        labels = jnp.minimum(labels, jnp.minimum(m_r, m_c))
        labels = jnp.minimum(labels, labels[labels])          # pointer jumping
        labels = jnp.minimum(labels, labels[labels])
        return labels

    n_rounds = int(math.ceil(math.log2(max(n_nodes, 2)))) + 2
    labels = jax.lax.fori_loop(0, n_rounds, cc_round,
                               jnp.arange(n_nodes, dtype=jnp.int32))
    used = jnp.zeros((n_nodes,), jnp.int32).at[labels].set(1)
    comp = (jnp.cumsum(used) - 1)[labels].astype(jnp.int32)
    num_nodes_out = comp.max() + 1
    x_mask = jnp.zeros((n_nodes,), bool).at[
        jnp.where(perm_mask, row, n_nodes)].set(True, mode="drop")

    # batch_out = scatter_mean(batch, comp)  (padded; first num_nodes_out valid)
    bsum_n = jax.ops.segment_sum(batch.astype(jnp.float32), comp,
                                 num_segments=n_nodes)
    bcnt_n = jax.ops.segment_sum(jnp.ones((n_nodes,), jnp.float32), comp,
                                 num_segments=n_nodes)
    batch_out = (bsum_n / jnp.maximum(bcnt_n, 1.0)).astype(jnp.int32)

    # EGIN conv on selected edges  (Pallas kernels 4a + 4b)
    ea_scaled_t_p = _pad_cols(edge_attr_scaled_t, e_pad)
    sel_row = _pad_cols(perm_mask.astype(jnp.float32).reshape(1, e_edges), e_pad)
    msg_t = egin_messages(x_t, col_p.reshape(1, e_pad), ea_scaled_t_p,
                          params["W_ex"].T, sel_row)
    x_all_t = egin_aggregate(msg_t, row_p.reshape(e_pad, 1), x_t, params["W_x"].T)
    x_all = x_all_t[:, :n_nodes].T                            # [N, Cx]

    # x_pool = scatter_add(x_sparse, comp[x_mask]); preserve untouched nodes
    contrib = jnp.where(x_mask[:, None], x_all, 0.0)
    x_pool = jax.ops.segment_sum(contrib, comp, num_segments=n_nodes)
    prsv_idx = jnp.where(~x_mask, comp, n_nodes)              # OOB index -> dropped
    x_out = x_pool.at[prsv_idx].set(x, mode="drop")           # padded to N rows

    # edge_reduce + coalesce: sort-based dedup (padded outputs + valid count)
    # TODO(synk): dynamic edge-count outputs are returned padded to E with a count.
    new_row, new_col = comp[row], comp[col]
    keep = ~edge_mask
    bigk = jnp.int32(n_nodes * n_nodes)
    ekey = jnp.where(keep, new_row * n_nodes + new_col, bigk)
    order2 = jnp.argsort(ekey)
    skey2 = ekey[order2]
    valid = skey2 < bigk
    newgrp = valid & jnp.concatenate(
        [jnp.array([True]), skey2[1:] != skey2[:-1]])
    gid = jnp.cumsum(newgrp.astype(jnp.int32)) - 1
    seg = jnp.where(valid, gid, e_edges)
    edge_attr_out = jax.ops.segment_sum(edge_attr_scaled[order2], seg,
                                        num_segments=e_edges + 1)[:e_edges]
    ukey = jax.ops.segment_min(skey2, seg, num_segments=e_edges + 1)[:e_edges]
    num_edges_out = newgrp.sum()
    in_prefix = jnp.arange(e_edges) < num_edges_out
    row_out = jnp.where(in_prefix, ukey // n_nodes, 0)
    col_out = jnp.where(in_prefix, ukey % n_nodes, 0)
    edge_index_out = jnp.stack([row_out, col_out], axis=0)

    # global_add_pool + BatchNorm1d  (Pallas kernel 5)
    x_out_t = _pad_cols(x_out.T, n_pad)
    batch_out_p = _pad1(batch_out, n_pad, -1).reshape(n_pad, 1)
    xg_t = global_pool_bn(x_out_t, batch_out_p, batch_size,
                          params["gamma_g"].reshape(cx, 1),
                          params["beta_g"].reshape(cx, 1))
    xg = xg_t.T                                               # [B, Cx]

    new_graph = (x_out, edge_index_out, edge_attr_out, batch_out,
                 num_nodes_out, num_edges_out)
    return new_graph, xg


# ------------------------------------------------------------------------
# Deterministic parameter init (shapes from MUSEPool.__init__)
# ------------------------------------------------------------------------
def init_params(key, in_channels_x, in_channels_e):
    cx, ce = in_channels_x, in_channels_e
    ks = jax.random.split(key, 5)
    bound_s = math.sqrt(6.0 / (1 + ce))                       # xavier_uniform_ on [1, Ce]
    lim_e = 1.0 / math.sqrt(ce)
    lim_x = 1.0 / math.sqrt(cx)
    return {
        "S": jax.random.uniform(ks[0], (1, ce), jnp.float32, -bound_s, bound_s),
        "W_e": jax.random.uniform(ks[1], (ce, ce), jnp.float32, -lim_e, lim_e),
        "b_e": jax.random.uniform(ks[2], (ce,), jnp.float32, -lim_e, lim_e),
        "gamma_e": jnp.ones((ce,), jnp.float32),
        "beta_e": jnp.zeros((ce,), jnp.float32),
        "W_ex": jax.random.uniform(ks[3], (ce, cx), jnp.float32, -lim_e, lim_e),
        "W_x": jax.random.uniform(ks[4], (cx, cx), jnp.float32, -lim_x, lim_x),
        "gamma_g": jnp.ones((cx,), jnp.float32),
        "beta_g": jnp.zeros((cx,), jnp.float32),
    }


if __name__ == "__main__":
    key = jax.random.PRNGKey(0)
    k_param, k_x, k_e = jax.random.split(key, 3)

    N, E, Cx, Ce, B = 8, 16, 8, 8, 2

    # Two 4-node cycles (one per graph), both directions present.
    row = jnp.array([0, 0, 1, 1, 2, 2, 3, 3, 4, 4, 5, 5, 6, 6, 7, 7], jnp.int32)
    col = jnp.array([1, 3, 0, 2, 1, 3, 0, 2, 5, 7, 4, 6, 5, 7, 4, 6], jnp.int32)
    edge_index = jnp.stack([row, col], axis=0)
    batch = jnp.array([0, 0, 0, 0, 1, 1, 1, 1], jnp.int32)

    x = jax.random.normal(k_x, (N, Cx), jnp.float32)
    edge_attr = jax.random.normal(k_e, (E, Ce), jnp.float32)

    params = init_params(k_param, Cx, Ce)

    # threshold=0.6 so some edges are actually pooled (default 0 never selects edges).
    new_graph, xg = muse_pool_forward(params, x, edge_index, edge_attr,
                                      batch, B, 0.6)
    jax.block_until_ready(xg)
    jax.block_until_ready(new_graph[0])
    print("KERNEL_OK")
</pallas_src>

<mosaic_0001>
module attributes {stable_mosaic.version = 11 : i64} {
  func.func private @main(%arg0: i32) attributes {dimension_semantics = [#tpu.dimension_semantics<core_parallel>], iteration_bounds = array<i64: 2>, tpu.core_type = #tpu.core_type<sc_scalar_subcore>, window_params = []} {
    return
  }
}

module attributes {stable_mosaic.version = 11 : i64} {
  func.func private @main(%arg0: i32) attributes {dimension_semantics = [#tpu.dimension_semantics<core_parallel>], iteration_bounds = array<i64: 2>, tpu.core_type = #tpu.core_type<sc_scalar_subcore>, window_params = []} {
    return
  }
}

module attributes {stable_mosaic.version = 11 : i64} {
  func.func @_bn_relu_score_kernel(%arg0: i32, %arg1: memref<8x512xf32, #tpu.memory_space<vmem>>, %arg2: memref<8x1xf32, #tpu.memory_space<vmem>>, %arg3: memref<8x1xf32, #tpu.memory_space<vmem>>, %arg4: memref<8x1xf32, #tpu.memory_space<vmem>>, %arg5: memref<8x1xf32, #tpu.memory_space<vmem>>, %arg6: memref<1x8xf32, #tpu.memory_space<vmem>>, %arg7: memref<8x512xf32, #tpu.memory_space<vmem>>, %arg8: memref<1x512xf32, #tpu.memory_space<vmem>>) attributes {dimension_semantics = [#tpu.dimension_semantics<parallel>], iteration_bounds = array<i64: 1>, scalar_prefetch = 0 : i64, scratch_operands = 0 : i64, tpu.core_type = #tpu.core_type<tc>, window_params = [{transform_indices = @transform_0, window_bounds = array<i64: 8, 512>}, {pipeline_mode = #tpu.pipeline_mode<synchronous>, transform_indices = @transform_1, window_bounds = array<i64: 8, 1>}, {pipeline_mode = #tpu.pipeline_mode<synchronous>, transform_indices = @transform_2, window_bounds = array<i64: 8, 1>}, {pipeline_mode = #tpu.pipeline_mode<synchronous>, transform_indices = @transform_3, window_bounds = array<i64: 8, 1>}, {pipeline_mode = #tpu.pipeline_mode<synchronous>, transform_indices = @transform_4, window_bounds = array<i64: 8, 1>}, {pipeline_mode = #tpu.pipeline_mode<synchronous>, transform_indices = @transform_5, window_bounds = array<i64: 1, 8>}, {transform_indices = @transform_6, window_bounds = array<i64: 8, 512>}, {transform_indices = @transform_7, window_bounds = array<i64: 1, 512>}]} {
    %c0 = arith.constant 0 : index
    %c0_0 = arith.constant 0 : index
    %0 = vector.load %arg1[%c0, %c0_0] : memref<8x512xf32, #tpu.memory_space<vmem>>, vector<8x512xf32>
    %c0_1 = arith.constant 0 : index
    %c0_2 = arith.constant 0 : index
    %1 = vector.load %arg2[%c0_1, %c0_2] : memref<8x1xf32, #tpu.memory_space<vmem>>, vector<8x1xf32>
    %2 = vector.broadcast %1 : vector<8x1xf32> to vector<8x512xf32>
    %3 = arith.subf %0, %2 : vector<8x512xf32>
    %c0_3 = arith.constant 0 : index
    %c0_4 = arith.constant 0 : index
    %4 = vector.load %arg3[%c0_3, %c0_4] : memref<8x1xf32, #tpu.memory_space<vmem>>, vector<8x1xf32>
    %5 = vector.broadcast %4 : vector<8x1xf32> to vector<8x512xf32>
    %6 = arith.mulf %3, %5 : vector<8x512xf32>
    %c0_5 = arith.constant 0 : index
    %c0_6 = arith.constant 0 : index
    %7 = vector.load %arg4[%c0_5, %c0_6] : memref<8x1xf32, #tpu.memory_space<vmem>>, vector<8x1xf32>
    %8 = vector.broadcast %7 : vector<8x1xf32> to vector<8x512xf32>
    %9 = arith.mulf %6, %8 : vector<8x512xf32>
    %c0_7 = arith.constant 0 : index
    %c0_8 = arith.constant 0 : index
    %10 = vector.load %arg5[%c0_7, %c0_8] : memref<8x1xf32, #tpu.memory_space<vmem>>, vector<8x1xf32>
    %11 = vector.broadcast %10 : vector<8x1xf32> to vector<8x512xf32>
    %12 = arith.addf %9, %11 : vector<8x512xf32>
    %cst = arith.constant 0.000000e+00 : f32
    %13 = vector.broadcast %cst : f32 to vector<8x512xf32>
    %14 = arith.maximumf %12, %13 : vector<8x512xf32>
    %c0_9 = arith.constant 0 : index
    %c0_10 = arith.constant 0 : index
    %15 = vector.load %arg7[%c0_9, %c0_10] : memref<8x512xf32, #tpu.memory_space<vmem>>, vector<8x512xf32>
    tpu.vector_store %arg7[%c0_9, %c0_10], %14 {strides = array<i32>} : memref<8x512xf32, #tpu.memory_space<vmem>>, vector<8x512xf32>,
    %c0_11 = arith.constant 0 : index
    %c0_12 = arith.constant 0 : index
    %16 = vector.load %arg6[%c0_11, %c0_12] : memref<1x8xf32, #tpu.memory_space<vmem>>, vector<1x8xf32>
    %cst_13 = arith.constant dense<0.000000e+00> : vector<1x512xf32>
    %17 = tpu.matmul %16, %14, %cst_13 {dimension_numbers = #tpu.dot_dimension_numbers<[1], [0], [0], [1], [0, 0, 1, 1], [], []>} : vector<1x8xf32>, vector<8x512xf32>, vector<1x512xf32> -> vector<1x512xf32>
    %c0_14 = arith.constant 0 : index
    %c0_15 = arith.constant 0 : index
    %18 = vector.load %arg8[%c0_14, %c0_15] : memref<1x512xf32, #tpu.memory_space<vmem>>, vector<1x512xf32>
    tpu.vector_store %arg8[%c0_14, %c0_15], %17 {strides = array<i32>} : memref<1x512xf32, #tpu.memory_space<vmem>>, vector<1x512xf32>,
    return
  }
  func.func @transform_0(%arg0: i32) -> (i32, i32) {
    %c0_i32 = arith.constant 0 : i32
    %c0_i32_0 = arith.constant 0 : i32
    return %c0_i32, %arg0 : i32, i32
  }
  func.func @transform_1(%arg0: i32) -> (i32, i32) {
    %c0_i32 = arith.constant 0 : i32
    %c0_i32_0 = arith.constant 0 : i32
    %c0_i32_1 = arith.constant 0 : i32
    return %c0_i32, %c0_i32_0 : i32, i32
  }
  func.func @transform_2(%arg0: i32) -> (i32, i32) {
    %c0_i32 = arith.constant 0 : i32
    %c0_i32_0 = arith.constant 0 : i32
    %c0_i32_1 = arith.constant 0 : i32
    return %c0_i32, %c0_i32_0 : i32, i32
  }
  func.func @transform_3(%arg0: i32) -> (i32, i32) {
    %c0_i32 = arith.constant 0 : i32
    %c0_i32_0 = arith.constant 0 : i32
    %c0_i32_1 = arith.constant 0 : i32
    return %c0_i32, %c0_i32_0 : i32, i32
  }
  func.func @transform_4(%arg0: i32) -> (i32, i32) {
    %c0_i32 = arith.constant 0 : i32
    %c0_i32_0 = arith.constant 0 : i32
    %c0_i32_1 = arith.constant 0 : i32
    return %c0_i32, %c0_i32_0 : i32, i32
  }
  func.func @transform_5(%arg0: i32) -> (i32, i32) {
    %c0_i32 = arith.constant 0 : i32
    %c0_i32_0 = arith.constant 0 : i32
    %c0_i32_1 = arith.constant 0 : i32
    return %c0_i32, %c0_i32_0 : i32, i32
  }
  func.func @transform_6(%arg0: i32) -> (i32, i32) {
    %c0_i32 = arith.constant 0 : i32
    %c0_i32_0 = arith.constant 0 : i32
    return %c0_i32, %arg0 : i32, i32
  }
  func.func @transform_7(%arg0: i32) -> (i32, i32) {
    %c0_i32 = arith.constant 0 : i32
    %c0_i32_0 = arith.constant 0 : i32
    return %c0_i32, %arg0 : i32, i32
  }
}

module attributes {stable_mosaic.version = 11 : i64} {
  func.func @_scatter_add_kernel(%arg0: i32, %arg1: i32, %arg2: memref<8x512xf32, #tpu.memory_space<vmem>>, %arg3: memref<512x1xi32, #tpu.memory_space<vmem>>, %arg4: memref<8x512xf32, #tpu.memory_space<vmem>>) attributes {dimension_semantics = [#tpu.dimension_semantics<parallel>, #tpu.dimension_semantics<arbitrary>], iteration_bounds = array<i64: 1, 1>, scalar_prefetch = 0 : i64, scratch_operands = 0 : i64, tpu.core_type = #tpu.core_type<tc>, window_params = [{transform_indices = @transform_0, window_bounds = array<i64: 8, 512>}, {transform_indices = @transform_1, window_bounds = array<i64: 512, 1>}, {transform_indices = @transform_2, window_bounds = array<i64: 8, 512>}]} {
    %c0_i32 = arith.constant 0 : i32
    %0 = arith.cmpi eq, %arg1, %c0_i32 : i32
    %1 = arith.extui %0 : i1 to i32
    %c0_i32_0 = arith.constant 0 : i32
    %2 = arith.cmpi ne, %1, %c0_i32_0 : i32
    scf.if %2 {
      %cst_8 = arith.constant 0.000000e+00 : f32
      %17 = vector.broadcast %cst_8 : f32 to vector<8x512xf32>
      %c0_9 = arith.constant 0 : index
      %c0_10 = arith.constant 0 : index
      %18 = vector.load %arg4[%c0_9, %c0_10] : memref<8x512xf32, #tpu.memory_space<vmem>>, vector<8x512xf32>
      tpu.vector_store %arg4[%c0_9, %c0_10], %17 {strides = array<i32>} : memref<8x512xf32, #tpu.memory_space<vmem>>, vector<8x512xf32>,
    } else {
    }
    %3 = tpu.iota {dimensions = array<i32: 1>} : vector<512x512xi32>
    %c512_i32 = arith.constant 512 : i32
    %4 = arith.muli %arg0, %c512_i32 : i32
    %5 = vector.broadcast %4 : i32 to vector<512x512xi32>
    %6 = arith.addi %3, %5 : vector<512x512xi32>
    %c0 = arith.constant 0 : index
    %c0_1 = arith.constant 0 : index
    %7 = vector.load %arg3[%c0, %c0_1] : memref<512x1xi32, #tpu.memory_space<vmem>>, vector<512x1xi32>
    %8 = vector.broadcast %7 : vector<512x1xi32> to vector<512x512xi32>
    %9 = arith.cmpi eq, %6, %8 : vector<512x512xi32>
    %10 = arith.extui %9 : vector<512x512xi1> to vector<512x512xi32>
    %11 = arith.sitofp %10 : vector<512x512xi32> to vector<512x512xf32>
    %c0_2 = arith.constant 0 : index
    %c0_3 = arith.constant 0 : index
    %12 = vector.load %arg4[%c0_2, %c0_3] : memref<8x512xf32, #tpu.memory_space<vmem>>, vector<8x512xf32>
    %c0_4 = arith.constant 0 : index
    %c0_5 = arith.constant 0 : index
    %13 = vector.load %arg2[%c0_4, %c0_5] : memref<8x512xf32, #tpu.memory_space<vmem>>, vector<8x512xf32>
    %cst = arith.constant dense<0.000000e+00> : vector<8x512xf32>
    %14 = tpu.matmul %13, %11, %cst {dimension_numbers = #tpu.dot_dimension_numbers<[1], [0], [0], [1], [0, 0, 1, 1], [], []>} : vector<8x512xf32>, vector<512x512xf32>, vector<8x512xf32> -> vector<8x512xf32>
    %15 = arith.addf %12, %14 : vector<8x512xf32>
    %c0_6 = arith.constant 0 : index
    %c0_7 = arith.constant 0 : index
    %16 = vector.load %arg4[%c0_6, %c0_7] : memref<8x512xf32, #tpu.memory_space<vmem>>, vector<8x512xf32>
    tpu.vector_store %arg4[%c0_6, %c0_7], %15 {strides = array<i32>} : memref<8x512xf32, #tpu.memory_space<vmem>>, vector<8x512xf32>,
    return
  }
  func.func @transform_0(%arg0: i32, %arg1: i32) -> (i32, i32) {
    %c0_i32 = arith.constant 0 : i32
    %c0_i32_0 = arith.constant 0 : i32
    return %c0_i32, %arg1 : i32, i32
  }
  func.func @transform_1(%arg0: i32, %arg1: i32) -> (i32, i32) {
    %c0_i32 = arith.constant 0 : i32
    %c0_i32_0 = arith.constant 0 : i32
    return %arg1, %c0_i32 : i32, i32
  }
  func.func @transform_2(%arg0: i32, %arg1: i32) -> (i32, i32) {
    %c0_i32 = arith.constant 0 : i32
    %c0_i32_0 = arith.constant 0 : i32
    return %c0_i32, %arg0 : i32, i32
  }
}

module attributes {stable_mosaic.version = 11 : i64} {
  func.func @_gather_linear_kernel(%arg0: i32, %arg1: i32, %arg2: memref<8x512xf32, #tpu.memory_space<vmem>>, %arg3: memref<8x512xf32, #tpu.memory_space<vmem>>, %arg4: memref<1x512xi32, #tpu.memory_space<vmem>>, %arg5: memref<1x512xf32, #tpu.memory_space<vmem>>, %arg6: memref<8x8xf32, #tpu.memory_space<vmem>>, %arg7: memref<8x1xf32, #tpu.memory_space<vmem>>, %arg8: memref<8x512xf32, #tpu.memory_space<vmem>>, %arg9: memref<1x8x1xf32, #tpu.memory_space<vmem>>, %arg10: memref<1x8x1xf32, #tpu.memory_space<vmem>>) attributes {dimension_semantics = [#tpu.dimension_semantics<parallel>, #tpu.dimension_semantics<arbitrary>], iteration_bounds = array<i64: 1, 1>, scalar_prefetch = 0 : i64, scratch_operands = 0 : i64, tpu.core_type = #tpu.core_type<tc>, window_params = [{transform_indices = @transform_0, window_bounds = array<i64: 8, 512>}, {transform_indices = @transform_1, window_bounds = array<i64: 8, 512>}, {transform_indices = @transform_2, window_bounds = array<i64: 1, 512>}, {transform_indices = @transform_3, window_bounds = array<i64: 1, 512>}, {pipeline_mode = #tpu.pipeline_mode<synchronous>, transform_indices = @transform_4, window_bounds = array<i64: 8, 8>}, {pipeline_mode = #tpu.pipeline_mode<synchronous>, transform_indices = @transform_5, window_bounds = array<i64: 8, 1>}, {transform_indices = @transform_6, window_bounds = array<i64: 8, 512>}, {transform_indices = @transform_7, window_bounds = array<i64: 1, 8, 1>}, {transform_indices = @transform_8, window_bounds = array<i64: 1, 8, 1>}]} {
    %c0_i32 = arith.constant 0 : i32
    %0 = arith.cmpi eq, %arg1, %c0_i32 : i32
    %1 = arith.extui %0 : i1 to i32
    %c0_i32_0 = arith.constant 0 : i32
    %2 = arith.cmpi ne, %1, %c0_i32_0 : i32
    scf.if %2 {
      %cst_10 = arith.constant 0.000000e+00 : f32
      %20 = vector.broadcast %cst_10 : f32 to vector<8x512xf32>
      %c0_11 = arith.constant 0 : index
      %c0_12 = arith.constant 0 : index
      %21 = vector.load %arg8[%c0_11, %c0_12] : memref<8x512xf32, #tpu.memory_space<vmem>>, vector<8x512xf32>
      tpu.vector_store %arg8[%c0_11, %c0_12], %20 {strides = array<i32>} : memref<8x512xf32, #tpu.memory_space<vmem>>, vector<8x512xf32>,
    } else {
    }
    %3 = tpu.iota {dimensions = array<i32: 0>} : vector<512x512xi32>
    %c512_i32 = arith.constant 512 : i32
    %4 = arith.muli %arg1, %c512_i32 : i32
    %5 = vector.broadcast %4 : i32 to vector<512x512xi32>
    %6 = arith.addi %3, %5 : vector<512x512xi32>
    %c0 = arith.constant 0 : index
    %c0_1 = arith.constant 0 : index
    %7 = vector.load %arg4[%c0, %c0_1] : memref<1x512xi32, #tpu.memory_space<vmem>>, vector<1x512xi32>
    %8 = vector.broadcast %7 : vector<1x512xi32> to vector<512x512xi32>
    %9 = arith.cmpi eq, %6, %8 : vector<512x512xi32>
    %10 = arith.extui %9 : vector<512x512xi1> to vector<512x512xi32>
    %11 = arith.sitofp %10 : vector<512x512xi32> to vector<512x512xf32>
    %c0_2 = arith.constant 0 : index
    %c0_3 = arith.constant 0 : index
    %12 = vector.load %arg8[%c0_2, %c0_3] : memref<8x512xf32, #tpu.memory_space<vmem>>, vector<8x512xf32>
    %c0_4 = arith.constant 0 : index
    %c0_5 = arith.constant 0 : index
    %13 = vector.load %arg2[%c0_4, %c0_5] : memref<8x512xf32, #tpu.memory_space<vmem>>, vector<8x512xf32>
    %cst = arith.constant dense<0.000000e+00> : vector<8x512xf32>
    %14 = tpu.matmul %13, %11, %cst {dimension_numbers = #tpu.dot_dimension_numbers<[1], [0], [0], [1], [0, 0, 1, 1], [], []>} : vector<8x512xf32>, vector<512x512xf32>, vector<8x512xf32> -> vector<8x512xf32>
    %15 = arith.addf %12, %14 : vector<8x512xf32>
    %c0_6 = arith.constant 0 : index
    %c0_7 = arith.constant 0 : index
    %16 = vector.load %arg8[%c0_6, %c0_7] : memref<8x512xf32, #tpu.memory_space<vmem>>, vector<8x512xf32>
    tpu.vector_store %arg8[%c0_6, %c0_7], %15 {strides = array<i32>} : memref<8x512xf32, #tpu.memory_space<vmem>>, vector<8x512xf32>,
    %c0_i32_8 = arith.constant 0 : i32
    %17 = arith.cmpi eq, %arg1, %c0_i32_8 : i32
    %18 = arith.extui %17 : i1 to i32
    %c0_i32_9 = arith.constant 0 : i32
    %19 = arith.cmpi ne, %18, %c0_i32_9 : i32
    scf.if %19 {
      %c0_10 = arith.constant 0 : index
      %c0_11 = arith.constant 0 : index
      %20 = vector.load %arg8[%c0_10, %c0_11] : memref<8x512xf32, #tpu.memory_space<vmem>>, vector<8x512xf32>
      %c0_12 = arith.constant 0 : index
      %c0_13 = arith.constant 0 : index
      %21 = vector.load %arg3[%c0_12, %c0_13] : memref<8x512xf32, #tpu.memory_space<vmem>>, vector<8x512xf32>
      %22 = arith.addf %20, %21 : vector<8x512xf32>
      %c0_14 = arith.constant 0 : index
      %c0_15 = arith.constant 0 : index
      %23 = vector.load %arg6[%c0_14, %c0_15] : memref<8x8xf32, #tpu.memory_space<vmem>>, vector<8x8xf32>
      %cst_16 = arith.constant dense<0.000000e+00> : vector<8x512xf32>
      %24 = tpu.matmul %23, %22, %cst_16 {dimension_numbers = #tpu.dot_dimension_numbers<[1], [0], [0], [1], [0, 0, 1, 1], [], []>} : vector<8x8xf32>, vector<8x512xf32>, vector<8x512xf32> -> vector<8x512xf32>
      %c0_17 = arith.constant 0 : index
      %c0_18 = arith.constant 0 : index
      %25 = vector.load %arg7[%c0_17, %c0_18] : memref<8x1xf32, #tpu.memory_space<vmem>>, vector<8x1xf32>
      %26 = vector.broadcast %25 : vector<8x1xf32> to vector<8x512xf32>
      %27 = arith.addf %24, %26 : vector<8x512xf32>
      %c0_19 = arith.constant 0 : index
      %c0_20 = arith.constant 0 : index
      %28 = vector.load %arg5[%c0_19, %c0_20] : memref<1x512xf32, #tpu.memory_space<vmem>>, vector<1x512xf32>
      %29 = vector.broadcast %28 : vector<1x512xf32> to vector<8x512xf32>
      %30 = arith.mulf %27, %29 : vector<8x512xf32>
      %c0_21 = arith.constant 0 : index
      %c0_22 = arith.constant 0 : index
      %31 = vector.load %arg8[%c0_21, %c0_22] : memref<8x512xf32, #tpu.memory_space<vmem>>, vector<8x512xf32>
      tpu.vector_store %arg8[%c0_21, %c0_22], %30 {strides = array<i32>} : memref<8x512xf32, #tpu.memory_space<vmem>>, vector<8x512xf32>,
      %cst_23 = arith.constant dense<0.000000e+00> : vector<8xf32>
      %32 = vector.multi_reduction <add>, %30, %cst_23 [1] : vector<8x512xf32> to vector<8xf32>
      %33 = vector.shape_cast %32 : vector<8xf32> to vector<8x1xf32>
      %34 = vector.shape_cast %33 : vector<8x1xf32> to vector<1x8x1xf32>
      %c0_24 = arith.constant 0 : index
      %c0_25 = arith.constant 0 : index
      %c0_26 = arith.constant 0 : index
      %35 = vector.load %arg9[%c0_24, %c0_25, %c0_26] : memref<1x8x1xf32, #tpu.memory_space<vmem>>, vector<1x8x1xf32>
      tpu.vector_store %arg9[%c0_24, %c0_25, %c0_26], %34 {strides = array<i32>} : memref<1x8x1xf32, #tpu.memory_space<vmem>>, vector<1x8x1xf32>,
      %36 = arith.mulf %30, %30 : vector<8x512xf32>
      %cst_27 = arith.constant dense<0.000000e+00> : vector<8xf32>
      %37 = vector.multi_reduction <add>, %36, %cst_27 [1] : vector<8x512xf32> to vector<8xf32>
      %38 = vector.shape_cast %37 : vector<8xf32> to vector<8x1xf32>
      %39 = vector.shape_cast %38 : vector<8x1xf32> to vector<1x8x1xf32>
      %c0_28 = arith.constant 0 : index
      %c0_29 = arith.constant 0 : index
      %c0_30 = arith.constant 0 : index
      %40 = vector.load %arg10[%c0_28, %c0_29, %c0_30] : memref<1x8x1xf32, #tpu.memory_space<vmem>>, vector<1x8x1xf32>
      tpu.vector_store %arg10[%c0_28, %c0_29, %c0_30], %39 {strides = array<i32>} : memref<1x8x1xf32, #tpu.memory_space<vmem>>, vector<1x8x1xf32>,
    } else {
    }
    return
  }
  func.func @transform_0(%arg0: i32, %arg1: i32) -> (i32, i32) {
    %c0_i32 = arith.constant 0 : i32
    %c0_i32_0 = arith.constant 0 : i32
    return %c0_i32, %arg1 : i32, i32
  }
  func.func @transform_1(%arg0: i32, %arg1: i32) -> (i32, i32) {
    %c0_i32 = arith.constant 0 : i32
    %c0_i32_0 = arith.constant 0 : i32
    return %c0_i32, %arg0 : i32, i32
  }
  func.func @transform_2(%arg0: i32, %arg1: i32) -> (i32, i32) {
    %c0_i32 = arith.constant 0 : i32
    %c0_i32_0 = arith.constant 0 : i32
    return %c0_i32, %arg0 : i32, i32
  }
  func.func @transform_3(%arg0: i32, %arg1: i32) -> (i32, i32) {
    %c0_i32 = arith.constant 0 : i32
    %c0_i32_0 = arith.constant 0 : i32
    return %c0_i32, %arg0 : i32, i32
  }
  func.func @transform_4(%arg0: i32, %arg1: i32) -> (i32, i32) {
    %c0_i32 = arith.constant 0 : i32
    %c0_i32_0 = arith.constant 0 : i32
    %c0_i32_1 = arith.constant 0 : i32
    return %c0_i32, %c0_i32_0 : i32, i32
  }
  func.func @transform_5(%arg0: i32, %arg1: i32) -> (i32, i32) {
    %c0_i32 = arith.constant 0 : i32
    %c0_i32_0 = arith.constant 0 : i32
    %c0_i32_1 = arith.constant 0 : i32
    return %c0_i32, %c0_i32_0 : i32, i32
  }
  func.func @transform_6(%arg0: i32, %arg1: i32) -> (i32, i32) {
    %c0_i32 = arith.constant 0 : i32
    %c0_i32_0 = arith.constant 0 : i32
    return %c0_i32, %arg0 : i32, i32
  }
  func.func @transform_7(%arg0: i32, %arg1: i32) -> (i32, i32, i32) {
    %c0_i32 = arith.constant 0 : i32
    %c0_i32_0 = arith.constant 0 : i32
    %c0_i32_1 = arith.constant 0 : i32
    return %arg0, %c0_i32, %c0_i32_0 : i32, i32, i32
  }
  func.func @transform_8(%arg0: i32, %arg1: i32) -> (i32, i32, i32) {
    %c0_i32 = arith.constant 0 : i32
    %c0_i32_0 = arith.constant 0 : i32
    %c0_i32_1 = arith.constant 0 : i32
    return %arg0, %c0_i32, %c0_i32_0 : i32, i32, i32
  }
}

module attributes {stable_mosaic.version = 11 : i64} {
  func.func @_egin_agg_kernel(%arg0: i32, %arg1: i32, %arg2: memref<8x512xf32, #tpu.memory_space<vmem>>, %arg3: memref<512x1xi32, #tpu.memory_space<vmem>>, %arg4: memref<8x512xf32, #tpu.memory_space<vmem>>, %arg5: memref<8x8xf32, #tpu.memory_space<vmem>>, %arg6: memref<8x512xf32, #tpu.memory_space<vmem>>) attributes {dimension_semantics = [#tpu.dimension_semantics<parallel>, #tpu.dimension_semantics<arbitrary>], iteration_bounds = array<i64: 1, 1>, scalar_prefetch = 0 : i64, scratch_operands = 0 : i64, tpu.core_type = #tpu.core_type<tc>, window_params = [{transform_indices = @transform_0, window_bounds = array<i64: 8, 512>}, {transform_indices = @transform_1, window_bounds = array<i64: 512, 1>}, {transform_indices = @transform_2, window_bounds = array<i64: 8, 512>}, {pipeline_mode = #tpu.pipeline_mode<synchronous>, transform_indices = @transform_3, window_bounds = array<i64: 8, 8>}, {transform_indices = @transform_4, window_bounds = array<i64: 8, 512>}]} {
    %c0_i32 = arith.constant 0 : i32
    %0 = arith.cmpi eq, %arg1, %c0_i32 : i32
    %1 = arith.extui %0 : i1 to i32
    %c0_i32_0 = arith.constant 0 : i32
    %2 = arith.cmpi ne, %1, %c0_i32_0 : i32
    scf.if %2 {
      %cst_10 = arith.constant 0.000000e+00 : f32
      %20 = vector.broadcast %cst_10 : f32 to vector<8x512xf32>
      %c0_11 = arith.constant 0 : index
      %c0_12 = arith.constant 0 : index
      %21 = vector.load %arg6[%c0_11, %c0_12] : memref<8x512xf32, #tpu.memory_space<vmem>>, vector<8x512xf32>
      tpu.vector_store %arg6[%c0_11, %c0_12], %20 {strides = array<i32>} : memref<8x512xf32, #tpu.memory_space<vmem>>, vector<8x512xf32>,
    } else {
    }
    %3 = tpu.iota {dimensions = array<i32: 1>} : vector<512x512xi32>
    %c512_i32 = arith.constant 512 : i32
    %4 = arith.muli %arg0, %c512_i32 : i32
    %5 = vector.broadcast %4 : i32 to vector<512x512xi32>
    %6 = arith.addi %3, %5 : vector<512x512xi32>
    %c0 = arith.constant 0 : index
    %c0_1 = arith.constant 0 : index
    %7 = vector.load %arg3[%c0, %c0_1] : memref<512x1xi32, #tpu.memory_space<vmem>>, vector<512x1xi32>
    %8 = vector.broadcast %7 : vector<512x1xi32> to vector<512x512xi32>
    %9 = arith.cmpi eq, %6, %8 : vector<512x512xi32>
    %10 = arith.extui %9 : vector<512x512xi1> to vector<512x512xi32>
    %11 = arith.sitofp %10 : vector<512x512xi32> to vector<512x512xf32>
    %c0_2 = arith.constant 0 : index
    %c0_3 = arith.constant 0 : index
    %12 = vector.load %arg6[%c0_2, %c0_3] : memref<8x512xf32, #tpu.memory_space<vmem>>, vector<8x512xf32>
    %c0_4 = arith.constant 0 : index
    %c0_5 = arith.constant 0 : index
    %13 = vector.load %arg2[%c0_4, %c0_5] : memref<8x512xf32, #tpu.memory_space<vmem>>, vector<8x512xf32>
    %cst = arith.constant dense<0.000000e+00> : vector<8x512xf32>
    %14 = tpu.matmul %13, %11, %cst {dimension_numbers = #tpu.dot_dimension_numbers<[1], [0], [0], [1], [0, 0, 1, 1], [], []>} : vector<8x512xf32>, vector<512x512xf32>, vector<8x512xf32> -> vector<8x512xf32>
    %15 = arith.addf %12, %14 : vector<8x512xf32>
    %c0_6 = arith.constant 0 : index
    %c0_7 = arith.constant 0 : index
    %16 = vector.load %arg6[%c0_6, %c0_7] : memref<8x512xf32, #tpu.memory_space<vmem>>, vector<8x512xf32>
    tpu.vector_store %arg6[%c0_6, %c0_7], %15 {strides = array<i32>} : memref<8x512xf32, #tpu.memory_space<vmem>>, vector<8x512xf32>,
    %c0_i32_8 = arith.constant 0 : i32
    %17 = arith.cmpi eq, %arg1, %c0_i32_8 : i32
    %18 = arith.extui %17 : i1 to i32
    %c0_i32_9 = arith.constant 0 : i32
    %19 = arith.cmpi ne, %18, %c0_i32_9 : i32
    scf.if %19 {
      %c0_10 = arith.constant 0 : index
      %c0_11 = arith.constant 0 : index
      %20 = vector.load %arg5[%c0_10, %c0_11] : memref<8x8xf32, #tpu.memory_space<vmem>>, vector<8x8xf32>
      %c0_12 = arith.constant 0 : index
      %c0_13 = arith.constant 0 : index
      %21 = vector.load %arg4[%c0_12, %c0_13] : memref<8x512xf32, #tpu.memory_space<vmem>>, vector<8x512xf32>
      %c0_14 = arith.constant 0 : index
      %c0_15 = arith.constant 0 : index
      %22 = vector.load %arg6[%c0_14, %c0_15] : memref<8x512xf32, #tpu.memory_space<vmem>>, vector<8x512xf32>
      %23 = arith.addf %21, %22 : vector<8x512xf32>
      %cst_16 = arith.constant dense<0.000000e+00> : vector<8x512xf32>
      %24 = tpu.matmul %20, %23, %cst_16 {dimension_numbers = #tpu.dot_dimension_numbers<[1], [0], [0], [1], [0, 0, 1, 1], [], []>} : vector<8x8xf32>, vector<8x512xf32>, vector<8x512xf32> -> vector<8x512xf32>
      %c0_17 = arith.constant 0 : index
      %c0_18 = arith.constant 0 : index
      %25 = vector.load %arg6[%c0_17, %c0_18] : memref<8x512xf32, #tpu.memory_space<vmem>>, vector<8x512xf32>
      tpu.vector_store %arg6[%c0_17, %c0_18], %24 {strides = array<i32>} : memref<8x512xf32, #tpu.memory_space<vmem>>, vector<8x512xf32>,
    } else {
    }
    return
  }
  func.func @transform_0(%arg0: i32, %arg1: i32) -> (i32, i32) {
    %c0_i32 = arith.constant 0 : i32
    %c0_i32_0 = arith.constant 0 : i32
    return %c0_i32, %arg1 : i32, i32
  }
  func.func @transform_1(%arg0: i32, %arg1: i32) -> (i32, i32) {
    %c0_i32 = arith.constant 0 : i32
    %c0_i32_0 = arith.constant 0 : i32
    return %arg1, %c0_i32 : i32, i32
  }
  func.func @transform_2(%arg0: i32, %arg1: i32) -> (i32, i32) {
    %c0_i32 = arith.constant 0 : i32
    %c0_i32_0 = arith.constant 0 : i32
    return %c0_i32, %arg0 : i32, i32
  }
  func.func @transform_3(%arg0: i32, %arg1: i32) -> (i32, i32) {
    %c0_i32 = arith.constant 0 : i32
    %c0_i32_0 = arith.constant 0 : i32
    %c0_i32_1 = arith.constant 0 : i32
    return %c0_i32, %c0_i32_0 : i32, i32
  }
  func.func @transform_4(%arg0: i32, %arg1: i32) -> (i32, i32) {
    %c0_i32 = arith.constant 0 : i32
    %c0_i32_0 = arith.constant 0 : i32
    return %c0_i32, %arg0 : i32, i32
  }
}

module attributes {stable_mosaic.version = 11 : i64} {
  func.func @_egin_msg_kernel(%arg0: i32, %arg1: i32, %arg2: memref<8x512xf32, #tpu.memory_space<vmem>>, %arg3: memref<1x512xi32, #tpu.memory_space<vmem>>, %arg4: memref<8x512xf32, #tpu.memory_space<vmem>>, %arg5: memref<8x8xf32, #tpu.memory_space<vmem>>, %arg6: memref<1x512xf32, #tpu.memory_space<vmem>>, %arg7: memref<8x512xf32, #tpu.memory_space<vmem>>) attributes {dimension_semantics = [#tpu.dimension_semantics<parallel>, #tpu.dimension_semantics<arbitrary>], iteration_bounds = array<i64: 1, 1>, scalar_prefetch = 0 : i64, scratch_operands = 0 : i64, tpu.core_type = #tpu.core_type<tc>, window_params = [{transform_indices = @transform_0, window_bounds = array<i64: 8, 512>}, {transform_indices = @transform_1, window_bounds = array<i64: 1, 512>}, {transform_indices = @transform_2, window_bounds = array<i64: 8, 512>}, {pipeline_mode = #tpu.pipeline_mode<synchronous>, transform_indices = @transform_3, window_bounds = array<i64: 8, 8>}, {transform_indices = @transform_4, window_bounds = array<i64: 1, 512>}, {transform_indices = @transform_5, window_bounds = array<i64: 8, 512>}]} {
    %c0_i32 = arith.constant 0 : i32
    %0 = arith.cmpi eq, %arg1, %c0_i32 : i32
    %1 = arith.extui %0 : i1 to i32
    %c0_i32_0 = arith.constant 0 : i32
    %2 = arith.cmpi ne, %1, %c0_i32_0 : i32
    scf.if %2 {
      %cst_10 = arith.constant 0.000000e+00 : f32
      %20 = vector.broadcast %cst_10 : f32 to vector<8x512xf32>
      %c0_11 = arith.constant 0 : index
      %c0_12 = arith.constant 0 : index
      %21 = vector.load %arg7[%c0_11, %c0_12] : memref<8x512xf32, #tpu.memory_space<vmem>>, vector<8x512xf32>
      tpu.vector_store %arg7[%c0_11, %c0_12], %20 {strides = array<i32>} : memref<8x512xf32, #tpu.memory_space<vmem>>, vector<8x512xf32>,
    } else {
    }
    %3 = tpu.iota {dimensions = array<i32: 0>} : vector<512x512xi32>
    %c512_i32 = arith.constant 512 : i32
    %4 = arith.muli %arg1, %c512_i32 : i32
    %5 = vector.broadcast %4 : i32 to vector<512x512xi32>
    %6 = arith.addi %3, %5 : vector<512x512xi32>
    %c0 = arith.constant 0 : index
    %c0_1 = arith.constant 0 : index
    %7 = vector.load %arg3[%c0, %c0_1] : memref<1x512xi32, #tpu.memory_space<vmem>>, vector<1x512xi32>
    %8 = vector.broadcast %7 : vector<1x512xi32> to vector<512x512xi32>
    %9 = arith.cmpi eq, %6, %8 : vector<512x512xi32>
    %10 = arith.extui %9 : vector<512x512xi1> to vector<512x512xi32>
    %11 = arith.sitofp %10 : vector<512x512xi32> to vector<512x512xf32>
    %c0_2 = arith.constant 0 : index
    %c0_3 = arith.constant 0 : index
    %12 = vector.load %arg7[%c0_2, %c0_3] : memref<8x512xf32, #tpu.memory_space<vmem>>, vector<8x512xf32>
    %c0_4 = arith.constant 0 : index
    %c0_5 = arith.constant 0 : index
    %13 = vector.load %arg2[%c0_4, %c0_5] : memref<8x512xf32, #tpu.memory_space<vmem>>, vector<8x512xf32>
    %cst = arith.constant dense<0.000000e+00> : vector<8x512xf32>
    %14 = tpu.matmul %13, %11, %cst {dimension_numbers = #tpu.dot_dimension_numbers<[1], [0], [0], [1], [0, 0, 1, 1], [], []>} : vector<8x512xf32>, vector<512x512xf32>, vector<8x512xf32> -> vector<8x512xf32>
    %15 = arith.addf %12, %14 : vector<8x512xf32>
    %c0_6 = arith.constant 0 : index
    %c0_7 = arith.constant 0 : index
    %16 = vector.load %arg7[%c0_6, %c0_7] : memref<8x512xf32, #tpu.memory_space<vmem>>, vector<8x512xf32>
    tpu.vector_store %arg7[%c0_6, %c0_7], %15 {strides = array<i32>} : memref<8x512xf32, #tpu.memory_space<vmem>>, vector<8x512xf32>,
    %c0_i32_8 = arith.constant 0 : i32
    %17 = arith.cmpi eq, %arg1, %c0_i32_8 : i32
    %18 = arith.extui %17 : i1 to i32
    %c0_i32_9 = arith.constant 0 : i32
    %19 = arith.cmpi ne, %18, %c0_i32_9 : i32
    scf.if %19 {
      %c0_10 = arith.constant 0 : index
      %c0_11 = arith.constant 0 : index
      %20 = vector.load %arg7[%c0_10, %c0_11] : memref<8x512xf32, #tpu.memory_space<vmem>>, vector<8x512xf32>
      %c0_12 = arith.constant 0 : index
      %c0_13 = arith.constant 0 : index
      %21 = vector.load %arg5[%c0_12, %c0_13] : memref<8x8xf32, #tpu.memory_space<vmem>>, vector<8x8xf32>
      %c0_14 = arith.constant 0 : index
      %c0_15 = arith.constant 0 : index
      %22 = vector.load %arg4[%c0_14, %c0_15] : memref<8x512xf32, #tpu.memory_space<vmem>>, vector<8x512xf32>
      %cst_16 = arith.constant dense<0.000000e+00> : vector<8x512xf32>
      %23 = tpu.matmul %21, %22, %cst_16 {dimension_numbers = #tpu.dot_dimension_numbers<[1], [0], [0], [1], [0, 0, 1, 1], [], []>} : vector<8x8xf32>, vector<8x512xf32>, vector<8x512xf32> -> vector<8x512xf32>
      %24 = arith.addf %20, %23 : vector<8x512xf32>
      %cst_17 = arith.constant 0.000000e+00 : f32
      %25 = vector.broadcast %cst_17 : f32 to vector<8x512xf32>
      %26 = arith.maximumf %24, %25 : vector<8x512xf32>
      %c0_18 = arith.constant 0 : index
      %c0_19 = arith.constant 0 : index
      %27 = vector.load %arg6[%c0_18, %c0_19] : memref<1x512xf32, #tpu.memory_space<vmem>>, vector<1x512xf32>
      %28 = vector.broadcast %27 : vector<1x512xf32> to vector<8x512xf32>
      %29 = arith.mulf %26, %28 : vector<8x512xf32>
      %c0_20 = arith.constant 0 : index
      %c0_21 = arith.constant 0 : index
      %30 = vector.load %arg7[%c0_20, %c0_21] : memref<8x512xf32, #tpu.memory_space<vmem>>, vector<8x512xf32>
      tpu.vector_store %arg7[%c0_20, %c0_21], %29 {strides = array<i32>} : memref<8x512xf32, #tpu.memory_space<vmem>>, vector<8x512xf32>,
    } else {
    }
    return
  }
  func.func @transform_0(%arg0: i32, %arg1: i32) -> (i32, i32) {
    %c0_i32 = arith.constant 0 : i32
    %c0_i32_0 = arith.constant 0 : i32
    return %c0_i32, %arg1 : i32, i32
  }
  func.func @transform_1(%arg0: i32, %arg1: i32) -> (i32, i32) {
    %c0_i32 = arith.constant 0 : i32
    %c0_i32_0 = arith.constant 0 : i32
    return %c0_i32, %arg0 : i32, i32
  }
  func.func @transform_2(%arg0: i32, %arg1: i32) -> (i32, i32) {
    %c0_i32 = arith.constant 0 : i32
    %c0_i32_0 = arith.constant 0 : i32
    return %c0_i32, %arg0 : i32, i32
  }
  func.func @transform_3(%arg0: i32, %arg1: i32) -> (i32, i32) {
    %c0_i32 = arith.constant 0 : i32
    %c0_i32_0 = arith.constant 0 : i32
    %c0_i32_1 = arith.constant 0 : i32
    return %c0_i32, %c0_i32_0 : i32, i32
  }
  func.func @transform_4(%arg0: i32, %arg1: i32) -> (i32, i32) {
    %c0_i32 = arith.constant 0 : i32
    %c0_i32_0 = arith.constant 0 : i32
    return %c0_i32, %arg0 : i32, i32
  }
  func.func @transform_5(%arg0: i32, %arg1: i32) -> (i32, i32) {
    %c0_i32 = arith.constant 0 : i32
    %c0_i32_0 = arith.constant 0 : i32
    return %c0_i32, %arg0 : i32, i32
  }
}

module attributes {stable_mosaic.version = 11 : i64} {
  func.func @_pool_bn_kernel(%arg0: i32, %arg1: memref<8x512xf32, #tpu.memory_space<vmem>>, %arg2: memref<512x1xi32, #tpu.memory_space<vmem>>, %arg3: memref<8x1xf32, #tpu.memory_space<vmem>>, %arg4: memref<8x1xf32, #tpu.memory_space<vmem>>, %arg5: memref<8x2xf32, #tpu.memory_space<vmem>>) attributes {dimension_semantics = [#tpu.dimension_semantics<arbitrary>], iteration_bounds = array<i64: 1>, scalar_prefetch = 0 : i64, scratch_operands = 0 : i64, tpu.core_type = #tpu.core_type<tc>, window_params = [{transform_indices = @transform_0, window_bounds = array<i64: 8, 512>}, {transform_indices = @transform_1, window_bounds = array<i64: 512, 1>}, {pipeline_mode = #tpu.pipeline_mode<synchronous>, transform_indices = @transform_2, window_bounds = array<i64: 8, 1>}, {pipeline_mode = #tpu.pipeline_mode<synchronous>, transform_indices = @transform_3, window_bounds = array<i64: 8, 1>}, {pipeline_mode = #tpu.pipeline_mode<synchronous>, transform_indices = @transform_4, window_bounds = array<i64: 8, 2>}]} {
    %c0_i32 = arith.constant 0 : i32
    %0 = arith.cmpi eq, %arg0, %c0_i32 : i32
    %1 = arith.extui %0 : i1 to i32
    %c0_i32_0 = arith.constant 0 : i32
    %2 = arith.cmpi ne, %1, %c0_i32_0 : i32
    scf.if %2 {
      %cst_10 = arith.constant 0.000000e+00 : f32
      %17 = vector.broadcast %cst_10 : f32 to vector<8x2xf32>
      %c0_11 = arith.constant 0 : index
      %c0_12 = arith.constant 0 : index
      %18 = vector.load %arg5[%c0_11, %c0_12] : memref<8x2xf32, #tpu.memory_space<vmem>>, vector<8x2xf32>
      tpu.vector_store %arg5[%c0_11, %c0_12], %17 {strides = array<i32>} : memref<8x2xf32, #tpu.memory_space<vmem>>, vector<8x2xf32>,
    } else {
    }
    %3 = tpu.iota {dimensions = array<i32: 1>} : vector<512x2xi32>
    %c0 = arith.constant 0 : index
    %c0_1 = arith.constant 0 : index
    %4 = vector.load %arg2[%c0, %c0_1] : memref<512x1xi32, #tpu.memory_space<vmem>>, vector<512x1xi32>
    %5 = vector.broadcast %4 : vector<512x1xi32> to vector<512x2xi32>
    %6 = arith.cmpi eq, %3, %5 : vector<512x2xi32>
    %7 = arith.extui %6 : vector<512x2xi1> to vector<512x2xi32>
    %8 = arith.sitofp %7 : vector<512x2xi32> to vector<512x2xf32>
    %c0_2 = arith.constant 0 : index
    %c0_3 = arith.constant 0 : index
    %9 = vector.load %arg5[%c0_2, %c0_3] : memref<8x2xf32, #tpu.memory_space<vmem>>, vector<8x2xf32>
    %c0_4 = arith.constant 0 : index
    %c0_5 = arith.constant 0 : index
    %10 = vector.load %arg1[%c0_4, %c0_5] : memref<8x512xf32, #tpu.memory_space<vmem>>, vector<8x512xf32>
    %cst = arith.constant dense<0.000000e+00> : vector<8x2xf32>
    %11 = tpu.matmul %10, %8, %cst {dimension_numbers = #tpu.dot_dimension_numbers<[1], [0], [0], [1], [0, 0, 1, 1], [], []>} : vector<8x512xf32>, vector<512x2xf32>, vector<8x2xf32> -> vector<8x2xf32>
    %12 = arith.addf %9, %11 : vector<8x2xf32>
    %c0_6 = arith.constant 0 : index
    %c0_7 = arith.constant 0 : index
    %13 = vector.load %arg5[%c0_6, %c0_7] : memref<8x2xf32, #tpu.memory_space<vmem>>, vector<8x2xf32>
    tpu.vector_store %arg5[%c0_6, %c0_7], %12 {strides = array<i32>} : memref<8x2xf32, #tpu.memory_space<vmem>>, vector<8x2xf32>,
    %c0_i32_8 = arith.constant 0 : i32
    %14 = arith.cmpi eq, %arg0, %c0_i32_8 : i32
    %15 = arith.extui %14 : i1 to i32
    %c0_i32_9 = arith.constant 0 : i32
    %16 = arith.cmpi ne, %15, %c0_i32_9 : i32
    scf.if %16 {
      %c0_10 = arith.constant 0 : index
      %c0_11 = arith.constant 0 : index
      %17 = vector.load %arg5[%c0_10, %c0_11] : memref<8x2xf32, #tpu.memory_space<vmem>>, vector<8x2xf32>
      %cst_12 = arith.constant dense<0.000000e+00> : vector<8xf32>
      %18 = vector.multi_reduction <add>, %17, %cst_12 [1] : vector<8x2xf32> to vector<8xf32>
      %19 = vector.shape_cast %18 : vector<8xf32> to vector<8x1xf32>
      %cst_13 = arith.constant 2.000000e+00 : f32
      %20 = vector.broadcast %cst_13 : f32 to vector<8x1xf32>
      %21 = arith.divf %19, %20 : vector<8x1xf32>
      %22 = vector.broadcast %21 : vector<8x1xf32> to vector<8x2xf32>
      %23 = arith.subf %17, %22 : vector<8x2xf32>
      %24 = arith.mulf %23, %23 : vector<8x2xf32>
      %cst_14 = arith.constant dense<0.000000e+00> : vector<8xf32>
      %25 = vector.multi_reduction <add>, %24, %cst_14 [1] : vector<8x2xf32> to vector<8xf32>
      %26 = vector.shape_cast %25 : vector<8xf32> to vector<8x1xf32>
      %cst_15 = arith.constant 2.000000e+00 : f32
      %27 = vector.broadcast %cst_15 : f32 to vector<8x1xf32>
      %28 = arith.divf %26, %27 : vector<8x1xf32>
      %29 = vector.broadcast %21 : vector<8x1xf32> to vector<8x2xf32>
      %30 = arith.subf %17, %29 : vector<8x2xf32>
      %cst_16 = arith.constant 9.99999974E-6 : f32
      %31 = vector.broadcast %cst_16 : f32 to vector<8x1xf32>
      %32 = arith.addf %28, %31 : vector<8x1xf32>
      %33 = math.rsqrt %32 : vector<8x1xf32>
      %34 = vector.broadcast %33 : vector<8x1xf32> to vector<8x2xf32>
      %35 = arith.mulf %30, %34 : vector<8x2xf32>
      %c0_17 = arith.constant 0 : index
      %c0_18 = arith.constant 0 : index
      %36 = vector.load %arg3[%c0_17, %c0_18] : memref<8x1xf32, #tpu.memory_space<vmem>>, vector<8x1xf32>
      %37 = vector.broadcast %36 : vector<8x1xf32> to vector<8x2xf32>
      %38 = arith.mulf %35, %37 : vector<8x2xf32>
      %c0_19 = arith.constant 0 : index
      %c0_20 = arith.constant 0 : index
      %39 = vector.load %arg4[%c0_19, %c0_20] : memref<8x1xf32, #tpu.memory_space<vmem>>, vector<8x1xf32>
      %40 = vector.broadcast %39 : vector<8x1xf32> to vector<8x2xf32>
      %41 = arith.addf %38, %40 : vector<8x2xf32>
      %c0_21 = arith.constant 0 : index
      %c0_22 = arith.constant 0 : index
      %42 = vector.load %arg5[%c0_21, %c0_22] : memref<8x2xf32, #tpu.memory_space<vmem>>, vector<8x2xf32>
      tpu.vector_store %arg5[%c0_21, %c0_22], %41 {strides = array<i32>} : memref<8x2xf32, #tpu.memory_space<vmem>>, vector<8x2xf32>,
    } else {
    }
    return
  }
  func.func @transform_0(%arg0: i32) -> (i32, i32) {
    %c0_i32 = arith.constant 0 : i32
    %c0_i32_0 = arith.constant 0 : i32
    return %c0_i32, %arg0 : i32, i32
  }
  func.func @transform_1(%arg0: i32) -> (i32, i32) {
    %c0_i32 = arith.constant 0 : i32
    %c0_i32_0 = arith.constant 0 : i32
    return %arg0, %c0_i32 : i32, i32
  }
  func.func @transform_2(%arg0: i32) -> (i32, i32) {
    %c0_i32 = arith.constant 0 : i32
    %c0_i32_0 = arith.constant 0 : i32
    %c0_i32_1 = arith.constant 0 : i32
    return %c0_i32, %c0_i32_0 : i32, i32
  }
  func.func @transform_3(%arg0: i32) -> (i32, i32) {
    %c0_i32 = arith.constant 0 : i32
    %c0_i32_0 = arith.constant 0 : i32
    %c0_i32_1 = arith.constant 0 : i32
    return %c0_i32, %c0_i32_0 : i32, i32
  }
  func.func @transform_4(%arg0: i32) -> (i32, i32) {
    %c0_i32 = arith.constant 0 : i32
    %c0_i32_0 = arith.constant 0 : i32
    %c0_i32_1 = arith.constant 0 : i32
    return %c0_i32, %c0_i32_0 : i32, i32
  }
}

</mosaic_0001>

<bundles_post_ra>
// kernel: custom-call
= control target key start
LH: loop header
LB: loop body
LE: loop exit
PB: predicated region body
PF: predicated region fallthrough
CT: control target
= control target key end

     0   :  { %s6_s0 = inlined_call_operand.vmem [shape: u32[16], index: 0, kind: output, shape index: {}]  }

// kernel: muse_pool_forward.8
= control target key start
LH: loop header
LB: loop body
LE: loop exit
PB: predicated region body
PF: predicated region fallthrough
CT: control target
= control target key end

     0   :  { %v273_v0 = vmov 0   ;;  %v274_v5 = vmov 0.0   ;;  %vm78_vm0 = vcmask 64512   ;;  %v275_v35 = vmov 1966171168   ;;  %s358_s3 = inlined_call_operand.vmem [shape: f32[8,1], index: 3, kind: input, shape index: {}]   ;;  %s359_s1 = inlined_call_operand.vmem [shape: f32[8,1], index: 1, kind: input, shape index: {}]   ;;  %s360_s4 = inlined_call_operand.vmem [shape: f32[8,1], index: 4, kind: input, shape index: {}]   ;;  %s361_s2 = inlined_call_operand.vmem [shape: f32[8,1], index: 2, kind: input, shape index: {}]   ;;  %s362_s0 = inlined_call_operand.vmem [shape: f32[8,512], index: 0, kind: input, shape index: {}]   ;;  %s363_s5 = inlined_call_operand.vmem [shape: f32[1,8], index: 5, kind: input, shape index: {}]   ;;  %s364_s6 = inlined_call_operand.vmem [shape: f32[8,512], index: 6, kind: output, shape index: {0}]   ;;  %s365_s7 = inlined_call_operand.vmem [shape: f32[1,512], index: 7, kind: output, shape index: {1}]  }
   0x1   :  { %272 = vset.pattern.permute.xlu1 %v273_v0  ;;  %271 = vset.pattern.permute.xlu0 %v273_v0  ;;  %v49_v1 = vld [vmem:[%s358_s3] sm:$0xff]  ;;  %v26_v8 = vld [vmem:[%s362_s0 + $0x8] sm:$0xff]  ;;  %v27_v9 = vld [vmem:[%s362_s0 + $0x10] sm:$0xff]  ;;  %v231_v36 = vunpack.c.l.s4 %v275_v35  ;;  %v233_v37 = vlaneseq }
   0x2   :  { %v29_v2 = vld [vmem:[%s359_s1] sm:$0xff]  ;;  %52 = vperm.xlu1 %272, %v49_v1   ;;  %146 = vmatprep.mubr.f32.mxu0 %v274_v5  ;;  %v28_v10 = vld [vmem:[%s362_s0 + $0x18] sm:$0xff] }
   0x3   :  { %32 = vperm.xlu0 %271, %v29_v2   ;;  %v59_v3 = vld [vmem:[%s360_s4] sm:$0xff]  ;;  %217 = vmatprep.mubr.f32.mxu1 %v274_v5  ;;  %v232_v38 = vunpack.c.0.s8 %v231_v36  ;;  %v234_v39 = vshrl.u32 %v233_v37, 7  ;;  %vm255_vm1 = vcmp.lt.s32.totalorder %v233_v37, 512 }
   0x4   :  { %v39_v4 = vld [vmem:[%s361_s2] sm:$0xff] }
   0x5   :  { %v25_v6 = vld [vmem:[%s362_s0] sm:$0xff]  ;;  %v235_v42 = vsub.s32 %v232_v38, %v234_v39 }
   0x6   :  { %62 = vperm.xlu1 %272, %v59_v3   ;;  %v77_v34 = vld [vmem:[%s363_s5] sm:$0x1] }
   0x7   :  { %42 = vperm.xlu0 %271, %v39_v4  }
  0x81   :  { %v53_v11 = vpop.permute.xlu1 %52 }
  0x82   :  { %v33_v7 = vpop.permute.xlu0 %32 }
  0x83   :  { %v35_v12 = vsub.f32 %v25_v6, %v33_v7  ;;  %v36_v13 = vsub.f32 %v26_v8, %v33_v7  ;;  %v37_v14 = vsub.f32 %v27_v9, %v33_v7  ;;  %v38_v15 = vsub.f32 %v28_v10, %v33_v7 }
  0x85   :  { %v63_v25 = vpop.permute.xlu1 %62 }
  0x86   :  { %v43_v16 = vpop.permute.xlu0 %42 }
  0x87   :  { %v45_v17 = vmul.f32 %v43_v16, %v35_v12  ;;  %v46_v18 = vmul.f32 %v43_v16, %v36_v13  ;;  %v47_v19 = vmul.f32 %v43_v16, %v37_v14  ;;  %v48_v20 = vmul.f32 %v43_v16, %v38_v15 }
  0x89   :  { %v56_v21 = vmul.f32 %v53_v11, %v46_v18  ;;  %v58_v22 = vmul.f32 %v53_v11, %v48_v20  ;;  %v55_v23 = vmul.f32 %v53_v11, %v45_v17  ;;  %v57_v24 = vmul.f32 %v53_v11, %v47_v19 }
  0x8b   :  { %v66_v26 = vadd.f32 %v63_v25, %v56_v21  ;;  %v68_v27 = vadd.f32 %v63_v25, %v58_v22  ;;  %v65_v28 = vadd.f32 %v63_v25, %v55_v23  ;;  %v67_v29 = vadd.f32 %v63_v25, %v57_v24 }
  0x8d   :  { %v70_v30 = vmax.f32 %v66_v26, 0.0  ;;  %v72_v31 = vmax.f32 %v68_v27, 0.0  ;;  %v69_v32 = vmax.f32 %v65_v28, 0.0  ;;  %v71_v33 = vmax.f32 %v67_v29, 0.0 }
  0x8f   :  { %74 = vst [vmem:[%s364_s6 + $0x8] sm:$0xff] %v70_v30  ;;  %82 = vmatprep.subr.mxu0 %v70_v30  ;;  %76 = vst [vmem:[%s364_s6 + $0x18] sm:$0xff] %v72_v31  ;;  %153 = vmatprep.subr.mxu1 %v72_v31 }
  0x90   :  { %73 = vst [vmem:[%s364_s6] sm:$0xff] %v69_v32  ;;  %75 = vst [vmem:[%s364_s6 + $0x10] sm:$0xff] %v71_v33  ;;  %83 = vmatpush1.msra.mxu0 %v69_v32  ;;  %154 = vmatpush1.msra.mxu1 %v71_v33 }
  0x91   :  { %266 = vmatmul.mubr.msk.f32.vlgmr.msra.gmra.mrb[0].mxu0 %vm78_vm0, %v77_v34  ;;  %267 = vmatmul.mubr.msk.f32.vlgmr.msra.gmra.mrb[0].mxu1 %vm78_vm0, %v77_v34 }
 0x164   :  { %v148_v40 = vpop.f32.mrb[0].mxu0  ;;  %v219_v41 = vpop.f32.mrb[0].mxu1 }
 0x165   :  { %v150_v43 = vpop.f32.mrb[1].mxu0  ;;  %v221_v44 = vpop.f32.mrb[1].mxu1 }
 0x166   :  { %v228_v45 = vcombine.low %v148_v40, %v150_v43  ;;  %v229_v46 = vcombine.low %v219_v41, %v221_v44 }
 0x168   :  { %v236_v47 = vrot.slane %v228_v45, %v235_v42  ;;  %v243_v48 = vrot.slane %v229_v46, %v235_v42 }
 0x16a   :  { %v244_v49 = vcombine.low %v236_v47, %v243_v48 }
 0x16c   :  { %v251_v50 = vrot.slane %v244_v49, %v235_v42 }
 0x16e   :  { %257 = vst.msk [vmem:[%s365_s7] sm:$0xf] %vm255_vm1, %v251_v50 }

// kernel: muse_pool_forward.6
= control target key start
LH: loop header
LB: loop body
LE: loop exit
PB: predicated region body
PF: predicated region fallthrough
CT: control target
= control target key end

     0   :  { %v2135_v0 = vmov 0   ;;  %s2861_s1 = inlined_call_operand.vmem [shape: s32[512,1], index: 1, kind: input, shape index: {}]   ;;  %s2862_s0 = inlined_call_operand.vmem [shape: f32[8,512], index: 0, kind: input, shape index: {}]   ;;  %s2863_s2 = inlined_call_operand.vmem [shape: f32[8,512], index: 2, kind: output, shape index: {}]  }
   0x1   :  { %2134 = vset.pattern.permute.xlu1 %v2135_v0  ;;  %2133 = vset.pattern.permute.xlu0 %v2135_v0  ;;  %v32_v1 = vld [vmem:[%s2861_s1 + $0x10] sm:$0xff]  ;;  %v30_v2 = vld [vmem:[%s2861_s1] sm:$0xff]  ;;  %v33_v3 = vld [vmem:[%s2861_s1 + $0x18] sm:$0xff]  ;;  %v19_v0 = vlaneseq }
   0x2   :  { %101 = vperm.xlu1 %2134, %v32_v1   ;;  %95 = vperm.xlu0 %2133, %v30_v2   ;;  %v31_v4 = vld [vmem:[%s2861_s1 + $0x8] sm:$0xff]  ;;  %v34_v6 = vld [vmem:[%s2861_s1 + $0x20] sm:$0xff]  ;;  %v37_v7 = vld [vmem:[%s2861_s1 + $0x38] sm:$0xff] }
   0x3   :  { %v35_v5 = vld [vmem:[%s2861_s1 + $0x28] sm:$0xff]  ;;  %v36_v8 = vld [vmem:[%s2861_s1 + $0x30] sm:$0xff]  ;;  %v38_v10 = vld [vmem:[%s2861_s1 + $0x40] sm:$0xff] }
   0x4   :  { %v39_v9 = vld [vmem:[%s2861_s1 + $0x48] sm:$0xff]  ;;  %v41_v11 = vld [vmem:[%s2861_s1 + $0x58] sm:$0xff]  ;;  %v40_v12 = vld [vmem:[%s2861_s1 + $0x50] sm:$0xff] }
   0x5   :  { %v43_v13 = vld [vmem:[%s2861_s1 + $0x68] sm:$0xff]  ;;  %v42_v14 = vld [vmem:[%s2861_s1 + $0x60] sm:$0xff]  ;;  %v45_v15 = vld [vmem:[%s2861_s1 + $0x78] sm:$0xff] }
   0x6   :  { %104 = vperm.xlu1 %2134, %v33_v3   ;;  %98 = vperm.xlu0 %2133, %v31_v4   ;;  %v44_v16 = vld [vmem:[%s2861_s1 + $0x70] sm:$0xff]  ;;  %v47_v17 = vld [vmem:[%s2861_s1 + $0x88] sm:$0xff]  ;;  %v46_v18 = vld [vmem:[%s2861_s1 + $0x80] sm:$0xff]  ;;  %v2347_v3 = vand.u32 127, %v19_v0 }
   0x7   :  { %v49_v19 = vld [vmem:[%s2861_s1 + $0x98] sm:$0xff]  ;;  %v48_v20 = vld [vmem:[%s2861_s1 + $0x90] sm:$0xff]  ;;  %v51_v21 = vld [vmem:[%s2861_s1 + $0xa8] sm:$0xff] }
   0x8   :  { %v50_v22 = vld [vmem:[%s2861_s1 + $0xa0] sm:$0xff]  ;;  %v53_v23 = vld [vmem:[%s2861_s1 + $0xb8] sm:$0xff]  ;;  %v52_v24 = vld [vmem:[%s2861_s1 + $0xb0] sm:$0xff] }
   0x9   :  { %v55_v25 = vld [vmem:[%s2861_s1 + $0xc8] sm:$0xff]  ;;  %v54_v26 = vld [vmem:[%s2861_s1 + $0xc0] sm:$0xff]  ;;  %v57_v27 = vld [vmem:[%s2861_s1 + $0xd8] sm:$0xff] }
   0xa   :  { %110 = vperm.xlu1 %2134, %v35_v5   ;;  %107 = vperm.xlu0 %2133, %v34_v6   ;;  %v56_v28 = vld [vmem:[%s2861_s1 + $0xd0] sm:$0xff]  ;;  %v59_v29 = vld [vmem:[%s2861_s1 + $0xe8] sm:$0xff]  ;;  %v58_v30 = vld [vmem:[%s2861_s1 + $0xe0] sm:$0xff]  ;;  %v2350_v6 = vadd.s32 128, %v2347_v3 }
   0xb   :  { %v61_v31 = vld [vmem:[%s2861_s1 + $0xf8] sm:$0xff]  ;;  %v60_v32 = vld [vmem:[%s2861_s1 + $0xf0] sm:$0xff]  ;;  %v63_v33 = vld [vmem:[%s2861_s1 + $0x108] sm:$0xff] }
   0xc   :  { %v62_v34 = vld [vmem:[%s2861_s1 + $0x100] sm:$0xff]  ;;  %v65_v35 = vld [vmem:[%s2861_s1 + $0x118] sm:$0xff]  ;;  %v64_v36 = vld [vmem:[%s2861_s1 + $0x110] sm:$0xff] }
   0xd   :  { %v67_v37 = vld [vmem:[%s2861_s1 + $0x128] sm:$0xff]  ;;  %v66_v38 = vld [vmem:[%s2861_s1 + $0x120] sm:$0xff]  ;;  %v69_v40 = vld [vmem:[%s2861_s1 + $0x138] sm:$0xff] }
   0xe   :  { %116 = vperm.xlu1 %2134, %v37_v7   ;;  %113 = vperm.xlu0 %2133, %v36_v8   ;;  %v1059_v39 = vld [vmem:[%s2862_s0 + $0x8] sm:$0xff]  ;;  %v68_v41 = vld [vmem:[%s2861_s1 + $0x130] sm:$0xff]  ;;  %v70_v43 = vld [vmem:[%s2861_s1 + $0x140] sm:$0xff]  ;;  %v2353_v7 = vadd.s32 384, %v2347_v3 }
   0xf   :  { %1126 = vmatprep.mubr.f32.mxu0 %v1059_v39  ;;  %1268 = vmatprep.mubr.f32.mxu1 %v1059_v39  ;;  %v71_v42 = vld [vmem:[%s2861_s1 + $0x148] sm:$0xff]  ;;  %v73_v44 = vld [vmem:[%s2861_s1 + $0x158] sm:$0xff]  ;;  %v72_v45 = vld [vmem:[%s2861_s1 + $0x150] sm:$0xff] }
  0x10   :  { %v75_v46 = vld [vmem:[%s2861_s1 + $0x168] sm:$0xff]  ;;  %v74_v47 = vld [vmem:[%s2861_s1 + $0x160] sm:$0xff]  ;;  %v77_v48 = vld [vmem:[%s2861_s1 + $0x178] sm:$0xff] }
  0x11   :  { %v76_v49 = vld [vmem:[%s2861_s1 + $0x170] sm:$0xff]  ;;  %v79_v50 = vld [vmem:[%s2861_s1 + $0x188] sm:$0xff]  ;;  %v78_v51 = vld [vmem:[%s2861_s1 + $0x180] sm:$0xff] }
  0x12   :  { %122 = vperm.xlu1 %2134, %v39_v9   ;;  %119 = vperm.xlu0 %2133, %v38_v10   ;;  %v81_v52 = vld [vmem:[%s2861_s1 + $0x198] sm:$0xff]  ;;  %v80_v53 = vld [vmem:[%s2861_s1 + $0x190] sm:$0xff]  ;;  %v83_v54 = vld [vmem:[%s2861_s1 + $0x1a8] sm:$0xff]  ;;  %v2356_v10 = vadd.s32 256, %v2347_v3 }
  0x13   :  { %v82_v55 = vld [vmem:[%s2861_s1 + $0x1a0] sm:$0xff]  ;;  %v85_v56 = vld [vmem:[%s2861_s1 + $0x1b8] sm:$0xff]  ;;  %v84_v57 = vld [vmem:[%s2861_s1 + $0x1b0] sm:$0xff] }
  0x14   :  { %v87_v58 = vld [vmem:[%s2861_s1 + $0x1c8] sm:$0xff]  ;;  %v86_v59 = vld [vmem:[%s2861_s1 + $0x1c0] sm:$0xff]  ;;  %v89_v60 = vld [vmem:[%s2861_s1 + $0x1d8] sm:$0xff] }
  0x15   :  { %v88_v61 = vld [vmem:[%s2861_s1 + $0x1d0] sm:$0xff]  ;;  %v91_v62 = vld [vmem:[%s2861_s1 + $0x1e8] sm:$0xff]  ;;  %v90_v63 = vld [vmem:[%s2861_s1 + $0x1e0] sm:$0xff] }
  0x16   :  { %128 = vperm.xlu1 %2134, %v41_v11   ;;  %125 = vperm.xlu0 %2133, %v40_v12   ;;  %v93_v1 = vld [vmem:[%s2861_s1 + $0x1f8] sm:$0xff]  ;;  %v92_v2 = vld [vmem:[%s2861_s1 + $0x1f0] sm:$0xff]  ;;  %v2136_v11 = vmov 1.0|1.0  }
  0x1a   :  { %134 = vperm.xlu1 %2134, %v43_v13   ;;  %131 = vperm.xlu0 %2133, %v42_v14  }
  0x1e   :  { %140 = vperm.xlu1 %2134, %v45_v15   ;;  %137 = vperm.xlu0 %2133, %v44_v16  }
  0x22   :  { %146 = vperm.xlu1 %2134, %v47_v17   ;;  %143 = vperm.xlu0 %2133, %v46_v18  }
  0x26   :  { %152 = vperm.xlu1 %2134, %v49_v19   ;;  %149 = vperm.xlu0 %2133, %v48_v20  }
  0x2a   :  { %158 = vperm.xlu1 %2134, %v51_v21   ;;  %155 = vperm.xlu0 %2133, %v50_v22  }
  0x2e   :  { %164 = vperm.xlu1 %2134, %v53_v23   ;;  %161 = vperm.xlu0 %2133, %v52_v24  }
  0x32   :  { %170 = vperm.xlu1 %2134, %v55_v25   ;;  %167 = vperm.xlu0 %2133, %v54_v26  }
  0x36   :  { %176 = vperm.xlu1 %2134, %v57_v27   ;;  %173 = vperm.xlu0 %2133, %v56_v28  }
  0x3a   :  { %182 = vperm.xlu1 %2134, %v59_v29   ;;  %179 = vperm.xlu0 %2133, %v58_v30  }
  0x3e   :  { %188 = vperm.xlu1 %2134, %v61_v31   ;;  %185 = vperm.xlu0 %2133, %v60_v32  }
  0x42   :  { %194 = vperm.xlu1 %2134, %v63_v33   ;;  %191 = vperm.xlu0 %2133, %v62_v34  }
  0x46   :  { %200 = vperm.xlu1 %2134, %v65_v35   ;;  %197 = vperm.xlu0 %2133, %v64_v36  }
  0x4a   :  { %206 = vperm.xlu1 %2134, %v67_v37   ;;  %203 = vperm.xlu0 %2133, %v66_v38  }
  0x4e   :  { %212 = vperm.xlu1 %2134, %v69_v40   ;;  %209 = vperm.xlu0 %2133, %v68_v41  }
  0x52   :  { %218 = vperm.xlu1 %2134, %v71_v42   ;;  %215 = vperm.xlu0 %2133, %v70_v43  }
  0x56   :  { %224 = vperm.xlu1 %2134, %v73_v44   ;;  %221 = vperm.xlu0 %2133, %v72_v45   ;;  %v1058_v44 = vld [vmem:[%s2862_s0] sm:$0xff] }
  0x5a   :  { %230 = vperm.xlu1 %2134, %v75_v46   ;;  %227 = vperm.xlu0 %2133, %v74_v47   ;;  %v1061_v47 = vld [vmem:[%s2862_s0 + $0x18] sm:$0xff] }
  0x5e   :  { %236 = vperm.xlu1 %2134, %v77_v48   ;;  %233 = vperm.xlu0 %2133, %v76_v49  }
  0x62   :  { %242 = vperm.xlu1 %2134, %v79_v50   ;;  %239 = vperm.xlu0 %2133, %v78_v51  }
  0x66   :  { %248 = vperm.xlu1 %2134, %v81_v52   ;;  %245 = vperm.xlu0 %2133, %v80_v53  }
  0x6a   :  { %254 = vperm.xlu1 %2134, %v83_v54   ;;  %251 = vperm.xlu0 %2133, %v82_v55  }
  0x6e   :  { %260 = vperm.xlu1 %2134, %v85_v56   ;;  %257 = vperm.xlu0 %2133, %v84_v57  }
  0x72   :  { %266 = vperm.xlu1 %2134, %v87_v58   ;;  %263 = vperm.xlu0 %2133, %v86_v59  }
  0x76   :  { %272 = vperm.xlu1 %2134, %v89_v60   ;;  %269 = vperm.xlu0 %2133, %v88_v61  }
  0x7a   :  { %278 = vperm.xlu1 %2134, %v91_v62   ;;  %275 = vperm.xlu0 %2133, %v90_v63  }
  0x7e   :  { %284 = vperm.xlu1 %2134, %v93_v1   ;;  %281 = vperm.xlu0 %2133, %v92_v2  }
  0x81   :  { %v102_v4 = vpop.permute.xlu1 %101  ;;  %v96_v5 = vpop.permute.xlu0 %95 }
  0x82   :  { %vm287_vm0 = vcmp.eq.s32.totalorder %v2350_v6, %v96_v5  ;;  %vm289_vm5 = vcmp.eq.s32.totalorder %v2353_v7, %v96_v5  ;;  %vm286_vm8 = vcmp.eq.s32.totalorder %v2347_v3, %v96_v5  ;;  %vm295_vm9 = vcmp.eq.s32.totalorder %v2350_v6, %v102_v4 }
  0x83   :  { %vm288_vm12 = vcmp.eq.s32.totalorder %v2356_v10, %v96_v5  ;;  %vm297_vm13 = vcmp.eq.s32.totalorder %v2353_v7, %v102_v4 }
  0x85   :  { %v105_v8 = vpop.permute.xlu1 %104  ;;  %v99_v9 = vpop.permute.xlu0 %98 }
  0x86   :  { %vm291_vm1 = vcmp.eq.s32.totalorder %v2350_v6, %v99_v9  ;;  %vm293_vm2 = vcmp.eq.s32.totalorder %v2353_v7, %v99_v9  ;;  %vm290_vm3 = vcmp.eq.s32.totalorder %v2347_v3, %v99_v9  ;;  %vm292_vm6 = vcmp.eq.s32.totalorder %v2356_v10, %v99_v9 }
  0x87   :  { %vm1870_vm4 = vmpackc.low %vm291_vm1, %vm287_vm0  ;;  %vm299_vm10 = vcmp.eq.s32.totalorder %v2350_v6, %v105_v8  ;;  %vm301_vm14 = vcmp.eq.s32.totalorder %v2353_v7, %v105_v8  ;;  %vm294_vm0 = vcmp.eq.s32.totalorder %v2347_v3, %v102_v4  ;;  %vm298_vm1 = vcmp.eq.s32.totalorder %v2347_v3, %v105_v8 }
  0x88   :  { %1871 = vmatprep.subr.msk.bf16.mxu0 %vm1870_vm4, %v2136_v11  ;;  %vm1998_vm7 = vmpackc.low %vm293_vm2, %vm289_vm5  ;;  %vm300_vm4 = vcmp.eq.s32.totalorder %v2356_v10, %v105_v8 }
  0x89   :  { %1999 = vmatprep.subr.msk.bf16.mxu1 %vm1998_vm7, %v2136_v11  ;;  %v111_v12 = vpop.permute.xlu1 %110  ;;  %vm1872_vm11 = vmpackc.low %vm290_vm3, %vm286_vm8  ;;  %v108_v13 = vpop.permute.xlu0 %107  ;;  %vm296_vm3 = vcmp.eq.s32.totalorder %v2356_v10, %v102_v4 }
  0x8a   :  { %1873 = vmatpush1.bf16.msk.msra.mxu0 %vm1872_vm11, %v2136_v11  ;;  %vm2000_vm15 = vmpackc.low %vm292_vm6, %vm288_vm12  ;;  %vm303_vm7 = vcmp.eq.s32.totalorder %v2350_v6, %v108_v13  ;;  %vm307_vm8 = vcmp.eq.s32.totalorder %v2350_v6, %v111_v12  ;;  %vm305_vm11 = vcmp.eq.s32.totalorder %v2353_v7, %v108_v13  ;;  %vm302_vm12 = vcmp.eq.s32.totalorder %v2347_v3, %v108_v13 }
  0x8b   :  { %2001 = vmatpush1.bf16.msk.msra.mxu1 %vm2000_vm15, %v2136_v11  ;;  %vm1874_vm2 = vmpackc.low %vm299_vm10, %vm295_vm9  ;;  %vm309_vm9 = vcmp.eq.s32.totalorder %v2353_v7, %v111_v12  ;;  %vm304_vm15 = vcmp.eq.s32.totalorder %v2356_v10, %v108_v13 }
  0x8c   :  { %1875 = vmatprep.subr.msk.bf16.mxu0 %vm1874_vm2, %v2136_v11  ;;  %vm2002_vm5 = vmpackc.low %vm301_vm14, %vm297_vm13  ;;  %vm306_vm13 = vcmp.eq.s32.totalorder %v2347_v3, %v111_v12  ;;  %vm308_vm2 = vcmp.eq.s32.totalorder %v2356_v10, %v111_v12 }
  0x8d   :  { %2003 = vmatprep.subr.msk.bf16.mxu1 %vm2002_vm5, %v2136_v11  ;;  %v117_v14 = vpop.permute.xlu1 %116  ;;  %vm1876_vm6 = vmpackc.low %vm298_vm1, %vm294_vm0  ;;  %v114_v15 = vpop.permute.xlu0 %113 }
  0x8e   :  { %1877 = vmatpush1.bf16.msk.msra.mxu0 %vm1876_vm6, %v2136_v11  ;;  %vm2004_vm10 = vmpackc.low %vm300_vm4, %vm296_vm3  ;;  %vm311_vm1 = vcmp.eq.s32.totalorder %v2350_v6, %v114_v15  ;;  %vm315_vm5 = vcmp.eq.s32.totalorder %v2350_v6, %v117_v14  ;;  %vm313_vm4 = vcmp.eq.s32.totalorder %v2353_v7, %v114_v15  ;;  %vm310_vm6 = vcmp.eq.s32.totalorder %v2347_v3, %v114_v15 }
  0x8f   :  { %2005 = vmatpush1.bf16.msk.msra.mxu1 %vm2004_vm10, %v2136_v11  ;;  %vm1878_vm14 = vmpackc.low %vm307_vm8, %vm303_vm7  ;;  %vm317_vm7 = vcmp.eq.s32.totalorder %v2353_v7, %v117_v14  ;;  %vm312_vm10 = vcmp.eq.s32.totalorder %v2356_v10, %v114_v15 }
  0x90   :  { %1879 = vmatprep.subr.msk.bf16.mxu0 %vm1878_vm14, %v2136_v11  ;;  %vm2006_vm0 = vmpackc.low %vm309_vm9, %vm305_vm11  ;;  %vm314_vm11 = vcmp.eq.s32.totalorder %v2347_v3, %v117_v14  ;;  %vm316_vm14 = vcmp.eq.s32.totalorder %v2356_v10, %v117_v14 }
  0x91   :  { %2007 = vmatprep.subr.msk.bf16.mxu1 %vm2006_vm0, %v2136_v11  ;;  %v123_v16 = vpop.permute.xlu1 %122  ;;  %vm1880_vm3 = vmpackc.low %vm306_vm13, %vm302_vm12  ;;  %v120_v17 = vpop.permute.xlu0 %119 }
  0x92   :  { %1881 = vmatpush1.bf16.msk.msra.mxu0 %vm1880_vm3, %v2136_v11  ;;  %vm2008_vm8 = vmpackc.low %vm308_vm2, %vm304_vm15  ;;  %vm319_vm13 = vcmp.eq.s32.totalorder %v2350_v6, %v120_v17  ;;  %vm323_vm0 = vcmp.eq.s32.totalorder %v2350_v6, %v123_v16  ;;  %vm321_vm2 = vcmp.eq.s32.totalorder %v2353_v7, %v120_v17  ;;  %vm318_vm3 = vcmp.eq.s32.totalorder %v2347_v3, %v120_v17 }
  0x93   :  { %2009 = vmatpush1.bf16.msk.msra.mxu1 %vm2008_vm8, %v2136_v11  ;;  %vm1882_vm9 = vmpackc.low %vm315_vm5, %vm311_vm1  ;;  %vm325_vm1 = vcmp.eq.s32.totalorder %v2353_v7, %v123_v16  ;;  %vm320_vm8 = vcmp.eq.s32.totalorder %v2356_v10, %v120_v17 }
  0x94   :  { %1883 = vmatprep.subr.msk.bf16.mxu0 %vm1882_vm9, %v2136_v11  ;;  %vm2010_vm12 = vmpackc.low %vm317_vm7, %vm313_vm4  ;;  %vm322_vm4 = vcmp.eq.s32.totalorder %v2347_v3, %v123_v16  ;;  %vm324_vm9 = vcmp.eq.s32.totalorder %v2356_v10, %v123_v16 }
  0x95   :  { %2011 = vmatprep.subr.msk.bf16.mxu1 %vm2010_vm12, %v2136_v11  ;;  %v129_v18 = vpop.permute.xlu1 %128  ;;  %vm1884_vm15 = vmpackc.low %vm314_vm11, %vm310_vm6  ;;  %v126_v19 = vpop.permute.xlu0 %125 }
  0x96   :  { %1885 = vmatpush1.bf16.msk.msra.mxu0 %vm1884_vm15, %v2136_v11  ;;  %vm2012_vm5 = vmpackc.low %vm316_vm14, %vm312_vm10  ;;  %vm327_vm11 = vcmp.eq.s32.totalorder %v2350_v6, %v126_v19  ;;  %vm331_vm12 = vcmp.eq.s32.totalorder %v2350_v6, %v129_v18  ;;  %vm329_vm14 = vcmp.eq.s32.totalorder %v2353_v7, %v126_v19  ;;  %vm326_vm15 = vcmp.eq.s32.totalorder %v2347_v3, %v126_v19 }
  0x97   :  { %2013 = vmatpush1.bf16.msk.msra.mxu1 %vm2012_vm5, %v2136_v11  ;;  %vm1886_vm7 = vmpackc.low %vm323_vm0, %vm319_vm13  ;;  %vm333_vm13 = vcmp.eq.s32.totalorder %v2353_v7, %v129_v18  ;;  %vm328_vm5 = vcmp.eq.s32.totalorder %v2356_v10, %v126_v19 }
  0x98   :  { %1887 = vmatprep.subr.msk.bf16.mxu0 %vm1886_vm7, %v2136_v11  ;;  %vm2014_vm6 = vmpackc.low %vm325_vm1, %vm321_vm2  ;;  %vm330_vm2 = vcmp.eq.s32.totalorder %v2347_v3, %v129_v18  ;;  %vm332_vm7 = vcmp.eq.s32.totalorder %v2356_v10, %v129_v18 }
  0x99   :  { %2015 = vmatprep.subr.msk.bf16.mxu1 %vm2014_vm6, %v2136_v11  ;;  %v135_v20 = vpop.permute.xlu1 %134  ;;  %vm1888_vm10 = vmpackc.low %vm322_vm4, %vm318_vm3  ;;  %v132_v21 = vpop.permute.xlu0 %131 }
  0x9a   :  { %1889 = vmatpush1.bf16.msk.msra.mxu0 %vm1888_vm10, %v2136_v11  ;;  %vm2016_vm0 = vmpackc.low %vm324_vm9, %vm320_vm8  ;;  %vm335_vm4 = vcmp.eq.s32.totalorder %v2350_v6, %v132_v21  ;;  %vm339_vm6 = vcmp.eq.s32.totalorder %v2350_v6, %v135_v20  ;;  %vm337_vm9 = vcmp.eq.s32.totalorder %v2353_v7, %v132_v21  ;;  %vm334_vm10 = vcmp.eq.s32.totalorder %v2347_v3, %v132_v21 }
  0x9b   :  { %2017 = vmatpush1.bf16.msk.msra.mxu1 %vm2016_vm0, %v2136_v11  ;;  %vm1890_vm1 = vmpackc.low %vm331_vm12, %vm327_vm11  ;;  %vm341_vm11 = vcmp.eq.s32.totalorder %v2353_v7, %v135_v20  ;;  %vm336_vm0 = vcmp.eq.s32.totalorder %v2356_v10, %v132_v21 }
  0x9c   :  { %1891 = vmatprep.subr.msk.bf16.mxu0 %vm1890_vm1, %v2136_v11  ;;  %vm2018_vm3 = vmpackc.low %vm333_vm13, %vm329_vm14  ;;  %vm338_vm14 = vcmp.eq.s32.totalorder %v2347_v3, %v135_v20  ;;  %vm340_vm1 = vcmp.eq.s32.totalorder %v2356_v10, %v135_v20 }
  0x9d   :  { %2019 = vmatprep.subr.msk.bf16.mxu1 %vm2018_vm3, %v2136_v11  ;;  %v141_v22 = vpop.permute.xlu1 %140  ;;  %vm1892_vm8 = vmpackc.low %vm330_vm2, %vm326_vm15  ;;  %v138_v23 = vpop.permute.xlu0 %137 }
  0x9e   :  { %1893 = vmatpush1.bf16.msk.msra.mxu0 %vm1892_vm8, %v2136_v11  ;;  %vm2020_vm12 = vmpackc.low %vm332_vm7, %vm328_vm5  ;;  %vm343_vm2 = vcmp.eq.s32.totalorder %v2350_v6, %v138_v23  ;;  %vm347_vm3 = vcmp.eq.s32.totalorder %v2350_v6, %v141_v22  ;;  %vm345_vm7 = vcmp.eq.s32.totalorder %v2353_v7, %v138_v23  ;;  %vm342_vm8 = vcmp.eq.s32.totalorder %v2347_v3, %v138_v23 }
  0x9f   :  { %2021 = vmatpush1.bf16.msk.msra.mxu1 %vm2020_vm12, %v2136_v11  ;;  %vm1894_vm13 = vmpackc.low %vm339_vm6, %vm335_vm4  ;;  %vm349_vm4 = vcmp.eq.s32.totalorder %v2353_v7, %v141_v22  ;;  %vm344_vm12 = vcmp.eq.s32.totalorder %v2356_v10, %v138_v23 }
  0xa0   :  { %1895 = vmatprep.subr.msk.bf16.mxu0 %vm1894_vm13, %v2136_v11  ;;  %vm2022_vm15 = vmpackc.low %vm341_vm11, %vm337_vm9  ;;  %vm346_vm9 = vcmp.eq.s32.totalorder %v2347_v3, %v141_v22  ;;  %vm348_vm13 = vcmp.eq.s32.totalorder %v2356_v10, %v141_v22 }
  0xa1   :  { %2023 = vmatprep.subr.msk.bf16.mxu1 %vm2022_vm15, %v2136_v11  ;;  %v147_v24 = vpop.permute.xlu1 %146  ;;  %vm1896_vm5 = vmpackc.low %vm338_vm14, %vm334_vm10  ;;  %v144_v25 = vpop.permute.xlu0 %143 }
  0xa2   :  { %1897 = vmatpush1.bf16.msk.msra.mxu0 %vm1896_vm5, %v2136_v11  ;;  %vm2024_vm6 = vmpackc.low %vm340_vm1, %vm336_vm0  ;;  %vm351_vm14 = vcmp.eq.s32.totalorder %v2350_v6, %v144_v25  ;;  %vm355_vm15 = vcmp.eq.s32.totalorder %v2350_v6, %v147_v24  ;;  %vm353_vm1 = vcmp.eq.s32.totalorder %v2353_v7, %v144_v25  ;;  %vm350_vm5 = vcmp.eq.s32.totalorder %v2347_v3, %v144_v25 }
  0xa3   :  { %2025 = vmatpush1.bf16.msk.msra.mxu1 %vm2024_vm6, %v2136_v11  ;;  %vm1898_vm11 = vmpackc.low %vm347_vm3, %vm343_vm2  ;;  %vm357_vm2 = vcmp.eq.s32.totalorder %v2353_v7, %v147_v24  ;;  %vm352_vm6 = vcmp.eq.s32.totalorder %v2356_v10, %v144_v25 }
  0xa4   :  { %1899 = vmatprep.subr.msk.bf16.mxu0 %vm1898_vm11, %v2136_v11  ;;  %vm2026_vm10 = vmpackc.low %vm349_vm4, %vm345_vm7  ;;  %vm354_vm7 = vcmp.eq.s32.totalorder %v2347_v3, %v147_v24  ;;  %vm356_vm11 = vcmp.eq.s32.totalorder %v2356_v10, %v147_v24 }
  0xa5   :  { %2027 = vmatprep.subr.msk.bf16.mxu1 %vm2026_vm10, %v2136_v11  ;;  %v153_v26 = vpop.permute.xlu1 %152  ;;  %vm1900_vm0 = vmpackc.low %vm346_vm9, %vm342_vm8  ;;  %v150_v27 = vpop.permute.xlu0 %149 }
  0xa6   :  { %1901 = vmatpush1.bf16.msk.msra.mxu0 %vm1900_vm0, %v2136_v11  ;;  %vm2028_vm3 = vmpackc.low %vm348_vm13, %vm344_vm12  ;;  %vm359_vm9 = vcmp.eq.s32.totalorder %v2350_v6, %v150_v27  ;;  %vm363_vm10 = vcmp.eq.s32.totalorder %v2350_v6, %v153_v26  ;;  %vm361_vm13 = vcmp.eq.s32.totalorder %v2353_v7, %v150_v27  ;;  %vm358_vm0 = vcmp.eq.s32.totalorder %v2347_v3, %v150_v27 }
  0xa7   :  { %2029 = vmatpush1.bf16.msk.msra.mxu1 %vm2028_vm3, %v2136_v11  ;;  %vm1902_vm4 = vmpackc.low %vm355_vm15, %vm351_vm14  ;;  %vm365_vm14 = vcmp.eq.s32.totalorder %v2353_v7, %v153_v26  ;;  %vm360_vm3 = vcmp.eq.s32.totalorder %v2356_v10, %v150_v27 }
  0xa8   :  { %1903 = vmatprep.subr.msk.bf16.mxu0 %vm1902_vm4, %v2136_v11  ;;  %vm2030_vm8 = vmpackc.low %vm357_vm2, %vm353_vm1  ;;  %vm362_vm1 = vcmp.eq.s32.totalorder %v2347_v3, %v153_v26  ;;  %vm364_vm4 = vcmp.eq.s32.totalorder %v2356_v10, %v153_v26 }
  0xa9   :  { %2031 = vmatprep.subr.msk.bf16.mxu1 %vm2030_vm8, %v2136_v11  ;;  %v159_v28 = vpop.permute.xlu1 %158  ;;  %vm1904_vm12 = vmpackc.low %vm354_vm7, %vm350_vm5  ;;  %v156_v29 = vpop.permute.xlu0 %155 }
  0xaa   :  { %1905 = vmatpush1.bf16.msk.msra.mxu0 %vm1904_vm12, %v2136_v11  ;;  %vm2032_vm15 = vmpackc.low %vm356_vm11, %vm352_vm6  ;;  %vm367_vm7 = vcmp.eq.s32.totalorder %v2350_v6, %v156_v29  ;;  %vm371_vm8 = vcmp.eq.s32.totalorder %v2350_v6, %v159_v28  ;;  %vm369_vm11 = vcmp.eq.s32.totalorder %v2353_v7, %v156_v29  ;;  %vm366_vm12 = vcmp.eq.s32.totalorder %v2347_v3, %v156_v29 }
  0xab   :  { %2033 = vmatpush1.bf16.msk.msra.mxu1 %vm2032_vm15, %v2136_v11  ;;  %vm1906_vm2 = vmpackc.low %vm363_vm10, %vm359_vm9  ;;  %vm373_vm9 = vcmp.eq.s32.totalorder %v2353_v7, %v159_v28  ;;  %vm368_vm15 = vcmp.eq.s32.totalorder %v2356_v10, %v156_v29 }
  0xac   :  { %1907 = vmatprep.subr.msk.bf16.mxu0 %vm1906_vm2, %v2136_v11  ;;  %vm2034_vm5 = vmpackc.low %vm365_vm14, %vm361_vm13  ;;  %vm370_vm13 = vcmp.eq.s32.totalorder %v2347_v3, %v159_v28  ;;  %vm372_vm2 = vcmp.eq.s32.totalorder %v2356_v10, %v159_v28 }
  0xad   :  { %2035 = vmatprep.subr.msk.bf16.mxu1 %vm2034_vm5, %v2136_v11  ;;  %v165_v30 = vpop.permute.xlu1 %164  ;;  %vm1908_vm6 = vmpackc.low %vm362_vm1, %vm358_vm0  ;;  %v162_v31 = vpop.permute.xlu0 %161 }
  0xae   :  { %1909 = vmatpush1.bf16.msk.msra.mxu0 %vm1908_vm6, %v2136_v11  ;;  %vm2036_vm10 = vmpackc.low %vm364_vm4, %vm360_vm3  ;;  %vm375_vm1 = vcmp.eq.s32.totalorder %v2350_v6, %v162_v31  ;;  %vm379_vm5 = vcmp.eq.s32.totalorder %v2350_v6, %v165_v30  ;;  %vm377_vm4 = vcmp.eq.s32.totalorder %v2353_v7, %v162_v31  ;;  %vm374_vm6 = vcmp.eq.s32.totalorder %v2347_v3, %v162_v31 }
  0xaf   :  { %2037 = vmatpush1.bf16.msk.msra.mxu1 %vm2036_vm10, %v2136_v11  ;;  %vm1910_vm14 = vmpackc.low %vm371_vm8, %vm367_vm7  ;;  %vm381_vm7 = vcmp.eq.s32.totalorder %v2353_v7, %v165_v30  ;;  %vm376_vm10 = vcmp.eq.s32.totalorder %v2356_v10, %v162_v31 }
  0xb0   :  { %1911 = vmatprep.subr.msk.bf16.mxu0 %vm1910_vm14, %v2136_v11  ;;  %vm2038_vm0 = vmpackc.low %vm373_vm9, %vm369_vm11  ;;  %vm378_vm11 = vcmp.eq.s32.totalorder %v2347_v3, %v165_v30  ;;  %vm380_vm14 = vcmp.eq.s32.totalorder %v2356_v10, %v165_v30 }
  0xb1   :  { %2039 = vmatprep.subr.msk.bf16.mxu1 %vm2038_vm0, %v2136_v11  ;;  %v171_v32 = vpop.permute.xlu1 %170  ;;  %vm1912_vm3 = vmpackc.low %vm370_vm13, %vm366_vm12  ;;  %v168_v33 = vpop.permute.xlu0 %167 }
  0xb2   :  { %1913 = vmatpush1.bf16.msk.msra.mxu0 %vm1912_vm3, %v2136_v11  ;;  %vm2040_vm8 = vmpackc.low %vm372_vm2, %vm368_vm15  ;;  %vm383_vm13 = vcmp.eq.s32.totalorder %v2350_v6, %v168_v33  ;;  %vm387_vm0 = vcmp.eq.s32.totalorder %v2350_v6, %v171_v32  ;;  %vm385_vm2 = vcmp.eq.s32.totalorder %v2353_v7, %v168_v33  ;;  %vm382_vm3 = vcmp.eq.s32.totalorder %v2347_v3, %v168_v33 }
  0xb3   :  { %2041 = vmatpush1.bf16.msk.msra.mxu1 %vm2040_vm8, %v2136_v11  ;;  %vm1914_vm9 = vmpackc.low %vm379_vm5, %vm375_vm1  ;;  %vm389_vm1 = vcmp.eq.s32.totalorder %v2353_v7, %v171_v32  ;;  %vm384_vm8 = vcmp.eq.s32.totalorder %v2356_v10, %v168_v33 }
  0xb4   :  { %1915 = vmatprep.subr.msk.bf16.mxu0 %vm1914_vm9, %v2136_v11  ;;  %vm2042_vm12 = vmpackc.low %vm381_vm7, %vm377_vm4  ;;  %vm386_vm4 = vcmp.eq.s32.totalorder %v2347_v3, %v171_v32  ;;  %vm388_vm9 = vcmp.eq.s32.totalorder %v2356_v10, %v171_v32 }
  0xb5   :  { %2043 = vmatprep.subr.msk.bf16.mxu1 %vm2042_vm12, %v2136_v11  ;;  %v177_v34 = vpop.permute.xlu1 %176  ;;  %vm1916_vm15 = vmpackc.low %vm378_vm11, %vm374_vm6  ;;  %v174_v35 = vpop.permute.xlu0 %173 }
  0xb6   :  { %1917 = vmatpush1.bf16.msk.msra.mxu0 %vm1916_vm15, %v2136_v11  ;;  %vm2044_vm5 = vmpackc.low %vm380_vm14, %vm376_vm10  ;;  %vm391_vm11 = vcmp.eq.s32.totalorder %v2350_v6, %v174_v35  ;;  %vm395_vm12 = vcmp.eq.s32.totalorder %v2350_v6, %v177_v34  ;;  %vm393_vm14 = vcmp.eq.s32.totalorder %v2353_v7, %v174_v35  ;;  %vm390_vm15 = vcmp.eq.s32.totalorder %v2347_v3, %v174_v35 }
  0xb7   :  { %2045 = vmatpush1.bf16.msk.msra.mxu1 %vm2044_vm5, %v2136_v11  ;;  %vm1918_vm7 = vmpackc.low %vm387_vm0, %vm383_vm13  ;;  %vm397_vm13 = vcmp.eq.s32.totalorder %v2353_v7, %v177_v34  ;;  %vm392_vm5 = vcmp.eq.s32.totalorder %v2356_v10, %v174_v35 }
  0xb8   :  { %1919 = vmatprep.subr.msk.bf16.mxu0 %vm1918_vm7, %v2136_v11  ;;  %vm2046_vm6 = vmpackc.low %vm389_vm1, %vm385_vm2  ;;  %vm394_vm2 = vcmp.eq.s32.totalorder %v2347_v3, %v177_v34  ;;  %vm396_vm7 = vcmp.eq.s32.totalorder %v2356_v10, %v177_v34 }
  0xb9   :  { %2047 = vmatprep.subr.msk.bf16.mxu1 %vm2046_vm6, %v2136_v11  ;;  %v183_v36 = vpop.permute.xlu1 %182  ;;  %vm1920_vm10 = vmpackc.low %vm386_vm4, %vm382_vm3  ;;  %v180_v37 = vpop.permute.xlu0 %179 }
  0xba   :  { %1921 = vmatpush1.bf16.msk.msra.mxu0 %vm1920_vm10, %v2136_v11  ;;  %vm2048_vm0 = vmpackc.low %vm388_vm9, %vm384_vm8  ;;  %vm399_vm4 = vcmp.eq.s32.totalorder %v2350_v6, %v180_v37  ;;  %vm403_vm6 = vcmp.eq.s32.totalorder %v2350_v6, %v183_v36  ;;  %vm401_vm9 = vcmp.eq.s32.totalorder %v2353_v7, %v180_v37  ;;  %vm398_vm10 = vcmp.eq.s32.totalorder %v2347_v3, %v180_v37 }
  0xbb   :  { %2049 = vmatpush1.bf16.msk.msra.mxu1 %vm2048_vm0, %v2136_v11  ;;  %vm1922_vm1 = vmpackc.low %vm395_vm12, %vm391_vm11  ;;  %vm405_vm11 = vcmp.eq.s32.totalorder %v2353_v7, %v183_v36  ;;  %vm400_vm0 = vcmp.eq.s32.totalorder %v2356_v10, %v180_v37 }
  0xbc   :  { %1923 = vmatprep.subr.msk.bf16.mxu0 %vm1922_vm1, %v2136_v11  ;;  %vm2050_vm3 = vmpackc.low %vm397_vm13, %vm393_vm14  ;;  %vm402_vm14 = vcmp.eq.s32.totalorder %v2347_v3, %v183_v36  ;;  %vm404_vm1 = vcmp.eq.s32.totalorder %v2356_v10, %v183_v36 }
  0xbd   :  { %2051 = vmatprep.subr.msk.bf16.mxu1 %vm2050_vm3, %v2136_v11  ;;  %v189_v38 = vpop.permute.xlu1 %188  ;;  %vm1924_vm8 = vmpackc.low %vm394_vm2, %vm390_vm15  ;;  %v186_v39 = vpop.permute.xlu0 %185 }
  0xbe   :  { %1925 = vmatpush1.bf16.msk.msra.mxu0 %vm1924_vm8, %v2136_v11  ;;  %vm2052_vm12 = vmpackc.low %vm396_vm7, %vm392_vm5  ;;  %vm407_vm2 = vcmp.eq.s32.totalorder %v2350_v6, %v186_v39  ;;  %vm411_vm3 = vcmp.eq.s32.totalorder %v2350_v6, %v189_v38  ;;  %vm409_vm7 = vcmp.eq.s32.totalorder %v2353_v7, %v186_v39  ;;  %vm406_vm8 = vcmp.eq.s32.totalorder %v2347_v3, %v186_v39 }
  0xbf   :  { %2053 = vmatpush1.bf16.msk.msra.mxu1 %vm2052_vm12, %v2136_v11  ;;  %vm1926_vm13 = vmpackc.low %vm403_vm6, %vm399_vm4  ;;  %vm413_vm4 = vcmp.eq.s32.totalorder %v2353_v7, %v189_v38  ;;  %vm408_vm12 = vcmp.eq.s32.totalorder %v2356_v10, %v186_v39 }
  0xc0   :  { %1927 = vmatprep.subr.msk.bf16.mxu0 %vm1926_vm13, %v2136_v11  ;;  %vm2054_vm15 = vmpackc.low %vm405_vm11, %vm401_vm9  ;;  %vm410_vm9 = vcmp.eq.s32.totalorder %v2347_v3, %v189_v38  ;;  %vm412_vm13 = vcmp.eq.s32.totalorder %v2356_v10, %v189_v38 }
  0xc1   :  { %2055 = vmatprep.subr.msk.bf16.mxu1 %vm2054_vm15, %v2136_v11  ;;  %v195_v40 = vpop.permute.xlu1 %194  ;;  %vm1928_vm5 = vmpackc.low %vm402_vm14, %vm398_vm10  ;;  %v192_v41 = vpop.permute.xlu0 %191 }
  0xc2   :  { %1929 = vmatpush1.bf16.msk.msra.mxu0 %vm1928_vm5, %v2136_v11  ;;  %vm2056_vm6 = vmpackc.low %vm404_vm1, %vm400_vm0  ;;  %vm415_vm14 = vcmp.eq.s32.totalorder %v2350_v6, %v192_v41  ;;  %vm419_vm15 = vcmp.eq.s32.totalorder %v2350_v6, %v195_v40  ;;  %vm417_vm1 = vcmp.eq.s32.totalorder %v2353_v7, %v192_v41  ;;  %vm414_vm5 = vcmp.eq.s32.totalorder %v2347_v3, %v192_v41 }
  0xc3   :  { %2057 = vmatpush1.bf16.msk.msra.mxu1 %vm2056_vm6, %v2136_v11  ;;  %vm1930_vm11 = vmpackc.low %vm411_vm3, %vm407_vm2  ;;  %vm421_vm2 = vcmp.eq.s32.totalorder %v2353_v7, %v195_v40  ;;  %vm418_vm3 = vcmp.eq.s32.totalorder %v2347_v3, %v195_v40  ;;  %vm416_vm6 = vcmp.eq.s32.totalorder %v2356_v10, %v192_v41 }
  0xc4   :  { %1931 = vmatprep.subr.msk.bf16.mxu0 %vm1930_vm11, %v2136_v11  ;;  %vm2058_vm10 = vmpackc.low %vm413_vm4, %vm409_vm7  ;;  %vm420_vm4 = vcmp.eq.s32.totalorder %v2356_v10, %v195_v40 }
  0xc5   :  { %2059 = vmatprep.subr.msk.bf16.mxu1 %vm2058_vm10, %v2136_v11  ;;  %v201_v42 = vpop.permute.xlu1 %200  ;;  %vm1932_vm0 = vmpackc.low %vm410_vm9, %vm406_vm8  ;;  %v198_v43 = vpop.permute.xlu0 %197 }
  0xc6   :  { %1933 = vmatpush1.bf16.msk.msra.mxu0 %vm1932_vm0, %v2136_v11  ;;  %vm2060_vm7 = vmpackc.low %vm412_vm13, %vm408_vm12  ;;  %vm423_vm11 = vcmp.eq.s32.totalorder %v2350_v6, %v198_v43  ;;  %vm427_vm12 = vcmp.eq.s32.totalorder %v2350_v6, %v201_v42  ;;  %vm425_vm10 = vcmp.eq.s32.totalorder %v2353_v7, %v198_v43  ;;  %vm422_vm0 = vcmp.eq.s32.totalorder %v2347_v3, %v198_v43 }
  0xc7   :  { %2061 = vmatpush1.bf16.msk.msra.mxu1 %vm2060_vm7, %v2136_v11  ;;  %vm1934_vm8 = vmpackc.low %vm419_vm15, %vm415_vm14  ;;  %vm429_vm14 = vcmp.eq.s32.totalorder %v2353_v7, %v201_v42  ;;  %vm426_vm15 = vcmp.eq.s32.totalorder %v2347_v3, %v201_v42 }
  0xc8   :  { %1935 = vmatprep.subr.msk.bf16.mxu0 %vm1934_vm8, %v2136_v11  ;;  %vm2062_vm9 = vmpackc.low %vm421_vm2, %vm417_vm1  ;;  %vm428_vm2 = vcmp.eq.s32.totalorder %v2356_v10, %v201_v42 }
  0xc9   :  { %2063 = vmatprep.subr.msk.bf16.mxu1 %vm2062_vm9, %v2136_v11  ;;  %v207_v45 = vpop.permute.xlu1 %206  ;;  %v204_v46 = vpop.permute.xlu0 %203  ;;  %1127 = vmatmul.mubr.f32.vlgmr.msra.gmra.mrb[0].mxu0 %v1058_v44  ;;  %vm1936_vm13 = vmpackc.low %vm418_vm3, %vm414_vm5  ;;  %vm424_vm3 = vcmp.eq.s32.totalorder %v2356_v10, %v198_v43 }
  0xca   :  { %1937 = vmatpush1.bf16.msk.msra.mxu0 %vm1936_vm13, %v2136_v11  ;;  %vm2064_vm1 = vmpackc.low %vm420_vm4, %vm416_vm6  ;;  %1269 = vmatmul.mubr.f32.vlgmr.msra.gmra.mrb[0].mxu1 %v1058_v44  ;;  %vm431_vm4 = vcmp.eq.s32.totalorder %v2350_v6, %v204_v46  ;;  %vm435_vm6 = vcmp.eq.s32.totalorder %v2350_v6, %v207_v45  ;;  %vm433_vm9 = vcmp.eq.s32.totalorder %v2353_v7, %v204_v46 }
  0xcb   :  { %vm1938_vm5 = vmpackc.low %vm427_vm12, %vm423_vm11  ;;  %2065 = vmatpush1.bf16.msk.msra.mxu1 %vm2064_vm1, %v2136_v11  ;;  %vm437_vm11 = vcmp.eq.s32.totalorder %v2353_v7, %v207_v45  ;;  %1197 = vmatprep.mubr.f32.mxu0 %v1061_v47  ;;  %vm434_vm12 = vcmp.eq.s32.totalorder %v2347_v3, %v207_v45  ;;  %vm430_vm13 = vcmp.eq.s32.totalorder %v2347_v3, %v204_v46 }
  0xcc   :  { %1939 = vmatprep.subr.msk.bf16.mxu0 %vm1938_vm5, %v2136_v11  ;;  %vm2066_vm7 = vmpackc.low %vm429_vm14, %vm425_vm10  ;;  %vm436_vm14 = vcmp.eq.s32.totalorder %v2356_v10, %v207_v45  ;;  %1339 = vmatprep.mubr.f32.mxu1 %v1061_v47 }
  0xcd   :  { %2067 = vmatprep.subr.msk.bf16.mxu1 %vm2066_vm7, %v2136_v11  ;;  %v213_v48 = vpop.permute.xlu1 %212  ;;  %v210_v49 = vpop.permute.xlu0 %209  ;;  %vm1940_vm8 = vmpackc.low %vm426_vm15, %vm422_vm0  ;;  %vm432_vm15 = vcmp.eq.s32.totalorder %v2356_v10, %v204_v46 }
  0xce   :  { %1941 = vmatpush1.bf16.msk.msra.mxu0 %vm1940_vm8, %v2136_v11  ;;  %vm2068_vm10 = vmpackc.low %vm428_vm2, %vm424_vm3  ;;  %vm439_vm5 = vcmp.eq.s32.totalorder %v2350_v6, %v210_v49  ;;  %vm443_vm7 = vcmp.eq.s32.totalorder %v2350_v6, %v213_v48  ;;  %vm441_vm3 = vcmp.eq.s32.totalorder %v2353_v7, %v210_v49  ;;  %vm438_vm8 = vcmp.eq.s32.totalorder %v2347_v3, %v210_v49 }
  0xcf   :  { %vm1942_vm0 = vmpackc.low %vm435_vm6, %vm431_vm4  ;;  %2069 = vmatpush1.bf16.msk.msra.mxu1 %vm2068_vm10, %v2136_v11  ;;  %vm445_vm4 = vcmp.eq.s32.totalorder %v2353_v7, %v213_v48  ;;  %vm442_vm6 = vcmp.eq.s32.totalorder %v2347_v3, %v213_v48  ;;  %vm440_vm10 = vcmp.eq.s32.totalorder %v2356_v10, %v210_v49 }
  0xd0   :  { %1943 = vmatprep.subr.msk.bf16.mxu0 %vm1942_vm0, %v2136_v11  ;;  %vm2070_vm1 = vmpackc.low %vm437_vm11, %vm433_vm9  ;;  %vm444_vm11 = vcmp.eq.s32.totalorder %v2356_v10, %v213_v48 }
  0xd1   :  { %2071 = vmatprep.subr.msk.bf16.mxu1 %vm2070_vm1, %v2136_v11  ;;  %v219_v50 = vpop.permute.xlu1 %218  ;;  %v216_v51 = vpop.permute.xlu0 %215  ;;  %vm1944_vm2 = vmpackc.low %vm434_vm12, %vm430_vm13 }
  0xd2   :  { %1945 = vmatpush1.bf16.msk.msra.mxu0 %vm1944_vm2, %v2136_v11  ;;  %vm2072_vm9 = vmpackc.low %vm436_vm14, %vm432_vm15  ;;  %vm447_vm0 = vcmp.eq.s32.totalorder %v2350_v6, %v216_v51  ;;  %vm451_vm1 = vcmp.eq.s32.totalorder %v2350_v6, %v219_v50  ;;  %vm449_vm15 = vcmp.eq.s32.totalorder %v2353_v7, %v216_v51  ;;  %vm446_vm2 = vcmp.eq.s32.totalorder %v2347_v3, %v216_v51 }
  0xd3   :  { %vm1946_vm12 = vmpackc.low %vm443_vm7, %vm439_vm5  ;;  %2073 = vmatpush1.bf16.msk.msra.mxu1 %vm2072_vm9, %v2136_v11  ;;  %vm453_vm5 = vcmp.eq.s32.totalorder %v2353_v7, %v219_v50  ;;  %vm450_vm7 = vcmp.eq.s32.totalorder %v2347_v3, %v219_v50  ;;  %vm448_vm9 = vcmp.eq.s32.totalorder %v2356_v10, %v216_v51 }
  0xd4   :  { %1947 = vmatprep.subr.msk.bf16.mxu0 %vm1946_vm12, %v2136_v11  ;;  %vm2074_vm13 = vmpackc.low %vm445_vm4, %vm441_vm3  ;;  %vm452_vm4 = vcmp.eq.s32.totalorder %v2356_v10, %v219_v50 }
  0xd5   :  { %2075 = vmatprep.subr.msk.bf16.mxu1 %vm2074_vm13, %v2136_v11  ;;  %v225_v52 = vpop.permute.xlu1 %224  ;;  %v222_v53 = vpop.permute.xlu0 %221  ;;  %vm1948_vm14 = vmpackc.low %vm442_vm6, %vm438_vm8 }
  0xd6   :  { %1949 = vmatpush1.bf16.msk.msra.mxu0 %vm1948_vm14, %v2136_v11  ;;  %vm2076_vm3 = vmpackc.low %vm444_vm11, %vm440_vm10  ;;  %vm455_vm12 = vcmp.eq.s32.totalorder %v2350_v6, %v222_v53  ;;  %vm459_vm13 = vcmp.eq.s32.totalorder %v2350_v6, %v225_v52  ;;  %vm457_vm10 = vcmp.eq.s32.totalorder %v2353_v7, %v222_v53  ;;  %vm454_vm14 = vcmp.eq.s32.totalorder %v2347_v3, %v222_v53 }
  0xd7   :  { %vm1950_vm6 = vmpackc.low %vm451_vm1, %vm447_vm0  ;;  %2077 = vmatpush1.bf16.msk.msra.mxu1 %vm2076_vm3, %v2136_v11  ;;  %vm461_vm0 = vcmp.eq.s32.totalorder %v2353_v7, %v225_v52  ;;  %vm458_vm1 = vcmp.eq.s32.totalorder %v2347_v3, %v225_v52  ;;  %vm456_vm3 = vcmp.eq.s32.totalorder %v2356_v10, %v222_v53 }
  0xd8   :  { %1951 = vmatprep.subr.msk.bf16.mxu0 %vm1950_vm6, %v2136_v11  ;;  %vm2078_vm8 = vmpackc.low %vm453_vm5, %vm449_vm15  ;;  %vm460_vm5 = vcmp.eq.s32.totalorder %v2356_v10, %v225_v52 }
  0xd9   :  { %2079 = vmatprep.subr.msk.bf16.mxu1 %vm2078_vm8, %v2136_v11  ;;  %v231_v54 = vpop.permute.xlu1 %230  ;;  %v228_v55 = vpop.permute.xlu0 %227  ;;  %vm1952_vm11 = vmpackc.low %vm450_vm7, %vm446_vm2 }
  0xda   :  { %1953 = vmatpush1.bf16.msk.msra.mxu0 %vm1952_vm11, %v2136_v11  ;;  %vm2080_vm15 = vmpackc.low %vm452_vm4, %vm448_vm9  ;;  %vm463_vm6 = vcmp.eq.s32.totalorder %v2350_v6, %v228_v55  ;;  %vm467_vm8 = vcmp.eq.s32.totalorder %v2350_v6, %v231_v54  ;;  %vm465_vm9 = vcmp.eq.s32.totalorder %v2353_v7, %v228_v55  ;;  %vm462_vm11 = vcmp.eq.s32.totalorder %v2347_v3, %v228_v55 }
  0xdb   :  { %vm1954_vm7 = vmpackc.low %vm459_vm13, %vm455_vm12  ;;  %2081 = vmatpush1.bf16.msk.msra.mxu1 %vm2080_vm15, %v2136_v11  ;;  %vm469_vm12 = vcmp.eq.s32.totalorder %v2353_v7, %v231_v54  ;;  %vm466_vm13 = vcmp.eq.s32.totalorder %v2347_v3, %v231_v54  ;;  %vm464_vm15 = vcmp.eq.s32.totalorder %v2356_v10, %v228_v55 }
  0xdc   :  { %1955 = vmatprep.subr.msk.bf16.mxu0 %vm1954_vm7, %v2136_v11  ;;  %vm2082_vm2 = vmpackc.low %vm461_vm0, %vm457_vm10  ;;  %vm468_vm0 = vcmp.eq.s32.totalorder %v2356_v10, %v231_v54 }
  0xdd   :  { %2083 = vmatprep.subr.msk.bf16.mxu1 %vm2082_vm2, %v2136_v11  ;;  %v237_v56 = vpop.permute.xlu1 %236  ;;  %v234_v57 = vpop.permute.xlu0 %233  ;;  %vm1956_vm4 = vmpackc.low %vm458_vm1, %vm454_vm14 }
  0xde   :  { %1957 = vmatpush1.bf16.msk.msra.mxu0 %vm1956_vm4, %v2136_v11  ;;  %vm2084_vm10 = vmpackc.low %vm460_vm5, %vm456_vm3  ;;  %vm471_vm7 = vcmp.eq.s32.totalorder %v2350_v6, %v234_v57  ;;  %vm475_vm2 = vcmp.eq.s32.totalorder %v2350_v6, %v237_v56  ;;  %vm473_vm3 = vcmp.eq.s32.totalorder %v2353_v7, %v234_v57  ;;  %vm470_vm4 = vcmp.eq.s32.totalorder %v2347_v3, %v234_v57 }
  0xdf   :  { %vm1958_vm1 = vmpackc.low %vm467_vm8, %vm463_vm6  ;;  %2085 = vmatpush1.bf16.msk.msra.mxu1 %vm2084_vm10, %v2136_v11  ;;  %vm477_vm6 = vcmp.eq.s32.totalorder %v2353_v7, %v237_v56  ;;  %vm474_vm8 = vcmp.eq.s32.totalorder %v2347_v3, %v237_v56  ;;  %vm472_vm10 = vcmp.eq.s32.totalorder %v2356_v10, %v234_v57 }
  0xe0   :  { %1959 = vmatprep.subr.msk.bf16.mxu0 %vm1958_vm1, %v2136_v11  ;;  %vm2086_vm14 = vmpackc.low %vm469_vm12, %vm465_vm9  ;;  %vm476_vm12 = vcmp.eq.s32.totalorder %v2356_v10, %v237_v56 }
  0xe1   :  { %2087 = vmatprep.subr.msk.bf16.mxu1 %vm2086_vm14, %v2136_v11  ;;  %v243_v58 = vpop.permute.xlu1 %242  ;;  %v240_v59 = vpop.permute.xlu0 %239  ;;  %vm1960_vm5 = vmpackc.low %vm466_vm13, %vm462_vm11 }
  0xe2   :  { %1961 = vmatpush1.bf16.msk.msra.mxu0 %vm1960_vm5, %v2136_v11  ;;  %vm2088_vm9 = vmpackc.low %vm468_vm0, %vm464_vm15  ;;  %vm479_vm1 = vcmp.eq.s32.totalorder %v2350_v6, %v240_v59  ;;  %vm483_vm14 = vcmp.eq.s32.totalorder %v2350_v6, %v243_v58  ;;  %vm481_vm15 = vcmp.eq.s32.totalorder %v2353_v7, %v240_v59  ;;  %vm478_vm5 = vcmp.eq.s32.totalorder %v2347_v3, %v240_v59 }
  0xe3   :  { %vm1962_vm13 = vmpackc.low %vm475_vm2, %vm471_vm7  ;;  %2089 = vmatpush1.bf16.msk.msra.mxu1 %vm2088_vm9, %v2136_v11  ;;  %vm485_vm7 = vcmp.eq.s32.totalorder %v2353_v7, %v243_v58  ;;  %vm482_vm2 = vcmp.eq.s32.totalorder %v2347_v3, %v243_v58  ;;  %vm480_vm9 = vcmp.eq.s32.totalorder %v2356_v10, %v240_v59 }
  0xe4   :  { %1963 = vmatprep.subr.msk.bf16.mxu0 %vm1962_vm13, %v2136_v11  ;;  %vm2090_vm11 = vmpackc.low %vm477_vm6, %vm473_vm3  ;;  %vm484_vm6 = vcmp.eq.s32.totalorder %v2356_v10, %v243_v58 }
  0xe5   :  { %2091 = vmatprep.subr.msk.bf16.mxu1 %vm2090_vm11, %v2136_v11  ;;  %v249_v60 = vpop.permute.xlu1 %248  ;;  %v246_v61 = vpop.permute.xlu0 %245  ;;  %vm1964_vm0 = vmpackc.low %vm474_vm8, %vm470_vm4 }
  0xe6   :  { %1965 = vmatpush1.bf16.msk.msra.mxu0 %vm1964_vm0, %v2136_v11  ;;  %vm2092_vm3 = vmpackc.low %vm476_vm12, %vm472_vm10  ;;  %vm487_vm13 = vcmp.eq.s32.totalorder %v2350_v6, %v246_v61  ;;  %vm491_vm11 = vcmp.eq.s32.totalorder %v2350_v6, %v249_v60  ;;  %vm489_vm10 = vcmp.eq.s32.totalorder %v2353_v7, %v246_v61  ;;  %vm486_vm0 = vcmp.eq.s32.totalorder %v2347_v3, %v246_v61 }
  0xe7   :  { %vm1966_vm8 = vmpackc.low %vm483_vm14, %vm479_vm1  ;;  %2093 = vmatpush1.bf16.msk.msra.mxu1 %vm2092_vm3, %v2136_v11  ;;  %vm493_vm1 = vcmp.eq.s32.totalorder %v2353_v7, %v249_v60  ;;  %vm490_vm14 = vcmp.eq.s32.totalorder %v2347_v3, %v249_v60  ;;  %vm488_vm3 = vcmp.eq.s32.totalorder %v2356_v10, %v246_v61 }
  0xe8   :  { %1967 = vmatprep.subr.msk.bf16.mxu0 %vm1966_vm8, %v2136_v11  ;;  %vm2094_vm4 = vmpackc.low %vm485_vm7, %vm481_vm15  ;;  %vm492_vm7 = vcmp.eq.s32.totalorder %v2356_v10, %v249_v60 }
  0xe9   :  { %2095 = vmatprep.subr.msk.bf16.mxu1 %vm2094_vm4, %v2136_v11  ;;  %v255_v62 = vpop.permute.xlu1 %254  ;;  %v252_v63 = vpop.permute.xlu0 %251  ;;  %vm1968_vm12 = vmpackc.low %vm482_vm2, %vm478_vm5 }
  0xea   :  { %1969 = vmatpush1.bf16.msk.msra.mxu0 %vm1968_vm12, %v2136_v11  ;;  %vm2096_vm15 = vmpackc.low %vm484_vm6, %vm480_vm9  ;;  %vm495_vm8 = vcmp.eq.s32.totalorder %v2350_v6, %v252_v63  ;;  %vm499_vm4 = vcmp.eq.s32.totalorder %v2350_v6, %v255_v62  ;;  %vm497_vm9 = vcmp.eq.s32.totalorder %v2353_v7, %v252_v63  ;;  %vm494_vm12 = vcmp.eq.s32.totalorder %v2347_v3, %v252_v63 }
  0xeb   :  { %vm1970_vm2 = vmpackc.low %vm491_vm11, %vm487_vm13  ;;  %2097 = vmatpush1.bf16.msk.msra.mxu1 %vm2096_vm15, %v2136_v11  ;;  %vm501_vm13 = vcmp.eq.s32.totalorder %v2353_v7, %v255_v62  ;;  %vm498_vm11 = vcmp.eq.s32.totalorder %v2347_v3, %v255_v62  ;;  %vm496_vm15 = vcmp.eq.s32.totalorder %v2356_v10, %v252_v63 }
  0xec   :  { %1971 = vmatprep.subr.msk.bf16.mxu0 %vm1970_vm2, %v2136_v11  ;;  %vm2098_vm5 = vmpackc.low %vm493_vm1, %vm489_vm10  ;;  %vm500_vm1 = vcmp.eq.s32.totalorder %v2356_v10, %v255_v62 }
  0xed   :  { %2099 = vmatprep.subr.msk.bf16.mxu1 %vm2098_vm5, %v2136_v11  ;;  %v261_v0 = vpop.permute.xlu1 %260  ;;  %v258_v1 = vpop.permute.xlu0 %257  ;;  %vm1972_vm6 = vmpackc.low %vm490_vm14, %vm486_vm0 }
  0xee   :  { %1973 = vmatpush1.bf16.msk.msra.mxu0 %vm1972_vm6, %v2136_v11  ;;  %vm2100_vm10 = vmpackc.low %vm492_vm7, %vm488_vm3  ;;  %vm503_vm2 = vcmp.eq.s32.totalorder %v2350_v6, %v258_v1  ;;  %vm507_vm5 = vcmp.eq.s32.totalorder %v2350_v6, %v261_v0  ;;  %vm505_vm3 = vcmp.eq.s32.totalorder %v2353_v7, %v258_v1  ;;  %vm502_vm6 = vcmp.eq.s32.totalorder %v2347_v3, %v258_v1 }
  0xef   :  { %vm1974_vm14 = vmpackc.low %vm499_vm4, %vm495_vm8  ;;  %2101 = vmatpush1.bf16.msk.msra.mxu1 %vm2100_vm10, %v2136_v11  ;;  %vm509_vm8 = vcmp.eq.s32.totalorder %v2353_v7, %v261_v0  ;;  %vm506_vm4 = vcmp.eq.s32.totalorder %v2347_v3, %v261_v0  ;;  %vm504_vm10 = vcmp.eq.s32.totalorder %v2356_v10, %v258_v1 }
  0xf0   :  { %1975 = vmatprep.subr.msk.bf16.mxu0 %vm1974_vm14, %v2136_v11  ;;  %vm2102_vm0 = vmpackc.low %vm501_vm13, %vm497_vm9  ;;  %vm508_vm13 = vcmp.eq.s32.totalorder %v2356_v10, %v261_v0 }
  0xf1   :  { %2103 = vmatprep.subr.msk.bf16.mxu1 %vm2102_vm0, %v2136_v11  ;;  %v267_v2 = vpop.permute.xlu1 %266  ;;  %v264_v4 = vpop.permute.xlu0 %263  ;;  %vm1976_vm7 = vmpackc.low %vm498_vm11, %vm494_vm12 }
  0xf2   :  { %1977 = vmatpush1.bf16.msk.msra.mxu0 %vm1976_vm7, %v2136_v11  ;;  %vm2104_vm9 = vmpackc.low %vm500_vm1, %vm496_vm15  ;;  %vm511_vm14 = vcmp.eq.s32.totalorder %v2350_v6, %v264_v4  ;;  %vm515_vm0 = vcmp.eq.s32.totalorder %v2350_v6, %v267_v2  ;;  %vm513_vm15 = vcmp.eq.s32.totalorder %v2353_v7, %v264_v4  ;;  %vm510_vm7 = vcmp.eq.s32.totalorder %v2347_v3, %v264_v4 }
  0xf3   :  { %vm1978_vm11 = vmpackc.low %vm507_vm5, %vm503_vm2  ;;  %2105 = vmatpush1.bf16.msk.msra.mxu1 %vm2104_vm9, %v2136_v11  ;;  %vm517_vm2 = vcmp.eq.s32.totalorder %v2353_v7, %v267_v2  ;;  %vm514_vm5 = vcmp.eq.s32.totalorder %v2347_v3, %v267_v2  ;;  %vm512_vm9 = vcmp.eq.s32.totalorder %v2356_v10, %v264_v4 }
  0xf4   :  { %1979 = vmatprep.subr.msk.bf16.mxu0 %vm1978_vm11, %v2136_v11  ;;  %vm2106_vm12 = vmpackc.low %vm509_vm8, %vm505_vm3  ;;  %vm516_vm8 = vcmp.eq.s32.totalorder %v2356_v10, %v267_v2 }
  0xf5   :  { %2107 = vmatprep.subr.msk.bf16.mxu1 %vm2106_vm12, %v2136_v11  ;;  %v273_v5 = vpop.permute.xlu1 %272  ;;  %v270_v8 = vpop.permute.xlu0 %269  ;;  %vm1980_vm1 = vmpackc.low %vm506_vm4, %vm502_vm6 }
  0xf6   :  { %1981 = vmatpush1.bf16.msk.msra.mxu0 %vm1980_vm1, %v2136_v11  ;;  %vm2108_vm3 = vmpackc.low %vm508_vm13, %vm504_vm10  ;;  %vm519_vm11 = vcmp.eq.s32.totalorder %v2350_v6, %v270_v8  ;;  %vm523_vm12 = vcmp.eq.s32.totalorder %v2350_v6, %v273_v5  ;;  %vm521_vm10 = vcmp.eq.s32.totalorder %v2353_v7, %v270_v8  ;;  %vm518_vm1 = vcmp.eq.s32.totalorder %v2347_v3, %v270_v8 }
  0xf7   :  { %vm1982_vm4 = vmpackc.low %vm515_vm0, %vm511_vm14  ;;  %2109 = vmatpush1.bf16.msk.msra.mxu1 %vm2108_vm3, %v2136_v11  ;;  %vm525_vm14 = vcmp.eq.s32.totalorder %v2353_v7, %v273_v5  ;;  %vm522_vm0 = vcmp.eq.s32.totalorder %v2347_v3, %v273_v5  ;;  %vm520_vm3 = vcmp.eq.s32.totalorder %v2356_v10, %v270_v8 }
  0xf8   :  { %1983 = vmatprep.subr.msk.bf16.mxu0 %vm1982_vm4, %v2136_v11  ;;  %vm2110_vm6 = vmpackc.low %vm517_vm2, %vm513_vm15  ;;  %vm524_vm2 = vcmp.eq.s32.totalorder %v2356_v10, %v273_v5 }
  0xf9   :  { %2111 = vmatprep.subr.msk.bf16.mxu1 %vm2110_vm6, %v2136_v11  ;;  %v279_v9 = vpop.permute.xlu1 %278  ;;  %v276_v12 = vpop.permute.xlu0 %275  ;;  %vm1984_vm13 = vmpackc.low %vm514_vm5, %vm510_vm7 }
  0xfa   :  { %1985 = vmatpush1.bf16.msk.msra.mxu0 %vm1984_vm13, %v2136_v11  ;;  %vm2112_vm15 = vmpackc.low %vm516_vm8, %vm512_vm9  ;;  %vm527_vm4 = vcmp.eq.s32.totalorder %v2350_v6, %v276_v12  ;;  %vm531_vm6 = vcmp.eq.s32.totalorder %v2350_v6, %v279_v9 }
  0xfb   :  { %vm1986_vm5 = vmpackc.low %vm523_vm12, %vm519_vm11  ;;  %2113 = vmatpush1.bf16.msk.msra.mxu1 %vm2112_vm15, %v2136_v11  ;;  %vm529_vm11 = vcmp.eq.s32.totalorder %v2353_v7, %v276_v12  ;;  %vm533_vm12 = vcmp.eq.s32.totalorder %v2353_v7, %v279_v9  ;;  %vm530_vm15 = vcmp.eq.s32.totalorder %v2347_v3, %v279_v9 }
  0xfc   :  { %1987 = vmatprep.subr.msk.bf16.mxu0 %vm1986_vm5, %v2136_v11  ;;  %vm2114_vm7 = vmpackc.low %vm525_vm14, %vm521_vm10  ;;  %vm526_vm10 = vcmp.eq.s32.totalorder %v2347_v3, %v276_v12  ;;  %vm532_vm14 = vcmp.eq.s32.totalorder %v2356_v10, %v279_v9 }
  0xfd   :  { %2115 = vmatprep.subr.msk.bf16.mxu1 %vm2114_vm7, %v2136_v11  ;;  %vm1988_vm13 = vmpackc.low %vm522_vm0, %vm518_vm1  ;;  %v285_v13 = vpop.permute.xlu1 %284  ;;  %v282_v14 = vpop.permute.xlu0 %281  ;;  %vm528_vm0 = vcmp.eq.s32.totalorder %v2356_v10, %v276_v12 }
  0xfe   :  { %1989 = vmatpush1.bf16.msk.msra.mxu0 %vm1988_vm13, %v2136_v11  ;;  %vm2116_vm8 = vmpackc.low %vm524_vm2, %vm520_vm3  ;;  %vm539_vm1 = vcmp.eq.s32.totalorder %v2350_v6, %v285_v13  ;;  %vm535_vm2 = vcmp.eq.s32.totalorder %v2350_v6, %v282_v14  ;;  %vm541_vm5 = vcmp.eq.s32.totalorder %v2353_v7, %v285_v13  ;;  %vm537_vm7 = vcmp.eq.s32.totalorder %v2353_v7, %v282_v14 }
  0xff   :  { %vm1990_vm9 = vmpackc.low %vm531_vm6, %vm527_vm4  ;;  %2117 = vmatpush1.bf16.msk.msra.mxu1 %vm2116_vm8, %v2136_v11  ;;  %vm538_vm6 = vcmp.eq.s32.totalorder %v2347_v3, %v285_v13  ;;  %vm534_vm13 = vcmp.eq.s32.totalorder %v2347_v3, %v282_v14  ;;  %v1060_v3 = vld [vmem:[%s2862_s0 + $0x10] sm:$0xff] }
 0x100   :  { %1991 = vmatprep.subr.msk.bf16.mxu0 %vm1990_vm9, %v2136_v11  ;;  %vm2118_vm3 = vmpackc.low %vm533_vm12, %vm529_vm11  ;;  %vm540_vm9 = vcmp.eq.s32.totalorder %v2356_v10, %v285_v13  ;;  %vm536_vm11 = vcmp.eq.s32.totalorder %v2356_v10, %v282_v14 }
 0x101   :  { %2119 = vmatprep.subr.msk.bf16.mxu1 %vm2118_vm3, %v2136_v11  ;;  %vm1992_vm4 = vmpackc.low %vm530_vm15, %vm526_vm10 }
 0x102   :  { %1993 = vmatpush1.bf16.msk.msra.mxu0 %vm1992_vm4, %v2136_v11  ;;  %vm2120_vm8 = vmpackc.low %vm532_vm14, %vm528_vm0 }
 0x103   :  { %2121 = vmatpush1.bf16.msk.msra.mxu1 %vm2120_vm8, %v2136_v11  ;;  %vm1994_vm12 = vmpackc.low %vm539_vm1, %vm535_vm2 }
 0x104   :  { %1995 = vmatprep.subr.msk.bf16.mxu0 %vm1994_vm12, %v2136_v11  ;;  %vm2122_vm3 = vmpackc.low %vm541_vm5, %vm537_vm7 }
 0x105   :  { %vm1996_vm10 = vmpackc.low %vm538_vm6, %vm534_vm13  ;;  %2123 = vmatprep.subr.msk.bf16.mxu1 %vm2122_vm3, %v2136_v11 }
 0x106   :  { %vm2124_vm15 = vmpackc.low %vm540_vm9, %vm536_vm11  ;;  %1997 = vmatpush1.bf16.msk.msra.mxu0 %vm1996_vm10, %v2136_v11 }
 0x107   :  { %2125 = vmatpush1.bf16.msk.msra.mxu1 %vm2124_vm15, %v2136_v11 }
 0x109   :  { %1198 = vmatmul.mubr.f32.vlgmr.msra.gmra.mrb[0].mxu0 %v1060_v3 }
 0x10a   :  { %1340 = vmatmul.mubr.f32.vlgmr.msra.gmra.mrb[0].mxu1 %v1060_v3 }
 0x1dc   :  { %v1199_v6 = vpop.f32.mrb[0].mxu0 }
 0x1dd   :  { %v1341_v7 = vpop.f32.mrb[0].mxu1  ;;  %v1201_v10 = vpop.f32.mrb[1].mxu0  ;;  %1350 = vst [vmem:[%s2863_s2] sm:$0xff] %v1199_v6 }
 0x1de   :  { %v1343_v15 = vpop.f32.mrb[1].mxu1  ;;  %1352 = vst [vmem:[%s2863_s2 + $0x10] sm:$0xff] %v1341_v7  ;;  %1351 = vst [vmem:[%s2863_s2 + $0x8] sm:$0xff] %v1201_v10 }
 0x1df   :  { %1353 = vst [vmem:[%s2863_s2 + $0x18] sm:$0xff] %v1343_v15 }

// kernel: muse_pool_forward.7
= control target key start
LH: loop header
LB: loop body
LE: loop exit
PB: predicated region body
PF: predicated region fallthrough
CT: control target
= control target key end

     0   :  { %v34_v0 = vlaneseq  ;;  %v2255_v15 = vmov 1.0|1.0   ;;  %s2850_s2 = inlined_call_operand.vmem [shape: s32[1,512], index: 2, kind: input, shape index: {}]   ;;  %s2851_s0 = inlined_call_operand.vmem [shape: f32[8,512], index: 0, kind: input, shape index: {}]   ;;  %s2852_s5 = inlined_call_operand.vmem [shape: f32[8,1], index: 5, kind: input, shape index: {}]   ;;  %s2853_s1 = inlined_call_operand.vmem [shape: f32[8,512], index: 1, kind: input, shape index: {}]   ;;  %s2854_s4 = inlined_call_operand.vmem [shape: f32[8,8], index: 4, kind: input, shape index: {}]   ;;  %s2855_s3 = inlined_call_operand.vmem [shape: f32[1,512], index: 3, kind: input, shape index: {}]   ;;  %s2856_s6 = inlined_call_operand.vmem [shape: f32[8,512], index: 6, kind: output, shape index: {0}]   ;;  %s2857_s7 = inlined_call_operand.vmem [shape: f32[1,8,1], index: 7, kind: output, shape index: {1}]   ;;  %s2858_s8 = inlined_call_operand.vmem [shape: f32[1,8,1], index: 8, kind: output, shape index: {2}]  }
   0x1   :  { %v955_v1 = vld [vmem:[%s2851_s0 + $0x8] sm:$0xff]  ;;  %v165_v3 = vld [vmem:[%s2850_s2] sm:$0xf]  ;;  %v957_v51 = vld [vmem:[%s2851_s0 + $0x18] sm:$0xff] }
   0x2   :  { %v2306_v2 = vshrl.u32 %v34_v0, 7  ;;  %1022 = vmatprep.mubr.f32.mxu0 %v955_v1  ;;  %1164 = vmatprep.mubr.f32.mxu1 %v955_v1  ;;  %v954_v48 = vld [vmem:[%s2851_s0] sm:$0xff] }
   0x4   :  { %v36_v4 = vadd.s32 8, %v2306_v2  ;;  %v172_v5 = vsub.s32 1, %v2306_v2  ;;  %v180_v6 = vsub.s32 3, %v2306_v2  ;;  %v168_v7 = vsub.s32 0, %v2306_v2 }
   0x5   :  { %v176_v8 = vsub.s32 2, %v2306_v2  ;;  %v37_v9 = vadd.s32 16, %v2306_v2  ;;  %v38_v13 = vadd.s32 24, %v2306_v2  ;;  %v39_v16 = vadd.s32 32, %v2306_v2 }
   0x6   :  { %v2319_v10 = vrot.slane %v165_v3, %v172_v5  ;;  %v2323_v11 = vrot.slane %v165_v3, %v180_v6  ;;  %v2327_v12 = vrot.slane %v165_v3, %v168_v7  ;;  %v40_v17 = vadd.s32 40, %v2306_v2 }
   0x7   :  { %v2332_v14 = vrot.slane %v165_v3, %v176_v8  ;;  %v41_v18 = vadd.s32 48, %v2306_v2  ;;  %v42_v19 = vadd.s32 56, %v2306_v2  ;;  %v43_v20 = vadd.s32 64, %v2306_v2 }
   0x8   :  { %vm183_vm0 = vcmp.eq.s32.totalorder %v2306_v2, %v2319_v10  ;;  %vm187_vm1 = vcmp.eq.s32.totalorder %v36_v4, %v2319_v10  ;;  %vm185_vm2 = vcmp.eq.s32.totalorder %v2306_v2, %v2323_v11  ;;  %vm189_vm3 = vcmp.eq.s32.totalorder %v36_v4, %v2323_v11 }
   0x9   :  { %vm1991_vm4 = vmpackc.low %vm187_vm1, %vm183_vm0  ;;  %vm182_vm5 = vcmp.eq.s32.totalorder %v2306_v2, %v2327_v12  ;;  %vm186_vm6 = vcmp.eq.s32.totalorder %v36_v4, %v2327_v12  ;;  %vm184_vm7 = vcmp.eq.s32.totalorder %v2306_v2, %v2332_v14  ;;  %vm188_vm8 = vcmp.eq.s32.totalorder %v36_v4, %v2332_v14 }
   0xa   :  { %1992 = vmatprep.subr.msk.bf16.mxu0 %vm1991_vm4, %v2255_v15  ;;  %vm2119_vm9 = vmpackc.low %vm189_vm3, %vm185_vm2  ;;  %vm191_vm10 = vcmp.eq.s32.totalorder %v37_v9, %v2319_v10  ;;  %vm195_vm11 = vcmp.eq.s32.totalorder %v38_v13, %v2319_v10  ;;  %vm193_vm13 = vcmp.eq.s32.totalorder %v37_v9, %v2323_v11  ;;  %vm197_vm14 = vcmp.eq.s32.totalorder %v38_v13, %v2323_v11 }
   0xb   :  { %2120 = vmatprep.subr.msk.bf16.mxu1 %vm2119_vm9, %v2255_v15  ;;  %vm1993_vm12 = vmpackc.low %vm186_vm6, %vm182_vm5  ;;  %vm190_vm0 = vcmp.eq.s32.totalorder %v37_v9, %v2327_v12  ;;  %vm194_vm1 = vcmp.eq.s32.totalorder %v38_v13, %v2327_v12  ;;  %vm192_vm3 = vcmp.eq.s32.totalorder %v37_v9, %v2332_v14  ;;  %vm196_vm4 = vcmp.eq.s32.totalorder %v38_v13, %v2332_v14 }
   0xc   :  { %1994 = vmatpush1.bf16.msk.msra.mxu0 %vm1993_vm12, %v2255_v15  ;;  %vm2121_vm15 = vmpackc.low %vm188_vm8, %vm184_vm7  ;;  %vm199_vm6 = vcmp.eq.s32.totalorder %v39_v16, %v2319_v10  ;;  %vm203_vm9 = vcmp.eq.s32.totalorder %v40_v17, %v2319_v10  ;;  %vm201_vm8 = vcmp.eq.s32.totalorder %v39_v16, %v2323_v11  ;;  %vm198_vm12 = vcmp.eq.s32.totalorder %v39_v16, %v2327_v12 }
   0xd   :  { %2122 = vmatpush1.bf16.msk.msra.mxu1 %vm2121_vm15, %v2255_v15  ;;  %vm1995_vm2 = vmpackc.low %vm195_vm11, %vm191_vm10  ;;  %vm205_vm10 = vcmp.eq.s32.totalorder %v40_v17, %v2323_v11  ;;  %vm200_vm15 = vcmp.eq.s32.totalorder %v39_v16, %v2332_v14  ;;  %v44_v21 = vadd.s32 72, %v2306_v2  ;;  %v45_v22 = vadd.s32 80, %v2306_v2 }
   0xe   :  { %1996 = vmatprep.subr.msk.bf16.mxu0 %vm1995_vm2, %v2255_v15  ;;  %vm2123_vm5 = vmpackc.low %vm197_vm14, %vm193_vm13  ;;  %vm202_vm13 = vcmp.eq.s32.totalorder %v40_v17, %v2327_v12  ;;  %vm204_vm2 = vcmp.eq.s32.totalorder %v40_v17, %v2332_v14  ;;  %v46_v23 = vadd.s32 88, %v2306_v2  ;;  %v47_v24 = vadd.s32 96, %v2306_v2 }
   0xf   :  { %2124 = vmatprep.subr.msk.bf16.mxu1 %vm2123_vm5, %v2255_v15  ;;  %vm1997_vm7 = vmpackc.low %vm194_vm1, %vm190_vm0  ;;  %vm207_vm1 = vcmp.eq.s32.totalorder %v41_v18, %v2319_v10  ;;  %vm211_vm5 = vcmp.eq.s32.totalorder %v42_v19, %v2319_v10  ;;  %v48_v25 = vadd.s32 104, %v2306_v2  ;;  %v49_v26 = vadd.s32 112, %v2306_v2 }
  0x10   :  { %1998 = vmatpush1.bf16.msk.msra.mxu0 %vm1997_vm7, %v2255_v15  ;;  %vm2125_vm11 = vmpackc.low %vm196_vm4, %vm192_vm3  ;;  %vm209_vm4 = vcmp.eq.s32.totalorder %v41_v18, %v2323_v11  ;;  %vm206_vm7 = vcmp.eq.s32.totalorder %v41_v18, %v2327_v12  ;;  %v50_v27 = vadd.s32 120, %v2306_v2  ;;  %v51_v28 = vadd.s32 128, %v2306_v2 }
  0x11   :  { %2126 = vmatpush1.bf16.msk.msra.mxu1 %vm2125_vm11, %v2255_v15  ;;  %vm1999_vm14 = vmpackc.low %vm203_vm9, %vm199_vm6  ;;  %vm213_vm6 = vcmp.eq.s32.totalorder %v42_v19, %v2323_v11  ;;  %vm208_vm11 = vcmp.eq.s32.totalorder %v41_v18, %v2332_v14  ;;  %v52_v29 = vadd.s32 136, %v2306_v2  ;;  %v53_v30 = vadd.s32 144, %v2306_v2 }
  0x12   :  { %2000 = vmatprep.subr.msk.bf16.mxu0 %vm1999_vm14, %v2255_v15  ;;  %vm2127_vm0 = vmpackc.low %vm205_vm10, %vm201_vm8  ;;  %vm210_vm8 = vcmp.eq.s32.totalorder %v42_v19, %v2327_v12  ;;  %vm212_vm14 = vcmp.eq.s32.totalorder %v42_v19, %v2332_v14  ;;  %v54_v31 = vadd.s32 152, %v2306_v2  ;;  %v55_v32 = vadd.s32 160, %v2306_v2 }
  0x13   :  { %2128 = vmatprep.subr.msk.bf16.mxu1 %vm2127_vm0, %v2255_v15  ;;  %vm2001_vm3 = vmpackc.low %vm202_vm13, %vm198_vm12  ;;  %vm215_vm13 = vcmp.eq.s32.totalorder %v43_v20, %v2319_v10  ;;  %vm219_vm0 = vcmp.eq.s32.totalorder %v44_v21, %v2319_v10  ;;  %v56_v33 = vadd.s32 168, %v2306_v2  ;;  %v57_v34 = vadd.s32 176, %v2306_v2 }
  0x14   :  { %2002 = vmatpush1.bf16.msk.msra.mxu0 %vm2001_vm3, %v2255_v15  ;;  %vm2129_vm9 = vmpackc.low %vm204_vm2, %vm200_vm15  ;;  %vm217_vm2 = vcmp.eq.s32.totalorder %v43_v20, %v2323_v11  ;;  %vm214_vm3 = vcmp.eq.s32.totalorder %v43_v20, %v2327_v12  ;;  %v58_v35 = vadd.s32 184, %v2306_v2  ;;  %v59_v36 = vadd.s32 192, %v2306_v2 }
  0x15   :  { %2130 = vmatpush1.bf16.msk.msra.mxu1 %vm2129_vm9, %v2255_v15  ;;  %vm2003_vm10 = vmpackc.low %vm211_vm5, %vm207_vm1  ;;  %vm221_vm1 = vcmp.eq.s32.totalorder %v44_v21, %v2323_v11  ;;  %vm216_vm9 = vcmp.eq.s32.totalorder %v43_v20, %v2332_v14  ;;  %v60_v37 = vadd.s32 200, %v2306_v2  ;;  %v61_v38 = vadd.s32 208, %v2306_v2 }
  0x16   :  { %2004 = vmatprep.subr.msk.bf16.mxu0 %vm2003_vm10, %v2255_v15  ;;  %vm2131_vm12 = vmpackc.low %vm213_vm6, %vm209_vm4  ;;  %vm218_vm4 = vcmp.eq.s32.totalorder %v44_v21, %v2327_v12  ;;  %vm220_vm10 = vcmp.eq.s32.totalorder %v44_v21, %v2332_v14  ;;  %v62_v39 = vadd.s32 216, %v2306_v2  ;;  %v63_v40 = vadd.s32 224, %v2306_v2 }
  0x17   :  { %2132 = vmatprep.subr.msk.bf16.mxu1 %vm2131_vm12, %v2255_v15  ;;  %vm2005_vm15 = vmpackc.low %vm210_vm8, %vm206_vm7  ;;  %vm223_vm8 = vcmp.eq.s32.totalorder %v45_v22, %v2319_v10  ;;  %vm227_vm12 = vcmp.eq.s32.totalorder %v46_v23, %v2319_v10  ;;  %v64_v41 = vadd.s32 232, %v2306_v2  ;;  %v65_v42 = vadd.s32 240, %v2306_v2 }
  0x18   :  { %2006 = vmatpush1.bf16.msk.msra.mxu0 %vm2005_vm15, %v2255_v15  ;;  %vm2133_vm5 = vmpackc.low %vm212_vm14, %vm208_vm11  ;;  %vm225_vm14 = vcmp.eq.s32.totalorder %v45_v22, %v2323_v11  ;;  %vm222_vm15 = vcmp.eq.s32.totalorder %v45_v22, %v2327_v12  ;;  %v66_v43 = vadd.s32 248, %v2306_v2  ;;  %v67_v44 = vadd.s32 256, %v2306_v2 }
  0x19   :  { %2134 = vmatpush1.bf16.msk.msra.mxu1 %vm2133_vm5, %v2255_v15  ;;  %vm2007_vm6 = vmpackc.low %vm219_vm0, %vm215_vm13  ;;  %vm229_vm13 = vcmp.eq.s32.totalorder %v46_v23, %v2323_v11  ;;  %vm224_vm5 = vcmp.eq.s32.totalorder %v45_v22, %v2332_v14  ;;  %v68_v45 = vadd.s32 264, %v2306_v2  ;;  %v69_v46 = vadd.s32 272, %v2306_v2 }
  0x1a   :  { %2008 = vmatprep.subr.msk.bf16.mxu0 %vm2007_vm6, %v2255_v15  ;;  %vm2135_vm7 = vmpackc.low %vm221_vm1, %vm217_vm2  ;;  %vm226_vm2 = vcmp.eq.s32.totalorder %v46_v23, %v2327_v12  ;;  %vm228_vm6 = vcmp.eq.s32.totalorder %v46_v23, %v2332_v14  ;;  %v70_v47 = vadd.s32 280, %v2306_v2  ;;  %v71_v49 = vadd.s32 288, %v2306_v2 }
  0x1b   :  { %2136 = vmatprep.subr.msk.bf16.mxu1 %vm2135_vm7, %v2255_v15  ;;  %vm2009_vm11 = vmpackc.low %vm218_vm4, %vm214_vm3  ;;  %vm231_vm4 = vcmp.eq.s32.totalorder %v47_v24, %v2319_v10  ;;  %vm235_vm7 = vcmp.eq.s32.totalorder %v48_v25, %v2319_v10  ;;  %v72_v50 = vadd.s32 296, %v2306_v2  ;;  %v73_v52 = vadd.s32 304, %v2306_v2 }
  0x1c   :  { %2010 = vmatpush1.bf16.msk.msra.mxu0 %vm2009_vm11, %v2255_v15  ;;  %vm2137_vm0 = vmpackc.low %vm220_vm10, %vm216_vm9  ;;  %vm233_vm10 = vcmp.eq.s32.totalorder %v47_v24, %v2323_v11  ;;  %vm230_vm11 = vcmp.eq.s32.totalorder %v47_v24, %v2327_v12  ;;  %v74_v53 = vadd.s32 312, %v2306_v2  ;;  %v75_v54 = vadd.s32 320, %v2306_v2 }
  0x1d   :  { %2138 = vmatpush1.bf16.msk.msra.mxu1 %vm2137_vm0, %v2255_v15  ;;  %vm2011_vm1 = vmpackc.low %vm227_vm12, %vm223_vm8  ;;  %vm237_vm8 = vcmp.eq.s32.totalorder %v48_v25, %v2323_v11  ;;  %vm232_vm0 = vcmp.eq.s32.totalorder %v47_v24, %v2332_v14  ;;  %v76_v55 = vadd.s32 328, %v2306_v2  ;;  %v77_v56 = vadd.s32 336, %v2306_v2 }
  0x1e   :  { %2012 = vmatprep.subr.msk.bf16.mxu0 %vm2011_vm1, %v2255_v15  ;;  %vm2139_vm3 = vmpackc.low %vm229_vm13, %vm225_vm14  ;;  %vm234_vm14 = vcmp.eq.s32.totalorder %v48_v25, %v2327_v12  ;;  %vm236_vm1 = vcmp.eq.s32.totalorder %v48_v25, %v2332_v14  ;;  %v78_v57 = vadd.s32 344, %v2306_v2  ;;  %v79_v58 = vadd.s32 352, %v2306_v2 }
  0x1f   :  { %2140 = vmatprep.subr.msk.bf16.mxu1 %vm2139_vm3, %v2255_v15  ;;  %vm2013_vm9 = vmpackc.low %vm226_vm2, %vm222_vm15  ;;  %vm239_vm2 = vcmp.eq.s32.totalorder %v49_v26, %v2319_v10  ;;  %vm243_vm3 = vcmp.eq.s32.totalorder %v50_v27, %v2319_v10  ;;  %v80_v59 = vadd.s32 360, %v2306_v2  ;;  %v81_v60 = vadd.s32 368, %v2306_v2 }
  0x20   :  { %2014 = vmatpush1.bf16.msk.msra.mxu0 %vm2013_vm9, %v2255_v15  ;;  %vm2141_vm12 = vmpackc.low %vm228_vm6, %vm224_vm5  ;;  %vm241_vm6 = vcmp.eq.s32.totalorder %v49_v26, %v2323_v11  ;;  %vm238_vm9 = vcmp.eq.s32.totalorder %v49_v26, %v2327_v12  ;;  %v82_v61 = vadd.s32 376, %v2306_v2  ;;  %v83_v62 = vadd.s32 384, %v2306_v2 }
  0x21   :  { %2142 = vmatpush1.bf16.msk.msra.mxu1 %vm2141_vm12, %v2255_v15  ;;  %vm2015_vm13 = vmpackc.low %vm235_vm7, %vm231_vm4  ;;  %vm245_vm4 = vcmp.eq.s32.totalorder %v50_v27, %v2323_v11  ;;  %vm240_vm12 = vcmp.eq.s32.totalorder %v49_v26, %v2332_v14  ;;  %v84_v63 = vadd.s32 392, %v2306_v2  ;;  %v85_v0 = vadd.s32 400, %v2306_v2 }
  0x22   :  { %2016 = vmatprep.subr.msk.bf16.mxu0 %vm2015_vm13, %v2255_v15  ;;  %vm2143_vm15 = vmpackc.low %vm237_vm8, %vm233_vm10  ;;  %vm242_vm10 = vcmp.eq.s32.totalorder %v50_v27, %v2327_v12  ;;  %vm244_vm13 = vcmp.eq.s32.totalorder %v50_v27, %v2332_v14  ;;  %v86_v1 = vadd.s32 408, %v2306_v2  ;;  %v87_v3 = vadd.s32 416, %v2306_v2  ;;  %v1258_v27 = vld [vmem:[%s2853_s1 + $0x8] sm:$0xff] }
  0x23   :  { %2144 = vmatprep.subr.msk.bf16.mxu1 %vm2143_vm15, %v2255_v15  ;;  %vm2017_vm5 = vmpackc.low %vm234_vm14, %vm230_vm11  ;;  %vm247_vm14 = vcmp.eq.s32.totalorder %v51_v28, %v2319_v10  ;;  %vm251_vm15 = vcmp.eq.s32.totalorder %v52_v29, %v2319_v10  ;;  %v88_v4 = vadd.s32 424, %v2306_v2  ;;  %v89_v9 = vadd.s32 432, %v2306_v2 }
  0x24   :  { %2018 = vmatpush1.bf16.msk.msra.mxu0 %vm2017_vm5, %v2255_v15  ;;  %vm2145_vm7 = vmpackc.low %vm236_vm1, %vm232_vm0  ;;  %vm249_vm1 = vcmp.eq.s32.totalorder %v51_v28, %v2323_v11  ;;  %vm246_vm5 = vcmp.eq.s32.totalorder %v51_v28, %v2327_v12  ;;  %v90_v13 = vadd.s32 440, %v2306_v2  ;;  %v91_v16 = vadd.s32 448, %v2306_v2 }
  0x25   :  { %2146 = vmatpush1.bf16.msk.msra.mxu1 %vm2145_vm7, %v2255_v15  ;;  %vm2019_vm8 = vmpackc.low %vm243_vm3, %vm239_vm2  ;;  %vm253_vm2 = vcmp.eq.s32.totalorder %v52_v29, %v2323_v11  ;;  %vm248_vm7 = vcmp.eq.s32.totalorder %v51_v28, %v2332_v14  ;;  %v92_v17 = vadd.s32 456, %v2306_v2  ;;  %v93_v18 = vadd.s32 464, %v2306_v2  ;;  %v1260_v28 = vld [vmem:[%s2853_s1 + $0x18] sm:$0xff] }
  0x26   :  { %2020 = vmatprep.subr.msk.bf16.mxu0 %vm2019_vm8, %v2255_v15  ;;  %vm2147_vm11 = vmpackc.low %vm245_vm4, %vm241_vm6  ;;  %vm250_vm6 = vcmp.eq.s32.totalorder %v52_v29, %v2327_v12  ;;  %vm252_vm8 = vcmp.eq.s32.totalorder %v52_v29, %v2332_v14  ;;  %v94_v19 = vadd.s32 472, %v2306_v2  ;;  %v95_v20 = vadd.s32 480, %v2306_v2  ;;  %v1257_v29 = vld [vmem:[%s2853_s1] sm:$0xff] }
  0x27   :  { %2148 = vmatprep.subr.msk.bf16.mxu1 %vm2147_vm11, %v2255_v15  ;;  %vm2021_vm0 = vmpackc.low %vm242_vm10, %vm238_vm9  ;;  %vm255_vm10 = vcmp.eq.s32.totalorder %v53_v30, %v2319_v10  ;;  %vm259_vm11 = vcmp.eq.s32.totalorder %v54_v31, %v2319_v10  ;;  %v96_v21 = vadd.s32 488, %v2306_v2  ;;  %v97_v22 = vadd.s32 496, %v2306_v2 }
  0x28   :  { %2022 = vmatpush1.bf16.msk.msra.mxu0 %vm2021_vm0, %v2255_v15  ;;  %vm2149_vm3 = vmpackc.low %vm244_vm13, %vm240_vm12  ;;  %vm257_vm13 = vcmp.eq.s32.totalorder %v53_v30, %v2323_v11  ;;  %vm254_vm0 = vcmp.eq.s32.totalorder %v53_v30, %v2327_v12  ;;  %v98_v23 = vadd.s32 504, %v2306_v2 }
  0x29   :  { %2150 = vmatpush1.bf16.msk.msra.mxu1 %vm2149_vm3, %v2255_v15  ;;  %vm2023_vm4 = vmpackc.low %vm251_vm15, %vm247_vm14  ;;  %vm261_vm14 = vcmp.eq.s32.totalorder %v54_v31, %v2323_v11  ;;  %vm256_vm3 = vcmp.eq.s32.totalorder %v53_v30, %v2332_v14  ;;  %v1259_v30 = vld [vmem:[%s2853_s1 + $0x10] sm:$0xff] }
  0x2a   :  { %2024 = vmatprep.subr.msk.bf16.mxu0 %vm2023_vm4, %v2255_v15  ;;  %vm2151_vm9 = vmpackc.low %vm253_vm2, %vm249_vm1  ;;  %vm258_vm1 = vcmp.eq.s32.totalorder %v54_v31, %v2327_v12  ;;  %vm260_vm4 = vcmp.eq.s32.totalorder %v54_v31, %v2332_v14 }
  0x2b   :  { %2152 = vmatprep.subr.msk.bf16.mxu1 %vm2151_vm9, %v2255_v15  ;;  %vm2025_vm12 = vmpackc.low %vm250_vm6, %vm246_vm5  ;;  %vm263_vm6 = vcmp.eq.s32.totalorder %v55_v32, %v2319_v10  ;;  %vm267_vm9 = vcmp.eq.s32.totalorder %v56_v33, %v2319_v10 }
  0x2c   :  { %2026 = vmatpush1.bf16.msk.msra.mxu0 %vm2025_vm12, %v2255_v15  ;;  %vm2153_vm15 = vmpackc.low %vm252_vm8, %vm248_vm7  ;;  %vm265_vm8 = vcmp.eq.s32.totalorder %v55_v32, %v2323_v11  ;;  %vm262_vm12 = vcmp.eq.s32.totalorder %v55_v32, %v2327_v12 }
  0x2d   :  { %2154 = vmatpush1.bf16.msk.msra.mxu1 %vm2153_vm15, %v2255_v15  ;;  %vm2027_vm2 = vmpackc.low %vm259_vm11, %vm255_vm10  ;;  %vm269_vm10 = vcmp.eq.s32.totalorder %v56_v33, %v2323_v11  ;;  %vm264_vm15 = vcmp.eq.s32.totalorder %v55_v32, %v2332_v14 }
  0x2e   :  { %2028 = vmatprep.subr.msk.bf16.mxu0 %vm2027_vm2, %v2255_v15  ;;  %vm2155_vm5 = vmpackc.low %vm261_vm14, %vm257_vm13  ;;  %vm266_vm13 = vcmp.eq.s32.totalorder %v56_v33, %v2327_v12  ;;  %vm268_vm2 = vcmp.eq.s32.totalorder %v56_v33, %v2332_v14 }
  0x2f   :  { %2156 = vmatprep.subr.msk.bf16.mxu1 %vm2155_vm5, %v2255_v15  ;;  %vm2029_vm7 = vmpackc.low %vm258_vm1, %vm254_vm0  ;;  %vm271_vm1 = vcmp.eq.s32.totalorder %v57_v34, %v2319_v10  ;;  %vm275_vm5 = vcmp.eq.s32.totalorder %v58_v35, %v2319_v10 }
  0x30   :  { %2030 = vmatpush1.bf16.msk.msra.mxu0 %vm2029_vm7, %v2255_v15  ;;  %vm2157_vm11 = vmpackc.low %vm260_vm4, %vm256_vm3  ;;  %vm273_vm4 = vcmp.eq.s32.totalorder %v57_v34, %v2323_v11  ;;  %vm270_vm7 = vcmp.eq.s32.totalorder %v57_v34, %v2327_v12 }
  0x31   :  { %2158 = vmatpush1.bf16.msk.msra.mxu1 %vm2157_vm11, %v2255_v15  ;;  %vm2031_vm14 = vmpackc.low %vm267_vm9, %vm263_vm6  ;;  %vm277_vm6 = vcmp.eq.s32.totalorder %v58_v35, %v2323_v11  ;;  %vm272_vm11 = vcmp.eq.s32.totalorder %v57_v34, %v2332_v14  ;;  %v1265_v34 = vld [vmem:[%s2854_s4] sm:$0xff] }
  0x32   :  { %2032 = vmatprep.subr.msk.bf16.mxu0 %vm2031_vm14, %v2255_v15  ;;  %vm2159_vm0 = vmpackc.low %vm269_vm10, %vm265_vm8  ;;  %vm274_vm8 = vcmp.eq.s32.totalorder %v58_v35, %v2327_v12  ;;  %vm276_vm14 = vcmp.eq.s32.totalorder %v58_v35, %v2332_v14 }
  0x33   :  { %2160 = vmatprep.subr.msk.bf16.mxu1 %vm2159_vm0, %v2255_v15  ;;  %vm2033_vm3 = vmpackc.low %vm266_vm13, %vm262_vm12  ;;  %vm279_vm13 = vcmp.eq.s32.totalorder %v59_v36, %v2319_v10  ;;  %vm283_vm0 = vcmp.eq.s32.totalorder %v60_v37, %v2319_v10 }
  0x34   :  { %2034 = vmatpush1.bf16.msk.msra.mxu0 %vm2033_vm3, %v2255_v15  ;;  %vm2161_vm9 = vmpackc.low %vm268_vm2, %vm264_vm15  ;;  %vm281_vm2 = vcmp.eq.s32.totalorder %v59_v36, %v2323_v11  ;;  %vm278_vm3 = vcmp.eq.s32.totalorder %v59_v36, %v2327_v12 }
  0x35   :  { %2162 = vmatpush1.bf16.msk.msra.mxu1 %vm2161_vm9, %v2255_v15  ;;  %vm2035_vm10 = vmpackc.low %vm275_vm5, %vm271_vm1  ;;  %vm285_vm1 = vcmp.eq.s32.totalorder %v60_v37, %v2323_v11  ;;  %vm280_vm9 = vcmp.eq.s32.totalorder %v59_v36, %v2332_v14  ;;  %v1418_v36 = vld [vmem:[%s2855_s3] sm:$0xf] }
  0x36   :  { %2036 = vmatprep.subr.msk.bf16.mxu0 %vm2035_vm10, %v2255_v15  ;;  %vm2163_vm12 = vmpackc.low %vm277_vm6, %vm273_vm4  ;;  %vm282_vm4 = vcmp.eq.s32.totalorder %v60_v37, %v2327_v12  ;;  %vm284_vm10 = vcmp.eq.s32.totalorder %v60_v37, %v2332_v14 }
  0x37   :  { %2164 = vmatprep.subr.msk.bf16.mxu1 %vm2163_vm12, %v2255_v15  ;;  %vm2037_vm15 = vmpackc.low %vm274_vm8, %vm270_vm7  ;;  %vm287_vm8 = vcmp.eq.s32.totalorder %v61_v38, %v2319_v10  ;;  %vm291_vm12 = vcmp.eq.s32.totalorder %v62_v39, %v2319_v10 }
  0x38   :  { %2038 = vmatpush1.bf16.msk.msra.mxu0 %vm2037_vm15, %v2255_v15  ;;  %vm2165_vm5 = vmpackc.low %vm276_vm14, %vm272_vm11  ;;  %vm289_vm14 = vcmp.eq.s32.totalorder %v61_v38, %v2323_v11  ;;  %vm286_vm15 = vcmp.eq.s32.totalorder %v61_v38, %v2327_v12 }
  0x39   :  { %2166 = vmatpush1.bf16.msk.msra.mxu1 %vm2165_vm5, %v2255_v15  ;;  %vm2039_vm6 = vmpackc.low %vm283_vm0, %vm279_vm13  ;;  %vm293_vm13 = vcmp.eq.s32.totalorder %v62_v39, %v2323_v11  ;;  %vm288_vm5 = vcmp.eq.s32.totalorder %v61_v38, %v2332_v14  ;;  %v1423_v38 = vrot.slane %v1418_v36, %v168_v7 }
  0x3a   :  { %2040 = vmatprep.subr.msk.bf16.mxu0 %vm2039_vm6, %v2255_v15  ;;  %vm2167_vm7 = vmpackc.low %vm285_vm1, %vm281_vm2  ;;  %vm290_vm2 = vcmp.eq.s32.totalorder %v62_v39, %v2327_v12  ;;  %vm292_vm6 = vcmp.eq.s32.totalorder %v62_v39, %v2332_v14 }
  0x3b   :  { %2168 = vmatprep.subr.msk.bf16.mxu1 %vm2167_vm7, %v2255_v15  ;;  %vm2041_vm11 = vmpackc.low %vm282_vm4, %vm278_vm3  ;;  %vm295_vm4 = vcmp.eq.s32.totalorder %v63_v40, %v2319_v10  ;;  %vm299_vm7 = vcmp.eq.s32.totalorder %v64_v41, %v2319_v10 }
  0x3c   :  { %2042 = vmatpush1.bf16.msk.msra.mxu0 %vm2041_vm11, %v2255_v15  ;;  %vm2169_vm0 = vmpackc.low %vm284_vm10, %vm280_vm9  ;;  %vm297_vm10 = vcmp.eq.s32.totalorder %v63_v40, %v2323_v11  ;;  %vm294_vm11 = vcmp.eq.s32.totalorder %v63_v40, %v2327_v12 }
  0x3d   :  { %2170 = vmatpush1.bf16.msk.msra.mxu1 %vm2169_vm0, %v2255_v15  ;;  %vm2043_vm1 = vmpackc.low %vm291_vm12, %vm287_vm8  ;;  %vm301_vm8 = vcmp.eq.s32.totalorder %v64_v41, %v2323_v11  ;;  %vm296_vm0 = vcmp.eq.s32.totalorder %v63_v40, %v2332_v14  ;;  %v1427_v40 = vrot.slane %v1418_v36, %v172_v5 }
  0x3e   :  { %2044 = vmatprep.subr.msk.bf16.mxu0 %vm2043_vm1, %v2255_v15  ;;  %vm2171_vm3 = vmpackc.low %vm293_vm13, %vm289_vm14  ;;  %vm298_vm14 = vcmp.eq.s32.totalorder %v64_v41, %v2327_v12  ;;  %vm300_vm1 = vcmp.eq.s32.totalorder %v64_v41, %v2332_v14  ;;  %v1431_v41 = vrot.slane %v1418_v36, %v176_v8 }
  0x3f   :  { %2172 = vmatprep.subr.msk.bf16.mxu1 %vm2171_vm3, %v2255_v15  ;;  %vm2045_vm9 = vmpackc.low %vm290_vm2, %vm286_vm15  ;;  %vm303_vm2 = vcmp.eq.s32.totalorder %v65_v42, %v2319_v10  ;;  %vm307_vm3 = vcmp.eq.s32.totalorder %v66_v43, %v2319_v10 }
  0x40   :  { %2046 = vmatpush1.bf16.msk.msra.mxu0 %vm2045_vm9, %v2255_v15  ;;  %vm2173_vm12 = vmpackc.low %vm292_vm6, %vm288_vm5  ;;  %vm305_vm6 = vcmp.eq.s32.totalorder %v65_v42, %v2323_v11  ;;  %vm302_vm9 = vcmp.eq.s32.totalorder %v65_v42, %v2327_v12 }
  0x41   :  { %2174 = vmatpush1.bf16.msk.msra.mxu1 %vm2173_vm12, %v2255_v15  ;;  %vm2047_vm13 = vmpackc.low %vm299_vm7, %vm295_vm4  ;;  %vm309_vm4 = vcmp.eq.s32.totalorder %v66_v43, %v2323_v11  ;;  %vm304_vm12 = vcmp.eq.s32.totalorder %v65_v42, %v2332_v14 }
  0x42   :  { %2048 = vmatprep.subr.msk.bf16.mxu0 %vm2047_vm13, %v2255_v15  ;;  %vm2175_vm15 = vmpackc.low %vm301_vm8, %vm297_vm10  ;;  %vm306_vm10 = vcmp.eq.s32.totalorder %v66_v43, %v2327_v12  ;;  %vm308_vm13 = vcmp.eq.s32.totalorder %v66_v43, %v2332_v14 }
  0x43   :  { %2176 = vmatprep.subr.msk.bf16.mxu1 %vm2175_vm15, %v2255_v15  ;;  %vm2049_vm5 = vmpackc.low %vm298_vm14, %vm294_vm11  ;;  %vm311_vm14 = vcmp.eq.s32.totalorder %v67_v44, %v2319_v10  ;;  %vm315_vm15 = vcmp.eq.s32.totalorder %v68_v45, %v2319_v10 }
  0x44   :  { %2050 = vmatpush1.bf16.msk.msra.mxu0 %vm2049_vm5, %v2255_v15  ;;  %vm2177_vm7 = vmpackc.low %vm300_vm1, %vm296_vm0  ;;  %vm313_vm1 = vcmp.eq.s32.totalorder %v67_v44, %v2323_v11  ;;  %vm310_vm5 = vcmp.eq.s32.totalorder %v67_v44, %v2327_v12 }
  0x45   :  { %2178 = vmatpush1.bf16.msk.msra.mxu1 %vm2177_vm7, %v2255_v15  ;;  %vm2051_vm8 = vmpackc.low %vm307_vm3, %vm303_vm2  ;;  %vm317_vm2 = vcmp.eq.s32.totalorder %v68_v45, %v2323_v11  ;;  %vm312_vm7 = vcmp.eq.s32.totalorder %v67_v44, %v2332_v14 }
  0x46   :  { %2052 = vmatprep.subr.msk.bf16.mxu0 %vm2051_vm8, %v2255_v15  ;;  %vm2179_vm11 = vmpackc.low %vm309_vm4, %vm305_vm6  ;;  %vm314_vm6 = vcmp.eq.s32.totalorder %v68_v45, %v2327_v12  ;;  %vm319_vm8 = vcmp.eq.s32.totalorder %v69_v46, %v2319_v10 }
  0x47   :  { %2180 = vmatprep.subr.msk.bf16.mxu1 %vm2179_vm11, %v2255_v15  ;;  %vm2053_vm0 = vmpackc.low %vm306_vm10, %vm302_vm9  ;;  %vm316_vm9 = vcmp.eq.s32.totalorder %v68_v45, %v2332_v14  ;;  %vm321_vm11 = vcmp.eq.s32.totalorder %v69_v46, %v2323_v11  ;;  %v1435_v45 = vrot.slane %v1418_v36, %v180_v6 }
  0x48   :  { %2054 = vmatpush1.bf16.msk.msra.mxu0 %vm2053_vm0, %v2255_v15  ;;  %vm2181_vm3 = vmpackc.low %vm308_vm13, %vm304_vm12  ;;  %vm323_vm12 = vcmp.eq.s32.totalorder %v70_v47, %v2319_v10  ;;  %vm318_vm0 = vcmp.eq.s32.totalorder %v69_v46, %v2327_v12 }
  0x49   :  { %2182 = vmatpush1.bf16.msk.msra.mxu1 %vm2181_vm3, %v2255_v15  ;;  %vm2055_vm4 = vmpackc.low %vm315_vm15, %vm311_vm14  ;;  %vm325_vm14 = vcmp.eq.s32.totalorder %v70_v47, %v2323_v11  ;;  %vm320_vm3 = vcmp.eq.s32.totalorder %v69_v46, %v2332_v14 }
  0x4a   :  { %2056 = vmatprep.subr.msk.bf16.mxu0 %vm2055_vm4, %v2255_v15  ;;  %vm2183_vm10 = vmpackc.low %vm317_vm2, %vm313_vm1  ;;  %vm322_vm1 = vcmp.eq.s32.totalorder %v70_v47, %v2327_v12  ;;  %vm327_vm4 = vcmp.eq.s32.totalorder %v71_v49, %v2319_v10 }
  0x4b   :  { %2184 = vmatprep.subr.msk.bf16.mxu1 %vm2183_vm10, %v2255_v15  ;;  %1023 = vmatmul.mubr.f32.vlgmr.msra.gmra.mrb[0].mxu0 %v954_v48  ;;  %vm2057_vm13 = vmpackc.low %vm314_vm6, %vm310_vm5  ;;  %vm324_vm5 = vcmp.eq.s32.totalorder %v70_v47, %v2332_v14  ;;  %vm329_vm10 = vcmp.eq.s32.totalorder %v71_v49, %v2323_v11 }
  0x4c   :  { %2058 = vmatpush1.bf16.msk.msra.mxu0 %vm2057_vm13, %v2255_v15  ;;  %1165 = vmatmul.mubr.f32.vlgmr.msra.gmra.mrb[0].mxu1 %v954_v48  ;;  %vm2185_vm15 = vmpackc.low %vm316_vm9, %vm312_vm7  ;;  %vm331_vm7 = vcmp.eq.s32.totalorder %v72_v50, %v2319_v10  ;;  %vm326_vm13 = vcmp.eq.s32.totalorder %v71_v49, %v2327_v12 }
  0x4d   :  { %2186 = vmatpush1.bf16.msk.msra.mxu1 %vm2185_vm15, %v2255_v15  ;;  %vm2059_vm2 = vmpackc.low %vm323_vm12, %vm319_vm8  ;;  %1093 = vmatprep.mubr.f32.mxu0 %v957_v51  ;;  %vm333_vm8 = vcmp.eq.s32.totalorder %v72_v50, %v2323_v11  ;;  %vm328_vm15 = vcmp.eq.s32.totalorder %v71_v49, %v2332_v14 }
  0x4e   :  { %2060 = vmatprep.subr.msk.bf16.mxu0 %vm2059_vm2, %v2255_v15  ;;  %vm2187_vm6 = vmpackc.low %vm325_vm14, %vm321_vm11  ;;  %1235 = vmatprep.mubr.f32.mxu1 %v957_v51  ;;  %vm330_vm11 = vcmp.eq.s32.totalorder %v72_v50, %v2327_v12  ;;  %vm335_vm2 = vcmp.eq.s32.totalorder %v73_v52, %v2319_v10 }
  0x4f   :  { %2188 = vmatprep.subr.msk.bf16.mxu1 %vm2187_vm6, %v2255_v15  ;;  %vm2061_vm9 = vmpackc.low %vm322_vm1, %vm318_vm0  ;;  %vm332_vm0 = vcmp.eq.s32.totalorder %v72_v50, %v2332_v14  ;;  %vm337_vm6 = vcmp.eq.s32.totalorder %v73_v52, %v2323_v11 }
  0x50   :  { %2062 = vmatpush1.bf16.msk.msra.mxu0 %vm2061_vm9, %v2255_v15  ;;  %vm2189_vm12 = vmpackc.low %vm324_vm5, %vm320_vm3  ;;  %vm339_vm3 = vcmp.eq.s32.totalorder %v74_v53, %v2319_v10  ;;  %vm334_vm9 = vcmp.eq.s32.totalorder %v73_v52, %v2327_v12 }
  0x51   :  { %2190 = vmatpush1.bf16.msk.msra.mxu1 %vm2189_vm12, %v2255_v15  ;;  %vm2063_vm14 = vmpackc.low %vm331_vm7, %vm327_vm4  ;;  %vm341_vm4 = vcmp.eq.s32.totalorder %v74_v53, %v2323_v11  ;;  %vm336_vm12 = vcmp.eq.s32.totalorder %v73_v52, %v2332_v14 }
  0x52   :  { %2064 = vmatprep.subr.msk.bf16.mxu0 %vm2063_vm14, %v2255_v15  ;;  %vm2191_vm1 = vmpackc.low %vm333_vm8, %vm329_vm10  ;;  %vm338_vm10 = vcmp.eq.s32.totalorder %v74_v53, %v2327_v12  ;;  %vm340_vm14 = vcmp.eq.s32.totalorder %v74_v53, %v2332_v14 }
  0x53   :  { %2192 = vmatprep.subr.msk.bf16.mxu1 %vm2191_vm1, %v2255_v15  ;;  %vm2065_vm5 = vmpackc.low %vm330_vm11, %vm326_vm13  ;;  %vm343_vm11 = vcmp.eq.s32.totalorder %v75_v54, %v2319_v10  ;;  %vm347_vm1 = vcmp.eq.s32.totalorder %v76_v55, %v2319_v10 }
  0x54   :  { %2066 = vmatpush1.bf16.msk.msra.mxu0 %vm2065_vm5, %v2255_v15  ;;  %vm2193_vm7 = vmpackc.low %vm332_vm0, %vm328_vm15  ;;  %vm345_vm0 = vcmp.eq.s32.totalorder %v75_v54, %v2323_v11  ;;  %vm342_vm5 = vcmp.eq.s32.totalorder %v75_v54, %v2327_v12 }
  0x55   :  { %2194 = vmatpush1.bf16.msk.msra.mxu1 %vm2193_vm7, %v2255_v15  ;;  %vm2067_vm8 = vmpackc.low %vm339_vm3, %vm335_vm2  ;;  %vm349_vm2 = vcmp.eq.s32.totalorder %v76_v55, %v2323_v11  ;;  %vm344_vm7 = vcmp.eq.s32.totalorder %v75_v54, %v2332_v14 }
  0x56   :  { %2068 = vmatprep.subr.msk.bf16.mxu0 %vm2067_vm8, %v2255_v15  ;;  %vm2195_vm13 = vmpackc.low %vm341_vm4, %vm337_vm6  ;;  %vm346_vm6 = vcmp.eq.s32.totalorder %v76_v55, %v2327_v12  ;;  %vm348_vm8 = vcmp.eq.s32.totalorder %v76_v55, %v2332_v14 }
  0x57   :  { %2196 = vmatprep.subr.msk.bf16.mxu1 %vm2195_vm13, %v2255_v15  ;;  %vm2069_vm15 = vmpackc.low %vm338_vm10, %vm334_vm9  ;;  %vm351_vm10 = vcmp.eq.s32.totalorder %v77_v56, %v2319_v10  ;;  %vm355_vm13 = vcmp.eq.s32.totalorder %v78_v57, %v2319_v10 }
  0x58   :  { %2070 = vmatpush1.bf16.msk.msra.mxu0 %vm2069_vm15, %v2255_v15  ;;  %vm2197_vm3 = vmpackc.low %vm340_vm14, %vm336_vm12  ;;  %vm353_vm14 = vcmp.eq.s32.totalorder %v77_v56, %v2323_v11  ;;  %vm350_vm15 = vcmp.eq.s32.totalorder %v77_v56, %v2327_v12 }
  0x59   :  { %2198 = vmatpush1.bf16.msk.msra.mxu1 %vm2197_vm3, %v2255_v15  ;;  %vm2071_vm4 = vmpackc.low %vm347_vm1, %vm343_vm11  ;;  %vm357_vm11 = vcmp.eq.s32.totalorder %v78_v57, %v2323_v11  ;;  %vm352_vm3 = vcmp.eq.s32.totalorder %v77_v56, %v2332_v14 }
  0x5a   :  { %2072 = vmatprep.subr.msk.bf16.mxu0 %vm2071_vm4, %v2255_v15  ;;  %vm2199_vm9 = vmpackc.low %vm349_vm2, %vm345_vm0  ;;  %vm354_vm0 = vcmp.eq.s32.totalorder %v78_v57, %v2327_v12  ;;  %vm356_vm4 = vcmp.eq.s32.totalorder %v78_v57, %v2332_v14 }
  0x5b   :  { %2200 = vmatprep.subr.msk.bf16.mxu1 %vm2199_vm9, %v2255_v15  ;;  %vm2073_vm12 = vmpackc.low %vm346_vm6, %vm342_vm5  ;;  %vm359_vm6 = vcmp.eq.s32.totalorder %v79_v58, %v2319_v10  ;;  %vm363_vm9 = vcmp.eq.s32.totalorder %v80_v59, %v2319_v10 }
  0x5c   :  { %2074 = vmatpush1.bf16.msk.msra.mxu0 %vm2073_vm12, %v2255_v15  ;;  %vm2201_vm1 = vmpackc.low %vm348_vm8, %vm344_vm7  ;;  %vm361_vm8 = vcmp.eq.s32.totalorder %v79_v58, %v2323_v11  ;;  %vm358_vm12 = vcmp.eq.s32.totalorder %v79_v58, %v2327_v12 }
  0x5d   :  { %2202 = vmatpush1.bf16.msk.msra.mxu1 %vm2201_vm1, %v2255_v15  ;;  %vm2075_vm2 = vmpackc.low %vm355_vm13, %vm351_vm10  ;;  %vm365_vm10 = vcmp.eq.s32.totalorder %v80_v59, %v2323_v11  ;;  %vm360_vm1 = vcmp.eq.s32.totalorder %v79_v58, %v2332_v14 }
  0x5e   :  { %2076 = vmatprep.subr.msk.bf16.mxu0 %vm2075_vm2, %v2255_v15  ;;  %vm2203_vm5 = vmpackc.low %vm357_vm11, %vm353_vm14  ;;  %vm362_vm14 = vcmp.eq.s32.totalorder %v80_v59, %v2327_v12  ;;  %vm364_vm2 = vcmp.eq.s32.totalorder %v80_v59, %v2332_v14 }
  0x5f   :  { %2204 = vmatprep.subr.msk.bf16.mxu1 %vm2203_vm5, %v2255_v15  ;;  %vm2077_vm7 = vmpackc.low %vm354_vm0, %vm350_vm15  ;;  %vm367_vm0 = vcmp.eq.s32.totalorder %v81_v60, %v2319_v10  ;;  %vm371_vm5 = vcmp.eq.s32.totalorder %v82_v61, %v2319_v10 }
  0x60   :  { %2078 = vmatpush1.bf16.msk.msra.mxu0 %vm2077_vm7, %v2255_v15  ;;  %vm2205_vm13 = vmpackc.low %vm356_vm4, %vm352_vm3  ;;  %vm369_vm4 = vcmp.eq.s32.totalorder %v81_v60, %v2323_v11  ;;  %vm366_vm7 = vcmp.eq.s32.totalorder %v81_v60, %v2327_v12 }
  0x61   :  { %2206 = vmatpush1.bf16.msk.msra.mxu1 %vm2205_vm13, %v2255_v15  ;;  %vm2079_vm11 = vmpackc.low %vm363_vm9, %vm359_vm6  ;;  %vm373_vm6 = vcmp.eq.s32.totalorder %v82_v61, %v2323_v11  ;;  %vm368_vm13 = vcmp.eq.s32.totalorder %v81_v60, %v2332_v14 }
  0x62   :  { %2080 = vmatprep.subr.msk.bf16.mxu0 %vm2079_vm11, %v2255_v15  ;;  %vm2207_vm15 = vmpackc.low %vm365_vm10, %vm361_vm8  ;;  %vm370_vm8 = vcmp.eq.s32.totalorder %v82_v61, %v2327_v12  ;;  %vm372_vm11 = vcmp.eq.s32.totalorder %v82_v61, %v2332_v14 }
  0x63   :  { %2208 = vmatprep.subr.msk.bf16.mxu1 %vm2207_vm15, %v2255_v15  ;;  %vm2081_vm3 = vmpackc.low %vm362_vm14, %vm358_vm12  ;;  %vm375_vm14 = vcmp.eq.s32.totalorder %v83_v62, %v2319_v10  ;;  %vm379_vm15 = vcmp.eq.s32.totalorder %v84_v63, %v2319_v10 }
  0x64   :  { %2082 = vmatpush1.bf16.msk.msra.mxu0 %vm2081_vm3, %v2255_v15  ;;  %vm2209_vm9 = vmpackc.low %vm364_vm2, %vm360_vm1  ;;  %vm377_vm2 = vcmp.eq.s32.totalorder %v83_v62, %v2323_v11  ;;  %vm374_vm3 = vcmp.eq.s32.totalorder %v83_v62, %v2327_v12 }
  0x65   :  { %2210 = vmatpush1.bf16.msk.msra.mxu1 %vm2209_vm9, %v2255_v15  ;;  %vm2083_vm10 = vmpackc.low %vm371_vm5, %vm367_vm0  ;;  %vm381_vm0 = vcmp.eq.s32.totalorder %v84_v63, %v2323_v11  ;;  %vm376_vm9 = vcmp.eq.s32.totalorder %v83_v62, %v2332_v14 }
  0x66   :  { %2084 = vmatprep.subr.msk.bf16.mxu0 %vm2083_vm10, %v2255_v15  ;;  %vm2211_vm12 = vmpackc.low %vm373_vm6, %vm369_vm4  ;;  %vm378_vm4 = vcmp.eq.s32.totalorder %v84_v63, %v2327_v12  ;;  %vm380_vm10 = vcmp.eq.s32.totalorder %v84_v63, %v2332_v14 }
  0x67   :  { %2212 = vmatprep.subr.msk.bf16.mxu1 %vm2211_vm12, %v2255_v15  ;;  %vm2085_vm1 = vmpackc.low %vm370_vm8, %vm366_vm7  ;;  %vm383_vm8 = vcmp.eq.s32.totalorder %v85_v0, %v2319_v10  ;;  %vm387_vm12 = vcmp.eq.s32.totalorder %v86_v1, %v2319_v10 }
  0x68   :  { %2086 = vmatpush1.bf16.msk.msra.mxu0 %vm2085_vm1, %v2255_v15  ;;  %vm2213_vm5 = vmpackc.low %vm372_vm11, %vm368_vm13  ;;  %vm385_vm11 = vcmp.eq.s32.totalorder %v85_v0, %v2323_v11  ;;  %vm382_vm1 = vcmp.eq.s32.totalorder %v85_v0, %v2327_v12 }
  0x69   :  { %2214 = vmatpush1.bf16.msk.msra.mxu1 %vm2213_vm5, %v2255_v15  ;;  %vm2087_vm6 = vmpackc.low %vm379_vm15, %vm375_vm14  ;;  %vm389_vm14 = vcmp.eq.s32.totalorder %v86_v1, %v2323_v11  ;;  %vm384_vm5 = vcmp.eq.s32.totalorder %v85_v0, %v2332_v14 }
  0x6a   :  { %2088 = vmatprep.subr.msk.bf16.mxu0 %vm2087_vm6, %v2255_v15  ;;  %vm2215_vm7 = vmpackc.low %vm381_vm0, %vm377_vm2  ;;  %vm386_vm2 = vcmp.eq.s32.totalorder %v86_v1, %v2327_v12  ;;  %vm388_vm6 = vcmp.eq.s32.totalorder %v86_v1, %v2332_v14 }
  0x6b   :  { %2216 = vmatprep.subr.msk.bf16.mxu1 %vm2215_vm7, %v2255_v15  ;;  %vm2089_vm13 = vmpackc.low %vm378_vm4, %vm374_vm3  ;;  %vm391_vm4 = vcmp.eq.s32.totalorder %v87_v3, %v2319_v10  ;;  %vm395_vm7 = vcmp.eq.s32.totalorder %v88_v4, %v2319_v10 }
  0x6c   :  { %2090 = vmatpush1.bf16.msk.msra.mxu0 %vm2089_vm13, %v2255_v15  ;;  %vm2217_vm15 = vmpackc.low %vm380_vm10, %vm376_vm9  ;;  %vm393_vm10 = vcmp.eq.s32.totalorder %v87_v3, %v2323_v11  ;;  %vm390_vm13 = vcmp.eq.s32.totalorder %v87_v3, %v2327_v12 }
  0x6d   :  { %2218 = vmatpush1.bf16.msk.msra.mxu1 %vm2217_vm15, %v2255_v15  ;;  %vm2091_vm0 = vmpackc.low %vm387_vm12, %vm383_vm8  ;;  %vm397_vm8 = vcmp.eq.s32.totalorder %v88_v4, %v2323_v11  ;;  %vm392_vm15 = vcmp.eq.s32.totalorder %v87_v3, %v2332_v14 }
  0x6e   :  { %2092 = vmatprep.subr.msk.bf16.mxu0 %vm2091_vm0, %v2255_v15  ;;  %vm2219_vm3 = vmpackc.low %vm389_vm14, %vm385_vm11  ;;  %vm394_vm11 = vcmp.eq.s32.totalorder %v88_v4, %v2327_v12  ;;  %vm396_vm0 = vcmp.eq.s32.totalorder %v88_v4, %v2332_v14 }
  0x6f   :  { %2220 = vmatprep.subr.msk.bf16.mxu1 %vm2219_vm3, %v2255_v15  ;;  %vm2093_vm9 = vmpackc.low %vm386_vm2, %vm382_vm1  ;;  %vm399_vm2 = vcmp.eq.s32.totalorder %v89_v9, %v2319_v10  ;;  %vm403_vm3 = vcmp.eq.s32.totalorder %v90_v13, %v2319_v10 }
  0x70   :  { %2094 = vmatpush1.bf16.msk.msra.mxu0 %vm2093_vm9, %v2255_v15  ;;  %vm2221_vm12 = vmpackc.low %vm388_vm6, %vm384_vm5  ;;  %vm401_vm6 = vcmp.eq.s32.totalorder %v89_v9, %v2323_v11  ;;  %vm398_vm9 = vcmp.eq.s32.totalorder %v89_v9, %v2327_v12 }
  0x71   :  { %2222 = vmatpush1.bf16.msk.msra.mxu1 %vm2221_vm12, %v2255_v15  ;;  %vm2095_vm14 = vmpackc.low %vm395_vm7, %vm391_vm4  ;;  %vm405_vm4 = vcmp.eq.s32.totalorder %v90_v13, %v2323_v11  ;;  %vm400_vm12 = vcmp.eq.s32.totalorder %v89_v9, %v2332_v14 }
  0x72   :  { %2096 = vmatprep.subr.msk.bf16.mxu0 %vm2095_vm14, %v2255_v15  ;;  %vm2223_vm1 = vmpackc.low %vm397_vm8, %vm393_vm10  ;;  %vm402_vm10 = vcmp.eq.s32.totalorder %v90_v13, %v2327_v12  ;;  %vm404_vm14 = vcmp.eq.s32.totalorder %v90_v13, %v2332_v14 }
  0x73   :  { %2224 = vmatprep.subr.msk.bf16.mxu1 %vm2223_vm1, %v2255_v15  ;;  %vm2097_vm5 = vmpackc.low %vm394_vm11, %vm390_vm13  ;;  %vm407_vm11 = vcmp.eq.s32.totalorder %v91_v16, %v2319_v10  ;;  %vm411_vm1 = vcmp.eq.s32.totalorder %v92_v17, %v2319_v10 }
  0x74   :  { %2098 = vmatpush1.bf16.msk.msra.mxu0 %vm2097_vm5, %v2255_v15  ;;  %vm2225_vm7 = vmpackc.low %vm396_vm0, %vm392_vm15  ;;  %vm409_vm0 = vcmp.eq.s32.totalorder %v91_v16, %v2323_v11  ;;  %vm406_vm5 = vcmp.eq.s32.totalorder %v91_v16, %v2327_v12 }
  0x75   :  { %2226 = vmatpush1.bf16.msk.msra.mxu1 %vm2225_vm7, %v2255_v15  ;;  %vm2099_vm8 = vmpackc.low %vm403_vm3, %vm399_vm2  ;;  %vm413_vm2 = vcmp.eq.s32.totalorder %v92_v17, %v2323_v11  ;;  %vm408_vm7 = vcmp.eq.s32.totalorder %v91_v16, %v2332_v14 }
  0x76   :  { %2100 = vmatprep.subr.msk.bf16.mxu0 %vm2099_vm8, %v2255_v15  ;;  %vm2227_vm13 = vmpackc.low %vm405_vm4, %vm401_vm6  ;;  %vm410_vm6 = vcmp.eq.s32.totalorder %v92_v17, %v2327_v12  ;;  %vm412_vm8 = vcmp.eq.s32.totalorder %v92_v17, %v2332_v14 }
  0x77   :  { %2228 = vmatprep.subr.msk.bf16.mxu1 %vm2227_vm13, %v2255_v15  ;;  %vm2101_vm15 = vmpackc.low %vm402_vm10, %vm398_vm9  ;;  %vm415_vm10 = vcmp.eq.s32.totalorder %v93_v18, %v2319_v10  ;;  %vm419_vm13 = vcmp.eq.s32.totalorder %v94_v19, %v2319_v10 }
  0x78   :  { %2102 = vmatpush1.bf16.msk.msra.mxu0 %vm2101_vm15, %v2255_v15  ;;  %vm2229_vm3 = vmpackc.low %vm404_vm14, %vm400_vm12  ;;  %vm417_vm14 = vcmp.eq.s32.totalorder %v93_v18, %v2323_v11  ;;  %vm414_vm15 = vcmp.eq.s32.totalorder %v93_v18, %v2327_v12 }
  0x79   :  { %2230 = vmatpush1.bf16.msk.msra.mxu1 %vm2229_vm3, %v2255_v15  ;;  %vm2103_vm4 = vmpackc.low %vm411_vm1, %vm407_vm11  ;;  %vm421_vm11 = vcmp.eq.s32.totalorder %v94_v19, %v2323_v11  ;;  %vm416_vm3 = vcmp.eq.s32.totalorder %v93_v18, %v2332_v14 }
  0x7a   :  { %2104 = vmatprep.subr.msk.bf16.mxu0 %vm2103_vm4, %v2255_v15  ;;  %vm2231_vm9 = vmpackc.low %vm413_vm2, %vm409_vm0  ;;  %vm418_vm0 = vcmp.eq.s32.totalorder %v94_v19, %v2327_v12  ;;  %vm420_vm4 = vcmp.eq.s32.totalorder %v94_v19, %v2332_v14 }
  0x7b   :  { %2232 = vmatprep.subr.msk.bf16.mxu1 %vm2231_vm9, %v2255_v15  ;;  %vm2105_vm12 = vmpackc.low %vm410_vm6, %vm406_vm5  ;;  %vm423_vm6 = vcmp.eq.s32.totalorder %v95_v20, %v2319_v10  ;;  %vm427_vm9 = vcmp.eq.s32.totalorder %v96_v21, %v2319_v10 }
  0x7c   :  { %2106 = vmatpush1.bf16.msk.msra.mxu0 %vm2105_vm12, %v2255_v15  ;;  %vm2233_vm1 = vmpackc.low %vm412_vm8, %vm408_vm7  ;;  %vm425_vm8 = vcmp.eq.s32.totalorder %v95_v20, %v2323_v11  ;;  %vm422_vm12 = vcmp.eq.s32.totalorder %v95_v20, %v2327_v12 }
  0x7d   :  { %2234 = vmatpush1.bf16.msk.msra.mxu1 %vm2233_vm1, %v2255_v15  ;;  %vm2107_vm2 = vmpackc.low %vm419_vm13, %vm415_vm10  ;;  %vm429_vm10 = vcmp.eq.s32.totalorder %v96_v21, %v2323_v11  ;;  %vm424_vm1 = vcmp.eq.s32.totalorder %v95_v20, %v2332_v14 }
  0x7e   :  { %2108 = vmatprep.subr.msk.bf16.mxu0 %vm2107_vm2, %v2255_v15  ;;  %vm2235_vm5 = vmpackc.low %vm421_vm11, %vm417_vm14  ;;  %vm426_vm14 = vcmp.eq.s32.totalorder %v96_v21, %v2327_v12  ;;  %vm428_vm2 = vcmp.eq.s32.totalorder %v96_v21, %v2332_v14 }
  0x7f   :  { %2236 = vmatprep.subr.msk.bf16.mxu1 %vm2235_vm5, %v2255_v15  ;;  %vm2109_vm7 = vmpackc.low %vm418_vm0, %vm414_vm15  ;;  %vm431_vm0 = vcmp.eq.s32.totalorder %v97_v22, %v2319_v10  ;;  %vm435_vm5 = vcmp.eq.s32.totalorder %v98_v23, %v2319_v10  ;;  %v956_v10 = vld [vmem:[%s2851_s0 + $0x10] sm:$0xff] }
  0x80   :  { %2110 = vmatpush1.bf16.msk.msra.mxu0 %vm2109_vm7, %v2255_v15  ;;  %vm2237_vm13 = vmpackc.low %vm420_vm4, %vm416_vm3  ;;  %vm433_vm4 = vcmp.eq.s32.totalorder %v97_v22, %v2323_v11  ;;  %vm437_vm7 = vcmp.eq.s32.totalorder %v98_v23, %v2323_v11  ;;  %v2256_v11 = vmov 0.0  }
  0x81   :  { %2238 = vmatpush1.bf16.msk.msra.mxu1 %vm2237_vm13, %v2255_v15  ;;  %vm2111_vm11 = vmpackc.low %vm427_vm9, %vm423_vm6  ;;  %vm430_vm9 = vcmp.eq.s32.totalorder %v97_v22, %v2327_v12  ;;  %vm434_vm13 = vcmp.eq.s32.totalorder %v98_v23, %v2327_v12  ;;  %v2257_v12 = vmov 0  }
  0x82   :  { %2112 = vmatprep.subr.msk.bf16.mxu0 %vm2111_vm11, %v2255_v15  ;;  %vm2239_vm15 = vmpackc.low %vm429_vm10, %vm425_vm8  ;;  %vm432_vm10 = vcmp.eq.s32.totalorder %v97_v22, %v2332_v14  ;;  %vm436_vm11 = vcmp.eq.s32.totalorder %v98_v23, %v2332_v14  ;;  %2254 = vset.pattern.permute.xlu0 %v2257_v12  ;;  %v1266_v14 = vld [vmem:[%s2852_s5] sm:$0xff] }
  0x83   :  { %2240 = vmatprep.subr.msk.bf16.mxu1 %vm2239_vm15, %v2255_v15  ;;  %vm2113_vm3 = vmpackc.low %vm426_vm14, %vm422_vm12  ;;  %1269 = vperm.xlu0 %2254, %v1266_v14   ;;  %vm1453_vm15 = vcmask 7168  }
  0x84   :  { %2114 = vmatpush1.bf16.msk.msra.mxu0 %vm2113_vm3, %v2255_v15  ;;  %vm2241_vm6 = vmpackc.low %vm428_vm2, %vm424_vm1  ;;  %vm1272_vm2 = vcmask 64512  }
  0x85   :  { %2242 = vmatpush1.bf16.msk.msra.mxu1 %vm2241_vm6, %v2255_v15  ;;  %vm2115_vm8 = vmpackc.low %vm435_vm5, %vm431_vm0 }
  0x86   :  { %2116 = vmatprep.subr.msk.bf16.mxu0 %vm2115_vm8, %v2255_v15  ;;  %vm2243_vm12 = vmpackc.low %vm437_vm7, %vm433_vm4 }
  0x87   :  { %2244 = vmatprep.subr.msk.bf16.mxu1 %vm2243_vm12, %v2255_v15  ;;  %vm2117_vm14 = vmpackc.low %vm434_vm13, %vm430_vm9 }
  0x88   :  { %2118 = vmatpush1.bf16.msk.msra.mxu0 %vm2117_vm14, %v2255_v15  ;;  %vm2245_vm1 = vmpackc.low %vm436_vm11, %vm432_vm10 }
  0x89   :  { %2246 = vmatpush1.bf16.msk.msra.mxu1 %vm2245_vm1, %v2255_v15 }
  0x8b   :  { %1094 = vmatmul.mubr.f32.vlgmr.msra.gmra.mrb[0].mxu0 %v956_v10 }
  0x8c   :  { %1236 = vmatmul.mubr.f32.vlgmr.msra.gmra.mrb[0].mxu1 %v956_v10  ;;  %1340 = vmatprep.mubr.f32.mxu0 %v2256_v11 }
  0x8d   :  { %1411 = vmatprep.mubr.f32.mxu1 %v2256_v11 }
 0x102   :  { %v1270_v37 = vpop.permute.xlu0 %1269 }
 0x15e   :  { %v1095_v24 = vpop.f32.mrb[0].mxu0 }
 0x15f   :  { %v1237_v25 = vpop.f32.mrb[0].mxu1  ;;  %v1097_v26 = vpop.f32.mrb[1].mxu0  ;;  %v1261_v33 = vadd.f32 %v1257_v29, %v1095_v24 }
 0x160   :  { %v1239_v15 = vpop.f32.mrb[1].mxu1  ;;  %v1262_v31 = vadd.f32 %v1258_v27, %v1097_v26  ;;  %v1263_v35 = vadd.f32 %v1259_v30, %v1237_v25 }
 0x161   :  { %v1264_v32 = vadd.f32 %v1260_v28, %v1239_v15 }
 0x162   :  { %1276 = vmatprep.subr.mxu0 %v1262_v31 }
 0x163   :  { %1347 = vmatprep.subr.mxu1 %v1264_v32  ;;  %1277 = vmatpush1.msra.mxu0 %v1261_v33 }
 0x164   :  { %1348 = vmatpush1.msra.mxu1 %v1263_v35  ;;  %1989 = vmatmul.mubr.msk.f32.vlgmr.msra.gmra.mrb[2].mxu0 %vm1272_vm2, %v1265_v34 }
 0x165   :  { %1990 = vmatmul.mubr.msk.f32.vlgmr.msra.gmra.mrb[2].mxu1 %vm1272_vm2, %v1265_v34 }
 0x237   :  { %v1342_v39 = vpop.f32.mrb[2].mxu0 }
 0x238   :  { %v1343_v42 = vadd.f32 %v1342_v39, %v1270_v37  ;;  %v1344_v43 = vpop.f32.mrb[3].mxu0  ;;  %v1413_v44 = vpop.f32.mrb[2].mxu1 }
 0x239   :  { %v1345_v46 = vadd.f32 %v1344_v43, %v1270_v37  ;;  %v1414_v47 = vadd.f32 %v1413_v44, %v1270_v37  ;;  %v1415_v48 = vpop.f32.mrb[3].mxu1 }
 0x23a   :  { %v1440_v49 = vmul.f32 %v1423_v38, %v1343_v42  ;;  %v1416_v50 = vadd.f32 %v1415_v48, %v1270_v37 }
 0x23b   :  { %v1441_v51 = vmul.f32 %v1427_v40, %v1345_v46  ;;  %v1442_v7 = vmul.f32 %v1431_v41, %v1414_v47 }
 0x23c   :  { %1444 = vst [vmem:[%s2856_s6] sm:$0xff] %v1440_v49  ;;  %v1443_v5 = vmul.f32 %v1435_v45, %v1416_v50  ;;  %v1455_v52 = vmul.f32 %v1440_v49, %v1440_v49 }
 0x23d   :  { %1445 = vst [vmem:[%s2856_s6 + $0x8] sm:$0xff] %v1441_v51  ;;  %1446 = vst [vmem:[%s2856_s6 + $0x10] sm:$0xff] %v1442_v7  ;;  %v1448_v2 = vadd.f32 %v1441_v51, %v1440_v49  ;;  %v1456_v6 = vmul.f32 %v1441_v51, %v1441_v51  ;;  %v1457_v53 = vmul.f32 %v1442_v7, %v1442_v7 }
 0x23e   :  { %1447 = vst [vmem:[%s2856_s6 + $0x18] sm:$0xff] %v1443_v5  ;;  %v1458_v56 = vmul.f32 %v1443_v5, %v1443_v5 }
 0x23f   :  { %v1449_v8 = vadd.f32 %v1448_v2, %v1442_v7  ;;  %v1459_v54 = vadd.f32 %v1456_v6, %v1455_v52 }
 0x241   :  { %v1450_v55 = vadd.f32 %v1449_v8, %v1443_v5  ;;  %v1460_v57 = vadd.f32 %v1459_v54, %v1457_v53 }
 0x243   :  { %1451 = vadd.xlane.f32.xlu0 %v1450_v55  ;;  %v1461_v58 = vadd.f32 %v1460_v57, %v1458_v56 }
 0x245   :  { %1462 = vadd.xlane.f32.xlu1 %v1461_v58 }
 0x2d0   :  { %v1452_v59 = vpop.xlane.xlu0 %1451 }
 0x2d1   :  { %1454 = vst.msk [vmem:[%s2857_s7] sm:$0xff] %vm1453_vm15, %v1452_v59 }
 0x2d2   :  { %v1463_v60 = vpop.xlane.xlu1 %1462 }
 0x2d3   :  { %1464 = vst.msk [vmem:[%s2858_s8] sm:$0xff] %vm1453_vm15, %v1463_v60 }

// kernel: muse_pool_forward.10
= control target key start
LH: loop header
LB: loop body
LE: loop exit
PB: predicated region body
PF: predicated region fallthrough
CT: control target
= control target key end

     0   :  { %v2309_v0 = vmov 0   ;;  %s3061_s1 = inlined_call_operand.vmem [shape: s32[512,1], index: 1, kind: input, shape index: {}]   ;;  %s3062_s0 = inlined_call_operand.vmem [shape: f32[8,512], index: 0, kind: input, shape index: {}]   ;;  %s3063_s2 = inlined_call_operand.vmem [shape: f32[8,512], index: 2, kind: input, shape index: {}]   ;;  %s3064_s3 = inlined_call_operand.vmem [shape: f32[8,8], index: 3, kind: input, shape index: {}]   ;;  %s3065_s4 = inlined_call_operand.vmem [shape: f32[8,512], index: 4, kind: output, shape index: {}]  }
   0x1   :  { %2308 = vset.pattern.permute.xlu1 %v2309_v0  ;;  %2307 = vset.pattern.permute.xlu0 %v2309_v0  ;;  %v38_v1 = vld [vmem:[%s3061_s1 + $0x10] sm:$0xff]  ;;  %v36_v2 = vld [vmem:[%s3061_s1] sm:$0xff]  ;;  %v39_v3 = vld [vmem:[%s3061_s1 + $0x18] sm:$0xff]  ;;  %v25_v0 = vlaneseq }
   0x2   :  { %107 = vperm.xlu1 %2308, %v38_v1   ;;  %101 = vperm.xlu0 %2307, %v36_v2   ;;  %v37_v4 = vld [vmem:[%s3061_s1 + $0x8] sm:$0xff]  ;;  %v40_v6 = vld [vmem:[%s3061_s1 + $0x20] sm:$0xff]  ;;  %v43_v7 = vld [vmem:[%s3061_s1 + $0x38] sm:$0xff] }
   0x3   :  { %v41_v5 = vld [vmem:[%s3061_s1 + $0x28] sm:$0xff]  ;;  %v42_v8 = vld [vmem:[%s3061_s1 + $0x30] sm:$0xff]  ;;  %v44_v10 = vld [vmem:[%s3061_s1 + $0x40] sm:$0xff] }
   0x4   :  { %v45_v9 = vld [vmem:[%s3061_s1 + $0x48] sm:$0xff]  ;;  %v47_v11 = vld [vmem:[%s3061_s1 + $0x58] sm:$0xff]  ;;  %v46_v12 = vld [vmem:[%s3061_s1 + $0x50] sm:$0xff] }
   0x5   :  { %v49_v13 = vld [vmem:[%s3061_s1 + $0x68] sm:$0xff]  ;;  %v48_v14 = vld [vmem:[%s3061_s1 + $0x60] sm:$0xff]  ;;  %v51_v15 = vld [vmem:[%s3061_s1 + $0x78] sm:$0xff] }
   0x6   :  { %110 = vperm.xlu1 %2308, %v39_v3   ;;  %104 = vperm.xlu0 %2307, %v37_v4   ;;  %v50_v16 = vld [vmem:[%s3061_s1 + $0x70] sm:$0xff]  ;;  %v53_v17 = vld [vmem:[%s3061_s1 + $0x88] sm:$0xff]  ;;  %v52_v18 = vld [vmem:[%s3061_s1 + $0x80] sm:$0xff]  ;;  %v2532_v3 = vand.u32 127, %v25_v0 }
   0x7   :  { %v55_v19 = vld [vmem:[%s3061_s1 + $0x98] sm:$0xff]  ;;  %v54_v20 = vld [vmem:[%s3061_s1 + $0x90] sm:$0xff]  ;;  %v57_v21 = vld [vmem:[%s3061_s1 + $0xa8] sm:$0xff] }
   0x8   :  { %v56_v22 = vld [vmem:[%s3061_s1 + $0xa0] sm:$0xff]  ;;  %v59_v23 = vld [vmem:[%s3061_s1 + $0xb8] sm:$0xff]  ;;  %v58_v24 = vld [vmem:[%s3061_s1 + $0xb0] sm:$0xff] }
   0x9   :  { %v61_v25 = vld [vmem:[%s3061_s1 + $0xc8] sm:$0xff]  ;;  %v60_v26 = vld [vmem:[%s3061_s1 + $0xc0] sm:$0xff]  ;;  %v63_v27 = vld [vmem:[%s3061_s1 + $0xd8] sm:$0xff] }
   0xa   :  { %116 = vperm.xlu1 %2308, %v41_v5   ;;  %113 = vperm.xlu0 %2307, %v40_v6   ;;  %v62_v28 = vld [vmem:[%s3061_s1 + $0xd0] sm:$0xff]  ;;  %v65_v29 = vld [vmem:[%s3061_s1 + $0xe8] sm:$0xff]  ;;  %v64_v30 = vld [vmem:[%s3061_s1 + $0xe0] sm:$0xff]  ;;  %v2535_v6 = vadd.s32 128, %v2532_v3 }
   0xb   :  { %v67_v31 = vld [vmem:[%s3061_s1 + $0xf8] sm:$0xff]  ;;  %v66_v32 = vld [vmem:[%s3061_s1 + $0xf0] sm:$0xff]  ;;  %v69_v33 = vld [vmem:[%s3061_s1 + $0x108] sm:$0xff] }
   0xc   :  { %v68_v34 = vld [vmem:[%s3061_s1 + $0x100] sm:$0xff]  ;;  %v71_v35 = vld [vmem:[%s3061_s1 + $0x118] sm:$0xff]  ;;  %v70_v36 = vld [vmem:[%s3061_s1 + $0x110] sm:$0xff] }
   0xd   :  { %v73_v37 = vld [vmem:[%s3061_s1 + $0x128] sm:$0xff]  ;;  %v72_v38 = vld [vmem:[%s3061_s1 + $0x120] sm:$0xff]  ;;  %v75_v40 = vld [vmem:[%s3061_s1 + $0x138] sm:$0xff] }
   0xe   :  { %122 = vperm.xlu1 %2308, %v43_v7   ;;  %119 = vperm.xlu0 %2307, %v42_v8   ;;  %v1065_v39 = vld [vmem:[%s3062_s0 + $0x8] sm:$0xff]  ;;  %v74_v41 = vld [vmem:[%s3061_s1 + $0x130] sm:$0xff]  ;;  %v76_v43 = vld [vmem:[%s3061_s1 + $0x140] sm:$0xff]  ;;  %v2538_v7 = vadd.s32 384, %v2532_v3 }
   0xf   :  { %1132 = vmatprep.mubr.f32.mxu0 %v1065_v39  ;;  %1274 = vmatprep.mubr.f32.mxu1 %v1065_v39  ;;  %v77_v42 = vld [vmem:[%s3061_s1 + $0x148] sm:$0xff]  ;;  %v79_v44 = vld [vmem:[%s3061_s1 + $0x158] sm:$0xff]  ;;  %v78_v45 = vld [vmem:[%s3061_s1 + $0x150] sm:$0xff] }
  0x10   :  { %v81_v46 = vld [vmem:[%s3061_s1 + $0x168] sm:$0xff]  ;;  %v80_v47 = vld [vmem:[%s3061_s1 + $0x160] sm:$0xff]  ;;  %v83_v48 = vld [vmem:[%s3061_s1 + $0x178] sm:$0xff] }
  0x11   :  { %v82_v49 = vld [vmem:[%s3061_s1 + $0x170] sm:$0xff]  ;;  %v85_v50 = vld [vmem:[%s3061_s1 + $0x188] sm:$0xff]  ;;  %v84_v51 = vld [vmem:[%s3061_s1 + $0x180] sm:$0xff] }
  0x12   :  { %128 = vperm.xlu1 %2308, %v45_v9   ;;  %125 = vperm.xlu0 %2307, %v44_v10   ;;  %v87_v52 = vld [vmem:[%s3061_s1 + $0x198] sm:$0xff]  ;;  %v86_v53 = vld [vmem:[%s3061_s1 + $0x190] sm:$0xff]  ;;  %v89_v54 = vld [vmem:[%s3061_s1 + $0x1a8] sm:$0xff]  ;;  %v2541_v10 = vadd.s32 256, %v2532_v3 }
  0x13   :  { %v88_v55 = vld [vmem:[%s3061_s1 + $0x1a0] sm:$0xff]  ;;  %v91_v56 = vld [vmem:[%s3061_s1 + $0x1b8] sm:$0xff]  ;;  %v90_v57 = vld [vmem:[%s3061_s1 + $0x1b0] sm:$0xff] }
  0x14   :  { %v93_v58 = vld [vmem:[%s3061_s1 + $0x1c8] sm:$0xff]  ;;  %v92_v59 = vld [vmem:[%s3061_s1 + $0x1c0] sm:$0xff]  ;;  %v95_v60 = vld [vmem:[%s3061_s1 + $0x1d8] sm:$0xff] }
  0x15   :  { %v94_v61 = vld [vmem:[%s3061_s1 + $0x1d0] sm:$0xff]  ;;  %v97_v62 = vld [vmem:[%s3061_s1 + $0x1e8] sm:$0xff]  ;;  %v96_v63 = vld [vmem:[%s3061_s1 + $0x1e0] sm:$0xff] }
  0x16   :  { %134 = vperm.xlu1 %2308, %v47_v11   ;;  %131 = vperm.xlu0 %2307, %v46_v12   ;;  %v99_v1 = vld [vmem:[%s3061_s1 + $0x1f8] sm:$0xff]  ;;  %v98_v2 = vld [vmem:[%s3061_s1 + $0x1f0] sm:$0xff]  ;;  %v2310_v11 = vmov 1.0|1.0  }
  0x1a   :  { %140 = vperm.xlu1 %2308, %v49_v13   ;;  %137 = vperm.xlu0 %2307, %v48_v14  }
  0x1e   :  { %146 = vperm.xlu1 %2308, %v51_v15   ;;  %143 = vperm.xlu0 %2307, %v50_v16  }
  0x22   :  { %152 = vperm.xlu1 %2308, %v53_v17   ;;  %149 = vperm.xlu0 %2307, %v52_v18  }
  0x26   :  { %158 = vperm.xlu1 %2308, %v55_v19   ;;  %155 = vperm.xlu0 %2307, %v54_v20  }
  0x2a   :  { %164 = vperm.xlu1 %2308, %v57_v21   ;;  %161 = vperm.xlu0 %2307, %v56_v22  }
  0x2e   :  { %170 = vperm.xlu1 %2308, %v59_v23   ;;  %167 = vperm.xlu0 %2307, %v58_v24  }
  0x32   :  { %176 = vperm.xlu1 %2308, %v61_v25   ;;  %173 = vperm.xlu0 %2307, %v60_v26  }
  0x36   :  { %182 = vperm.xlu1 %2308, %v63_v27   ;;  %179 = vperm.xlu0 %2307, %v62_v28  }
  0x3a   :  { %188 = vperm.xlu1 %2308, %v65_v29   ;;  %185 = vperm.xlu0 %2307, %v64_v30  }
  0x3e   :  { %194 = vperm.xlu1 %2308, %v67_v31   ;;  %191 = vperm.xlu0 %2307, %v66_v32  }
  0x42   :  { %200 = vperm.xlu1 %2308, %v69_v33   ;;  %197 = vperm.xlu0 %2307, %v68_v34  }
  0x46   :  { %206 = vperm.xlu1 %2308, %v71_v35   ;;  %203 = vperm.xlu0 %2307, %v70_v36  }
  0x4a   :  { %212 = vperm.xlu1 %2308, %v73_v37   ;;  %209 = vperm.xlu0 %2307, %v72_v38  }
  0x4e   :  { %218 = vperm.xlu1 %2308, %v75_v40   ;;  %215 = vperm.xlu0 %2307, %v74_v41  }
  0x52   :  { %224 = vperm.xlu1 %2308, %v77_v42   ;;  %221 = vperm.xlu0 %2307, %v76_v43  }
  0x56   :  { %230 = vperm.xlu1 %2308, %v79_v44   ;;  %227 = vperm.xlu0 %2307, %v78_v45   ;;  %v1064_v44 = vld [vmem:[%s3062_s0] sm:$0xff] }
  0x5a   :  { %236 = vperm.xlu1 %2308, %v81_v46   ;;  %233 = vperm.xlu0 %2307, %v80_v47   ;;  %v1067_v47 = vld [vmem:[%s3062_s0 + $0x18] sm:$0xff] }
  0x5e   :  { %242 = vperm.xlu1 %2308, %v83_v48   ;;  %239 = vperm.xlu0 %2307, %v82_v49  }
  0x62   :  { %248 = vperm.xlu1 %2308, %v85_v50   ;;  %245 = vperm.xlu0 %2307, %v84_v51  }
  0x66   :  { %254 = vperm.xlu1 %2308, %v87_v52   ;;  %251 = vperm.xlu0 %2307, %v86_v53  }
  0x6a   :  { %260 = vperm.xlu1 %2308, %v89_v54   ;;  %257 = vperm.xlu0 %2307, %v88_v55  }
  0x6e   :  { %266 = vperm.xlu1 %2308, %v91_v56   ;;  %263 = vperm.xlu0 %2307, %v90_v57  }
  0x72   :  { %272 = vperm.xlu1 %2308, %v93_v58   ;;  %269 = vperm.xlu0 %2307, %v92_v59  }
  0x76   :  { %278 = vperm.xlu1 %2308, %v95_v60   ;;  %275 = vperm.xlu0 %2307, %v94_v61  }
  0x7a   :  { %284 = vperm.xlu1 %2308, %v97_v62   ;;  %281 = vperm.xlu0 %2307, %v96_v63  }
  0x7e   :  { %290 = vperm.xlu1 %2308, %v99_v1   ;;  %287 = vperm.xlu0 %2307, %v98_v2  }
  0x81   :  { %v108_v4 = vpop.permute.xlu1 %107  ;;  %v102_v5 = vpop.permute.xlu0 %101 }
  0x82   :  { %vm293_vm0 = vcmp.eq.s32.totalorder %v2535_v6, %v102_v5  ;;  %vm295_vm5 = vcmp.eq.s32.totalorder %v2538_v7, %v102_v5  ;;  %vm292_vm8 = vcmp.eq.s32.totalorder %v2532_v3, %v102_v5  ;;  %vm301_vm9 = vcmp.eq.s32.totalorder %v2535_v6, %v108_v4 }
  0x83   :  { %vm294_vm12 = vcmp.eq.s32.totalorder %v2541_v10, %v102_v5  ;;  %vm303_vm13 = vcmp.eq.s32.totalorder %v2538_v7, %v108_v4 }
  0x85   :  { %v111_v8 = vpop.permute.xlu1 %110  ;;  %v105_v9 = vpop.permute.xlu0 %104 }
  0x86   :  { %vm297_vm1 = vcmp.eq.s32.totalorder %v2535_v6, %v105_v9  ;;  %vm299_vm2 = vcmp.eq.s32.totalorder %v2538_v7, %v105_v9  ;;  %vm296_vm3 = vcmp.eq.s32.totalorder %v2532_v3, %v105_v9  ;;  %vm298_vm6 = vcmp.eq.s32.totalorder %v2541_v10, %v105_v9 }
  0x87   :  { %vm2044_vm4 = vmpackc.low %vm297_vm1, %vm293_vm0  ;;  %vm305_vm10 = vcmp.eq.s32.totalorder %v2535_v6, %v111_v8  ;;  %vm307_vm14 = vcmp.eq.s32.totalorder %v2538_v7, %v111_v8  ;;  %vm300_vm0 = vcmp.eq.s32.totalorder %v2532_v3, %v108_v4  ;;  %vm304_vm1 = vcmp.eq.s32.totalorder %v2532_v3, %v111_v8 }
  0x88   :  { %2045 = vmatprep.subr.msk.bf16.mxu0 %vm2044_vm4, %v2310_v11  ;;  %vm2172_vm7 = vmpackc.low %vm299_vm2, %vm295_vm5  ;;  %vm306_vm4 = vcmp.eq.s32.totalorder %v2541_v10, %v111_v8 }
  0x89   :  { %2173 = vmatprep.subr.msk.bf16.mxu1 %vm2172_vm7, %v2310_v11  ;;  %v117_v12 = vpop.permute.xlu1 %116  ;;  %vm2046_vm11 = vmpackc.low %vm296_vm3, %vm292_vm8  ;;  %v114_v13 = vpop.permute.xlu0 %113  ;;  %vm302_vm3 = vcmp.eq.s32.totalorder %v2541_v10, %v108_v4 }
  0x8a   :  { %2047 = vmatpush1.bf16.msk.msra.mxu0 %vm2046_vm11, %v2310_v11  ;;  %vm2174_vm15 = vmpackc.low %vm298_vm6, %vm294_vm12  ;;  %vm309_vm7 = vcmp.eq.s32.totalorder %v2535_v6, %v114_v13  ;;  %vm313_vm8 = vcmp.eq.s32.totalorder %v2535_v6, %v117_v12  ;;  %vm311_vm11 = vcmp.eq.s32.totalorder %v2538_v7, %v114_v13  ;;  %vm308_vm12 = vcmp.eq.s32.totalorder %v2532_v3, %v114_v13 }
  0x8b   :  { %2175 = vmatpush1.bf16.msk.msra.mxu1 %vm2174_vm15, %v2310_v11  ;;  %vm2048_vm2 = vmpackc.low %vm305_vm10, %vm301_vm9  ;;  %vm315_vm9 = vcmp.eq.s32.totalorder %v2538_v7, %v117_v12  ;;  %vm310_vm15 = vcmp.eq.s32.totalorder %v2541_v10, %v114_v13 }
  0x8c   :  { %2049 = vmatprep.subr.msk.bf16.mxu0 %vm2048_vm2, %v2310_v11  ;;  %vm2176_vm5 = vmpackc.low %vm307_vm14, %vm303_vm13  ;;  %vm312_vm13 = vcmp.eq.s32.totalorder %v2532_v3, %v117_v12  ;;  %vm314_vm2 = vcmp.eq.s32.totalorder %v2541_v10, %v117_v12 }
  0x8d   :  { %2177 = vmatprep.subr.msk.bf16.mxu1 %vm2176_vm5, %v2310_v11  ;;  %v123_v14 = vpop.permute.xlu1 %122  ;;  %vm2050_vm6 = vmpackc.low %vm304_vm1, %vm300_vm0  ;;  %v120_v15 = vpop.permute.xlu0 %119 }
  0x8e   :  { %2051 = vmatpush1.bf16.msk.msra.mxu0 %vm2050_vm6, %v2310_v11  ;;  %vm2178_vm10 = vmpackc.low %vm306_vm4, %vm302_vm3  ;;  %vm317_vm1 = vcmp.eq.s32.totalorder %v2535_v6, %v120_v15  ;;  %vm321_vm5 = vcmp.eq.s32.totalorder %v2535_v6, %v123_v14  ;;  %vm319_vm4 = vcmp.eq.s32.totalorder %v2538_v7, %v120_v15  ;;  %vm316_vm6 = vcmp.eq.s32.totalorder %v2532_v3, %v120_v15 }
  0x8f   :  { %2179 = vmatpush1.bf16.msk.msra.mxu1 %vm2178_vm10, %v2310_v11  ;;  %vm2052_vm14 = vmpackc.low %vm313_vm8, %vm309_vm7  ;;  %vm323_vm7 = vcmp.eq.s32.totalorder %v2538_v7, %v123_v14  ;;  %vm318_vm10 = vcmp.eq.s32.totalorder %v2541_v10, %v120_v15 }
  0x90   :  { %2053 = vmatprep.subr.msk.bf16.mxu0 %vm2052_vm14, %v2310_v11  ;;  %vm2180_vm0 = vmpackc.low %vm315_vm9, %vm311_vm11  ;;  %vm320_vm11 = vcmp.eq.s32.totalorder %v2532_v3, %v123_v14  ;;  %vm322_vm14 = vcmp.eq.s32.totalorder %v2541_v10, %v123_v14 }
  0x91   :  { %2181 = vmatprep.subr.msk.bf16.mxu1 %vm2180_vm0, %v2310_v11  ;;  %v129_v16 = vpop.permute.xlu1 %128  ;;  %vm2054_vm3 = vmpackc.low %vm312_vm13, %vm308_vm12  ;;  %v126_v17 = vpop.permute.xlu0 %125 }
  0x92   :  { %2055 = vmatpush1.bf16.msk.msra.mxu0 %vm2054_vm3, %v2310_v11  ;;  %vm2182_vm8 = vmpackc.low %vm314_vm2, %vm310_vm15  ;;  %vm325_vm13 = vcmp.eq.s32.totalorder %v2535_v6, %v126_v17  ;;  %vm329_vm0 = vcmp.eq.s32.totalorder %v2535_v6, %v129_v16  ;;  %vm327_vm2 = vcmp.eq.s32.totalorder %v2538_v7, %v126_v17  ;;  %vm324_vm3 = vcmp.eq.s32.totalorder %v2532_v3, %v126_v17 }
  0x93   :  { %2183 = vmatpush1.bf16.msk.msra.mxu1 %vm2182_vm8, %v2310_v11  ;;  %vm2056_vm9 = vmpackc.low %vm321_vm5, %vm317_vm1  ;;  %vm331_vm1 = vcmp.eq.s32.totalorder %v2538_v7, %v129_v16  ;;  %vm326_vm8 = vcmp.eq.s32.totalorder %v2541_v10, %v126_v17 }
  0x94   :  { %2057 = vmatprep.subr.msk.bf16.mxu0 %vm2056_vm9, %v2310_v11  ;;  %vm2184_vm12 = vmpackc.low %vm323_vm7, %vm319_vm4  ;;  %vm328_vm4 = vcmp.eq.s32.totalorder %v2532_v3, %v129_v16  ;;  %vm330_vm9 = vcmp.eq.s32.totalorder %v2541_v10, %v129_v16  ;;  %v1365_v16 = vld [vmem:[%s3063_s2 + $0x8] sm:$0xff] }
  0x95   :  { %2185 = vmatprep.subr.msk.bf16.mxu1 %vm2184_vm12, %v2310_v11  ;;  %v135_v18 = vpop.permute.xlu1 %134  ;;  %vm2058_vm15 = vmpackc.low %vm320_vm11, %vm316_vm6  ;;  %v132_v19 = vpop.permute.xlu0 %131 }
  0x96   :  { %2059 = vmatpush1.bf16.msk.msra.mxu0 %vm2058_vm15, %v2310_v11  ;;  %vm2186_vm5 = vmpackc.low %vm322_vm14, %vm318_vm10  ;;  %vm333_vm11 = vcmp.eq.s32.totalorder %v2535_v6, %v132_v19  ;;  %vm337_vm12 = vcmp.eq.s32.totalorder %v2535_v6, %v135_v18  ;;  %vm335_vm14 = vcmp.eq.s32.totalorder %v2538_v7, %v132_v19  ;;  %vm332_vm15 = vcmp.eq.s32.totalorder %v2532_v3, %v132_v19 }
  0x97   :  { %2187 = vmatpush1.bf16.msk.msra.mxu1 %vm2186_vm5, %v2310_v11  ;;  %vm2060_vm7 = vmpackc.low %vm329_vm0, %vm325_vm13  ;;  %vm339_vm13 = vcmp.eq.s32.totalorder %v2538_v7, %v135_v18  ;;  %vm334_vm5 = vcmp.eq.s32.totalorder %v2541_v10, %v132_v19  ;;  %v1366_v19 = vld [vmem:[%s3063_s2 + $0x10] sm:$0xff] }
  0x98   :  { %2061 = vmatprep.subr.msk.bf16.mxu0 %vm2060_vm7, %v2310_v11  ;;  %vm2188_vm6 = vmpackc.low %vm331_vm1, %vm327_vm2  ;;  %vm336_vm2 = vcmp.eq.s32.totalorder %v2532_v3, %v135_v18  ;;  %vm338_vm7 = vcmp.eq.s32.totalorder %v2541_v10, %v135_v18  ;;  %v1367_v18 = vld [vmem:[%s3063_s2 + $0x18] sm:$0xff] }
  0x99   :  { %2189 = vmatprep.subr.msk.bf16.mxu1 %vm2188_vm6, %v2310_v11  ;;  %v141_v20 = vpop.permute.xlu1 %140  ;;  %vm2062_vm10 = vmpackc.low %vm328_vm4, %vm324_vm3  ;;  %v138_v21 = vpop.permute.xlu0 %137 }
  0x9a   :  { %2063 = vmatpush1.bf16.msk.msra.mxu0 %vm2062_vm10, %v2310_v11  ;;  %vm2190_vm0 = vmpackc.low %vm330_vm9, %vm326_vm8  ;;  %vm341_vm4 = vcmp.eq.s32.totalorder %v2535_v6, %v138_v21  ;;  %vm345_vm6 = vcmp.eq.s32.totalorder %v2535_v6, %v141_v20  ;;  %vm343_vm9 = vcmp.eq.s32.totalorder %v2538_v7, %v138_v21  ;;  %vm340_vm10 = vcmp.eq.s32.totalorder %v2532_v3, %v138_v21 }
  0x9b   :  { %2191 = vmatpush1.bf16.msk.msra.mxu1 %vm2190_vm0, %v2310_v11  ;;  %vm2064_vm1 = vmpackc.low %vm337_vm12, %vm333_vm11  ;;  %vm347_vm11 = vcmp.eq.s32.totalorder %v2538_v7, %v141_v20  ;;  %vm342_vm0 = vcmp.eq.s32.totalorder %v2541_v10, %v138_v21 }
  0x9c   :  { %2065 = vmatprep.subr.msk.bf16.mxu0 %vm2064_vm1, %v2310_v11  ;;  %vm2192_vm3 = vmpackc.low %vm339_vm13, %vm335_vm14  ;;  %vm344_vm14 = vcmp.eq.s32.totalorder %v2532_v3, %v141_v20  ;;  %vm346_vm1 = vcmp.eq.s32.totalorder %v2541_v10, %v141_v20 }
  0x9d   :  { %2193 = vmatprep.subr.msk.bf16.mxu1 %vm2192_vm3, %v2310_v11  ;;  %v147_v22 = vpop.permute.xlu1 %146  ;;  %vm2066_vm8 = vmpackc.low %vm336_vm2, %vm332_vm15  ;;  %v144_v23 = vpop.permute.xlu0 %143 }
  0x9e   :  { %2067 = vmatpush1.bf16.msk.msra.mxu0 %vm2066_vm8, %v2310_v11  ;;  %vm2194_vm12 = vmpackc.low %vm338_vm7, %vm334_vm5  ;;  %vm349_vm2 = vcmp.eq.s32.totalorder %v2535_v6, %v144_v23  ;;  %vm353_vm3 = vcmp.eq.s32.totalorder %v2535_v6, %v147_v22  ;;  %vm351_vm7 = vcmp.eq.s32.totalorder %v2538_v7, %v144_v23  ;;  %vm348_vm8 = vcmp.eq.s32.totalorder %v2532_v3, %v144_v23 }
  0x9f   :  { %2195 = vmatpush1.bf16.msk.msra.mxu1 %vm2194_vm12, %v2310_v11  ;;  %vm2068_vm13 = vmpackc.low %vm345_vm6, %vm341_vm4  ;;  %vm355_vm4 = vcmp.eq.s32.totalorder %v2538_v7, %v147_v22  ;;  %vm350_vm12 = vcmp.eq.s32.totalorder %v2541_v10, %v144_v23  ;;  %v1363_v23 = vld [vmem:[%s3064_s3] sm:$0xff] }
  0xa0   :  { %2069 = vmatprep.subr.msk.bf16.mxu0 %vm2068_vm13, %v2310_v11  ;;  %vm2196_vm15 = vmpackc.low %vm347_vm11, %vm343_vm9  ;;  %vm352_vm9 = vcmp.eq.s32.totalorder %v2532_v3, %v147_v22  ;;  %vm354_vm13 = vcmp.eq.s32.totalorder %v2541_v10, %v147_v22 }
  0xa1   :  { %2197 = vmatprep.subr.msk.bf16.mxu1 %vm2196_vm15, %v2310_v11  ;;  %v153_v24 = vpop.permute.xlu1 %152  ;;  %vm2070_vm5 = vmpackc.low %vm344_vm14, %vm340_vm10  ;;  %v150_v25 = vpop.permute.xlu0 %149 }
  0xa2   :  { %2071 = vmatpush1.bf16.msk.msra.mxu0 %vm2070_vm5, %v2310_v11  ;;  %vm2198_vm6 = vmpackc.low %vm346_vm1, %vm342_vm0  ;;  %vm357_vm14 = vcmp.eq.s32.totalorder %v2535_v6, %v150_v25  ;;  %vm361_vm15 = vcmp.eq.s32.totalorder %v2535_v6, %v153_v24  ;;  %vm359_vm1 = vcmp.eq.s32.totalorder %v2538_v7, %v150_v25  ;;  %vm356_vm5 = vcmp.eq.s32.totalorder %v2532_v3, %v150_v25 }
  0xa3   :  { %2199 = vmatpush1.bf16.msk.msra.mxu1 %vm2198_vm6, %v2310_v11  ;;  %vm2072_vm11 = vmpackc.low %vm353_vm3, %vm349_vm2  ;;  %vm363_vm2 = vcmp.eq.s32.totalorder %v2538_v7, %v153_v24  ;;  %vm358_vm6 = vcmp.eq.s32.totalorder %v2541_v10, %v150_v25 }
  0xa4   :  { %2073 = vmatprep.subr.msk.bf16.mxu0 %vm2072_vm11, %v2310_v11  ;;  %vm2200_vm10 = vmpackc.low %vm355_vm4, %vm351_vm7  ;;  %vm360_vm7 = vcmp.eq.s32.totalorder %v2532_v3, %v153_v24  ;;  %vm362_vm11 = vcmp.eq.s32.totalorder %v2541_v10, %v153_v24 }
  0xa5   :  { %2201 = vmatprep.subr.msk.bf16.mxu1 %vm2200_vm10, %v2310_v11  ;;  %v159_v26 = vpop.permute.xlu1 %158  ;;  %vm2074_vm0 = vmpackc.low %vm352_vm9, %vm348_vm8  ;;  %v156_v27 = vpop.permute.xlu0 %155 }
  0xa6   :  { %2075 = vmatpush1.bf16.msk.msra.mxu0 %vm2074_vm0, %v2310_v11  ;;  %vm2202_vm3 = vmpackc.low %vm354_vm13, %vm350_vm12  ;;  %vm365_vm9 = vcmp.eq.s32.totalorder %v2535_v6, %v156_v27  ;;  %vm369_vm10 = vcmp.eq.s32.totalorder %v2535_v6, %v159_v26  ;;  %vm367_vm13 = vcmp.eq.s32.totalorder %v2538_v7, %v156_v27  ;;  %vm364_vm0 = vcmp.eq.s32.totalorder %v2532_v3, %v156_v27 }
  0xa7   :  { %2203 = vmatpush1.bf16.msk.msra.mxu1 %vm2202_vm3, %v2310_v11  ;;  %vm2076_vm4 = vmpackc.low %vm361_vm15, %vm357_vm14  ;;  %vm371_vm14 = vcmp.eq.s32.totalorder %v2538_v7, %v159_v26  ;;  %vm366_vm3 = vcmp.eq.s32.totalorder %v2541_v10, %v156_v27 }
  0xa8   :  { %2077 = vmatprep.subr.msk.bf16.mxu0 %vm2076_vm4, %v2310_v11  ;;  %vm2204_vm8 = vmpackc.low %vm363_vm2, %vm359_vm1  ;;  %vm368_vm1 = vcmp.eq.s32.totalorder %v2532_v3, %v159_v26  ;;  %vm370_vm4 = vcmp.eq.s32.totalorder %v2541_v10, %v159_v26 }
  0xa9   :  { %2205 = vmatprep.subr.msk.bf16.mxu1 %vm2204_vm8, %v2310_v11  ;;  %v165_v28 = vpop.permute.xlu1 %164  ;;  %vm2078_vm12 = vmpackc.low %vm360_vm7, %vm356_vm5  ;;  %v162_v29 = vpop.permute.xlu0 %161 }
  0xaa   :  { %2079 = vmatpush1.bf16.msk.msra.mxu0 %vm2078_vm12, %v2310_v11  ;;  %vm2206_vm15 = vmpackc.low %vm362_vm11, %vm358_vm6  ;;  %vm373_vm7 = vcmp.eq.s32.totalorder %v2535_v6, %v162_v29  ;;  %vm377_vm8 = vcmp.eq.s32.totalorder %v2535_v6, %v165_v28  ;;  %vm375_vm11 = vcmp.eq.s32.totalorder %v2538_v7, %v162_v29  ;;  %vm372_vm12 = vcmp.eq.s32.totalorder %v2532_v3, %v162_v29 }
  0xab   :  { %2207 = vmatpush1.bf16.msk.msra.mxu1 %vm2206_vm15, %v2310_v11  ;;  %vm2080_vm2 = vmpackc.low %vm369_vm10, %vm365_vm9  ;;  %vm379_vm9 = vcmp.eq.s32.totalorder %v2538_v7, %v165_v28  ;;  %vm374_vm15 = vcmp.eq.s32.totalorder %v2541_v10, %v162_v29 }
  0xac   :  { %2081 = vmatprep.subr.msk.bf16.mxu0 %vm2080_vm2, %v2310_v11  ;;  %vm2208_vm5 = vmpackc.low %vm371_vm14, %vm367_vm13  ;;  %vm376_vm13 = vcmp.eq.s32.totalorder %v2532_v3, %v165_v28  ;;  %vm378_vm2 = vcmp.eq.s32.totalorder %v2541_v10, %v165_v28 }
  0xad   :  { %2209 = vmatprep.subr.msk.bf16.mxu1 %vm2208_vm5, %v2310_v11  ;;  %v171_v30 = vpop.permute.xlu1 %170  ;;  %vm2082_vm6 = vmpackc.low %vm368_vm1, %vm364_vm0  ;;  %v168_v31 = vpop.permute.xlu0 %167 }
  0xae   :  { %2083 = vmatpush1.bf16.msk.msra.mxu0 %vm2082_vm6, %v2310_v11  ;;  %vm2210_vm10 = vmpackc.low %vm370_vm4, %vm366_vm3  ;;  %vm381_vm1 = vcmp.eq.s32.totalorder %v2535_v6, %v168_v31  ;;  %vm385_vm5 = vcmp.eq.s32.totalorder %v2535_v6, %v171_v30  ;;  %vm383_vm4 = vcmp.eq.s32.totalorder %v2538_v7, %v168_v31  ;;  %vm380_vm6 = vcmp.eq.s32.totalorder %v2532_v3, %v168_v31 }
  0xaf   :  { %2211 = vmatpush1.bf16.msk.msra.mxu1 %vm2210_vm10, %v2310_v11  ;;  %vm2084_vm14 = vmpackc.low %vm377_vm8, %vm373_vm7  ;;  %vm387_vm7 = vcmp.eq.s32.totalorder %v2538_v7, %v171_v30  ;;  %vm382_vm10 = vcmp.eq.s32.totalorder %v2541_v10, %v168_v31 }
  0xb0   :  { %2085 = vmatprep.subr.msk.bf16.mxu0 %vm2084_vm14, %v2310_v11  ;;  %vm2212_vm0 = vmpackc.low %vm379_vm9, %vm375_vm11  ;;  %vm384_vm11 = vcmp.eq.s32.totalorder %v2532_v3, %v171_v30  ;;  %vm386_vm14 = vcmp.eq.s32.totalorder %v2541_v10, %v171_v30 }
  0xb1   :  { %2213 = vmatprep.subr.msk.bf16.mxu1 %vm2212_vm0, %v2310_v11  ;;  %v177_v32 = vpop.permute.xlu1 %176  ;;  %vm2086_vm3 = vmpackc.low %vm376_vm13, %vm372_vm12  ;;  %v174_v33 = vpop.permute.xlu0 %173 }
  0xb2   :  { %2087 = vmatpush1.bf16.msk.msra.mxu0 %vm2086_vm3, %v2310_v11  ;;  %vm2214_vm8 = vmpackc.low %vm378_vm2, %vm374_vm15  ;;  %vm389_vm13 = vcmp.eq.s32.totalorder %v2535_v6, %v174_v33  ;;  %vm393_vm0 = vcmp.eq.s32.totalorder %v2535_v6, %v177_v32  ;;  %vm391_vm2 = vcmp.eq.s32.totalorder %v2538_v7, %v174_v33  ;;  %vm388_vm3 = vcmp.eq.s32.totalorder %v2532_v3, %v174_v33 }
  0xb3   :  { %2215 = vmatpush1.bf16.msk.msra.mxu1 %vm2214_vm8, %v2310_v11  ;;  %vm2088_vm9 = vmpackc.low %vm385_vm5, %vm381_vm1  ;;  %vm395_vm1 = vcmp.eq.s32.totalorder %v2538_v7, %v177_v32  ;;  %vm390_vm8 = vcmp.eq.s32.totalorder %v2541_v10, %v174_v33 }
  0xb4   :  { %2089 = vmatprep.subr.msk.bf16.mxu0 %vm2088_vm9, %v2310_v11  ;;  %vm2216_vm12 = vmpackc.low %vm387_vm7, %vm383_vm4  ;;  %vm392_vm4 = vcmp.eq.s32.totalorder %v2532_v3, %v177_v32  ;;  %vm394_vm9 = vcmp.eq.s32.totalorder %v2541_v10, %v177_v32 }
  0xb5   :  { %2217 = vmatprep.subr.msk.bf16.mxu1 %vm2216_vm12, %v2310_v11  ;;  %v183_v34 = vpop.permute.xlu1 %182  ;;  %vm2090_vm15 = vmpackc.low %vm384_vm11, %vm380_vm6  ;;  %v180_v35 = vpop.permute.xlu0 %179 }
  0xb6   :  { %2091 = vmatpush1.bf16.msk.msra.mxu0 %vm2090_vm15, %v2310_v11  ;;  %vm2218_vm5 = vmpackc.low %vm386_vm14, %vm382_vm10  ;;  %vm397_vm11 = vcmp.eq.s32.totalorder %v2535_v6, %v180_v35  ;;  %vm401_vm12 = vcmp.eq.s32.totalorder %v2535_v6, %v183_v34  ;;  %vm399_vm14 = vcmp.eq.s32.totalorder %v2538_v7, %v180_v35  ;;  %vm396_vm15 = vcmp.eq.s32.totalorder %v2532_v3, %v180_v35 }
  0xb7   :  { %2219 = vmatpush1.bf16.msk.msra.mxu1 %vm2218_vm5, %v2310_v11  ;;  %vm2092_vm7 = vmpackc.low %vm393_vm0, %vm389_vm13  ;;  %vm403_vm13 = vcmp.eq.s32.totalorder %v2538_v7, %v183_v34  ;;  %vm398_vm5 = vcmp.eq.s32.totalorder %v2541_v10, %v180_v35 }
  0xb8   :  { %2093 = vmatprep.subr.msk.bf16.mxu0 %vm2092_vm7, %v2310_v11  ;;  %vm2220_vm6 = vmpackc.low %vm395_vm1, %vm391_vm2  ;;  %vm400_vm2 = vcmp.eq.s32.totalorder %v2532_v3, %v183_v34  ;;  %vm402_vm7 = vcmp.eq.s32.totalorder %v2541_v10, %v183_v34 }
  0xb9   :  { %2221 = vmatprep.subr.msk.bf16.mxu1 %vm2220_vm6, %v2310_v11  ;;  %v189_v36 = vpop.permute.xlu1 %188  ;;  %vm2094_vm10 = vmpackc.low %vm392_vm4, %vm388_vm3  ;;  %v186_v37 = vpop.permute.xlu0 %185 }
  0xba   :  { %2095 = vmatpush1.bf16.msk.msra.mxu0 %vm2094_vm10, %v2310_v11  ;;  %vm2222_vm0 = vmpackc.low %vm394_vm9, %vm390_vm8  ;;  %vm405_vm4 = vcmp.eq.s32.totalorder %v2535_v6, %v186_v37  ;;  %vm409_vm6 = vcmp.eq.s32.totalorder %v2535_v6, %v189_v36  ;;  %vm407_vm9 = vcmp.eq.s32.totalorder %v2538_v7, %v186_v37  ;;  %vm404_vm10 = vcmp.eq.s32.totalorder %v2532_v3, %v186_v37 }
  0xbb   :  { %2223 = vmatpush1.bf16.msk.msra.mxu1 %vm2222_vm0, %v2310_v11  ;;  %vm2096_vm1 = vmpackc.low %vm401_vm12, %vm397_vm11  ;;  %vm411_vm11 = vcmp.eq.s32.totalorder %v2538_v7, %v189_v36  ;;  %vm406_vm0 = vcmp.eq.s32.totalorder %v2541_v10, %v186_v37 }
  0xbc   :  { %2097 = vmatprep.subr.msk.bf16.mxu0 %vm2096_vm1, %v2310_v11  ;;  %vm2224_vm3 = vmpackc.low %vm403_vm13, %vm399_vm14  ;;  %vm408_vm14 = vcmp.eq.s32.totalorder %v2532_v3, %v189_v36  ;;  %vm410_vm1 = vcmp.eq.s32.totalorder %v2541_v10, %v189_v36 }
  0xbd   :  { %2225 = vmatprep.subr.msk.bf16.mxu1 %vm2224_vm3, %v2310_v11  ;;  %v195_v38 = vpop.permute.xlu1 %194  ;;  %vm2098_vm8 = vmpackc.low %vm400_vm2, %vm396_vm15  ;;  %v192_v39 = vpop.permute.xlu0 %191 }
  0xbe   :  { %2099 = vmatpush1.bf16.msk.msra.mxu0 %vm2098_vm8, %v2310_v11  ;;  %vm2226_vm12 = vmpackc.low %vm402_vm7, %vm398_vm5  ;;  %vm413_vm2 = vcmp.eq.s32.totalorder %v2535_v6, %v192_v39  ;;  %vm417_vm3 = vcmp.eq.s32.totalorder %v2535_v6, %v195_v38  ;;  %vm415_vm7 = vcmp.eq.s32.totalorder %v2538_v7, %v192_v39  ;;  %vm412_vm8 = vcmp.eq.s32.totalorder %v2532_v3, %v192_v39 }
  0xbf   :  { %2227 = vmatpush1.bf16.msk.msra.mxu1 %vm2226_vm12, %v2310_v11  ;;  %vm2100_vm13 = vmpackc.low %vm409_vm6, %vm405_vm4  ;;  %vm419_vm4 = vcmp.eq.s32.totalorder %v2538_v7, %v195_v38  ;;  %vm414_vm12 = vcmp.eq.s32.totalorder %v2541_v10, %v192_v39 }
  0xc0   :  { %2101 = vmatprep.subr.msk.bf16.mxu0 %vm2100_vm13, %v2310_v11  ;;  %vm2228_vm15 = vmpackc.low %vm411_vm11, %vm407_vm9  ;;  %vm416_vm9 = vcmp.eq.s32.totalorder %v2532_v3, %v195_v38  ;;  %vm418_vm13 = vcmp.eq.s32.totalorder %v2541_v10, %v195_v38 }
  0xc1   :  { %2229 = vmatprep.subr.msk.bf16.mxu1 %vm2228_vm15, %v2310_v11  ;;  %v201_v40 = vpop.permute.xlu1 %200  ;;  %vm2102_vm5 = vmpackc.low %vm408_vm14, %vm404_vm10  ;;  %v198_v41 = vpop.permute.xlu0 %197 }
  0xc2   :  { %2103 = vmatpush1.bf16.msk.msra.mxu0 %vm2102_vm5, %v2310_v11  ;;  %vm2230_vm6 = vmpackc.low %vm410_vm1, %vm406_vm0  ;;  %vm421_vm14 = vcmp.eq.s32.totalorder %v2535_v6, %v198_v41  ;;  %vm425_vm15 = vcmp.eq.s32.totalorder %v2535_v6, %v201_v40  ;;  %vm423_vm1 = vcmp.eq.s32.totalorder %v2538_v7, %v198_v41  ;;  %vm420_vm5 = vcmp.eq.s32.totalorder %v2532_v3, %v198_v41 }
  0xc3   :  { %2231 = vmatpush1.bf16.msk.msra.mxu1 %vm2230_vm6, %v2310_v11  ;;  %vm2104_vm11 = vmpackc.low %vm417_vm3, %vm413_vm2  ;;  %vm427_vm2 = vcmp.eq.s32.totalorder %v2538_v7, %v201_v40  ;;  %vm424_vm3 = vcmp.eq.s32.totalorder %v2532_v3, %v201_v40  ;;  %vm422_vm6 = vcmp.eq.s32.totalorder %v2541_v10, %v198_v41 }
  0xc4   :  { %2105 = vmatprep.subr.msk.bf16.mxu0 %vm2104_vm11, %v2310_v11  ;;  %vm2232_vm10 = vmpackc.low %vm419_vm4, %vm415_vm7  ;;  %vm426_vm4 = vcmp.eq.s32.totalorder %v2541_v10, %v201_v40 }
  0xc5   :  { %2233 = vmatprep.subr.msk.bf16.mxu1 %vm2232_vm10, %v2310_v11  ;;  %v207_v42 = vpop.permute.xlu1 %206  ;;  %vm2106_vm0 = vmpackc.low %vm416_vm9, %vm412_vm8  ;;  %v204_v43 = vpop.permute.xlu0 %203 }
  0xc6   :  { %2107 = vmatpush1.bf16.msk.msra.mxu0 %vm2106_vm0, %v2310_v11  ;;  %vm2234_vm7 = vmpackc.low %vm418_vm13, %vm414_vm12  ;;  %vm429_vm11 = vcmp.eq.s32.totalorder %v2535_v6, %v204_v43  ;;  %vm433_vm12 = vcmp.eq.s32.totalorder %v2535_v6, %v207_v42  ;;  %vm431_vm10 = vcmp.eq.s32.totalorder %v2538_v7, %v204_v43  ;;  %vm428_vm0 = vcmp.eq.s32.totalorder %v2532_v3, %v204_v43 }
  0xc7   :  { %2235 = vmatpush1.bf16.msk.msra.mxu1 %vm2234_vm7, %v2310_v11  ;;  %vm2108_vm8 = vmpackc.low %vm425_vm15, %vm421_vm14  ;;  %vm435_vm14 = vcmp.eq.s32.totalorder %v2538_v7, %v207_v42  ;;  %vm432_vm15 = vcmp.eq.s32.totalorder %v2532_v3, %v207_v42 }
  0xc8   :  { %2109 = vmatprep.subr.msk.bf16.mxu0 %vm2108_vm8, %v2310_v11  ;;  %vm2236_vm9 = vmpackc.low %vm427_vm2, %vm423_vm1  ;;  %vm434_vm2 = vcmp.eq.s32.totalorder %v2541_v10, %v207_v42 }
  0xc9   :  { %2237 = vmatprep.subr.msk.bf16.mxu1 %vm2236_vm9, %v2310_v11  ;;  %v213_v45 = vpop.permute.xlu1 %212  ;;  %v210_v46 = vpop.permute.xlu0 %209  ;;  %1133 = vmatmul.mubr.f32.vlgmr.msra.gmra.mrb[0].mxu0 %v1064_v44  ;;  %vm2110_vm13 = vmpackc.low %vm424_vm3, %vm420_vm5  ;;  %vm430_vm3 = vcmp.eq.s32.totalorder %v2541_v10, %v204_v43 }
  0xca   :  { %2111 = vmatpush1.bf16.msk.msra.mxu0 %vm2110_vm13, %v2310_v11  ;;  %vm2238_vm1 = vmpackc.low %vm426_vm4, %vm422_vm6  ;;  %1275 = vmatmul.mubr.f32.vlgmr.msra.gmra.mrb[0].mxu1 %v1064_v44  ;;  %vm437_vm4 = vcmp.eq.s32.totalorder %v2535_v6, %v210_v46  ;;  %vm441_vm6 = vcmp.eq.s32.totalorder %v2535_v6, %v213_v45  ;;  %vm439_vm9 = vcmp.eq.s32.totalorder %v2538_v7, %v210_v46 }
  0xcb   :  { %vm2112_vm5 = vmpackc.low %vm433_vm12, %vm429_vm11  ;;  %2239 = vmatpush1.bf16.msk.msra.mxu1 %vm2238_vm1, %v2310_v11  ;;  %vm443_vm11 = vcmp.eq.s32.totalorder %v2538_v7, %v213_v45  ;;  %1203 = vmatprep.mubr.f32.mxu0 %v1067_v47  ;;  %vm440_vm12 = vcmp.eq.s32.totalorder %v2532_v3, %v213_v45  ;;  %vm436_vm13 = vcmp.eq.s32.totalorder %v2532_v3, %v210_v46 }
  0xcc   :  { %2113 = vmatprep.subr.msk.bf16.mxu0 %vm2112_vm5, %v2310_v11  ;;  %vm2240_vm7 = vmpackc.low %vm435_vm14, %vm431_vm10  ;;  %vm442_vm14 = vcmp.eq.s32.totalorder %v2541_v10, %v213_v45  ;;  %1345 = vmatprep.mubr.f32.mxu1 %v1067_v47 }
  0xcd   :  { %2241 = vmatprep.subr.msk.bf16.mxu1 %vm2240_vm7, %v2310_v11  ;;  %v219_v48 = vpop.permute.xlu1 %218  ;;  %v216_v49 = vpop.permute.xlu0 %215  ;;  %vm2114_vm8 = vmpackc.low %vm432_vm15, %vm428_vm0  ;;  %vm438_vm15 = vcmp.eq.s32.totalorder %v2541_v10, %v210_v46 }
  0xce   :  { %2115 = vmatpush1.bf16.msk.msra.mxu0 %vm2114_vm8, %v2310_v11  ;;  %vm2242_vm10 = vmpackc.low %vm434_vm2, %vm430_vm3  ;;  %vm445_vm5 = vcmp.eq.s32.totalorder %v2535_v6, %v216_v49  ;;  %vm449_vm7 = vcmp.eq.s32.totalorder %v2535_v6, %v219_v48  ;;  %vm447_vm3 = vcmp.eq.s32.totalorder %v2538_v7, %v216_v49  ;;  %vm444_vm8 = vcmp.eq.s32.totalorder %v2532_v3, %v216_v49 }
  0xcf   :  { %vm2116_vm0 = vmpackc.low %vm441_vm6, %vm437_vm4  ;;  %2243 = vmatpush1.bf16.msk.msra.mxu1 %vm2242_vm10, %v2310_v11  ;;  %vm451_vm4 = vcmp.eq.s32.totalorder %v2538_v7, %v219_v48  ;;  %vm448_vm6 = vcmp.eq.s32.totalorder %v2532_v3, %v219_v48  ;;  %vm446_vm10 = vcmp.eq.s32.totalorder %v2541_v10, %v216_v49 }
  0xd0   :  { %2117 = vmatprep.subr.msk.bf16.mxu0 %vm2116_vm0, %v2310_v11  ;;  %vm2244_vm1 = vmpackc.low %vm443_vm11, %vm439_vm9  ;;  %vm450_vm11 = vcmp.eq.s32.totalorder %v2541_v10, %v219_v48 }
  0xd1   :  { %2245 = vmatprep.subr.msk.bf16.mxu1 %vm2244_vm1, %v2310_v11  ;;  %v225_v50 = vpop.permute.xlu1 %224  ;;  %v222_v51 = vpop.permute.xlu0 %221  ;;  %vm2118_vm2 = vmpackc.low %vm440_vm12, %vm436_vm13 }
  0xd2   :  { %2119 = vmatpush1.bf16.msk.msra.mxu0 %vm2118_vm2, %v2310_v11  ;;  %vm2246_vm9 = vmpackc.low %vm442_vm14, %vm438_vm15  ;;  %vm453_vm0 = vcmp.eq.s32.totalorder %v2535_v6, %v222_v51  ;;  %vm457_vm1 = vcmp.eq.s32.totalorder %v2535_v6, %v225_v50  ;;  %vm455_vm15 = vcmp.eq.s32.totalorder %v2538_v7, %v222_v51  ;;  %vm452_vm2 = vcmp.eq.s32.totalorder %v2532_v3, %v222_v51 }
  0xd3   :  { %vm2120_vm12 = vmpackc.low %vm449_vm7, %vm445_vm5  ;;  %2247 = vmatpush1.bf16.msk.msra.mxu1 %vm2246_vm9, %v2310_v11  ;;  %vm459_vm5 = vcmp.eq.s32.totalorder %v2538_v7, %v225_v50  ;;  %vm456_vm7 = vcmp.eq.s32.totalorder %v2532_v3, %v225_v50  ;;  %vm454_vm9 = vcmp.eq.s32.totalorder %v2541_v10, %v222_v51 }
  0xd4   :  { %2121 = vmatprep.subr.msk.bf16.mxu0 %vm2120_vm12, %v2310_v11  ;;  %vm2248_vm13 = vmpackc.low %vm451_vm4, %vm447_vm3  ;;  %vm458_vm4 = vcmp.eq.s32.totalorder %v2541_v10, %v225_v50 }
  0xd5   :  { %2249 = vmatprep.subr.msk.bf16.mxu1 %vm2248_vm13, %v2310_v11  ;;  %v231_v52 = vpop.permute.xlu1 %230  ;;  %v228_v53 = vpop.permute.xlu0 %227  ;;  %vm2122_vm14 = vmpackc.low %vm448_vm6, %vm444_vm8 }
  0xd6   :  { %2123 = vmatpush1.bf16.msk.msra.mxu0 %vm2122_vm14, %v2310_v11  ;;  %vm2250_vm3 = vmpackc.low %vm450_vm11, %vm446_vm10  ;;  %vm461_vm12 = vcmp.eq.s32.totalorder %v2535_v6, %v228_v53  ;;  %vm465_vm13 = vcmp.eq.s32.totalorder %v2535_v6, %v231_v52  ;;  %vm463_vm10 = vcmp.eq.s32.totalorder %v2538_v7, %v228_v53  ;;  %vm460_vm14 = vcmp.eq.s32.totalorder %v2532_v3, %v228_v53 }
  0xd7   :  { %vm2124_vm6 = vmpackc.low %vm457_vm1, %vm453_vm0  ;;  %2251 = vmatpush1.bf16.msk.msra.mxu1 %vm2250_vm3, %v2310_v11  ;;  %vm467_vm0 = vcmp.eq.s32.totalorder %v2538_v7, %v231_v52  ;;  %vm464_vm1 = vcmp.eq.s32.totalorder %v2532_v3, %v231_v52  ;;  %vm462_vm3 = vcmp.eq.s32.totalorder %v2541_v10, %v228_v53 }
  0xd8   :  { %2125 = vmatprep.subr.msk.bf16.mxu0 %vm2124_vm6, %v2310_v11  ;;  %vm2252_vm8 = vmpackc.low %vm459_vm5, %vm455_vm15  ;;  %vm466_vm5 = vcmp.eq.s32.totalorder %v2541_v10, %v231_v52 }
  0xd9   :  { %2253 = vmatprep.subr.msk.bf16.mxu1 %vm2252_vm8, %v2310_v11  ;;  %v237_v54 = vpop.permute.xlu1 %236  ;;  %v234_v55 = vpop.permute.xlu0 %233  ;;  %vm2126_vm11 = vmpackc.low %vm456_vm7, %vm452_vm2 }
  0xda   :  { %2127 = vmatpush1.bf16.msk.msra.mxu0 %vm2126_vm11, %v2310_v11  ;;  %vm2254_vm15 = vmpackc.low %vm458_vm4, %vm454_vm9  ;;  %vm469_vm6 = vcmp.eq.s32.totalorder %v2535_v6, %v234_v55  ;;  %vm473_vm8 = vcmp.eq.s32.totalorder %v2535_v6, %v237_v54  ;;  %vm471_vm9 = vcmp.eq.s32.totalorder %v2538_v7, %v234_v55  ;;  %vm468_vm11 = vcmp.eq.s32.totalorder %v2532_v3, %v234_v55 }
  0xdb   :  { %vm2128_vm7 = vmpackc.low %vm465_vm13, %vm461_vm12  ;;  %2255 = vmatpush1.bf16.msk.msra.mxu1 %vm2254_vm15, %v2310_v11  ;;  %vm475_vm12 = vcmp.eq.s32.totalorder %v2538_v7, %v237_v54  ;;  %vm472_vm13 = vcmp.eq.s32.totalorder %v2532_v3, %v237_v54  ;;  %vm470_vm15 = vcmp.eq.s32.totalorder %v2541_v10, %v234_v55 }
  0xdc   :  { %2129 = vmatprep.subr.msk.bf16.mxu0 %vm2128_vm7, %v2310_v11  ;;  %vm2256_vm2 = vmpackc.low %vm467_vm0, %vm463_vm10  ;;  %vm474_vm0 = vcmp.eq.s32.totalorder %v2541_v10, %v237_v54 }
  0xdd   :  { %2257 = vmatprep.subr.msk.bf16.mxu1 %vm2256_vm2, %v2310_v11  ;;  %v243_v56 = vpop.permute.xlu1 %242  ;;  %v240_v57 = vpop.permute.xlu0 %239  ;;  %vm2130_vm4 = vmpackc.low %vm464_vm1, %vm460_vm14 }
  0xde   :  { %2131 = vmatpush1.bf16.msk.msra.mxu0 %vm2130_vm4, %v2310_v11  ;;  %vm2258_vm10 = vmpackc.low %vm466_vm5, %vm462_vm3  ;;  %vm477_vm7 = vcmp.eq.s32.totalorder %v2535_v6, %v240_v57  ;;  %vm481_vm2 = vcmp.eq.s32.totalorder %v2535_v6, %v243_v56  ;;  %vm479_vm3 = vcmp.eq.s32.totalorder %v2538_v7, %v240_v57  ;;  %vm476_vm4 = vcmp.eq.s32.totalorder %v2532_v3, %v240_v57 }
  0xdf   :  { %vm2132_vm1 = vmpackc.low %vm473_vm8, %vm469_vm6  ;;  %2259 = vmatpush1.bf16.msk.msra.mxu1 %vm2258_vm10, %v2310_v11  ;;  %vm483_vm6 = vcmp.eq.s32.totalorder %v2538_v7, %v243_v56  ;;  %vm480_vm8 = vcmp.eq.s32.totalorder %v2532_v3, %v243_v56  ;;  %vm478_vm10 = vcmp.eq.s32.totalorder %v2541_v10, %v240_v57 }
  0xe0   :  { %2133 = vmatprep.subr.msk.bf16.mxu0 %vm2132_vm1, %v2310_v11  ;;  %vm2260_vm14 = vmpackc.low %vm475_vm12, %vm471_vm9  ;;  %vm482_vm12 = vcmp.eq.s32.totalorder %v2541_v10, %v243_v56 }
  0xe1   :  { %2261 = vmatprep.subr.msk.bf16.mxu1 %vm2260_vm14, %v2310_v11  ;;  %v249_v58 = vpop.permute.xlu1 %248  ;;  %v246_v59 = vpop.permute.xlu0 %245  ;;  %vm2134_vm5 = vmpackc.low %vm472_vm13, %vm468_vm11 }
  0xe2   :  { %2135 = vmatpush1.bf16.msk.msra.mxu0 %vm2134_vm5, %v2310_v11  ;;  %vm2262_vm9 = vmpackc.low %vm474_vm0, %vm470_vm15  ;;  %vm485_vm1 = vcmp.eq.s32.totalorder %v2535_v6, %v246_v59  ;;  %vm489_vm14 = vcmp.eq.s32.totalorder %v2535_v6, %v249_v58  ;;  %vm487_vm15 = vcmp.eq.s32.totalorder %v2538_v7, %v246_v59  ;;  %vm484_vm5 = vcmp.eq.s32.totalorder %v2532_v3, %v246_v59 }
  0xe3   :  { %vm2136_vm13 = vmpackc.low %vm481_vm2, %vm477_vm7  ;;  %2263 = vmatpush1.bf16.msk.msra.mxu1 %vm2262_vm9, %v2310_v11  ;;  %vm491_vm7 = vcmp.eq.s32.totalorder %v2538_v7, %v249_v58  ;;  %vm488_vm2 = vcmp.eq.s32.totalorder %v2532_v3, %v249_v58  ;;  %vm486_vm9 = vcmp.eq.s32.totalorder %v2541_v10, %v246_v59 }
  0xe4   :  { %2137 = vmatprep.subr.msk.bf16.mxu0 %vm2136_vm13, %v2310_v11  ;;  %vm2264_vm11 = vmpackc.low %vm483_vm6, %vm479_vm3  ;;  %vm490_vm6 = vcmp.eq.s32.totalorder %v2541_v10, %v249_v58 }
  0xe5   :  { %2265 = vmatprep.subr.msk.bf16.mxu1 %vm2264_vm11, %v2310_v11  ;;  %v255_v60 = vpop.permute.xlu1 %254  ;;  %v252_v61 = vpop.permute.xlu0 %251  ;;  %vm2138_vm0 = vmpackc.low %vm480_vm8, %vm476_vm4 }
  0xe6   :  { %2139 = vmatpush1.bf16.msk.msra.mxu0 %vm2138_vm0, %v2310_v11  ;;  %vm2266_vm3 = vmpackc.low %vm482_vm12, %vm478_vm10  ;;  %vm493_vm13 = vcmp.eq.s32.totalorder %v2535_v6, %v252_v61  ;;  %vm497_vm11 = vcmp.eq.s32.totalorder %v2535_v6, %v255_v60  ;;  %vm495_vm10 = vcmp.eq.s32.totalorder %v2538_v7, %v252_v61  ;;  %vm492_vm0 = vcmp.eq.s32.totalorder %v2532_v3, %v252_v61 }
  0xe7   :  { %vm2140_vm8 = vmpackc.low %vm489_vm14, %vm485_vm1  ;;  %2267 = vmatpush1.bf16.msk.msra.mxu1 %vm2266_vm3, %v2310_v11  ;;  %vm499_vm1 = vcmp.eq.s32.totalorder %v2538_v7, %v255_v60  ;;  %vm496_vm14 = vcmp.eq.s32.totalorder %v2532_v3, %v255_v60  ;;  %vm494_vm3 = vcmp.eq.s32.totalorder %v2541_v10, %v252_v61 }
  0xe8   :  { %2141 = vmatprep.subr.msk.bf16.mxu0 %vm2140_vm8, %v2310_v11  ;;  %vm2268_vm4 = vmpackc.low %vm491_vm7, %vm487_vm15  ;;  %vm498_vm7 = vcmp.eq.s32.totalorder %v2541_v10, %v255_v60 }
  0xe9   :  { %2269 = vmatprep.subr.msk.bf16.mxu1 %vm2268_vm4, %v2310_v11  ;;  %v261_v62 = vpop.permute.xlu1 %260  ;;  %v258_v63 = vpop.permute.xlu0 %257  ;;  %vm2142_vm12 = vmpackc.low %vm488_vm2, %vm484_vm5 }
  0xea   :  { %2143 = vmatpush1.bf16.msk.msra.mxu0 %vm2142_vm12, %v2310_v11  ;;  %vm2270_vm15 = vmpackc.low %vm490_vm6, %vm486_vm9  ;;  %vm501_vm8 = vcmp.eq.s32.totalorder %v2535_v6, %v258_v63  ;;  %vm505_vm4 = vcmp.eq.s32.totalorder %v2535_v6, %v261_v62  ;;  %vm503_vm9 = vcmp.eq.s32.totalorder %v2538_v7, %v258_v63  ;;  %vm500_vm12 = vcmp.eq.s32.totalorder %v2532_v3, %v258_v63 }
  0xeb   :  { %vm2144_vm2 = vmpackc.low %vm497_vm11, %vm493_vm13  ;;  %2271 = vmatpush1.bf16.msk.msra.mxu1 %vm2270_vm15, %v2310_v11  ;;  %vm507_vm13 = vcmp.eq.s32.totalorder %v2538_v7, %v261_v62  ;;  %vm504_vm11 = vcmp.eq.s32.totalorder %v2532_v3, %v261_v62  ;;  %vm502_vm15 = vcmp.eq.s32.totalorder %v2541_v10, %v258_v63 }
  0xec   :  { %2145 = vmatprep.subr.msk.bf16.mxu0 %vm2144_vm2, %v2310_v11  ;;  %vm2272_vm5 = vmpackc.low %vm499_vm1, %vm495_vm10  ;;  %vm506_vm1 = vcmp.eq.s32.totalorder %v2541_v10, %v261_v62 }
  0xed   :  { %2273 = vmatprep.subr.msk.bf16.mxu1 %vm2272_vm5, %v2310_v11  ;;  %v267_v0 = vpop.permute.xlu1 %266  ;;  %v264_v1 = vpop.permute.xlu0 %263  ;;  %vm2146_vm6 = vmpackc.low %vm496_vm14, %vm492_vm0 }
  0xee   :  { %2147 = vmatpush1.bf16.msk.msra.mxu0 %vm2146_vm6, %v2310_v11  ;;  %vm2274_vm10 = vmpackc.low %vm498_vm7, %vm494_vm3  ;;  %vm509_vm2 = vcmp.eq.s32.totalorder %v2535_v6, %v264_v1  ;;  %vm513_vm5 = vcmp.eq.s32.totalorder %v2535_v6, %v267_v0  ;;  %vm511_vm3 = vcmp.eq.s32.totalorder %v2538_v7, %v264_v1  ;;  %vm508_vm6 = vcmp.eq.s32.totalorder %v2532_v3, %v264_v1 }
  0xef   :  { %vm2148_vm14 = vmpackc.low %vm505_vm4, %vm501_vm8  ;;  %2275 = vmatpush1.bf16.msk.msra.mxu1 %vm2274_vm10, %v2310_v11  ;;  %vm515_vm8 = vcmp.eq.s32.totalorder %v2538_v7, %v267_v0  ;;  %vm512_vm4 = vcmp.eq.s32.totalorder %v2532_v3, %v267_v0  ;;  %vm510_vm10 = vcmp.eq.s32.totalorder %v2541_v10, %v264_v1 }
  0xf0   :  { %2149 = vmatprep.subr.msk.bf16.mxu0 %vm2148_vm14, %v2310_v11  ;;  %vm2276_vm0 = vmpackc.low %vm507_vm13, %vm503_vm9  ;;  %vm514_vm13 = vcmp.eq.s32.totalorder %v2541_v10, %v267_v0 }
  0xf1   :  { %2277 = vmatprep.subr.msk.bf16.mxu1 %vm2276_vm0, %v2310_v11  ;;  %v273_v2 = vpop.permute.xlu1 %272  ;;  %v270_v4 = vpop.permute.xlu0 %269  ;;  %vm2150_vm7 = vmpackc.low %vm504_vm11, %vm500_vm12 }
  0xf2   :  { %2151 = vmatpush1.bf16.msk.msra.mxu0 %vm2150_vm7, %v2310_v11  ;;  %vm2278_vm9 = vmpackc.low %vm506_vm1, %vm502_vm15  ;;  %vm517_vm14 = vcmp.eq.s32.totalorder %v2535_v6, %v270_v4  ;;  %vm521_vm0 = vcmp.eq.s32.totalorder %v2535_v6, %v273_v2  ;;  %vm519_vm15 = vcmp.eq.s32.totalorder %v2538_v7, %v270_v4  ;;  %vm516_vm7 = vcmp.eq.s32.totalorder %v2532_v3, %v270_v4 }
  0xf3   :  { %vm2152_vm11 = vmpackc.low %vm513_vm5, %vm509_vm2  ;;  %2279 = vmatpush1.bf16.msk.msra.mxu1 %vm2278_vm9, %v2310_v11  ;;  %vm523_vm2 = vcmp.eq.s32.totalorder %v2538_v7, %v273_v2  ;;  %vm520_vm5 = vcmp.eq.s32.totalorder %v2532_v3, %v273_v2  ;;  %vm518_vm9 = vcmp.eq.s32.totalorder %v2541_v10, %v270_v4 }
  0xf4   :  { %2153 = vmatprep.subr.msk.bf16.mxu0 %vm2152_vm11, %v2310_v11  ;;  %vm2280_vm12 = vmpackc.low %vm515_vm8, %vm511_vm3  ;;  %vm522_vm8 = vcmp.eq.s32.totalorder %v2541_v10, %v273_v2 }
  0xf5   :  { %2281 = vmatprep.subr.msk.bf16.mxu1 %vm2280_vm12, %v2310_v11  ;;  %v279_v5 = vpop.permute.xlu1 %278  ;;  %v276_v8 = vpop.permute.xlu0 %275  ;;  %vm2154_vm1 = vmpackc.low %vm512_vm4, %vm508_vm6 }
  0xf6   :  { %2155 = vmatpush1.bf16.msk.msra.mxu0 %vm2154_vm1, %v2310_v11  ;;  %vm2282_vm3 = vmpackc.low %vm514_vm13, %vm510_vm10  ;;  %vm525_vm11 = vcmp.eq.s32.totalorder %v2535_v6, %v276_v8  ;;  %vm529_vm12 = vcmp.eq.s32.totalorder %v2535_v6, %v279_v5  ;;  %vm527_vm10 = vcmp.eq.s32.totalorder %v2538_v7, %v276_v8  ;;  %vm524_vm1 = vcmp.eq.s32.totalorder %v2532_v3, %v276_v8 }
  0xf7   :  { %vm2156_vm4 = vmpackc.low %vm521_vm0, %vm517_vm14  ;;  %2283 = vmatpush1.bf16.msk.msra.mxu1 %vm2282_vm3, %v2310_v11  ;;  %vm531_vm14 = vcmp.eq.s32.totalorder %v2538_v7, %v279_v5  ;;  %vm528_vm0 = vcmp.eq.s32.totalorder %v2532_v3, %v279_v5  ;;  %vm526_vm3 = vcmp.eq.s32.totalorder %v2541_v10, %v276_v8 }
  0xf8   :  { %2157 = vmatprep.subr.msk.bf16.mxu0 %vm2156_vm4, %v2310_v11  ;;  %vm2284_vm6 = vmpackc.low %vm523_vm2, %vm519_vm15  ;;  %vm530_vm2 = vcmp.eq.s32.totalorder %v2541_v10, %v279_v5 }
  0xf9   :  { %2285 = vmatprep.subr.msk.bf16.mxu1 %vm2284_vm6, %v2310_v11  ;;  %v285_v9 = vpop.permute.xlu1 %284  ;;  %v282_v12 = vpop.permute.xlu0 %281  ;;  %vm2158_vm13 = vmpackc.low %vm520_vm5, %vm516_vm7 }
  0xfa   :  { %2159 = vmatpush1.bf16.msk.msra.mxu0 %vm2158_vm13, %v2310_v11  ;;  %vm2286_vm15 = vmpackc.low %vm522_vm8, %vm518_vm9  ;;  %vm533_vm4 = vcmp.eq.s32.totalorder %v2535_v6, %v282_v12  ;;  %vm537_vm6 = vcmp.eq.s32.totalorder %v2535_v6, %v285_v9 }
  0xfb   :  { %vm2160_vm5 = vmpackc.low %vm529_vm12, %vm525_vm11  ;;  %2287 = vmatpush1.bf16.msk.msra.mxu1 %vm2286_vm15, %v2310_v11  ;;  %vm535_vm11 = vcmp.eq.s32.totalorder %v2538_v7, %v282_v12  ;;  %vm539_vm12 = vcmp.eq.s32.totalorder %v2538_v7, %v285_v9  ;;  %vm536_vm15 = vcmp.eq.s32.totalorder %v2532_v3, %v285_v9 }
  0xfc   :  { %2161 = vmatprep.subr.msk.bf16.mxu0 %vm2160_vm5, %v2310_v11  ;;  %vm2288_vm7 = vmpackc.low %vm531_vm14, %vm527_vm10  ;;  %vm532_vm10 = vcmp.eq.s32.totalorder %v2532_v3, %v282_v12  ;;  %vm538_vm14 = vcmp.eq.s32.totalorder %v2541_v10, %v285_v9 }
  0xfd   :  { %2289 = vmatprep.subr.msk.bf16.mxu1 %vm2288_vm7, %v2310_v11  ;;  %vm2162_vm13 = vmpackc.low %vm528_vm0, %vm524_vm1  ;;  %v291_v13 = vpop.permute.xlu1 %290  ;;  %v288_v14 = vpop.permute.xlu0 %287  ;;  %vm534_vm0 = vcmp.eq.s32.totalorder %v2541_v10, %v282_v12 }
  0xfe   :  { %2163 = vmatpush1.bf16.msk.msra.mxu0 %vm2162_vm13, %v2310_v11  ;;  %vm2290_vm8 = vmpackc.low %vm530_vm2, %vm526_vm3  ;;  %vm545_vm1 = vcmp.eq.s32.totalorder %v2535_v6, %v291_v13  ;;  %vm541_vm2 = vcmp.eq.s32.totalorder %v2535_v6, %v288_v14  ;;  %vm547_vm5 = vcmp.eq.s32.totalorder %v2538_v7, %v291_v13  ;;  %vm543_vm7 = vcmp.eq.s32.totalorder %v2538_v7, %v288_v14 }
  0xff   :  { %vm2164_vm9 = vmpackc.low %vm537_vm6, %vm533_vm4  ;;  %2291 = vmatpush1.bf16.msk.msra.mxu1 %vm2290_vm8, %v2310_v11  ;;  %vm544_vm6 = vcmp.eq.s32.totalorder %v2532_v3, %v291_v13  ;;  %vm540_vm13 = vcmp.eq.s32.totalorder %v2532_v3, %v288_v14  ;;  %v1066_v3 = vld [vmem:[%s3062_s0 + $0x10] sm:$0xff]  ;;  %v2311_v6 = vmov 0.0  }
 0x100   :  { %2165 = vmatprep.subr.msk.bf16.mxu0 %vm2164_vm9, %v2310_v11  ;;  %vm2292_vm3 = vmpackc.low %vm539_vm12, %vm535_vm11  ;;  %vm546_vm9 = vcmp.eq.s32.totalorder %v2541_v10, %v291_v13  ;;  %vm542_vm11 = vcmp.eq.s32.totalorder %v2541_v10, %v288_v14 }
 0x101   :  { %2293 = vmatprep.subr.msk.bf16.mxu1 %vm2292_vm3, %v2310_v11  ;;  %vm2166_vm4 = vmpackc.low %vm536_vm15, %vm532_vm10 }
 0x102   :  { %2167 = vmatpush1.bf16.msk.msra.mxu0 %vm2166_vm4, %v2310_v11  ;;  %vm2294_vm8 = vmpackc.low %vm538_vm14, %vm534_vm0  ;;  %vm1376_vm14 = vcmask 64512  }
 0x103   :  { %2295 = vmatpush1.bf16.msk.msra.mxu1 %vm2294_vm8, %v2310_v11  ;;  %vm2168_vm12 = vmpackc.low %vm545_vm1, %vm541_vm2 }
 0x104   :  { %2169 = vmatprep.subr.msk.bf16.mxu0 %vm2168_vm12, %v2310_v11  ;;  %vm2296_vm3 = vmpackc.low %vm547_vm5, %vm543_vm7 }
 0x105   :  { %vm2170_vm10 = vmpackc.low %vm544_vm6, %vm540_vm13  ;;  %2297 = vmatprep.subr.msk.bf16.mxu1 %vm2296_vm3, %v2310_v11 }
 0x106   :  { %vm2298_vm15 = vmpackc.low %vm546_vm9, %vm542_vm11  ;;  %2171 = vmatpush1.bf16.msk.msra.mxu0 %vm2170_vm10, %v2310_v11 }
 0x107   :  { %2299 = vmatpush1.bf16.msk.msra.mxu1 %vm2298_vm15, %v2310_v11  ;;  %v1364_v11 = vld [vmem:[%s3063_s2] sm:$0xff] }
 0x109   :  { %1204 = vmatmul.mubr.f32.vlgmr.msra.gmra.mrb[0].mxu0 %v1066_v3 }
 0x10a   :  { %1346 = vmatmul.mubr.f32.vlgmr.msra.gmra.mrb[0].mxu1 %v1066_v3  ;;  %1444 = vmatprep.mubr.f32.mxu0 %v2311_v6 }
 0x10b   :  { %1515 = vmatprep.mubr.f32.mxu1 %v2311_v6 }
 0x1dc   :  { %v1205_v7 = vpop.f32.mrb[0].mxu0 }
 0x1dd   :  { %v1347_v10 = vpop.f32.mrb[0].mxu1  ;;  %v1207_v15 = vpop.f32.mrb[1].mxu0  ;;  %v1372_v22 = vadd.f32 %v1364_v11, %v1205_v7 }
 0x1de   :  { %v1349_v17 = vpop.f32.mrb[1].mxu1  ;;  %v1373_v20 = vadd.f32 %v1365_v16, %v1207_v15  ;;  %v1374_v24 = vadd.f32 %v1366_v19, %v1347_v10 }
 0x1df   :  { %v1375_v21 = vadd.f32 %v1367_v18, %v1349_v17 }
 0x1e0   :  { %1380 = vmatprep.subr.mxu0 %v1373_v20 }
 0x1e1   :  { %1451 = vmatprep.subr.mxu1 %v1375_v21  ;;  %1381 = vmatpush1.msra.mxu0 %v1372_v22 }
 0x1e2   :  { %1452 = vmatpush1.msra.mxu1 %v1374_v24  ;;  %2042 = vmatmul.mubr.msk.f32.vlgmr.msra.gmra.mrb[2].mxu0 %vm1376_vm14, %v1363_v23 }
 0x1e3   :  { %2043 = vmatmul.mubr.msk.f32.vlgmr.msra.gmra.mrb[2].mxu1 %vm1376_vm14, %v1363_v23 }
 0x2b5   :  { %v1446_v25 = vpop.f32.mrb[2].mxu0 }
 0x2b6   :  { %1522 = vst [vmem:[%s3065_s4] sm:$0xff] %v1446_v25  ;;  %v1517_v26 = vpop.f32.mrb[2].mxu1  ;;  %v1448_v27 = vpop.f32.mrb[3].mxu0 }
 0x2b7   :  { %1524 = vst [vmem:[%s3065_s4 + $0x10] sm:$0xff] %v1517_v26  ;;  %1523 = vst [vmem:[%s3065_s4 + $0x8] sm:$0xff] %v1448_v27  ;;  %v1519_v28 = vpop.f32.mrb[3].mxu1 }
 0x2b8   :  { %1525 = vst [vmem:[%s3065_s4 + $0x18] sm:$0xff] %v1519_v28 }

// kernel: muse_pool_forward.9
= control target key start
LH: loop header
LB: loop body
LE: loop exit
PB: predicated region body
PF: predicated region fallthrough
CT: control target
= control target key end

     0   :  { %v28_v0 = vlaneseq  ;;  %v2236_v15 = vmov 1.0|1.0   ;;  %s2806_s1 = inlined_call_operand.vmem [shape: s32[1,512], index: 1, kind: input, shape index: {}]   ;;  %s2807_s0 = inlined_call_operand.vmem [shape: f32[8,512], index: 0, kind: input, shape index: {}]   ;;  %s2808_s2 = inlined_call_operand.vmem [shape: f32[8,512], index: 2, kind: input, shape index: {}]   ;;  %s2809_s3 = inlined_call_operand.vmem [shape: f32[8,8], index: 3, kind: input, shape index: {}]   ;;  %s2810_s4 = inlined_call_operand.vmem [shape: f32[1,512], index: 4, kind: input, shape index: {}]   ;;  %s2811_s5 = inlined_call_operand.vmem [shape: f32[8,512], index: 5, kind: output, shape index: {}]  }
   0x1   :  { %v949_v1 = vld [vmem:[%s2807_s0 + $0x8] sm:$0xff]  ;;  %v159_v3 = vld [vmem:[%s2806_s1] sm:$0xf]  ;;  %v951_v51 = vld [vmem:[%s2807_s0 + $0x18] sm:$0xff] }
   0x2   :  { %v2271_v2 = vshrl.u32 %v28_v0, 7  ;;  %1016 = vmatprep.mubr.f32.mxu0 %v949_v1  ;;  %1158 = vmatprep.mubr.f32.mxu1 %v949_v1  ;;  %v948_v48 = vld [vmem:[%s2807_s0] sm:$0xff] }
   0x4   :  { %v30_v4 = vadd.s32 8, %v2271_v2  ;;  %v166_v5 = vsub.s32 1, %v2271_v2  ;;  %v174_v6 = vsub.s32 3, %v2271_v2  ;;  %v162_v7 = vsub.s32 0, %v2271_v2 }
   0x5   :  { %v170_v8 = vsub.s32 2, %v2271_v2  ;;  %v31_v9 = vadd.s32 16, %v2271_v2  ;;  %v32_v13 = vadd.s32 24, %v2271_v2  ;;  %v33_v16 = vadd.s32 32, %v2271_v2 }
   0x6   :  { %v2284_v10 = vrot.slane %v159_v3, %v166_v5  ;;  %v2288_v11 = vrot.slane %v159_v3, %v174_v6  ;;  %v2292_v12 = vrot.slane %v159_v3, %v162_v7  ;;  %v34_v17 = vadd.s32 40, %v2271_v2 }
   0x7   :  { %v2297_v14 = vrot.slane %v159_v3, %v170_v8  ;;  %v35_v18 = vadd.s32 48, %v2271_v2  ;;  %v36_v19 = vadd.s32 56, %v2271_v2  ;;  %v37_v20 = vadd.s32 64, %v2271_v2 }
   0x8   :  { %vm177_vm0 = vcmp.eq.s32.totalorder %v2271_v2, %v2284_v10  ;;  %vm181_vm1 = vcmp.eq.s32.totalorder %v30_v4, %v2284_v10  ;;  %vm179_vm2 = vcmp.eq.s32.totalorder %v2271_v2, %v2288_v11  ;;  %vm183_vm3 = vcmp.eq.s32.totalorder %v30_v4, %v2288_v11 }
   0x9   :  { %vm1958_vm4 = vmpackc.low %vm181_vm1, %vm177_vm0  ;;  %vm176_vm5 = vcmp.eq.s32.totalorder %v2271_v2, %v2292_v12  ;;  %vm180_vm6 = vcmp.eq.s32.totalorder %v30_v4, %v2292_v12  ;;  %vm178_vm7 = vcmp.eq.s32.totalorder %v2271_v2, %v2297_v14  ;;  %vm182_vm8 = vcmp.eq.s32.totalorder %v30_v4, %v2297_v14 }
   0xa   :  { %1959 = vmatprep.subr.msk.bf16.mxu0 %vm1958_vm4, %v2236_v15  ;;  %vm2086_vm9 = vmpackc.low %vm183_vm3, %vm179_vm2  ;;  %vm185_vm10 = vcmp.eq.s32.totalorder %v31_v9, %v2284_v10  ;;  %vm189_vm11 = vcmp.eq.s32.totalorder %v32_v13, %v2284_v10  ;;  %vm187_vm13 = vcmp.eq.s32.totalorder %v31_v9, %v2288_v11  ;;  %vm191_vm14 = vcmp.eq.s32.totalorder %v32_v13, %v2288_v11 }
   0xb   :  { %2087 = vmatprep.subr.msk.bf16.mxu1 %vm2086_vm9, %v2236_v15  ;;  %vm1960_vm12 = vmpackc.low %vm180_vm6, %vm176_vm5  ;;  %vm184_vm0 = vcmp.eq.s32.totalorder %v31_v9, %v2292_v12  ;;  %vm188_vm1 = vcmp.eq.s32.totalorder %v32_v13, %v2292_v12  ;;  %vm186_vm3 = vcmp.eq.s32.totalorder %v31_v9, %v2297_v14  ;;  %vm190_vm4 = vcmp.eq.s32.totalorder %v32_v13, %v2297_v14 }
   0xc   :  { %1961 = vmatpush1.bf16.msk.msra.mxu0 %vm1960_vm12, %v2236_v15  ;;  %vm2088_vm15 = vmpackc.low %vm182_vm8, %vm178_vm7  ;;  %vm193_vm6 = vcmp.eq.s32.totalorder %v33_v16, %v2284_v10  ;;  %vm197_vm9 = vcmp.eq.s32.totalorder %v34_v17, %v2284_v10  ;;  %vm195_vm8 = vcmp.eq.s32.totalorder %v33_v16, %v2288_v11  ;;  %vm192_vm12 = vcmp.eq.s32.totalorder %v33_v16, %v2292_v12 }
   0xd   :  { %2089 = vmatpush1.bf16.msk.msra.mxu1 %vm2088_vm15, %v2236_v15  ;;  %vm1962_vm2 = vmpackc.low %vm189_vm11, %vm185_vm10  ;;  %vm199_vm10 = vcmp.eq.s32.totalorder %v34_v17, %v2288_v11  ;;  %vm194_vm15 = vcmp.eq.s32.totalorder %v33_v16, %v2297_v14  ;;  %v38_v21 = vadd.s32 72, %v2271_v2  ;;  %v39_v22 = vadd.s32 80, %v2271_v2 }
   0xe   :  { %1963 = vmatprep.subr.msk.bf16.mxu0 %vm1962_vm2, %v2236_v15  ;;  %vm2090_vm5 = vmpackc.low %vm191_vm14, %vm187_vm13  ;;  %vm196_vm13 = vcmp.eq.s32.totalorder %v34_v17, %v2292_v12  ;;  %vm198_vm2 = vcmp.eq.s32.totalorder %v34_v17, %v2297_v14  ;;  %v40_v23 = vadd.s32 88, %v2271_v2  ;;  %v41_v24 = vadd.s32 96, %v2271_v2 }
   0xf   :  { %2091 = vmatprep.subr.msk.bf16.mxu1 %vm2090_vm5, %v2236_v15  ;;  %vm1964_vm7 = vmpackc.low %vm188_vm1, %vm184_vm0  ;;  %vm201_vm1 = vcmp.eq.s32.totalorder %v35_v18, %v2284_v10  ;;  %vm205_vm5 = vcmp.eq.s32.totalorder %v36_v19, %v2284_v10  ;;  %v42_v25 = vadd.s32 104, %v2271_v2  ;;  %v43_v26 = vadd.s32 112, %v2271_v2 }
  0x10   :  { %1965 = vmatpush1.bf16.msk.msra.mxu0 %vm1964_vm7, %v2236_v15  ;;  %vm2092_vm11 = vmpackc.low %vm190_vm4, %vm186_vm3  ;;  %vm203_vm4 = vcmp.eq.s32.totalorder %v35_v18, %v2288_v11  ;;  %vm200_vm7 = vcmp.eq.s32.totalorder %v35_v18, %v2292_v12  ;;  %v44_v27 = vadd.s32 120, %v2271_v2  ;;  %v45_v28 = vadd.s32 128, %v2271_v2 }
  0x11   :  { %2093 = vmatpush1.bf16.msk.msra.mxu1 %vm2092_vm11, %v2236_v15  ;;  %vm1966_vm14 = vmpackc.low %vm197_vm9, %vm193_vm6  ;;  %vm207_vm6 = vcmp.eq.s32.totalorder %v36_v19, %v2288_v11  ;;  %vm202_vm11 = vcmp.eq.s32.totalorder %v35_v18, %v2297_v14  ;;  %v46_v29 = vadd.s32 136, %v2271_v2  ;;  %v47_v30 = vadd.s32 144, %v2271_v2 }
  0x12   :  { %1967 = vmatprep.subr.msk.bf16.mxu0 %vm1966_vm14, %v2236_v15  ;;  %vm2094_vm0 = vmpackc.low %vm199_vm10, %vm195_vm8  ;;  %vm204_vm8 = vcmp.eq.s32.totalorder %v36_v19, %v2292_v12  ;;  %vm206_vm14 = vcmp.eq.s32.totalorder %v36_v19, %v2297_v14  ;;  %v48_v31 = vadd.s32 152, %v2271_v2  ;;  %v49_v32 = vadd.s32 160, %v2271_v2 }
  0x13   :  { %2095 = vmatprep.subr.msk.bf16.mxu1 %vm2094_vm0, %v2236_v15  ;;  %vm1968_vm3 = vmpackc.low %vm196_vm13, %vm192_vm12  ;;  %vm209_vm13 = vcmp.eq.s32.totalorder %v37_v20, %v2284_v10  ;;  %vm213_vm0 = vcmp.eq.s32.totalorder %v38_v21, %v2284_v10  ;;  %v50_v33 = vadd.s32 168, %v2271_v2  ;;  %v51_v34 = vadd.s32 176, %v2271_v2 }
  0x14   :  { %1969 = vmatpush1.bf16.msk.msra.mxu0 %vm1968_vm3, %v2236_v15  ;;  %vm2096_vm9 = vmpackc.low %vm198_vm2, %vm194_vm15  ;;  %vm211_vm2 = vcmp.eq.s32.totalorder %v37_v20, %v2288_v11  ;;  %vm208_vm3 = vcmp.eq.s32.totalorder %v37_v20, %v2292_v12  ;;  %v52_v35 = vadd.s32 184, %v2271_v2  ;;  %v53_v36 = vadd.s32 192, %v2271_v2 }
  0x15   :  { %2097 = vmatpush1.bf16.msk.msra.mxu1 %vm2096_vm9, %v2236_v15  ;;  %vm1970_vm10 = vmpackc.low %vm205_vm5, %vm201_vm1  ;;  %vm215_vm1 = vcmp.eq.s32.totalorder %v38_v21, %v2288_v11  ;;  %vm210_vm9 = vcmp.eq.s32.totalorder %v37_v20, %v2297_v14  ;;  %v54_v37 = vadd.s32 200, %v2271_v2  ;;  %v55_v38 = vadd.s32 208, %v2271_v2 }
  0x16   :  { %1971 = vmatprep.subr.msk.bf16.mxu0 %vm1970_vm10, %v2236_v15  ;;  %vm2098_vm12 = vmpackc.low %vm207_vm6, %vm203_vm4  ;;  %vm212_vm4 = vcmp.eq.s32.totalorder %v38_v21, %v2292_v12  ;;  %vm214_vm10 = vcmp.eq.s32.totalorder %v38_v21, %v2297_v14  ;;  %v56_v39 = vadd.s32 216, %v2271_v2  ;;  %v57_v40 = vadd.s32 224, %v2271_v2 }
  0x17   :  { %2099 = vmatprep.subr.msk.bf16.mxu1 %vm2098_vm12, %v2236_v15  ;;  %vm1972_vm15 = vmpackc.low %vm204_vm8, %vm200_vm7  ;;  %vm217_vm8 = vcmp.eq.s32.totalorder %v39_v22, %v2284_v10  ;;  %vm221_vm12 = vcmp.eq.s32.totalorder %v40_v23, %v2284_v10  ;;  %v58_v41 = vadd.s32 232, %v2271_v2  ;;  %v59_v42 = vadd.s32 240, %v2271_v2 }
  0x18   :  { %1973 = vmatpush1.bf16.msk.msra.mxu0 %vm1972_vm15, %v2236_v15  ;;  %vm2100_vm5 = vmpackc.low %vm206_vm14, %vm202_vm11  ;;  %vm219_vm14 = vcmp.eq.s32.totalorder %v39_v22, %v2288_v11  ;;  %vm216_vm15 = vcmp.eq.s32.totalorder %v39_v22, %v2292_v12  ;;  %v60_v43 = vadd.s32 248, %v2271_v2  ;;  %v61_v44 = vadd.s32 256, %v2271_v2 }
  0x19   :  { %2101 = vmatpush1.bf16.msk.msra.mxu1 %vm2100_vm5, %v2236_v15  ;;  %vm1974_vm6 = vmpackc.low %vm213_vm0, %vm209_vm13  ;;  %vm223_vm13 = vcmp.eq.s32.totalorder %v40_v23, %v2288_v11  ;;  %vm218_vm5 = vcmp.eq.s32.totalorder %v39_v22, %v2297_v14  ;;  %v62_v45 = vadd.s32 264, %v2271_v2  ;;  %v63_v46 = vadd.s32 272, %v2271_v2 }
  0x1a   :  { %1975 = vmatprep.subr.msk.bf16.mxu0 %vm1974_vm6, %v2236_v15  ;;  %vm2102_vm7 = vmpackc.low %vm215_vm1, %vm211_vm2  ;;  %vm220_vm2 = vcmp.eq.s32.totalorder %v40_v23, %v2292_v12  ;;  %vm222_vm6 = vcmp.eq.s32.totalorder %v40_v23, %v2297_v14  ;;  %v64_v47 = vadd.s32 280, %v2271_v2  ;;  %v65_v49 = vadd.s32 288, %v2271_v2 }
  0x1b   :  { %2103 = vmatprep.subr.msk.bf16.mxu1 %vm2102_vm7, %v2236_v15  ;;  %vm1976_vm11 = vmpackc.low %vm212_vm4, %vm208_vm3  ;;  %vm225_vm4 = vcmp.eq.s32.totalorder %v41_v24, %v2284_v10  ;;  %vm229_vm7 = vcmp.eq.s32.totalorder %v42_v25, %v2284_v10  ;;  %v66_v50 = vadd.s32 296, %v2271_v2  ;;  %v67_v52 = vadd.s32 304, %v2271_v2 }
  0x1c   :  { %1977 = vmatpush1.bf16.msk.msra.mxu0 %vm1976_vm11, %v2236_v15  ;;  %vm2104_vm0 = vmpackc.low %vm214_vm10, %vm210_vm9  ;;  %vm227_vm10 = vcmp.eq.s32.totalorder %v41_v24, %v2288_v11  ;;  %vm224_vm11 = vcmp.eq.s32.totalorder %v41_v24, %v2292_v12  ;;  %v68_v53 = vadd.s32 312, %v2271_v2  ;;  %v69_v54 = vadd.s32 320, %v2271_v2 }
  0x1d   :  { %2105 = vmatpush1.bf16.msk.msra.mxu1 %vm2104_vm0, %v2236_v15  ;;  %vm1978_vm1 = vmpackc.low %vm221_vm12, %vm217_vm8  ;;  %vm231_vm8 = vcmp.eq.s32.totalorder %v42_v25, %v2288_v11  ;;  %vm226_vm0 = vcmp.eq.s32.totalorder %v41_v24, %v2297_v14  ;;  %v70_v55 = vadd.s32 328, %v2271_v2  ;;  %v71_v56 = vadd.s32 336, %v2271_v2  ;;  %v1254_v24 = vld [vmem:[%s2808_s2 + $0x10] sm:$0xff] }
  0x1e   :  { %1979 = vmatprep.subr.msk.bf16.mxu0 %vm1978_vm1, %v2236_v15  ;;  %vm2106_vm3 = vmpackc.low %vm223_vm13, %vm219_vm14  ;;  %vm228_vm14 = vcmp.eq.s32.totalorder %v42_v25, %v2292_v12  ;;  %vm230_vm1 = vcmp.eq.s32.totalorder %v42_v25, %v2297_v14  ;;  %v72_v57 = vadd.s32 344, %v2271_v2  ;;  %v73_v58 = vadd.s32 352, %v2271_v2 }
  0x1f   :  { %2107 = vmatprep.subr.msk.bf16.mxu1 %vm2106_vm3, %v2236_v15  ;;  %vm1980_vm9 = vmpackc.low %vm220_vm2, %vm216_vm15  ;;  %vm233_vm2 = vcmp.eq.s32.totalorder %v43_v26, %v2284_v10  ;;  %vm237_vm3 = vcmp.eq.s32.totalorder %v44_v27, %v2284_v10  ;;  %v74_v59 = vadd.s32 360, %v2271_v2  ;;  %v75_v60 = vadd.s32 368, %v2271_v2 }
  0x20   :  { %1981 = vmatpush1.bf16.msk.msra.mxu0 %vm1980_vm9, %v2236_v15  ;;  %vm2108_vm12 = vmpackc.low %vm222_vm6, %vm218_vm5  ;;  %vm235_vm6 = vcmp.eq.s32.totalorder %v43_v26, %v2288_v11  ;;  %vm232_vm9 = vcmp.eq.s32.totalorder %v43_v26, %v2292_v12  ;;  %v76_v61 = vadd.s32 376, %v2271_v2  ;;  %v77_v62 = vadd.s32 384, %v2271_v2 }
  0x21   :  { %2109 = vmatpush1.bf16.msk.msra.mxu1 %vm2108_vm12, %v2236_v15  ;;  %vm1982_vm13 = vmpackc.low %vm229_vm7, %vm225_vm4  ;;  %vm239_vm4 = vcmp.eq.s32.totalorder %v44_v27, %v2288_v11  ;;  %vm234_vm12 = vcmp.eq.s32.totalorder %v43_v26, %v2297_v14  ;;  %v78_v63 = vadd.s32 392, %v2271_v2  ;;  %v79_v0 = vadd.s32 400, %v2271_v2  ;;  %v1410_v26 = vld [vmem:[%s2810_s4] sm:$0xf] }
  0x22   :  { %1983 = vmatprep.subr.msk.bf16.mxu0 %vm1982_vm13, %v2236_v15  ;;  %vm2110_vm15 = vmpackc.low %vm231_vm8, %vm227_vm10  ;;  %vm236_vm10 = vcmp.eq.s32.totalorder %v44_v27, %v2292_v12  ;;  %vm238_vm13 = vcmp.eq.s32.totalorder %v44_v27, %v2297_v14  ;;  %v80_v1 = vadd.s32 408, %v2271_v2  ;;  %v81_v3 = vadd.s32 416, %v2271_v2 }
  0x23   :  { %2111 = vmatprep.subr.msk.bf16.mxu1 %vm2110_vm15, %v2236_v15  ;;  %vm1984_vm5 = vmpackc.low %vm228_vm14, %vm224_vm11  ;;  %vm241_vm14 = vcmp.eq.s32.totalorder %v45_v28, %v2284_v10  ;;  %vm245_vm15 = vcmp.eq.s32.totalorder %v46_v29, %v2284_v10  ;;  %v82_v4 = vadd.s32 424, %v2271_v2  ;;  %v83_v9 = vadd.s32 432, %v2271_v2 }
  0x24   :  { %1985 = vmatpush1.bf16.msk.msra.mxu0 %vm1984_vm5, %v2236_v15  ;;  %vm2112_vm7 = vmpackc.low %vm230_vm1, %vm226_vm0  ;;  %vm243_vm1 = vcmp.eq.s32.totalorder %v45_v28, %v2288_v11  ;;  %vm240_vm5 = vcmp.eq.s32.totalorder %v45_v28, %v2292_v12  ;;  %v84_v13 = vadd.s32 440, %v2271_v2  ;;  %v85_v16 = vadd.s32 448, %v2271_v2 }
  0x25   :  { %2113 = vmatpush1.bf16.msk.msra.mxu1 %vm2112_vm7, %v2236_v15  ;;  %vm1986_vm8 = vmpackc.low %vm237_vm3, %vm233_vm2  ;;  %vm247_vm2 = vcmp.eq.s32.totalorder %v46_v29, %v2288_v11  ;;  %vm242_vm7 = vcmp.eq.s32.totalorder %v45_v28, %v2297_v14  ;;  %v86_v17 = vadd.s32 456, %v2271_v2  ;;  %v87_v18 = vadd.s32 464, %v2271_v2 }
  0x26   :  { %1987 = vmatprep.subr.msk.bf16.mxu0 %vm1986_vm8, %v2236_v15  ;;  %vm2114_vm11 = vmpackc.low %vm239_vm4, %vm235_vm6  ;;  %vm244_vm6 = vcmp.eq.s32.totalorder %v46_v29, %v2292_v12  ;;  %vm246_vm8 = vcmp.eq.s32.totalorder %v46_v29, %v2297_v14  ;;  %v88_v19 = vadd.s32 472, %v2271_v2  ;;  %v89_v20 = vadd.s32 480, %v2271_v2 }
  0x27   :  { %2115 = vmatprep.subr.msk.bf16.mxu1 %vm2114_vm11, %v2236_v15  ;;  %vm1988_vm0 = vmpackc.low %vm236_vm10, %vm232_vm9  ;;  %vm249_vm10 = vcmp.eq.s32.totalorder %v47_v30, %v2284_v10  ;;  %vm253_vm11 = vcmp.eq.s32.totalorder %v48_v31, %v2284_v10  ;;  %v90_v21 = vadd.s32 488, %v2271_v2  ;;  %v91_v22 = vadd.s32 496, %v2271_v2 }
  0x28   :  { %1989 = vmatpush1.bf16.msk.msra.mxu0 %vm1988_vm0, %v2236_v15  ;;  %vm2116_vm3 = vmpackc.low %vm238_vm13, %vm234_vm12  ;;  %vm251_vm13 = vcmp.eq.s32.totalorder %v47_v30, %v2288_v11  ;;  %vm248_vm0 = vcmp.eq.s32.totalorder %v47_v30, %v2292_v12  ;;  %v92_v23 = vadd.s32 504, %v2271_v2  ;;  %v2237_v25 = vmov 0.0  }
  0x29   :  { %2117 = vmatpush1.bf16.msk.msra.mxu1 %vm2116_vm3, %v2236_v15  ;;  %vm1990_vm4 = vmpackc.low %vm245_vm15, %vm241_vm14  ;;  %vm255_vm14 = vcmp.eq.s32.totalorder %v48_v31, %v2288_v11  ;;  %vm250_vm3 = vcmp.eq.s32.totalorder %v47_v30, %v2297_v14  ;;  %v1415_v28 = vrot.slane %v1410_v26, %v162_v7 }
  0x2a   :  { %1991 = vmatprep.subr.msk.bf16.mxu0 %vm1990_vm4, %v2236_v15  ;;  %vm2118_vm9 = vmpackc.low %vm247_vm2, %vm243_vm1  ;;  %vm252_vm1 = vcmp.eq.s32.totalorder %v48_v31, %v2292_v12  ;;  %vm254_vm4 = vcmp.eq.s32.totalorder %v48_v31, %v2297_v14  ;;  %v1423_v31 = vrot.slane %v1410_v26, %v170_v8 }
  0x2b   :  { %2119 = vmatprep.subr.msk.bf16.mxu1 %vm2118_vm9, %v2236_v15  ;;  %vm1992_vm12 = vmpackc.low %vm244_vm6, %vm240_vm5  ;;  %vm257_vm6 = vcmp.eq.s32.totalorder %v49_v32, %v2284_v10  ;;  %vm261_vm9 = vcmp.eq.s32.totalorder %v50_v33, %v2284_v10 }
  0x2c   :  { %1993 = vmatpush1.bf16.msk.msra.mxu0 %vm1992_vm12, %v2236_v15  ;;  %vm2120_vm15 = vmpackc.low %vm246_vm8, %vm242_vm7  ;;  %vm259_vm8 = vcmp.eq.s32.totalorder %v49_v32, %v2288_v11  ;;  %vm256_vm12 = vcmp.eq.s32.totalorder %v49_v32, %v2292_v12 }
  0x2d   :  { %2121 = vmatpush1.bf16.msk.msra.mxu1 %vm2120_vm15, %v2236_v15  ;;  %vm1994_vm2 = vmpackc.low %vm253_vm11, %vm249_vm10  ;;  %vm263_vm10 = vcmp.eq.s32.totalorder %v50_v33, %v2288_v11  ;;  %vm258_vm15 = vcmp.eq.s32.totalorder %v49_v32, %v2297_v14  ;;  %v1419_v32 = vrot.slane %v1410_v26, %v166_v5 }
  0x2e   :  { %1995 = vmatprep.subr.msk.bf16.mxu0 %vm1994_vm2, %v2236_v15  ;;  %vm2122_vm5 = vmpackc.low %vm255_vm14, %vm251_vm13  ;;  %vm260_vm13 = vcmp.eq.s32.totalorder %v50_v33, %v2292_v12  ;;  %vm262_vm2 = vcmp.eq.s32.totalorder %v50_v33, %v2297_v14 }
  0x2f   :  { %2123 = vmatprep.subr.msk.bf16.mxu1 %vm2122_vm5, %v2236_v15  ;;  %vm1996_vm7 = vmpackc.low %vm252_vm1, %vm248_vm0  ;;  %vm265_vm1 = vcmp.eq.s32.totalorder %v51_v34, %v2284_v10  ;;  %vm269_vm5 = vcmp.eq.s32.totalorder %v52_v35, %v2284_v10 }
  0x30   :  { %1997 = vmatpush1.bf16.msk.msra.mxu0 %vm1996_vm7, %v2236_v15  ;;  %vm2124_vm11 = vmpackc.low %vm254_vm4, %vm250_vm3  ;;  %vm267_vm4 = vcmp.eq.s32.totalorder %v51_v34, %v2288_v11  ;;  %vm264_vm7 = vcmp.eq.s32.totalorder %v51_v34, %v2292_v12 }
  0x31   :  { %2125 = vmatpush1.bf16.msk.msra.mxu1 %vm2124_vm11, %v2236_v15  ;;  %vm1998_vm14 = vmpackc.low %vm261_vm9, %vm257_vm6  ;;  %vm271_vm6 = vcmp.eq.s32.totalorder %v52_v35, %v2288_v11  ;;  %vm266_vm11 = vcmp.eq.s32.totalorder %v51_v34, %v2297_v14 }
  0x32   :  { %1999 = vmatprep.subr.msk.bf16.mxu0 %vm1998_vm14, %v2236_v15  ;;  %vm2126_vm0 = vmpackc.low %vm263_vm10, %vm259_vm8  ;;  %vm268_vm8 = vcmp.eq.s32.totalorder %v52_v35, %v2292_v12  ;;  %vm270_vm14 = vcmp.eq.s32.totalorder %v52_v35, %v2297_v14  ;;  %v1427_v35 = vrot.slane %v1410_v26, %v174_v6 }
  0x33   :  { %2127 = vmatprep.subr.msk.bf16.mxu1 %vm2126_vm0, %v2236_v15  ;;  %vm2000_vm3 = vmpackc.low %vm260_vm13, %vm256_vm12  ;;  %vm273_vm13 = vcmp.eq.s32.totalorder %v53_v36, %v2284_v10  ;;  %vm277_vm0 = vcmp.eq.s32.totalorder %v54_v37, %v2284_v10 }
  0x34   :  { %2001 = vmatpush1.bf16.msk.msra.mxu0 %vm2000_vm3, %v2236_v15  ;;  %vm2128_vm9 = vmpackc.low %vm262_vm2, %vm258_vm15  ;;  %vm275_vm2 = vcmp.eq.s32.totalorder %v53_v36, %v2288_v11  ;;  %vm272_vm3 = vcmp.eq.s32.totalorder %v53_v36, %v2292_v12 }
  0x35   :  { %2129 = vmatpush1.bf16.msk.msra.mxu1 %vm2128_vm9, %v2236_v15  ;;  %vm2002_vm10 = vmpackc.low %vm269_vm5, %vm265_vm1  ;;  %vm279_vm1 = vcmp.eq.s32.totalorder %v54_v37, %v2288_v11  ;;  %vm274_vm9 = vcmp.eq.s32.totalorder %v53_v36, %v2297_v14 }
  0x36   :  { %2003 = vmatprep.subr.msk.bf16.mxu0 %vm2002_vm10, %v2236_v15  ;;  %vm2130_vm12 = vmpackc.low %vm271_vm6, %vm267_vm4  ;;  %vm276_vm4 = vcmp.eq.s32.totalorder %v54_v37, %v2292_v12  ;;  %vm278_vm10 = vcmp.eq.s32.totalorder %v54_v37, %v2297_v14 }
  0x37   :  { %2131 = vmatprep.subr.msk.bf16.mxu1 %vm2130_vm12, %v2236_v15  ;;  %vm2004_vm15 = vmpackc.low %vm268_vm8, %vm264_vm7  ;;  %vm281_vm8 = vcmp.eq.s32.totalorder %v55_v38, %v2284_v10  ;;  %vm285_vm12 = vcmp.eq.s32.totalorder %v56_v39, %v2284_v10 }
  0x38   :  { %2005 = vmatpush1.bf16.msk.msra.mxu0 %vm2004_vm15, %v2236_v15  ;;  %vm2132_vm5 = vmpackc.low %vm270_vm14, %vm266_vm11  ;;  %vm283_vm14 = vcmp.eq.s32.totalorder %v55_v38, %v2288_v11  ;;  %vm280_vm15 = vcmp.eq.s32.totalorder %v55_v38, %v2292_v12 }
  0x39   :  { %2133 = vmatpush1.bf16.msk.msra.mxu1 %vm2132_vm5, %v2236_v15  ;;  %vm2006_vm6 = vmpackc.low %vm277_vm0, %vm273_vm13  ;;  %vm287_vm13 = vcmp.eq.s32.totalorder %v56_v39, %v2288_v11  ;;  %vm282_vm5 = vcmp.eq.s32.totalorder %v55_v38, %v2297_v14 }
  0x3a   :  { %2007 = vmatprep.subr.msk.bf16.mxu0 %vm2006_vm6, %v2236_v15  ;;  %vm2134_vm7 = vmpackc.low %vm279_vm1, %vm275_vm2  ;;  %vm284_vm2 = vcmp.eq.s32.totalorder %v56_v39, %v2292_v12  ;;  %vm286_vm6 = vcmp.eq.s32.totalorder %v56_v39, %v2297_v14 }
  0x3b   :  { %2135 = vmatprep.subr.msk.bf16.mxu1 %vm2134_vm7, %v2236_v15  ;;  %vm2008_vm11 = vmpackc.low %vm276_vm4, %vm272_vm3  ;;  %vm289_vm4 = vcmp.eq.s32.totalorder %v57_v40, %v2284_v10  ;;  %vm293_vm7 = vcmp.eq.s32.totalorder %v58_v41, %v2284_v10 }
  0x3c   :  { %2009 = vmatpush1.bf16.msk.msra.mxu0 %vm2008_vm11, %v2236_v15  ;;  %vm2136_vm0 = vmpackc.low %vm278_vm10, %vm274_vm9  ;;  %vm291_vm10 = vcmp.eq.s32.totalorder %v57_v40, %v2288_v11  ;;  %vm288_vm11 = vcmp.eq.s32.totalorder %v57_v40, %v2292_v12 }
  0x3d   :  { %2137 = vmatpush1.bf16.msk.msra.mxu1 %vm2136_vm0, %v2236_v15  ;;  %vm2010_vm1 = vmpackc.low %vm285_vm12, %vm281_vm8  ;;  %vm295_vm8 = vcmp.eq.s32.totalorder %v58_v41, %v2288_v11  ;;  %vm290_vm0 = vcmp.eq.s32.totalorder %v57_v40, %v2297_v14 }
  0x3e   :  { %2011 = vmatprep.subr.msk.bf16.mxu0 %vm2010_vm1, %v2236_v15  ;;  %vm2138_vm3 = vmpackc.low %vm287_vm13, %vm283_vm14  ;;  %vm292_vm14 = vcmp.eq.s32.totalorder %v58_v41, %v2292_v12  ;;  %vm294_vm1 = vcmp.eq.s32.totalorder %v58_v41, %v2297_v14 }
  0x3f   :  { %2139 = vmatprep.subr.msk.bf16.mxu1 %vm2138_vm3, %v2236_v15  ;;  %vm2012_vm9 = vmpackc.low %vm284_vm2, %vm280_vm15  ;;  %vm297_vm2 = vcmp.eq.s32.totalorder %v59_v42, %v2284_v10  ;;  %vm301_vm3 = vcmp.eq.s32.totalorder %v60_v43, %v2284_v10 }
  0x40   :  { %2013 = vmatpush1.bf16.msk.msra.mxu0 %vm2012_vm9, %v2236_v15  ;;  %vm2140_vm12 = vmpackc.low %vm286_vm6, %vm282_vm5  ;;  %vm299_vm6 = vcmp.eq.s32.totalorder %v59_v42, %v2288_v11  ;;  %vm296_vm9 = vcmp.eq.s32.totalorder %v59_v42, %v2292_v12 }
  0x41   :  { %2141 = vmatpush1.bf16.msk.msra.mxu1 %vm2140_vm12, %v2236_v15  ;;  %vm2014_vm13 = vmpackc.low %vm293_vm7, %vm289_vm4  ;;  %vm303_vm4 = vcmp.eq.s32.totalorder %v60_v43, %v2288_v11  ;;  %vm298_vm12 = vcmp.eq.s32.totalorder %v59_v42, %v2297_v14 }
  0x42   :  { %2015 = vmatprep.subr.msk.bf16.mxu0 %vm2014_vm13, %v2236_v15  ;;  %vm2142_vm15 = vmpackc.low %vm295_vm8, %vm291_vm10  ;;  %vm300_vm10 = vcmp.eq.s32.totalorder %v60_v43, %v2292_v12  ;;  %vm302_vm13 = vcmp.eq.s32.totalorder %v60_v43, %v2297_v14 }
  0x43   :  { %2143 = vmatprep.subr.msk.bf16.mxu1 %vm2142_vm15, %v2236_v15  ;;  %vm2016_vm5 = vmpackc.low %vm292_vm14, %vm288_vm11  ;;  %vm305_vm14 = vcmp.eq.s32.totalorder %v61_v44, %v2284_v10  ;;  %vm309_vm15 = vcmp.eq.s32.totalorder %v62_v45, %v2284_v10 }
  0x44   :  { %2017 = vmatpush1.bf16.msk.msra.mxu0 %vm2016_vm5, %v2236_v15  ;;  %vm2144_vm7 = vmpackc.low %vm294_vm1, %vm290_vm0  ;;  %vm307_vm1 = vcmp.eq.s32.totalorder %v61_v44, %v2288_v11  ;;  %vm304_vm5 = vcmp.eq.s32.totalorder %v61_v44, %v2292_v12 }
  0x45   :  { %2145 = vmatpush1.bf16.msk.msra.mxu1 %vm2144_vm7, %v2236_v15  ;;  %vm2018_vm8 = vmpackc.low %vm301_vm3, %vm297_vm2  ;;  %vm311_vm2 = vcmp.eq.s32.totalorder %v62_v45, %v2288_v11  ;;  %vm306_vm7 = vcmp.eq.s32.totalorder %v61_v44, %v2297_v14 }
  0x46   :  { %2019 = vmatprep.subr.msk.bf16.mxu0 %vm2018_vm8, %v2236_v15  ;;  %vm2146_vm11 = vmpackc.low %vm303_vm4, %vm299_vm6  ;;  %vm308_vm6 = vcmp.eq.s32.totalorder %v62_v45, %v2292_v12  ;;  %vm313_vm8 = vcmp.eq.s32.totalorder %v63_v46, %v2284_v10 }
  0x47   :  { %2147 = vmatprep.subr.msk.bf16.mxu1 %vm2146_vm11, %v2236_v15  ;;  %vm2020_vm0 = vmpackc.low %vm300_vm10, %vm296_vm9  ;;  %vm310_vm9 = vcmp.eq.s32.totalorder %v62_v45, %v2297_v14  ;;  %vm315_vm11 = vcmp.eq.s32.totalorder %v63_v46, %v2288_v11 }
  0x48   :  { %2021 = vmatpush1.bf16.msk.msra.mxu0 %vm2020_vm0, %v2236_v15  ;;  %vm2148_vm3 = vmpackc.low %vm302_vm13, %vm298_vm12  ;;  %vm317_vm12 = vcmp.eq.s32.totalorder %v64_v47, %v2284_v10  ;;  %vm312_vm0 = vcmp.eq.s32.totalorder %v63_v46, %v2292_v12 }
  0x49   :  { %2149 = vmatpush1.bf16.msk.msra.mxu1 %vm2148_vm3, %v2236_v15  ;;  %vm2022_vm4 = vmpackc.low %vm309_vm15, %vm305_vm14  ;;  %vm319_vm14 = vcmp.eq.s32.totalorder %v64_v47, %v2288_v11  ;;  %vm314_vm3 = vcmp.eq.s32.totalorder %v63_v46, %v2297_v14 }
  0x4a   :  { %2023 = vmatprep.subr.msk.bf16.mxu0 %vm2022_vm4, %v2236_v15  ;;  %vm2150_vm10 = vmpackc.low %vm311_vm2, %vm307_vm1  ;;  %vm316_vm1 = vcmp.eq.s32.totalorder %v64_v47, %v2292_v12  ;;  %vm321_vm4 = vcmp.eq.s32.totalorder %v65_v49, %v2284_v10 }
  0x4b   :  { %2151 = vmatprep.subr.msk.bf16.mxu1 %vm2150_vm10, %v2236_v15  ;;  %1017 = vmatmul.mubr.f32.vlgmr.msra.gmra.mrb[0].mxu0 %v948_v48  ;;  %vm2024_vm13 = vmpackc.low %vm308_vm6, %vm304_vm5  ;;  %vm318_vm5 = vcmp.eq.s32.totalorder %v64_v47, %v2297_v14  ;;  %vm323_vm10 = vcmp.eq.s32.totalorder %v65_v49, %v2288_v11 }
  0x4c   :  { %2025 = vmatpush1.bf16.msk.msra.mxu0 %vm2024_vm13, %v2236_v15  ;;  %1159 = vmatmul.mubr.f32.vlgmr.msra.gmra.mrb[0].mxu1 %v948_v48  ;;  %vm2152_vm15 = vmpackc.low %vm310_vm9, %vm306_vm7  ;;  %vm325_vm7 = vcmp.eq.s32.totalorder %v66_v50, %v2284_v10  ;;  %vm320_vm13 = vcmp.eq.s32.totalorder %v65_v49, %v2292_v12 }
  0x4d   :  { %2153 = vmatpush1.bf16.msk.msra.mxu1 %vm2152_vm15, %v2236_v15  ;;  %vm2026_vm2 = vmpackc.low %vm317_vm12, %vm313_vm8  ;;  %1087 = vmatprep.mubr.f32.mxu0 %v951_v51  ;;  %vm327_vm8 = vcmp.eq.s32.totalorder %v66_v50, %v2288_v11  ;;  %vm322_vm15 = vcmp.eq.s32.totalorder %v65_v49, %v2297_v14 }
  0x4e   :  { %2027 = vmatprep.subr.msk.bf16.mxu0 %vm2026_vm2, %v2236_v15  ;;  %vm2154_vm6 = vmpackc.low %vm319_vm14, %vm315_vm11  ;;  %1229 = vmatprep.mubr.f32.mxu1 %v951_v51  ;;  %vm324_vm11 = vcmp.eq.s32.totalorder %v66_v50, %v2292_v12  ;;  %vm329_vm2 = vcmp.eq.s32.totalorder %v67_v52, %v2284_v10 }
  0x4f   :  { %2155 = vmatprep.subr.msk.bf16.mxu1 %vm2154_vm6, %v2236_v15  ;;  %vm2028_vm9 = vmpackc.low %vm316_vm1, %vm312_vm0  ;;  %vm326_vm0 = vcmp.eq.s32.totalorder %v66_v50, %v2297_v14  ;;  %vm331_vm6 = vcmp.eq.s32.totalorder %v67_v52, %v2288_v11 }
  0x50   :  { %2029 = vmatpush1.bf16.msk.msra.mxu0 %vm2028_vm9, %v2236_v15  ;;  %vm2156_vm12 = vmpackc.low %vm318_vm5, %vm314_vm3  ;;  %vm333_vm3 = vcmp.eq.s32.totalorder %v68_v53, %v2284_v10  ;;  %vm328_vm9 = vcmp.eq.s32.totalorder %v67_v52, %v2292_v12 }
  0x51   :  { %2157 = vmatpush1.bf16.msk.msra.mxu1 %vm2156_vm12, %v2236_v15  ;;  %vm2030_vm14 = vmpackc.low %vm325_vm7, %vm321_vm4  ;;  %vm335_vm4 = vcmp.eq.s32.totalorder %v68_v53, %v2288_v11  ;;  %vm330_vm12 = vcmp.eq.s32.totalorder %v67_v52, %v2297_v14 }
  0x52   :  { %2031 = vmatprep.subr.msk.bf16.mxu0 %vm2030_vm14, %v2236_v15  ;;  %vm2158_vm1 = vmpackc.low %vm327_vm8, %vm323_vm10  ;;  %vm332_vm10 = vcmp.eq.s32.totalorder %v68_v53, %v2292_v12  ;;  %vm334_vm14 = vcmp.eq.s32.totalorder %v68_v53, %v2297_v14 }
  0x53   :  { %2159 = vmatprep.subr.msk.bf16.mxu1 %vm2158_vm1, %v2236_v15  ;;  %vm2032_vm5 = vmpackc.low %vm324_vm11, %vm320_vm13  ;;  %vm337_vm11 = vcmp.eq.s32.totalorder %v69_v54, %v2284_v10  ;;  %vm341_vm1 = vcmp.eq.s32.totalorder %v70_v55, %v2284_v10 }
  0x54   :  { %2033 = vmatpush1.bf16.msk.msra.mxu0 %vm2032_vm5, %v2236_v15  ;;  %vm2160_vm7 = vmpackc.low %vm326_vm0, %vm322_vm15  ;;  %vm339_vm0 = vcmp.eq.s32.totalorder %v69_v54, %v2288_v11  ;;  %vm336_vm5 = vcmp.eq.s32.totalorder %v69_v54, %v2292_v12 }
  0x55   :  { %2161 = vmatpush1.bf16.msk.msra.mxu1 %vm2160_vm7, %v2236_v15  ;;  %vm2034_vm8 = vmpackc.low %vm333_vm3, %vm329_vm2  ;;  %vm343_vm2 = vcmp.eq.s32.totalorder %v70_v55, %v2288_v11  ;;  %vm338_vm7 = vcmp.eq.s32.totalorder %v69_v54, %v2297_v14 }
  0x56   :  { %2035 = vmatprep.subr.msk.bf16.mxu0 %vm2034_vm8, %v2236_v15  ;;  %vm2162_vm13 = vmpackc.low %vm335_vm4, %vm331_vm6  ;;  %vm340_vm6 = vcmp.eq.s32.totalorder %v70_v55, %v2292_v12  ;;  %vm342_vm8 = vcmp.eq.s32.totalorder %v70_v55, %v2297_v14 }
  0x57   :  { %2163 = vmatprep.subr.msk.bf16.mxu1 %vm2162_vm13, %v2236_v15  ;;  %vm2036_vm15 = vmpackc.low %vm332_vm10, %vm328_vm9  ;;  %vm345_vm10 = vcmp.eq.s32.totalorder %v71_v56, %v2284_v10  ;;  %vm349_vm13 = vcmp.eq.s32.totalorder %v72_v57, %v2284_v10 }
  0x58   :  { %2037 = vmatpush1.bf16.msk.msra.mxu0 %vm2036_vm15, %v2236_v15  ;;  %vm2164_vm3 = vmpackc.low %vm334_vm14, %vm330_vm12  ;;  %vm347_vm14 = vcmp.eq.s32.totalorder %v71_v56, %v2288_v11  ;;  %vm344_vm15 = vcmp.eq.s32.totalorder %v71_v56, %v2292_v12 }
  0x59   :  { %2165 = vmatpush1.bf16.msk.msra.mxu1 %vm2164_vm3, %v2236_v15  ;;  %vm2038_vm4 = vmpackc.low %vm341_vm1, %vm337_vm11  ;;  %vm351_vm11 = vcmp.eq.s32.totalorder %v72_v57, %v2288_v11  ;;  %vm346_vm3 = vcmp.eq.s32.totalorder %v71_v56, %v2297_v14 }
  0x5a   :  { %2039 = vmatprep.subr.msk.bf16.mxu0 %vm2038_vm4, %v2236_v15  ;;  %vm2166_vm9 = vmpackc.low %vm343_vm2, %vm339_vm0  ;;  %vm348_vm0 = vcmp.eq.s32.totalorder %v72_v57, %v2292_v12  ;;  %vm350_vm4 = vcmp.eq.s32.totalorder %v72_v57, %v2297_v14 }
  0x5b   :  { %2167 = vmatprep.subr.msk.bf16.mxu1 %vm2166_vm9, %v2236_v15  ;;  %vm2040_vm12 = vmpackc.low %vm340_vm6, %vm336_vm5  ;;  %vm353_vm6 = vcmp.eq.s32.totalorder %v73_v58, %v2284_v10  ;;  %vm357_vm9 = vcmp.eq.s32.totalorder %v74_v59, %v2284_v10 }
  0x5c   :  { %2041 = vmatpush1.bf16.msk.msra.mxu0 %vm2040_vm12, %v2236_v15  ;;  %vm2168_vm1 = vmpackc.low %vm342_vm8, %vm338_vm7  ;;  %vm355_vm8 = vcmp.eq.s32.totalorder %v73_v58, %v2288_v11  ;;  %vm352_vm12 = vcmp.eq.s32.totalorder %v73_v58, %v2292_v12 }
  0x5d   :  { %2169 = vmatpush1.bf16.msk.msra.mxu1 %vm2168_vm1, %v2236_v15  ;;  %vm2042_vm2 = vmpackc.low %vm349_vm13, %vm345_vm10  ;;  %vm359_vm10 = vcmp.eq.s32.totalorder %v74_v59, %v2288_v11  ;;  %vm354_vm1 = vcmp.eq.s32.totalorder %v73_v58, %v2297_v14 }
  0x5e   :  { %2043 = vmatprep.subr.msk.bf16.mxu0 %vm2042_vm2, %v2236_v15  ;;  %vm2170_vm5 = vmpackc.low %vm351_vm11, %vm347_vm14  ;;  %vm356_vm14 = vcmp.eq.s32.totalorder %v74_v59, %v2292_v12  ;;  %vm358_vm2 = vcmp.eq.s32.totalorder %v74_v59, %v2297_v14 }
  0x5f   :  { %2171 = vmatprep.subr.msk.bf16.mxu1 %vm2170_vm5, %v2236_v15  ;;  %vm2044_vm7 = vmpackc.low %vm348_vm0, %vm344_vm15  ;;  %vm361_vm0 = vcmp.eq.s32.totalorder %v75_v60, %v2284_v10  ;;  %vm365_vm5 = vcmp.eq.s32.totalorder %v76_v61, %v2284_v10 }
  0x60   :  { %2045 = vmatpush1.bf16.msk.msra.mxu0 %vm2044_vm7, %v2236_v15  ;;  %vm2172_vm13 = vmpackc.low %vm350_vm4, %vm346_vm3  ;;  %vm363_vm4 = vcmp.eq.s32.totalorder %v75_v60, %v2288_v11  ;;  %vm360_vm7 = vcmp.eq.s32.totalorder %v75_v60, %v2292_v12 }
  0x61   :  { %2173 = vmatpush1.bf16.msk.msra.mxu1 %vm2172_vm13, %v2236_v15  ;;  %vm2046_vm11 = vmpackc.low %vm357_vm9, %vm353_vm6  ;;  %vm367_vm6 = vcmp.eq.s32.totalorder %v76_v61, %v2288_v11  ;;  %vm362_vm13 = vcmp.eq.s32.totalorder %v75_v60, %v2297_v14 }
  0x62   :  { %2047 = vmatprep.subr.msk.bf16.mxu0 %vm2046_vm11, %v2236_v15  ;;  %vm2174_vm15 = vmpackc.low %vm359_vm10, %vm355_vm8  ;;  %vm364_vm8 = vcmp.eq.s32.totalorder %v76_v61, %v2292_v12  ;;  %vm366_vm11 = vcmp.eq.s32.totalorder %v76_v61, %v2297_v14 }
  0x63   :  { %2175 = vmatprep.subr.msk.bf16.mxu1 %vm2174_vm15, %v2236_v15  ;;  %vm2048_vm3 = vmpackc.low %vm356_vm14, %vm352_vm12  ;;  %vm369_vm14 = vcmp.eq.s32.totalorder %v77_v62, %v2284_v10  ;;  %vm373_vm15 = vcmp.eq.s32.totalorder %v78_v63, %v2284_v10 }
  0x64   :  { %2049 = vmatpush1.bf16.msk.msra.mxu0 %vm2048_vm3, %v2236_v15  ;;  %vm2176_vm9 = vmpackc.low %vm358_vm2, %vm354_vm1  ;;  %vm371_vm2 = vcmp.eq.s32.totalorder %v77_v62, %v2288_v11  ;;  %vm368_vm3 = vcmp.eq.s32.totalorder %v77_v62, %v2292_v12 }
  0x65   :  { %2177 = vmatpush1.bf16.msk.msra.mxu1 %vm2176_vm9, %v2236_v15  ;;  %vm2050_vm10 = vmpackc.low %vm365_vm5, %vm361_vm0  ;;  %vm375_vm0 = vcmp.eq.s32.totalorder %v78_v63, %v2288_v11  ;;  %vm370_vm9 = vcmp.eq.s32.totalorder %v77_v62, %v2297_v14 }
  0x66   :  { %2051 = vmatprep.subr.msk.bf16.mxu0 %vm2050_vm10, %v2236_v15  ;;  %vm2178_vm12 = vmpackc.low %vm367_vm6, %vm363_vm4  ;;  %vm372_vm4 = vcmp.eq.s32.totalorder %v78_v63, %v2292_v12  ;;  %vm374_vm10 = vcmp.eq.s32.totalorder %v78_v63, %v2297_v14 }
  0x67   :  { %2179 = vmatprep.subr.msk.bf16.mxu1 %vm2178_vm12, %v2236_v15  ;;  %vm2052_vm1 = vmpackc.low %vm364_vm8, %vm360_vm7  ;;  %vm377_vm8 = vcmp.eq.s32.totalorder %v79_v0, %v2284_v10  ;;  %vm381_vm12 = vcmp.eq.s32.totalorder %v80_v1, %v2284_v10 }
  0x68   :  { %2053 = vmatpush1.bf16.msk.msra.mxu0 %vm2052_vm1, %v2236_v15  ;;  %vm2180_vm5 = vmpackc.low %vm366_vm11, %vm362_vm13  ;;  %vm379_vm11 = vcmp.eq.s32.totalorder %v79_v0, %v2288_v11  ;;  %vm376_vm1 = vcmp.eq.s32.totalorder %v79_v0, %v2292_v12 }
  0x69   :  { %2181 = vmatpush1.bf16.msk.msra.mxu1 %vm2180_vm5, %v2236_v15  ;;  %vm2054_vm6 = vmpackc.low %vm373_vm15, %vm369_vm14  ;;  %vm383_vm14 = vcmp.eq.s32.totalorder %v80_v1, %v2288_v11  ;;  %vm378_vm5 = vcmp.eq.s32.totalorder %v79_v0, %v2297_v14 }
  0x6a   :  { %2055 = vmatprep.subr.msk.bf16.mxu0 %vm2054_vm6, %v2236_v15  ;;  %vm2182_vm7 = vmpackc.low %vm375_vm0, %vm371_vm2  ;;  %vm380_vm2 = vcmp.eq.s32.totalorder %v80_v1, %v2292_v12  ;;  %vm382_vm6 = vcmp.eq.s32.totalorder %v80_v1, %v2297_v14 }
  0x6b   :  { %2183 = vmatprep.subr.msk.bf16.mxu1 %vm2182_vm7, %v2236_v15  ;;  %vm2056_vm13 = vmpackc.low %vm372_vm4, %vm368_vm3  ;;  %vm385_vm4 = vcmp.eq.s32.totalorder %v81_v3, %v2284_v10  ;;  %vm389_vm7 = vcmp.eq.s32.totalorder %v82_v4, %v2284_v10 }
  0x6c   :  { %2057 = vmatpush1.bf16.msk.msra.mxu0 %vm2056_vm13, %v2236_v15  ;;  %vm2184_vm15 = vmpackc.low %vm374_vm10, %vm370_vm9  ;;  %vm387_vm10 = vcmp.eq.s32.totalorder %v81_v3, %v2288_v11  ;;  %vm384_vm13 = vcmp.eq.s32.totalorder %v81_v3, %v2292_v12 }
  0x6d   :  { %2185 = vmatpush1.bf16.msk.msra.mxu1 %vm2184_vm15, %v2236_v15  ;;  %vm2058_vm0 = vmpackc.low %vm381_vm12, %vm377_vm8  ;;  %vm391_vm8 = vcmp.eq.s32.totalorder %v82_v4, %v2288_v11  ;;  %vm386_vm15 = vcmp.eq.s32.totalorder %v81_v3, %v2297_v14 }
  0x6e   :  { %2059 = vmatprep.subr.msk.bf16.mxu0 %vm2058_vm0, %v2236_v15  ;;  %vm2186_vm3 = vmpackc.low %vm383_vm14, %vm379_vm11  ;;  %vm388_vm11 = vcmp.eq.s32.totalorder %v82_v4, %v2292_v12  ;;  %vm390_vm0 = vcmp.eq.s32.totalorder %v82_v4, %v2297_v14 }
  0x6f   :  { %2187 = vmatprep.subr.msk.bf16.mxu1 %vm2186_vm3, %v2236_v15  ;;  %vm2060_vm9 = vmpackc.low %vm380_vm2, %vm376_vm1  ;;  %vm393_vm2 = vcmp.eq.s32.totalorder %v83_v9, %v2284_v10  ;;  %vm397_vm3 = vcmp.eq.s32.totalorder %v84_v13, %v2284_v10 }
  0x70   :  { %2061 = vmatpush1.bf16.msk.msra.mxu0 %vm2060_vm9, %v2236_v15  ;;  %vm2188_vm12 = vmpackc.low %vm382_vm6, %vm378_vm5  ;;  %vm395_vm6 = vcmp.eq.s32.totalorder %v83_v9, %v2288_v11  ;;  %vm392_vm9 = vcmp.eq.s32.totalorder %v83_v9, %v2292_v12 }
  0x71   :  { %2189 = vmatpush1.bf16.msk.msra.mxu1 %vm2188_vm12, %v2236_v15  ;;  %vm2062_vm14 = vmpackc.low %vm389_vm7, %vm385_vm4  ;;  %vm399_vm4 = vcmp.eq.s32.totalorder %v84_v13, %v2288_v11  ;;  %vm394_vm12 = vcmp.eq.s32.totalorder %v83_v9, %v2297_v14 }
  0x72   :  { %2063 = vmatprep.subr.msk.bf16.mxu0 %vm2062_vm14, %v2236_v15  ;;  %vm2190_vm1 = vmpackc.low %vm391_vm8, %vm387_vm10  ;;  %vm396_vm10 = vcmp.eq.s32.totalorder %v84_v13, %v2292_v12  ;;  %vm398_vm14 = vcmp.eq.s32.totalorder %v84_v13, %v2297_v14 }
  0x73   :  { %2191 = vmatprep.subr.msk.bf16.mxu1 %vm2190_vm1, %v2236_v15  ;;  %vm2064_vm5 = vmpackc.low %vm388_vm11, %vm384_vm13  ;;  %vm401_vm11 = vcmp.eq.s32.totalorder %v85_v16, %v2284_v10  ;;  %vm405_vm1 = vcmp.eq.s32.totalorder %v86_v17, %v2284_v10 }
  0x74   :  { %2065 = vmatpush1.bf16.msk.msra.mxu0 %vm2064_vm5, %v2236_v15  ;;  %vm2192_vm7 = vmpackc.low %vm390_vm0, %vm386_vm15  ;;  %vm403_vm0 = vcmp.eq.s32.totalorder %v85_v16, %v2288_v11  ;;  %vm400_vm5 = vcmp.eq.s32.totalorder %v85_v16, %v2292_v12 }
  0x75   :  { %2193 = vmatpush1.bf16.msk.msra.mxu1 %vm2192_vm7, %v2236_v15  ;;  %vm2066_vm8 = vmpackc.low %vm397_vm3, %vm393_vm2  ;;  %vm407_vm2 = vcmp.eq.s32.totalorder %v86_v17, %v2288_v11  ;;  %vm402_vm7 = vcmp.eq.s32.totalorder %v85_v16, %v2297_v14 }
  0x76   :  { %2067 = vmatprep.subr.msk.bf16.mxu0 %vm2066_vm8, %v2236_v15  ;;  %vm2194_vm13 = vmpackc.low %vm399_vm4, %vm395_vm6  ;;  %vm404_vm6 = vcmp.eq.s32.totalorder %v86_v17, %v2292_v12  ;;  %vm406_vm8 = vcmp.eq.s32.totalorder %v86_v17, %v2297_v14 }
  0x77   :  { %2195 = vmatprep.subr.msk.bf16.mxu1 %vm2194_vm13, %v2236_v15  ;;  %vm2068_vm15 = vmpackc.low %vm396_vm10, %vm392_vm9  ;;  %vm409_vm10 = vcmp.eq.s32.totalorder %v87_v18, %v2284_v10  ;;  %vm413_vm13 = vcmp.eq.s32.totalorder %v88_v19, %v2284_v10 }
  0x78   :  { %2069 = vmatpush1.bf16.msk.msra.mxu0 %vm2068_vm15, %v2236_v15  ;;  %vm2196_vm3 = vmpackc.low %vm398_vm14, %vm394_vm12  ;;  %vm411_vm14 = vcmp.eq.s32.totalorder %v87_v18, %v2288_v11  ;;  %vm408_vm15 = vcmp.eq.s32.totalorder %v87_v18, %v2292_v12 }
  0x79   :  { %2197 = vmatpush1.bf16.msk.msra.mxu1 %vm2196_vm3, %v2236_v15  ;;  %vm2070_vm4 = vmpackc.low %vm405_vm1, %vm401_vm11  ;;  %vm415_vm11 = vcmp.eq.s32.totalorder %v88_v19, %v2288_v11  ;;  %vm410_vm3 = vcmp.eq.s32.totalorder %v87_v18, %v2297_v14 }
  0x7a   :  { %2071 = vmatprep.subr.msk.bf16.mxu0 %vm2070_vm4, %v2236_v15  ;;  %vm2198_vm9 = vmpackc.low %vm407_vm2, %vm403_vm0  ;;  %vm412_vm0 = vcmp.eq.s32.totalorder %v88_v19, %v2292_v12  ;;  %vm414_vm4 = vcmp.eq.s32.totalorder %v88_v19, %v2297_v14 }
  0x7b   :  { %2199 = vmatprep.subr.msk.bf16.mxu1 %vm2198_vm9, %v2236_v15  ;;  %vm2072_vm12 = vmpackc.low %vm404_vm6, %vm400_vm5  ;;  %vm417_vm6 = vcmp.eq.s32.totalorder %v89_v20, %v2284_v10  ;;  %vm421_vm9 = vcmp.eq.s32.totalorder %v90_v21, %v2284_v10 }
  0x7c   :  { %2073 = vmatpush1.bf16.msk.msra.mxu0 %vm2072_vm12, %v2236_v15  ;;  %vm2200_vm1 = vmpackc.low %vm406_vm8, %vm402_vm7  ;;  %vm419_vm8 = vcmp.eq.s32.totalorder %v89_v20, %v2288_v11  ;;  %vm416_vm12 = vcmp.eq.s32.totalorder %v89_v20, %v2292_v12 }
  0x7d   :  { %2201 = vmatpush1.bf16.msk.msra.mxu1 %vm2200_vm1, %v2236_v15  ;;  %vm2074_vm2 = vmpackc.low %vm413_vm13, %vm409_vm10  ;;  %vm423_vm10 = vcmp.eq.s32.totalorder %v90_v21, %v2288_v11  ;;  %vm418_vm1 = vcmp.eq.s32.totalorder %v89_v20, %v2297_v14 }
  0x7e   :  { %2075 = vmatprep.subr.msk.bf16.mxu0 %vm2074_vm2, %v2236_v15  ;;  %vm2202_vm5 = vmpackc.low %vm415_vm11, %vm411_vm14  ;;  %vm420_vm14 = vcmp.eq.s32.totalorder %v90_v21, %v2292_v12  ;;  %vm422_vm2 = vcmp.eq.s32.totalorder %v90_v21, %v2297_v14 }
  0x7f   :  { %2203 = vmatprep.subr.msk.bf16.mxu1 %vm2202_vm5, %v2236_v15  ;;  %vm2076_vm7 = vmpackc.low %vm412_vm0, %vm408_vm15  ;;  %vm425_vm0 = vcmp.eq.s32.totalorder %v91_v22, %v2284_v10  ;;  %vm429_vm5 = vcmp.eq.s32.totalorder %v92_v23, %v2284_v10  ;;  %v1253_v10 = vld [vmem:[%s2808_s2 + $0x8] sm:$0xff] }
  0x80   :  { %2077 = vmatpush1.bf16.msk.msra.mxu0 %vm2076_vm7, %v2236_v15  ;;  %vm2204_vm13 = vmpackc.low %vm414_vm4, %vm410_vm3  ;;  %vm427_vm4 = vcmp.eq.s32.totalorder %v91_v22, %v2288_v11  ;;  %vm431_vm7 = vcmp.eq.s32.totalorder %v92_v23, %v2288_v11  ;;  %v1255_v11 = vld [vmem:[%s2808_s2 + $0x18] sm:$0xff] }
  0x81   :  { %2205 = vmatpush1.bf16.msk.msra.mxu1 %vm2204_vm13, %v2236_v15  ;;  %vm2078_vm11 = vmpackc.low %vm421_vm9, %vm417_vm6  ;;  %vm424_vm9 = vcmp.eq.s32.totalorder %v91_v22, %v2292_v12  ;;  %vm428_vm13 = vcmp.eq.s32.totalorder %v92_v23, %v2292_v12  ;;  %v950_v12 = vld [vmem:[%s2807_s0 + $0x10] sm:$0xff] }
  0x82   :  { %2079 = vmatprep.subr.msk.bf16.mxu0 %vm2078_vm11, %v2236_v15  ;;  %vm2206_vm15 = vmpackc.low %vm423_vm10, %vm419_vm8  ;;  %vm426_vm10 = vcmp.eq.s32.totalorder %v91_v22, %v2297_v14  ;;  %vm430_vm11 = vcmp.eq.s32.totalorder %v92_v23, %v2297_v14  ;;  %v1252_v14 = vld [vmem:[%s2808_s2] sm:$0xff] }
  0x83   :  { %2207 = vmatprep.subr.msk.bf16.mxu1 %vm2206_vm15, %v2236_v15  ;;  %vm2080_vm3 = vmpackc.low %vm420_vm14, %vm416_vm12 }
  0x84   :  { %2081 = vmatpush1.bf16.msk.msra.mxu0 %vm2080_vm3, %v2236_v15  ;;  %vm2208_vm6 = vmpackc.low %vm422_vm2, %vm418_vm1  ;;  %vm1256_vm2 = vcmask 64512  }
  0x85   :  { %2209 = vmatpush1.bf16.msk.msra.mxu1 %vm2208_vm6, %v2236_v15  ;;  %vm2082_vm8 = vmpackc.low %vm429_vm5, %vm425_vm0 }
  0x86   :  { %2083 = vmatprep.subr.msk.bf16.mxu0 %vm2082_vm8, %v2236_v15  ;;  %vm2210_vm12 = vmpackc.low %vm431_vm7, %vm427_vm4 }
  0x87   :  { %2211 = vmatprep.subr.msk.bf16.mxu1 %vm2210_vm12, %v2236_v15  ;;  %vm2084_vm14 = vmpackc.low %vm428_vm13, %vm424_vm9 }
  0x88   :  { %2085 = vmatpush1.bf16.msk.msra.mxu0 %vm2084_vm14, %v2236_v15  ;;  %vm2212_vm1 = vmpackc.low %vm430_vm11, %vm426_vm10 }
  0x89   :  { %2213 = vmatpush1.bf16.msk.msra.mxu1 %vm2212_vm1, %v2236_v15  ;;  %1260 = vmatprep.subr.mxu0 %v1253_v10  ;;  %v1251_v15 = vld [vmem:[%s2809_s3] sm:$0xff] }
  0x8a   :  { %1331 = vmatprep.subr.mxu1 %v1255_v11 }
  0x8b   :  { %1088 = vmatmul.mubr.f32.vlgmr.msra.gmra.mrb[0].mxu0 %v950_v12 }
  0x8c   :  { %1230 = vmatmul.mubr.f32.vlgmr.msra.gmra.mrb[0].mxu1 %v950_v12  ;;  %1261 = vmatpush1.msra.mxu0 %v1252_v14 }
  0x8d   :  { %1332 = vmatpush1.msra.mxu1 %v1254_v24  ;;  %1324 = vmatprep.mubr.f32.mxu0 %v2237_v25 }
  0x8e   :  { %1395 = vmatprep.mubr.f32.mxu1 %v2237_v25 }
  0x93   :  { %1956 = vmatmul.mubr.msk.f32.vlgmr.msra.gmra.mrb[0].mxu0 %vm1256_vm2, %v1251_v15 }
  0x94   :  { %1957 = vmatmul.mubr.msk.f32.vlgmr.msra.gmra.mrb[0].mxu1 %vm1256_vm2, %v1251_v15 }
 0x166   :  { %v1326_v27 = vpop.f32.mrb[0].mxu0 }
 0x167   :  { %v1397_v29 = vpop.f32.mrb[0].mxu1  ;;  %v1328_v30 = vpop.f32.mrb[1].mxu0  ;;  %v1406_v34 = vmax.f32 %v1326_v27, 0.0 }
 0x168   :  { %v1399_v33 = vpop.f32.mrb[1].mxu1  ;;  %v1408_v36 = vmax.f32 %v1397_v29, 0.0  ;;  %v1407_v37 = vmax.f32 %v1328_v30, 0.0 }
 0x169   :  { %v1432_v38 = vmul.f32 %v1415_v28, %v1406_v34  ;;  %v1409_v39 = vmax.f32 %v1399_v33, 0.0 }
 0x16a   :  { %v1434_v40 = vmul.f32 %v1423_v31, %v1408_v36  ;;  %v1433_v41 = vmul.f32 %v1419_v32, %v1407_v37 }
 0x16b   :  { %1436 = vst [vmem:[%s2811_s5] sm:$0xff] %v1432_v38  ;;  %v1435_v7 = vmul.f32 %v1427_v35, %v1409_v39 }
 0x16c   :  { %1438 = vst [vmem:[%s2811_s5 + $0x10] sm:$0xff] %v1434_v40  ;;  %1437 = vst [vmem:[%s2811_s5 + $0x8] sm:$0xff] %v1433_v41 }
 0x16d   :  { %1439 = vst [vmem:[%s2811_s5 + $0x18] sm:$0xff] %v1435_v7 }

// kernel: muse_pool_forward.11
= control target key start
LH: loop header
LB: loop body
LE: loop exit
PB: predicated region body
PF: predicated region fallthrough
CT: control target
= control target key end

     0   :  { %v927_v0 = vmov 0   ;;  %s1283_s1 = inlined_call_operand.vmem [shape: s32[512,1], index: 1, kind: input, shape index: {}]   ;;  %s1284_s0 = inlined_call_operand.vmem [shape: f32[8,512], index: 0, kind: input, shape index: {}]   ;;  %s1285_s4 = inlined_call_operand.vmem [shape: f32[8,2], index: 4, kind: output, shape index: {}]   ;;  %s1286_s2 = inlined_call_operand.vmem [shape: f32[8,1], index: 2, kind: input, shape index: {}]   ;;  %s1287_s3 = inlined_call_operand.vmem [shape: f32[8,1], index: 3, kind: input, shape index: {}]  }
   0x1   :  { %924 = vset.pattern.permute.xlu1 %v927_v0  ;;  %923 = vset.pattern.permute.xlu0 %v927_v0  ;;  %v73_v1 = vld [vmem:[%s1283_s1 + $0x180] sm:$0xff]  ;;  %v74_v3 = vld [vmem:[%s1283_s1 + $0x188] sm:$0xff]  ;;  %v44_v9 = vld [vmem:[%s1283_s1 + $0x98] sm:$0xff] }
   0x2   :  { %v41_v2 = vld [vmem:[%s1283_s1 + $0x80] sm:$0xff]  ;;  %234 = vperm.xlu1 %924, %v73_v1   ;;  %v42_v4 = vld [vmem:[%s1283_s1 + $0x88] sm:$0xff]  ;;  %v43_v10 = vld [vmem:[%s1283_s1 + $0x90] sm:$0xff]  ;;  %v23_v1 = vlaneseq }
   0x3   :  { %138 = vperm.xlu0 %923, %v41_v2   ;;  %v26_v5 = vld [vmem:[%s1283_s1 + $0x8] sm:$0xff]  ;;  %v25_v6 = vld [vmem:[%s1283_s1] sm:$0xff]  ;;  %v76_v11 = vld [vmem:[%s1283_s1 + $0x198] sm:$0xff] }
   0x4   :  { %v58_v7 = vld [vmem:[%s1283_s1 + $0x108] sm:$0xff]  ;;  %v57_v8 = vld [vmem:[%s1283_s1 + $0x100] sm:$0xff]  ;;  %v75_v12 = vld [vmem:[%s1283_s1 + $0x190] sm:$0xff] }
   0x5   :  { %v28_v13 = vld [vmem:[%s1283_s1 + $0x18] sm:$0xff]  ;;  %v27_v14 = vld [vmem:[%s1283_s1 + $0x10] sm:$0xff]  ;;  %v46_v17 = vld [vmem:[%s1283_s1 + $0xa8] sm:$0xff] }
   0x6   :  { %237 = vperm.xlu1 %924, %v74_v3   ;;  %v60_v15 = vld [vmem:[%s1283_s1 + $0x118] sm:$0xff]  ;;  %v59_v16 = vld [vmem:[%s1283_s1 + $0x110] sm:$0xff]  ;;  %v45_v18 = vld [vmem:[%s1283_s1 + $0xa0] sm:$0xff] }
   0x7   :  { %141 = vperm.xlu0 %923, %v42_v4   ;;  %v78_v19 = vld [vmem:[%s1283_s1 + $0x1a8] sm:$0xff]  ;;  %v77_v20 = vld [vmem:[%s1283_s1 + $0x1a0] sm:$0xff]  ;;  %v48_v25 = vld [vmem:[%s1283_s1 + $0xb8] sm:$0xff] }
   0x8   :  { %v30_v21 = vld [vmem:[%s1283_s1 + $0x28] sm:$0xff]  ;;  %v29_v22 = vld [vmem:[%s1283_s1 + $0x20] sm:$0xff]  ;;  %v47_v26 = vld [vmem:[%s1283_s1 + $0xb0] sm:$0xff] }
   0x9   :  { %v62_v23 = vld [vmem:[%s1283_s1 + $0x128] sm:$0xff]  ;;  %v61_v24 = vld [vmem:[%s1283_s1 + $0x120] sm:$0xff]  ;;  %v80_v27 = vld [vmem:[%s1283_s1 + $0x1b8] sm:$0xff] }
   0xa   :  { %93 = vperm.xlu1 %924, %v26_v5   ;;  %v79_v28 = vld [vmem:[%s1283_s1 + $0x1b0] sm:$0xff]  ;;  %v32_v29 = vld [vmem:[%s1283_s1 + $0x38] sm:$0xff]  ;;  %v50_v33 = vld [vmem:[%s1283_s1 + $0xc8] sm:$0xff] }
   0xb   :  { %90 = vperm.xlu0 %923, %v25_v6   ;;  %v31_v30 = vld [vmem:[%s1283_s1 + $0x30] sm:$0xff]  ;;  %v64_v31 = vld [vmem:[%s1283_s1 + $0x138] sm:$0xff]  ;;  %v49_v34 = vld [vmem:[%s1283_s1 + $0xc0] sm:$0xff]  ;;  %v1153_v6 = vand.u32 127, %v23_v1 }
   0xc   :  { %v63_v32 = vld [vmem:[%s1283_s1 + $0x130] sm:$0xff]  ;;  %v82_v35 = vld [vmem:[%s1283_s1 + $0x1c8] sm:$0xff]  ;;  %v81_v36 = vld [vmem:[%s1283_s1 + $0x1c0] sm:$0xff] }
   0xd   :  { %v34_v37 = vld [vmem:[%s1283_s1 + $0x48] sm:$0xff]  ;;  %v33_v38 = vld [vmem:[%s1283_s1 + $0x40] sm:$0xff]  ;;  %v52_v41 = vld [vmem:[%s1283_s1 + $0xd8] sm:$0xff] }
   0xe   :  { %189 = vperm.xlu1 %924, %v58_v7   ;;  %v66_v39 = vld [vmem:[%s1283_s1 + $0x148] sm:$0xff]  ;;  %v65_v40 = vld [vmem:[%s1283_s1 + $0x140] sm:$0xff]  ;;  %v51_v42 = vld [vmem:[%s1283_s1 + $0xd0] sm:$0xff] }
   0xf   :  { %186 = vperm.xlu0 %923, %v57_v8   ;;  %v84_v43 = vld [vmem:[%s1283_s1 + $0x1d8] sm:$0xff]  ;;  %v83_v44 = vld [vmem:[%s1283_s1 + $0x1d0] sm:$0xff]  ;;  %v54_v49 = vld [vmem:[%s1283_s1 + $0xe8] sm:$0xff] }
  0x10   :  { %v36_v45 = vld [vmem:[%s1283_s1 + $0x58] sm:$0xff]  ;;  %v35_v46 = vld [vmem:[%s1283_s1 + $0x50] sm:$0xff]  ;;  %v53_v50 = vld [vmem:[%s1283_s1 + $0xe0] sm:$0xff] }
  0x11   :  { %v68_v47 = vld [vmem:[%s1283_s1 + $0x158] sm:$0xff]  ;;  %v67_v48 = vld [vmem:[%s1283_s1 + $0x150] sm:$0xff]  ;;  %v86_v51 = vld [vmem:[%s1283_s1 + $0x1e8] sm:$0xff] }
  0x12   :  { %147 = vperm.xlu1 %924, %v44_v9   ;;  %v85_v52 = vld [vmem:[%s1283_s1 + $0x1e0] sm:$0xff]  ;;  %v38_v53 = vld [vmem:[%s1283_s1 + $0x68] sm:$0xff]  ;;  %v56_v57 = vld [vmem:[%s1283_s1 + $0xf8] sm:$0xff]  ;;  %v928_v9 = vmov 1.0|1.0  }
  0x13   :  { %144 = vperm.xlu0 %923, %v43_v10   ;;  %v37_v54 = vld [vmem:[%s1283_s1 + $0x60] sm:$0xff]  ;;  %v70_v55 = vld [vmem:[%s1283_s1 + $0x168] sm:$0xff]  ;;  %v55_v58 = vld [vmem:[%s1283_s1 + $0xf0] sm:$0xff] }
  0x14   :  { %v69_v56 = vld [vmem:[%s1283_s1 + $0x160] sm:$0xff]  ;;  %v88_v59 = vld [vmem:[%s1283_s1 + $0x1f8] sm:$0xff]  ;;  %v87_v60 = vld [vmem:[%s1283_s1 + $0x1f0] sm:$0xff] }
  0x15   :  { %v40_v61 = vld [vmem:[%s1283_s1 + $0x78] sm:$0xff]  ;;  %v39_v62 = vld [vmem:[%s1283_s1 + $0x70] sm:$0xff]  ;;  %v475_v4 = vld [vmem:[%s1284_s0 + $0x8] sm:$0xff] }
  0x16   :  { %243 = vperm.xlu1 %924, %v76_v11   ;;  %v72_v63 = vld [vmem:[%s1283_s1 + $0x178] sm:$0xff]  ;;  %v71_v0 = vld [vmem:[%s1283_s1 + $0x170] sm:$0xff]  ;;  %542 = vmatprep.mubr.f32.mxu0 %v475_v4  ;;  %v474_v4 = vld [vmem:[%s1284_s0] sm:$0xff] }
  0x17   :  { %240 = vperm.xlu0 %923, %v75_v12   ;;  %v477_v5 = vld [vmem:[%s1284_s0 + $0x18] sm:$0xff] }
  0x18   :  { %612 = vmatprep.mubr.f32.mxu1 %v477_v5 }
  0x1a   :  { %99 = vperm.xlu1 %924, %v28_v13  }
  0x1b   :  { %96 = vperm.xlu0 %923, %v27_v14  }
  0x1e   :  { %195 = vperm.xlu1 %924, %v60_v15  }
  0x1f   :  { %192 = vperm.xlu0 %923, %v59_v16  }
  0x22   :  { %153 = vperm.xlu1 %924, %v46_v17  }
  0x23   :  { %150 = vperm.xlu0 %923, %v45_v18  }
  0x26   :  { %249 = vperm.xlu1 %924, %v78_v19  }
  0x27   :  { %246 = vperm.xlu0 %923, %v77_v20  }
  0x2a   :  { %105 = vperm.xlu1 %924, %v30_v21  }
  0x2b   :  { %102 = vperm.xlu0 %923, %v29_v22  }
  0x2e   :  { %201 = vperm.xlu1 %924, %v62_v23  }
  0x2f   :  { %198 = vperm.xlu0 %923, %v61_v24  }
  0x32   :  { %159 = vperm.xlu1 %924, %v48_v25  }
  0x33   :  { %156 = vperm.xlu0 %923, %v47_v26  }
  0x36   :  { %255 = vperm.xlu1 %924, %v80_v27  }
  0x37   :  { %252 = vperm.xlu0 %923, %v79_v28  }
  0x3a   :  { %111 = vperm.xlu1 %924, %v32_v29  }
  0x3b   :  { %108 = vperm.xlu0 %923, %v31_v30  }
  0x3e   :  { %207 = vperm.xlu1 %924, %v64_v31  }
  0x3f   :  { %204 = vperm.xlu0 %923, %v63_v32  }
  0x42   :  { %165 = vperm.xlu1 %924, %v50_v33  }
  0x43   :  { %162 = vperm.xlu0 %923, %v49_v34  }
  0x46   :  { %261 = vperm.xlu1 %924, %v82_v35  }
  0x47   :  { %258 = vperm.xlu0 %923, %v81_v36  }
  0x4a   :  { %117 = vperm.xlu1 %924, %v34_v37  }
  0x4b   :  { %114 = vperm.xlu0 %923, %v33_v38  }
  0x4e   :  { %213 = vperm.xlu1 %924, %v66_v39  }
  0x4f   :  { %210 = vperm.xlu0 %923, %v65_v40  }
  0x52   :  { %171 = vperm.xlu1 %924, %v52_v41  }
  0x53   :  { %168 = vperm.xlu0 %923, %v51_v42  }
  0x56   :  { %267 = vperm.xlu1 %924, %v84_v43  }
  0x57   :  { %264 = vperm.xlu0 %923, %v83_v44  }
  0x5a   :  { %123 = vperm.xlu1 %924, %v36_v45  }
  0x5b   :  { %120 = vperm.xlu0 %923, %v35_v46  }
  0x5e   :  { %219 = vperm.xlu1 %924, %v68_v47  }
  0x5f   :  { %216 = vperm.xlu0 %923, %v67_v48  }
  0x62   :  { %177 = vperm.xlu1 %924, %v54_v49  }
  0x63   :  { %174 = vperm.xlu0 %923, %v53_v50  }
  0x66   :  { %273 = vperm.xlu1 %924, %v86_v51  }
  0x67   :  { %270 = vperm.xlu0 %923, %v85_v52  }
  0x6a   :  { %129 = vperm.xlu1 %924, %v38_v53  }
  0x6b   :  { %126 = vperm.xlu0 %923, %v37_v54  }
  0x6e   :  { %225 = vperm.xlu1 %924, %v70_v55  }
  0x6f   :  { %222 = vperm.xlu0 %923, %v69_v56  }
  0x72   :  { %183 = vperm.xlu1 %924, %v56_v57  }
  0x73   :  { %180 = vperm.xlu0 %923, %v55_v58  }
  0x76   :  { %279 = vperm.xlu1 %924, %v88_v59  }
  0x77   :  { %276 = vperm.xlu0 %923, %v87_v60  }
  0x7a   :  { %135 = vperm.xlu1 %924, %v40_v61  }
  0x7b   :  { %132 = vperm.xlu0 %923, %v39_v62  }
  0x7e   :  { %231 = vperm.xlu1 %924, %v72_v63  }
  0x7f   :  { %228 = vperm.xlu0 %923, %v71_v0  }
  0x81   :  { %v235_v2 = vpop.permute.xlu1 %234 }
  0x82   :  { %v139_v3 = vpop.permute.xlu0 %138  ;;  %vm329_vm3 = vcmp.eq.s32.totalorder %v1153_v6, %v235_v2 }
  0x83   :  { %vm297_vm0 = vcmp.eq.s32.totalorder %v1153_v6, %v139_v3 }
  0x85   :  { %v238_v7 = vpop.permute.xlu1 %237 }
  0x86   :  { %v142_v8 = vpop.permute.xlu0 %141  ;;  %vm330_vm1 = vcmp.eq.s32.totalorder %v1153_v6, %v238_v7 }
  0x87   :  { %vm298_vm2 = vcmp.eq.s32.totalorder %v1153_v6, %v142_v8  ;;  %vm888_vm5 = vmpackc.low %vm330_vm1, %vm329_vm3  ;;  %v476_v8 = vld [vmem:[%s1284_s0 + $0x10] sm:$0xff] }
  0x88   :  { %vm856_vm4 = vmpackc.low %vm298_vm2, %vm297_vm0  ;;  %889 = vmatprep.subr.msk.bf16.mxu1 %vm888_vm5, %v928_v9 }
  0x89   :  { %857 = vmatprep.subr.msk.bf16.mxu0 %vm856_vm4, %v928_v9  ;;  %v94_v10 = vpop.permute.xlu1 %93 }
  0x8a   :  { %v91_v11 = vpop.permute.xlu0 %90  ;;  %vm282_vm6 = vcmp.eq.s32.totalorder %v1153_v6, %v94_v10  ;;  %v929_v10 = vmov 0.0  }
  0x8b   :  { %vm281_vm7 = vcmp.eq.s32.totalorder %v1153_v6, %v91_v11 }
  0x8c   :  { %vm858_vm8 = vmpackc.low %vm282_vm6, %vm281_vm7 }
  0x8d   :  { %859 = vmatpush3.bf16.msk.msra.mxu0 %vm858_vm8, %v928_v9  ;;  %v190_v12 = vpop.permute.xlu1 %189 }
  0x8e   :  { %v187_v13 = vpop.permute.xlu0 %186  ;;  %vm314_vm9 = vcmp.eq.s32.totalorder %v1153_v6, %v190_v12 }
  0x8f   :  { %vm313_vm10 = vcmp.eq.s32.totalorder %v1153_v6, %v187_v13 }
  0x90   :  { %vm890_vm11 = vmpackc.low %vm314_vm9, %vm313_vm10 }
  0x91   :  { %891 = vmatpush3.bf16.msk.msra.mxu1 %vm890_vm11, %v928_v9  ;;  %v148_v14 = vpop.permute.xlu1 %147 }
  0x92   :  { %v145_v15 = vpop.permute.xlu0 %144  ;;  %vm300_vm12 = vcmp.eq.s32.totalorder %v1153_v6, %v148_v14 }
  0x93   :  { %vm299_vm13 = vcmp.eq.s32.totalorder %v1153_v6, %v145_v15 }
  0x94   :  { %vm860_vm14 = vmpackc.low %vm300_vm12, %vm299_vm13 }
  0x95   :  { %861 = vmatprep.subr.msk.bf16.mxu0 %vm860_vm14, %v928_v9  ;;  %v244_v16 = vpop.permute.xlu1 %243 }
  0x96   :  { %v241_v17 = vpop.permute.xlu0 %240  ;;  %vm332_vm15 = vcmp.eq.s32.totalorder %v1153_v6, %v244_v16 }
  0x97   :  { %vm331_vm0 = vcmp.eq.s32.totalorder %v1153_v6, %v241_v17 }
  0x98   :  { %vm892_vm1 = vmpackc.low %vm332_vm15, %vm331_vm0 }
  0x99   :  { %893 = vmatprep.subr.msk.bf16.mxu1 %vm892_vm1, %v928_v9  ;;  %v100_v18 = vpop.permute.xlu1 %99 }
  0x9a   :  { %v97_v19 = vpop.permute.xlu0 %96  ;;  %vm284_vm2 = vcmp.eq.s32.totalorder %v1153_v6, %v100_v18 }
  0x9b   :  { %vm283_vm3 = vcmp.eq.s32.totalorder %v1153_v6, %v97_v19 }
  0x9c   :  { %vm862_vm4 = vmpackc.low %vm284_vm2, %vm283_vm3 }
  0x9d   :  { %863 = vmatpush3.bf16.msk.msra.mxu0 %vm862_vm4, %v928_v9  ;;  %v196_v20 = vpop.permute.xlu1 %195 }
  0x9e   :  { %v193_v21 = vpop.permute.xlu0 %192  ;;  %vm316_vm5 = vcmp.eq.s32.totalorder %v1153_v6, %v196_v20  ;;  %v639_v20 = vld [vmem:[%s1286_s2] sm:$0xff] }
  0x9f   :  { %vm315_vm6 = vcmp.eq.s32.totalorder %v1153_v6, %v193_v21 }
  0xa0   :  { %vm894_vm7 = vmpackc.low %vm316_vm5, %vm315_vm6 }
  0xa1   :  { %895 = vmatpush3.bf16.msk.msra.mxu1 %vm894_vm7, %v928_v9  ;;  %v154_v22 = vpop.permute.xlu1 %153 }
  0xa2   :  { %v151_v23 = vpop.permute.xlu0 %150  ;;  %vm302_vm8 = vcmp.eq.s32.totalorder %v1153_v6, %v154_v22 }
  0xa3   :  { %vm301_vm9 = vcmp.eq.s32.totalorder %v1153_v6, %v151_v23 }
  0xa4   :  { %vm864_vm10 = vmpackc.low %vm302_vm8, %vm301_vm9 }
  0xa5   :  { %865 = vmatprep.subr.msk.bf16.mxu0 %vm864_vm10, %v928_v9  ;;  %v250_v24 = vpop.permute.xlu1 %249 }
  0xa6   :  { %v247_v25 = vpop.permute.xlu0 %246  ;;  %vm334_vm11 = vcmp.eq.s32.totalorder %v1153_v6, %v250_v24 }
  0xa7   :  { %vm333_vm12 = vcmp.eq.s32.totalorder %v1153_v6, %v247_v25 }
  0xa8   :  { %vm896_vm13 = vmpackc.low %vm334_vm11, %vm333_vm12 }
  0xa9   :  { %897 = vmatprep.subr.msk.bf16.mxu1 %vm896_vm13, %v928_v9  ;;  %v106_v26 = vpop.permute.xlu1 %105 }
  0xaa   :  { %v103_v27 = vpop.permute.xlu0 %102  ;;  %vm286_vm14 = vcmp.eq.s32.totalorder %v1153_v6, %v106_v26  ;;  %v646_v26 = vld [vmem:[%s1287_s3] sm:$0xff] }
  0xab   :  { %vm285_vm15 = vcmp.eq.s32.totalorder %v1153_v6, %v103_v27 }
  0xac   :  { %vm866_vm0 = vmpackc.low %vm286_vm14, %vm285_vm15 }
  0xad   :  { %867 = vmatpush3.bf16.msk.msra.mxu0 %vm866_vm0, %v928_v9  ;;  %v202_v28 = vpop.permute.xlu1 %201 }
  0xae   :  { %v199_v29 = vpop.permute.xlu0 %198  ;;  %vm318_vm1 = vcmp.eq.s32.totalorder %v1153_v6, %v202_v28 }
  0xaf   :  { %vm317_vm2 = vcmp.eq.s32.totalorder %v1153_v6, %v199_v29 }
  0xb0   :  { %vm898_vm3 = vmpackc.low %vm318_vm1, %vm317_vm2 }
  0xb1   :  { %899 = vmatpush3.bf16.msk.msra.mxu1 %vm898_vm3, %v928_v9  ;;  %v160_v30 = vpop.permute.xlu1 %159 }
  0xb2   :  { %v157_v31 = vpop.permute.xlu0 %156  ;;  %vm304_vm4 = vcmp.eq.s32.totalorder %v1153_v6, %v160_v30 }
  0xb3   :  { %vm303_vm5 = vcmp.eq.s32.totalorder %v1153_v6, %v157_v31 }
  0xb4   :  { %vm868_vm6 = vmpackc.low %vm304_vm4, %vm303_vm5 }
  0xb5   :  { %869 = vmatprep.subr.msk.bf16.mxu0 %vm868_vm6, %v928_v9  ;;  %v256_v32 = vpop.permute.xlu1 %255 }
  0xb6   :  { %v253_v33 = vpop.permute.xlu0 %252  ;;  %vm336_vm7 = vcmp.eq.s32.totalorder %v1153_v6, %v256_v32 }
  0xb7   :  { %vm335_vm8 = vcmp.eq.s32.totalorder %v1153_v6, %v253_v33 }
  0xb8   :  { %vm900_vm9 = vmpackc.low %vm336_vm7, %vm335_vm8 }
  0xb9   :  { %901 = vmatprep.subr.msk.bf16.mxu1 %vm900_vm9, %v928_v9  ;;  %v112_v34 = vpop.permute.xlu1 %111 }
  0xba   :  { %v109_v35 = vpop.permute.xlu0 %108  ;;  %vm288_vm10 = vcmp.eq.s32.totalorder %v1153_v6, %v112_v34 }
  0xbb   :  { %vm287_vm11 = vcmp.eq.s32.totalorder %v1153_v6, %v109_v35 }
  0xbc   :  { %vm870_vm12 = vmpackc.low %vm288_vm10, %vm287_vm11 }
  0xbd   :  { %871 = vmatpush3.bf16.msk.msra.mxu0 %vm870_vm12, %v928_v9  ;;  %v208_v36 = vpop.permute.xlu1 %207 }
  0xbe   :  { %v205_v37 = vpop.permute.xlu0 %204  ;;  %vm320_vm13 = vcmp.eq.s32.totalorder %v1153_v6, %v208_v36 }
  0xbf   :  { %vm319_vm14 = vcmp.eq.s32.totalorder %v1153_v6, %v205_v37 }
  0xc0   :  { %vm902_vm15 = vmpackc.low %vm320_vm13, %vm319_vm14 }
  0xc1   :  { %903 = vmatpush3.bf16.msk.msra.mxu1 %vm902_vm15, %v928_v9  ;;  %v166_v38 = vpop.permute.xlu1 %165 }
  0xc2   :  { %v163_v39 = vpop.permute.xlu0 %162  ;;  %vm306_vm0 = vcmp.eq.s32.totalorder %v1153_v6, %v166_v38 }
  0xc3   :  { %vm305_vm1 = vcmp.eq.s32.totalorder %v1153_v6, %v163_v39 }
  0xc4   :  { %vm872_vm2 = vmpackc.low %vm306_vm0, %vm305_vm1 }
  0xc5   :  { %873 = vmatprep.subr.msk.bf16.mxu0 %vm872_vm2, %v928_v9  ;;  %v262_v40 = vpop.permute.xlu1 %261 }
  0xc6   :  { %v259_v41 = vpop.permute.xlu0 %258  ;;  %vm338_vm3 = vcmp.eq.s32.totalorder %v1153_v6, %v262_v40 }
  0xc7   :  { %vm337_vm4 = vcmp.eq.s32.totalorder %v1153_v6, %v259_v41 }
  0xc8   :  { %vm904_vm5 = vmpackc.low %vm338_vm3, %vm337_vm4 }
  0xc9   :  { %905 = vmatprep.subr.msk.bf16.mxu1 %vm904_vm5, %v928_v9  ;;  %v118_v42 = vpop.permute.xlu1 %117 }
  0xca   :  { %v115_v43 = vpop.permute.xlu0 %114  ;;  %vm290_vm6 = vcmp.eq.s32.totalorder %v1153_v6, %v118_v42 }
  0xcb   :  { %vm289_vm7 = vcmp.eq.s32.totalorder %v1153_v6, %v115_v43 }
  0xcc   :  { %vm874_vm8 = vmpackc.low %vm290_vm6, %vm289_vm7 }
  0xcd   :  { %875 = vmatpush3.bf16.msk.msra.mxu0 %vm874_vm8, %v928_v9  ;;  %v214_v44 = vpop.permute.xlu1 %213 }
  0xce   :  { %v211_v45 = vpop.permute.xlu0 %210  ;;  %vm322_vm9 = vcmp.eq.s32.totalorder %v1153_v6, %v214_v44 }
  0xcf   :  { %vm321_vm10 = vcmp.eq.s32.totalorder %v1153_v6, %v211_v45 }
  0xd0   :  { %vm906_vm11 = vmpackc.low %vm322_vm9, %vm321_vm10 }
  0xd1   :  { %907 = vmatpush3.bf16.msk.msra.mxu1 %vm906_vm11, %v928_v9  ;;  %v172_v46 = vpop.permute.xlu1 %171 }
  0xd2   :  { %v169_v47 = vpop.permute.xlu0 %168  ;;  %vm308_vm12 = vcmp.eq.s32.totalorder %v1153_v6, %v172_v46 }
  0xd3   :  { %vm307_vm13 = vcmp.eq.s32.totalorder %v1153_v6, %v169_v47 }
  0xd4   :  { %vm876_vm14 = vmpackc.low %vm308_vm12, %vm307_vm13 }
  0xd5   :  { %877 = vmatprep.subr.msk.bf16.mxu0 %vm876_vm14, %v928_v9  ;;  %v268_v48 = vpop.permute.xlu1 %267 }
  0xd6   :  { %v265_v49 = vpop.permute.xlu0 %264  ;;  %vm340_vm15 = vcmp.eq.s32.totalorder %v1153_v6, %v268_v48 }
  0xd7   :  { %vm339_vm0 = vcmp.eq.s32.totalorder %v1153_v6, %v265_v49 }
  0xd8   :  { %vm908_vm1 = vmpackc.low %vm340_vm15, %vm339_vm0 }
  0xd9   :  { %909 = vmatprep.subr.msk.bf16.mxu1 %vm908_vm1, %v928_v9  ;;  %v124_v50 = vpop.permute.xlu1 %123 }
  0xda   :  { %v121_v51 = vpop.permute.xlu0 %120  ;;  %vm292_vm2 = vcmp.eq.s32.totalorder %v1153_v6, %v124_v50 }
  0xdb   :  { %vm291_vm3 = vcmp.eq.s32.totalorder %v1153_v6, %v121_v51 }
  0xdc   :  { %vm878_vm4 = vmpackc.low %vm292_vm2, %vm291_vm3 }
  0xdd   :  { %879 = vmatpush3.bf16.msk.msra.mxu0 %vm878_vm4, %v928_v9  ;;  %v220_v52 = vpop.permute.xlu1 %219 }
  0xde   :  { %v217_v53 = vpop.permute.xlu0 %216  ;;  %vm324_vm5 = vcmp.eq.s32.totalorder %v1153_v6, %v220_v52 }
  0xdf   :  { %vm323_vm6 = vcmp.eq.s32.totalorder %v1153_v6, %v217_v53 }
  0xe0   :  { %vm910_vm7 = vmpackc.low %vm324_vm5, %vm323_vm6 }
  0xe1   :  { %911 = vmatpush3.bf16.msk.msra.mxu1 %vm910_vm7, %v928_v9  ;;  %v178_v54 = vpop.permute.xlu1 %177 }
  0xe2   :  { %v175_v55 = vpop.permute.xlu0 %174  ;;  %vm310_vm8 = vcmp.eq.s32.totalorder %v1153_v6, %v178_v54 }
  0xe3   :  { %vm309_vm9 = vcmp.eq.s32.totalorder %v1153_v6, %v175_v55 }
  0xe4   :  { %vm880_vm10 = vmpackc.low %vm310_vm8, %vm309_vm9 }
  0xe5   :  { %881 = vmatprep.subr.msk.bf16.mxu0 %vm880_vm10, %v928_v9  ;;  %v274_v56 = vpop.permute.xlu1 %273 }
  0xe6   :  { %v271_v57 = vpop.permute.xlu0 %270  ;;  %vm342_vm11 = vcmp.eq.s32.totalorder %v1153_v6, %v274_v56 }
  0xe7   :  { %vm341_vm12 = vcmp.eq.s32.totalorder %v1153_v6, %v271_v57 }
  0xe8   :  { %vm912_vm13 = vmpackc.low %vm342_vm11, %vm341_vm12 }
  0xe9   :  { %913 = vmatprep.subr.msk.bf16.mxu1 %vm912_vm13, %v928_v9  ;;  %v130_v58 = vpop.permute.xlu1 %129 }
  0xea   :  { %v127_v59 = vpop.permute.xlu0 %126  ;;  %vm294_vm14 = vcmp.eq.s32.totalorder %v1153_v6, %v130_v58 }
  0xeb   :  { %vm293_vm15 = vcmp.eq.s32.totalorder %v1153_v6, %v127_v59 }
  0xec   :  { %vm882_vm0 = vmpackc.low %vm294_vm14, %vm293_vm15 }
  0xed   :  { %883 = vmatpush3.bf16.msk.msra.mxu0 %vm882_vm0, %v928_v9  ;;  %v226_v60 = vpop.permute.xlu1 %225  ;;  %vm21_vm0 = vcmask 15360  }
  0xee   :  { %v223_v61 = vpop.permute.xlu0 %222  ;;  %vm326_vm1 = vcmp.eq.s32.totalorder %v1153_v6, %v226_v60  ;;  %22 = vst.msk [vmem:[%s1285_s4] sm:$0xff] %vm21_vm0, %v929_v10 }
  0xef   :  { %vm325_vm2 = vcmp.eq.s32.totalorder %v1153_v6, %v223_v61 }
  0xf0   :  { %vm914_vm3 = vmpackc.low %vm326_vm1, %vm325_vm2 }
  0xf1   :  { %915 = vmatpush3.bf16.msk.msra.mxu1 %vm914_vm3, %v928_v9  ;;  %v184_v62 = vpop.permute.xlu1 %183 }
  0xf2   :  { %v181_v63 = vpop.permute.xlu0 %180  ;;  %vm312_vm4 = vcmp.eq.s32.totalorder %v1153_v6, %v184_v62 }
  0xf3   :  { %vm311_vm5 = vcmp.eq.s32.totalorder %v1153_v6, %v181_v63 }
  0xf4   :  { %vm884_vm6 = vmpackc.low %vm312_vm4, %vm311_vm5 }
  0xf5   :  { %885 = vmatprep.subr.msk.bf16.mxu0 %vm884_vm6, %v928_v9  ;;  %v280_v0 = vpop.permute.xlu1 %279 }
  0xf6   :  { %v277_v1 = vpop.permute.xlu0 %276  ;;  %vm344_vm7 = vcmp.eq.s32.totalorder %v1153_v6, %v280_v0 }
  0xf7   :  { %vm343_vm8 = vcmp.eq.s32.totalorder %v1153_v6, %v277_v1 }
  0xf8   :  { %vm916_vm9 = vmpackc.low %vm344_vm7, %vm343_vm8 }
  0xf9   :  { %917 = vmatprep.subr.msk.bf16.mxu1 %vm916_vm9, %v928_v9  ;;  %v136_v2 = vpop.permute.xlu1 %135 }
  0xfa   :  { %v133_v3 = vpop.permute.xlu0 %132  ;;  %vm296_vm10 = vcmp.eq.s32.totalorder %v1153_v6, %v136_v2 }
  0xfb   :  { %vm295_vm11 = vcmp.eq.s32.totalorder %v1153_v6, %v133_v3 }
  0xfc   :  { %vm886_vm12 = vmpackc.low %vm296_vm10, %vm295_vm11 }
  0xfd   :  { %887 = vmatpush3.bf16.msk.msra.mxu0 %vm886_vm12, %v928_v9  ;;  %v232_v5 = vpop.permute.xlu1 %231 }
  0xfe   :  { %v229_v7 = vpop.permute.xlu0 %228  ;;  %vm328_vm13 = vcmp.eq.s32.totalorder %v1153_v6, %v232_v5 }
  0xff   :  { %vm327_vm14 = vcmp.eq.s32.totalorder %v1153_v6, %v229_v7 }
 0x100   :  { %vm918_vm15 = vmpackc.low %vm328_vm13, %vm327_vm14  ;;  %543 = vmatmul.mubr.f32.vlgmr.msra.gmra.mrb[0].mxu0 %v474_v4 }
 0x101   :  { %919 = vmatpush3.bf16.msk.msra.mxu1 %vm918_vm15, %v928_v9  ;;  %v473_v9 = vld [vmem:[%s1285_s4] sm:$0xff] }
 0x104   :  { %613 = vmatmul.mubr.f32.vlgmr.msra.gmra.mrb[0].mxu1 %v476_v8 }
 0x1d3   :  { %v818_v11 = vpop.f32.mrb[0].mxu0 }
 0x1d4   :  { %v819_v12 = vpop.f32.mrb[1].mxu0 }
 0x1d5   :  { %v820_v13 = vadd.f32 %v819_v12, %v818_v11 }
 0x1d7   :  { %v853_v6 = vpop.f32.mrb[0].mxu1 }
 0x1d8   :  { %v854_v14 = vpop.f32.mrb[1].mxu1 }
 0x1d9   :  { %v855_v15 = vadd.f32 %v854_v14, %v853_v6 }
 0x1db   :  { %v615_v16 = vadd.f32 %v855_v15, %v820_v13 }
 0x1dd   :  { %v618_v17 = vadd.f32 %v615_v16, %v473_v9 }
 0x1df   :  { %620 = vst.msk [vmem:[%s1285_s4] sm:$0xff] %vm21_vm0, %v618_v17 }
 0x1e6   :  { %v624_v18 = vld [vmem:[%s1285_s4] sm:$0xff] }
 0x1e7   :  { %v625_v19 = vsel %vm21_vm0, %v624_v18, 0.0 }
 0x1e8   :  { %626 = vadd.xlane.f32.xlu0 %v625_v19 }
 0x1fe   :  { %642 = vperm.xlu0 %923, %v639_v20  }
 0x275   :  { %v627_v21 = vpop.xlane.xlu0 %626 }
 0x276   :  { %v629_v22 = vmul.f32 0.5, %v627_v21 }
 0x278   :  { %v630_v23 = vsub.f32 %v624_v18, %v629_v22 }
 0x27a   :  { %v631_v24 = vmul.f32 %v630_v23, %v630_v23 }
 0x27c   :  { %v632_v25 = vsel %vm21_vm0, %v631_v24, 0.0 }
 0x27d   :  { %633 = vadd.xlane.f32.xlu1 %v632_v25  ;;  %v643_v32 = vpop.permute.xlu0 %642 }
 0x28e   :  { %649 = vperm.xlu1 %924, %v646_v26  }
 0x30a   :  { %v634_v27 = vpop.xlane.xlu1 %633 }
 0x30b   :  { %v635_v28 = vmul.f32 0.5, %v634_v27 }
 0x30d   :  { %v636_v29 = vadd.f32 1e-05, %v635_v28 }
 0x30e   :  { %v650_v34 = vpop.permute.xlu1 %649 }
 0x30f   :  { %925 = vrsqrt.f32 %v636_v29 }
 0x319   :  { %v926_v30 = vpop.eup %925 }
 0x31a   :  { %v638_v31 = vmul.f32 %v926_v30, %v630_v23 }
 0x31c   :  { %v645_v33 = vmul.f32 %v643_v32, %v638_v31 }
 0x31e   :  { %v652_v35 = vadd.f32 %v650_v34, %v645_v33 }
 0x320   :  { %653 = vst.msk [vmem:[%s1285_s4] sm:$0xff] %vm21_vm0, %v652_v35 }

</bundles_post_ra>
